<compile_context>
chip_gen: v5e
topology: v5e:2x2
jax: 0.10.0
libtpu: 0.0.40
codegen_flags: <defaults>
</compile_context>

<pallas_src>
import jax
import jax.numpy as jnp
from jax import lax
from jax.experimental import pallas as pl
from jax.experimental.pallas import tpu as pltpu

IN_DIM = 3072
OUT_DIM = 768
EPS = 1e-12


def _round_up(x, m):
    return ((x + m - 1) // m) * m


def transformer_output_kernel(h_ref, w_ref, b_ref, res_ref, gamma_ref, beta_ref, o_ref):
    # Dense: (tm, 3072) bf16 @ (3072, 768) bf16 on the MXU, f32 accumulation.
    acc = jnp.dot(h_ref[...], w_ref[...], preferred_element_type=jnp.float32)
    # Fold the bias straight into the f32 accumulator (single epilogue pass).
    acc = acc + b_ref[...]

    # Dropout: module is evaluated in inference mode -> identity.
    # TODO(synk): training-mode dropout (p=0.1) would need pltpu.prng_random_bits + mask.

    # Residual add + TF-style LayerNorm over the last axis (two-pass variance in f32).
    x = acc + res_ref[...].astype(jnp.float32)
    u = jnp.mean(x, axis=-1, keepdims=True)
    xc = x - u
    s = jnp.mean(xc * xc, axis=-1, keepdims=True)
    xn = xc * lax.rsqrt(s + EPS)          # rsqrt lowers to the EUP slot (cheap)
    o_ref[...] = (gamma_ref[...] * xn + beta_ref[...]).astype(o_ref.dtype)


def transformer_output(hidden_states, input_tensor, w, b, gamma, beta, *, tm=256):
    """hidden_states: (..., 3072), input_tensor: (..., 768). w: (3072, 768)."""
    lead = hidden_states.shape[:-1]
    out_dtype = hidden_states.dtype

    h2 = hidden_states.reshape(-1, IN_DIM)
    r2 = input_tensor.reshape(-1, OUT_DIM).astype(jnp.float32)
    M = h2.shape[0]

    # Fixed row tile; shrink for tiny problems. Keep rows a multiple of 16 so bf16
    # tiles stay aligned to the (16,128) / (8,128) sublane tiling (no masked stores).
    tm_eff = min(tm, _round_up(M, 16))
    M_pad = _round_up(M, tm_eff)
    if M_pad != M:
        h2 = jnp.pad(h2, ((0, M_pad - M), (0, 0)))
        r2 = jnp.pad(r2, ((0, M_pad - M), (0, 0)))

    # Cast once in the wrapper (not per grid step): bf16 MXU operands, f32 accumulation.
    h_bf = h2.astype(jnp.bfloat16)
    w_bf = w.astype(jnp.bfloat16)

    b2 = b.reshape(1, OUT_DIM).astype(jnp.float32)
    g2 = gamma.reshape(1, OUT_DIM).astype(jnp.float32)
    be2 = beta.reshape(1, OUT_DIM).astype(jnp.float32)

    grid = (M_pad // tm_eff,)

    out_itemsize = jnp.dtype(out_dtype).itemsize
    cost = pl.CostEstimate(
        flops=2 * M_pad * IN_DIM * OUT_DIM,
        transcendentals=M_pad,  # one rsqrt per row
        bytes_accessed=(h_bf.size * 2 + w_bf.size * 2 + r2.size * 4
                        + 3 * OUT_DIM * 4 + M_pad * OUT_DIM * out_itemsize),
    )

    out = pl.pallas_call(
        transformer_output_kernel,
        out_shape=jax.ShapeDtypeStruct((M_pad, OUT_DIM), out_dtype),
        grid_spec=pltpu.PrefetchScalarGridSpec(
            num_scalar_prefetch=0,
            grid=grid,
            in_specs=[
                # hidden_states row tile (pipelined / double-buffered)
                pl.BlockSpec((tm_eff, IN_DIM), lambda i: (i, 0)),
                # weight: constant across the grid -> single buffer (saves ~4.5 MiB VMEM)
                pl.BlockSpec((IN_DIM, OUT_DIM), lambda i: (0, 0),
                             pipeline_mode=pl.Buffered(1)),
                # bias / gamma / beta: tiny constants, single-buffered
                pl.BlockSpec((1, OUT_DIM), lambda i: (0, 0),
                             pipeline_mode=pl.Buffered(1)),
                # residual row tile
                pl.BlockSpec((tm_eff, OUT_DIM), lambda i: (i, 0)),
                pl.BlockSpec((1, OUT_DIM), lambda i: (0, 0),
                             pipeline_mode=pl.Buffered(1)),
                pl.BlockSpec((1, OUT_DIM), lambda i: (0, 0),
                             pipeline_mode=pl.Buffered(1)),
            ],
            out_specs=pl.BlockSpec((tm_eff, OUT_DIM), lambda i: (i, 0)),
        ),
        compiler_params=pltpu.CompilerParams(
            dimension_semantics=("parallel",),        # rows shard across v7x's 2 TCs
            vmem_limit_bytes=48 * 1024 * 1024,        # fits v5e/v6e (128 MiB) and v7x (64 MiB)
        ),
        cost_estimate=cost,
    )(h_bf, w_bf, b2, r2, g2, be2)

    return out[:M].reshape(*lead, OUT_DIM)


def reference(hidden_states, input_tensor, w, b, gamma, beta):
    y = hidden_states @ w + b
    x = y + input_tensor
    u = jnp.mean(x, axis=-1, keepdims=True)
    s = jnp.mean((x - u) ** 2, axis=-1, keepdims=True)
    xn = (x - u) / jnp.sqrt(s + EPS)
    return gamma * xn + beta


if __name__ == "__main__":
    key = jax.random.PRNGKey(0)
    kh, kr, kw, kb = jax.random.split(key, 4)

    batch, seq = 2, 8
    hidden_states = jax.random.normal(kh, (batch, seq, IN_DIM), dtype=jnp.float32)
    input_tensor = jax.random.normal(kr, (batch, seq, OUT_DIM), dtype=jnp.float32)

    # Deterministic parameter init (nn.Linear-style scale), LayerNorm gamma=1, beta=0.
    bound = 1.0 / (IN_DIM ** 0.5)
    w = jax.random.uniform(kw, (IN_DIM, OUT_DIM), jnp.float32, -bound, bound)
    b = jax.random.uniform(kb, (OUT_DIM,), jnp.float32, -bound, bound)
    gamma = jnp.ones((OUT_DIM,), jnp.float32)
    beta = jnp.zeros((OUT_DIM,), jnp.float32)

    out = transformer_output(hidden_states, input_tensor, w, b, gamma, beta)
    out = jax.block_until_ready(out)

    ref = reference(hidden_states, input_tensor, w, b, gamma, beta)
    assert out.shape == (batch, seq, OUT_DIM)
    # Tolerance accounts for the bf16 matmul operands (f32 accumulation); LN output is O(1).
    assert jnp.allclose(out, ref, atol=2e-2, rtol=2e-2)
    print("KERNEL_OK")
</pallas_src>

<mosaic_0001>
module attributes {stable_mosaic.version = 11 : i64} {
  func.func @transformer_output_kernel(%arg0: i32, %arg1: memref<16x3072xbf16, #tpu.memory_space<vmem>>, %arg2: memref<3072x768xbf16, #tpu.memory_space<vmem>>, %arg3: memref<1x768xf32, #tpu.memory_space<vmem>>, %arg4: memref<16x768xf32, #tpu.memory_space<vmem>>, %arg5: memref<1x768xf32, #tpu.memory_space<vmem>>, %arg6: memref<1x768xf32, #tpu.memory_space<vmem>>, %arg7: memref<16x768xf32, #tpu.memory_space<vmem>>) attributes {dimension_semantics = [#tpu.dimension_semantics<parallel>], iteration_bounds = array<i64: 1>, scalar_prefetch = 0 : i64, scratch_operands = 0 : i64, tpu.core_type = #tpu.core_type<tc>, window_params = [{transform_indices = @transform_0, window_bounds = array<i64: 16, 3072>}, {pipeline_mode = #tpu.pipeline_mode<synchronous>, transform_indices = @transform_1, window_bounds = array<i64: 3072, 768>}, {pipeline_mode = #tpu.pipeline_mode<synchronous>, transform_indices = @transform_2, window_bounds = array<i64: 1, 768>}, {transform_indices = @transform_3, window_bounds = array<i64: 16, 768>}, {pipeline_mode = #tpu.pipeline_mode<synchronous>, transform_indices = @transform_4, window_bounds = array<i64: 1, 768>}, {pipeline_mode = #tpu.pipeline_mode<synchronous>, transform_indices = @transform_5, window_bounds = array<i64: 1, 768>}, {transform_indices = @transform_6, window_bounds = array<i64: 16, 768>}]} {
    %c0 = arith.constant 0 : index
    %c0_0 = arith.constant 0 : index
    %0 = vector.load %arg1[%c0, %c0_0] : memref<16x3072xbf16, #tpu.memory_space<vmem>>, vector<16x3072xbf16>
    %c0_1 = arith.constant 0 : index
    %c0_2 = arith.constant 0 : index
    %1 = vector.load %arg2[%c0_1, %c0_2] : memref<3072x768xbf16, #tpu.memory_space<vmem>>, vector<3072x768xbf16>
    %cst = arith.constant dense<0.000000e+00> : vector<16x768xf32>
    %2 = tpu.matmul %0, %1, %cst {dimension_numbers = #tpu.dot_dimension_numbers<[1], [0], [0], [1], [0, 0, 1, 1], [], []>} : vector<16x3072xbf16>, vector<3072x768xbf16>, vector<16x768xf32> -> vector<16x768xf32>
    %c0_3 = arith.constant 0 : index
    %c0_4 = arith.constant 0 : index
    %3 = vector.load %arg3[%c0_3, %c0_4] : memref<1x768xf32, #tpu.memory_space<vmem>>, vector<1x768xf32>
    %4 = vector.broadcast %3 : vector<1x768xf32> to vector<16x768xf32>
    %5 = arith.addf %2, %4 : vector<16x768xf32>
    %c0_5 = arith.constant 0 : index
    %c0_6 = arith.constant 0 : index
    %6 = vector.load %arg4[%c0_5, %c0_6] : memref<16x768xf32, #tpu.memory_space<vmem>>, vector<16x768xf32>
    %7 = arith.addf %5, %6 : vector<16x768xf32>
    %cst_7 = arith.constant dense<0.000000e+00> : vector<16xf32>
    %8 = vector.multi_reduction <add>, %7, %cst_7 [1] : vector<16x768xf32> to vector<16xf32>
    %9 = vector.shape_cast %8 : vector<16xf32> to vector<16x1xf32>
    %cst_8 = arith.constant 7.680000e+02 : f32
    %10 = vector.broadcast %cst_8 : f32 to vector<16x1xf32>
    %11 = arith.divf %9, %10 : vector<16x1xf32>
    %12 = vector.broadcast %11 : vector<16x1xf32> to vector<16x768xf32>
    %13 = arith.subf %7, %12 : vector<16x768xf32>
    %14 = arith.mulf %13, %13 : vector<16x768xf32>
    %cst_9 = arith.constant dense<0.000000e+00> : vector<16xf32>
    %15 = vector.multi_reduction <add>, %14, %cst_9 [1] : vector<16x768xf32> to vector<16xf32>
    %16 = vector.shape_cast %15 : vector<16xf32> to vector<16x1xf32>
    %cst_10 = arith.constant 7.680000e+02 : f32
    %17 = vector.broadcast %cst_10 : f32 to vector<16x1xf32>
    %18 = arith.divf %16, %17 : vector<16x1xf32>
    %cst_11 = arith.constant 9.99999996E-13 : f32
    %19 = vector.broadcast %cst_11 : f32 to vector<16x1xf32>
    %20 = arith.addf %18, %19 : vector<16x1xf32>
    %21 = math.rsqrt %20 : vector<16x1xf32>
    %22 = vector.broadcast %21 : vector<16x1xf32> to vector<16x768xf32>
    %23 = arith.mulf %13, %22 : vector<16x768xf32>
    %c0_12 = arith.constant 0 : index
    %c0_13 = arith.constant 0 : index
    %24 = vector.load %arg5[%c0_12, %c0_13] : memref<1x768xf32, #tpu.memory_space<vmem>>, vector<1x768xf32>
    %25 = vector.broadcast %24 : vector<1x768xf32> to vector<16x768xf32>
    %26 = arith.mulf %25, %23 : vector<16x768xf32>
    %c0_14 = arith.constant 0 : index
    %c0_15 = arith.constant 0 : index
    %27 = vector.load %arg6[%c0_14, %c0_15] : memref<1x768xf32, #tpu.memory_space<vmem>>, vector<1x768xf32>
    %28 = vector.broadcast %27 : vector<1x768xf32> to vector<16x768xf32>
    %29 = arith.addf %26, %28 : vector<16x768xf32>
    %c0_16 = arith.constant 0 : index
    %c0_17 = arith.constant 0 : index
    %30 = vector.load %arg7[%c0_16, %c0_17] : memref<16x768xf32, #tpu.memory_space<vmem>>, vector<16x768xf32>
    tpu.vector_store %arg7[%c0_16, %c0_17], %29 {strides = array<i32>} : memref<16x768xf32, #tpu.memory_space<vmem>>, vector<16x768xf32>,
    return
  }
  func.func @transform_0(%arg0: i32) -> (i32, i32) {
    %c0_i32 = arith.constant 0 : i32
    %c0_i32_0 = arith.constant 0 : i32
    return %arg0, %c0_i32 : i32, i32
  }
  func.func @transform_1(%arg0: i32) -> (i32, i32) {
    %c0_i32 = arith.constant 0 : i32
    %c0_i32_0 = arith.constant 0 : i32
    %c0_i32_1 = arith.constant 0 : i32
    return %c0_i32, %c0_i32_0 : i32, i32
  }
  func.func @transform_2(%arg0: i32) -> (i32, i32) {
    %c0_i32 = arith.constant 0 : i32
    %c0_i32_0 = arith.constant 0 : i32
    %c0_i32_1 = arith.constant 0 : i32
    return %c0_i32, %c0_i32_0 : i32, i32
  }
  func.func @transform_3(%arg0: i32) -> (i32, i32) {
    %c0_i32 = arith.constant 0 : i32
    %c0_i32_0 = arith.constant 0 : i32
    return %arg0, %c0_i32 : i32, i32
  }
  func.func @transform_4(%arg0: i32) -> (i32, i32) {
    %c0_i32 = arith.constant 0 : i32
    %c0_i32_0 = arith.constant 0 : i32
    %c0_i32_1 = arith.constant 0 : i32
    return %c0_i32, %c0_i32_0 : i32, i32
  }
  func.func @transform_5(%arg0: i32) -> (i32, i32) {
    %c0_i32 = arith.constant 0 : i32
    %c0_i32_0 = arith.constant 0 : i32
    %c0_i32_1 = arith.constant 0 : i32
    return %c0_i32, %c0_i32_0 : i32, i32
  }
  func.func @transform_6(%arg0: i32) -> (i32, i32) {
    %c0_i32 = arith.constant 0 : i32
    %c0_i32_0 = arith.constant 0 : i32
    return %arg0, %c0_i32 : i32, i32
  }
}

</mosaic_0001>

<bundles_post_ra>
// kernel: tpu_custom_call.1
= control target key start
LH: loop header
LB: loop body
LE: loop exit
PB: predicated region body
PF: predicated region fallthrough
CT: control target
= control target key end

     0   :  { %11 = vsyncpa [#allocation3], 0  ;;  %s16268_s0 = inlined_call_operand.hbm [shape: bf16[16,3072], index: 0, kind: input, shape index: {}]   ;;  %s16269_s1 = inlined_call_operand.hbm [shape: bf16[3072,768], index: 1, kind: input, shape index: {}]   ;;  %s16270_s2 = inlined_call_operand.hbm [shape: f32[1,768], index: 2, kind: input, shape index: {}]   ;;  %s16271_s3 = inlined_call_operand.hbm [shape: f32[16,768], index: 3, kind: input, shape index: {}]   ;;  %s16272_s4 = inlined_call_operand.hbm [shape: f32[1,768], index: 4, kind: input, shape index: {}]   ;;  %s16273_s5 = inlined_call_operand.hbm [shape: f32[1,768], index: 5, kind: input, shape index: {}]   ;;  %s16274_s6 = inlined_call_operand.hbm [shape: f32[16,768], index: 6, kind: output, shape index: {}]  }
   0x1   :  { %12 = vsyncpa [#allocation6], 0 }
   0x2   :  { %13 = vsyncpa [#allocation9], 0 }
   0x3   :  { %14 = vsyncpa [#allocation12], 0  ;;  %s33_s23 = sshll.u32 %s16269_s1, 4  ;;  %s34_s23 = int_to_ptr.hbm [resolvable:$true] %s33_s23 }
   0x4   :  { %15 = vsyncpa [#allocation4], 0  ;;  %s15488_s24 = smov [#allocation5]   ;;  %s57_s28 = sshll.u32 %s16271_s3, 4  ;;  %s58_s28 = int_to_ptr.hbm [resolvable:$true] %s57_s28 }
   0x5   :  { %s35_s25 = sshll.u32 %s15488_s24, 4  ;;  %s15489_s29 = smov 384   ;;  %s36_s25 = int_to_ptr.vmem [resolvable:$true] %s35_s25 }
   0x6   :  { %s15490_s30 = smov 24   ;;  %s15491_s7 = smov [#allocation8]  }
   0x7   :  { %41 = dma.hbm_to_vmem [thread:$0]  %s34_s23, 147456, %s36_s25, [#allocation6], %s15489_s29, %s15489_s29, %s15490_s30  }
   0x8   :  { %s59_s8 = sshll.u32 %s15491_s7, 4  ;;  %s15492_s9 = smov 768   ;;  %s60_s8 = int_to_ptr.vmem [resolvable:$true] %s59_s8 }
   0x9   :  { %s15493_s10 = smov 48   ;;  %s20_s12 = sshll.u32 %s16268_s0, 4  ;;  %s21_s12 = int_to_ptr.hbm [resolvable:$true] %s20_s12 }
   0xa   :  { %65 = dma.hbm_to_vmem [thread:$0]  %s58_s28, 1536, %s60_s8, [#allocation9], %s15492_s9, %s15492_s9, %s15493_s10  }
   0xb   :  { %s15494_s13 = smov [#allocation2]   ;;  %s47_s16 = sshll.u32 %s16270_s2, 4  ;;  %s48_s16 = int_to_ptr.hbm [resolvable:$true] %s47_s16 }
   0xc   :  { %s22_s3 = sshll.u32 %s15494_s13, 4  ;;  %s15495_s17 = smov 1536   ;;  %s23_s3 = int_to_ptr.vmem [resolvable:$true] %s22_s3 }
   0xd   :  { %s15496_s18 = smov 96   ;;  %s15497_s19 = smov [#allocation7]  }
   0xe   :  { %28 = dma.hbm_to_vmem [thread:$0]  %s21_s12, 3072, %s23_s3, [#allocation3], %s15495_s17, %s15495_s17, %s15496_s18  }
   0xf   :  { %s49_s20 = sshll.u32 %s15497_s19, 4  ;;  %s71_s23 = sshll.u32 %s16272_s4, 4  ;;  %s50_s20 = int_to_ptr.vmem [resolvable:$true] %s49_s20  ;;  %s72_s23 = int_to_ptr.hbm [resolvable:$true] %s71_s23 }
  0x10   :  { %52 = dma.hbm_to_vmem [thread:$0]  %s48_s16, 96, %s50_s20, [#allocation6]  }
  0x11   :  { %s82_s25 = sshll.u32 %s16273_s5, 4  ;;  %s15498_s26 = smov [#allocation10]   ;;  %s83_s25 = int_to_ptr.hbm [resolvable:$true] %s82_s25 }
  0x12   :  { %s73_s27 = sshll.u32 %s15498_s26, 4  ;;  %s15499_s2 = smov [#allocation11]   ;;  %s74_s27 = int_to_ptr.vmem [resolvable:$true] %s73_s27 }
  0x13   :  { %76 = dma.hbm_to_vmem [thread:$0]  %s72_s23, 96, %s74_s27, [#allocation9]  }
  0x14   :  { %s84_s28 = sshll.u32 %s15499_s2, 4  ;;  %s85_s28 = int_to_ptr.vmem [resolvable:$true] %s84_s28 }
  0x15   :  { %87 = dma.hbm_to_vmem [thread:$0]  %s83_s25, 96, %s85_s28, [#allocation12]  }
  0x16   :  { %15478 = dma.done.wait [#allocation3], 3072  }
  0x17   :  { %15479 = vsyncadd [#allocation3], 4294964224 }
  0x18   :  { %15480 = dma.done.wait [#allocation6], 147552  }
  0x19   :  { %15481 = vsyncadd [#allocation6], 4294819744 }
  0x1a   :  { %15482 = dma.done.wait [#allocation9], 1632  }
  0x1b   :  { %15483 = vsyncadd [#allocation9], 4294965664 }
  0x1c   :  { %15484 = dma.done.wait [#allocation12], 96  }
  0x1d   :  { %15485 = vsyncadd [#allocation12], 4294967200  ;;  %v9671_v0 = vld [vmem:[#allocation5 + $0x150] sm:$0xf]  ;;  %v14178_v1 = vld [vmem:[#allocation5 + $0x164] sm:$0xf0] }
  0x1e   :  { %v9863_v2 = vld [vmem:[#allocation5 + $0x2d0] sm:$0xf]  ;;  %v9672_v3 = vor.u32 %v14178_v1, %v9671_v0  ;;  %v14226_v4 = vld [vmem:[#allocation5 + $0x2e4] sm:$0xf0]  ;;  %v9647_v11 = vld [vmem:[#allocation5 + $0x120] sm:$0xf] }
  0x1f   :  { %v10055_v5 = vld [vmem:[#allocation5 + $0x450] sm:$0xf]  ;;  %v14274_v6 = vld [vmem:[#allocation5 + $0x464] sm:$0xf0]  ;;  %v9864_v7 = vor.u32 %v14226_v4, %v9863_v2  ;;  %v14172_v13 = vld [vmem:[#allocation5 + $0x134] sm:$0xf0] }
  0x20   :  { %v10056_v8 = vor.u32 %v14274_v6, %v10055_v5  ;;  %v10247_v9 = vld [vmem:[#allocation5 + $0x5d0] sm:$0xf]  ;;  %v14322_v10 = vld [vmem:[#allocation5 + $0x5e4] sm:$0xf0]  ;;  %7182 = vmatpush.bf16.msra.mxu0 %v9672_v3  ;;  %v9839_v14 = vld [vmem:[#allocation5 + $0x2a0] sm:$0xf]  ;;  %v9648_v16 = vor.u32 %v14172_v13, %v9647_v11 }
  0x21   :  { %v10248_v12 = vor.u32 %v14322_v10, %v10247_v9  ;;  %v14220_v15 = vld [vmem:[#allocation5 + $0x2b4] sm:$0xf0]  ;;  %7196 = vmatpush.bf16.msra.mxu1 %v9864_v7  ;;  %v10031_v18 = vld [vmem:[#allocation5 + $0x420] sm:$0xf]  ;;  %v9623_v23 = vld [vmem:[#allocation5 + $0xf0] sm:$0xf] }
  0x22   :  { %7210 = vmatpush.bf16.msra.mxu2 %v10056_v8  ;;  %v9840_v17 = vor.u32 %v14220_v15, %v9839_v14  ;;  %v14268_v19 = vld [vmem:[#allocation5 + $0x434] sm:$0xf0]  ;;  %v10223_v20 = vld [vmem:[#allocation5 + $0x5a0] sm:$0xf]  ;;  %v14166_v24 = vld [vmem:[#allocation5 + $0x104] sm:$0xf0] }
  0x23   :  { %7224 = vmatpush.bf16.msra.mxu3 %v10248_v12  ;;  %v10032_v21 = vor.u32 %v14268_v19, %v10031_v18  ;;  %v14316_v22 = vld [vmem:[#allocation5 + $0x5b4] sm:$0xf0]  ;;  %v9815_v26 = vld [vmem:[#allocation5 + $0x270] sm:$0xf]  ;;  %v14214_v27 = vld [vmem:[#allocation5 + $0x284] sm:$0xf0]  ;;  %v9624_v29 = vor.u32 %v14166_v24, %v9623_v23 }
  0x24   :  { %v10224_v25 = vor.u32 %v14316_v22, %v10223_v20  ;;  %v10007_v28 = vld [vmem:[#allocation5 + $0x3f0] sm:$0xf]  ;;  %7183 = vmatpush.bf16.msra.mxu0 %v9648_v16  ;;  %v14262_v30 = vld [vmem:[#allocation5 + $0x404] sm:$0xf0]  ;;  %v9816_v33 = vor.u32 %v14214_v27, %v9815_v26  ;;  %v9599_v35 = vld [vmem:[#allocation5 + $0xc0] sm:$0xf] }
  0x25   :  { %v10199_v31 = vld [vmem:[#allocation5 + $0x570] sm:$0xf]  ;;  %v14310_v32 = vld [vmem:[#allocation5 + $0x584] sm:$0xf0]  ;;  %7197 = vmatpush.bf16.msra.mxu1 %v9840_v17  ;;  %v10008_v34 = vor.u32 %v14262_v30, %v10007_v28  ;;  %v14160_v36 = vld [vmem:[#allocation5 + $0xd4] sm:$0xf0] }
  0x26   :  { %7211 = vmatpush.bf16.msra.mxu2 %v10032_v21  ;;  %v9791_v37 = vld [vmem:[#allocation5 + $0x240] sm:$0xf]  ;;  %v10200_v38 = vor.u32 %v14310_v32, %v10199_v31  ;;  %v14208_v39 = vld [vmem:[#allocation5 + $0x254] sm:$0xf0]  ;;  %v9600_v44 = vor.u32 %v14160_v36, %v9599_v35  ;;  %v9575_v47 = vld [vmem:[#allocation5 + $0x90] sm:$0xf] }
  0x27   :  { %7225 = vmatpush.bf16.msra.mxu3 %v10224_v25  ;;  %v9983_v40 = vld [vmem:[#allocation5 + $0x3c0] sm:$0xf]  ;;  %v14256_v41 = vld [vmem:[#allocation5 + $0x3d4] sm:$0xf0]  ;;  %v9792_v45 = vor.u32 %v14208_v39, %v9791_v37  ;;  %v14154_v48 = vld [vmem:[#allocation5 + $0xa4] sm:$0xf0] }
  0x28   :  { %v10175_v42 = vld [vmem:[#allocation5 + $0x540] sm:$0xf]  ;;  %v14304_v43 = vld [vmem:[#allocation5 + $0x554] sm:$0xf0]  ;;  %7184 = vmatpush.bf16.msra.mxu0 %v9624_v29  ;;  %v9984_v46 = vor.u32 %v14256_v41, %v9983_v40  ;;  %v9767_v49 = vld [vmem:[#allocation5 + $0x210] sm:$0xf]  ;;  %v9576_v56 = vor.u32 %v14154_v48, %v9575_v47 }
  0x29   :  { %7198 = vmatpush.bf16.msra.mxu1 %v9816_v33  ;;  %v10176_v50 = vor.u32 %v14304_v43, %v10175_v42  ;;  %v14202_v51 = vld [vmem:[#allocation5 + $0x224] sm:$0xf0]  ;;  %v9959_v52 = vld [vmem:[#allocation5 + $0x390] sm:$0xf]  ;;  %v9551_v59 = vld [vmem:[#allocation5 + $0x60] sm:$0xf] }
  0x2a   :  { %7212 = vmatpush.bf16.msra.mxu2 %v10008_v34  ;;  %v14250_v53 = vld [vmem:[#allocation5 + $0x3a4] sm:$0xf0]  ;;  %v10151_v54 = vld [vmem:[#allocation5 + $0x510] sm:$0xf]  ;;  %v9768_v57 = vor.u32 %v14202_v51, %v9767_v49  ;;  %v14148_v60 = vld [vmem:[#allocation5 + $0x74] sm:$0xf0] }
  0x2b   :  { %7226 = vmatpush.bf16.msra.mxu3 %v10200_v38  ;;  %v14298_v55 = vld [vmem:[#allocation5 + $0x524] sm:$0xf0]  ;;  %v9960_v58 = vor.u32 %v14250_v53, %v9959_v52  ;;  %v9743_v61 = vld [vmem:[#allocation5 + $0x1e0] sm:$0xf]  ;;  %v14196_v63 = vld [vmem:[#allocation5 + $0x1f4] sm:$0xf0]  ;;  %v9552_v4 = vor.u32 %v14148_v60, %v9551_v59 }
  0x2c   :  { %7185 = vmatpush.bf16.msra.mxu0 %v9600_v44  ;;  %v10152_v62 = vor.u32 %v14298_v55, %v10151_v54  ;;  %v9935_v0 = vld [vmem:[#allocation5 + $0x360] sm:$0xf]  ;;  %v14244_v1 = vld [vmem:[#allocation5 + $0x374] sm:$0xf0]  ;;  %v9744_v5 = vor.u32 %v14196_v63, %v9743_v61  ;;  %v9527_v7 = vld [vmem:[#allocation5 + $0x30] sm:$0xf] }
  0x2d   :  { %7199 = vmatpush.bf16.msra.mxu1 %v9792_v45  ;;  %v10127_v2 = vld [vmem:[#allocation5 + $0x4e0] sm:$0xf]  ;;  %v14292_v3 = vld [vmem:[#allocation5 + $0x4f4] sm:$0xf0]  ;;  %v9936_v6 = vor.u32 %v14244_v1, %v9935_v0  ;;  %v14142_v8 = vld [vmem:[#allocation5 + $0x44] sm:$0xf0] }
  0x2e   :  { %7213 = vmatpush.bf16.msra.mxu2 %v9984_v46  ;;  %v9719_v9 = vld [vmem:[#allocation5 + $0x1b0] sm:$0xf]  ;;  %v10128_v10 = vor.u32 %v14292_v3, %v10127_v2  ;;  %v14190_v11 = vld [vmem:[#allocation5 + $0x1c4] sm:$0xf0]  ;;  %v9528_v16 = vor.u32 %v14142_v8, %v9527_v7  ;;  %v9503_v17 = vld [vmem:[#allocation5] sm:$0xf] }
  0x2f   :  { %7227 = vmatpush.bf16.msra.mxu3 %v10176_v50  ;;  %v9911_v12 = vld [vmem:[#allocation5 + $0x330] sm:$0xf]  ;;  %v14238_v13 = vld [vmem:[#allocation5 + $0x344] sm:$0xf0]  ;;  %v14136_v18 = vld [vmem:[#allocation5 + $0x14] sm:$0xf0]  ;;  %v9720_v19 = vor.u32 %v14190_v11, %v9719_v9 }
  0x30   :  { %7186 = vmatpush.bf16.msra.mxu0 %v9576_v56  ;;  %v10103_v14 = vld [vmem:[#allocation5 + $0x4b0] sm:$0xf]  ;;  %v14286_v15 = vld [vmem:[#allocation5 + $0x4c4] sm:$0xf0]  ;;  %v9912_v20 = vor.u32 %v14238_v13, %v9911_v12  ;;  %v9695_v21 = vld [vmem:[#allocation5 + $0x180] sm:$0xf]  ;;  %v9504_v31 = vor.u32 %v14136_v18, %v9503_v17 }
  0x31   :  { %7200 = vmatpush.bf16.msra.mxu1 %v9768_v57  ;;  %v14184_v22 = vld [vmem:[#allocation5 + $0x194] sm:$0xf0]  ;;  %v9887_v23 = vld [vmem:[#allocation5 + $0x300] sm:$0xf]  ;;  %v10104_v24 = vor.u32 %v14286_v15, %v10103_v14  ;;  %v10439_v28 = vld [vmem:[#allocation5 + $0x750] sm:$0xf] }
  0x32   :  { %7214 = vmatpush.bf16.msra.mxu2 %v9960_v58  ;;  %v14232_v25 = vld [vmem:[#allocation5 + $0x314] sm:$0xf0]  ;;  %v10079_v26 = vld [vmem:[#allocation5 + $0x480] sm:$0xf]  ;;  %v14370_v29 = vld [vmem:[#allocation5 + $0x764] sm:$0xf0]  ;;  %v9696_v35 = vor.u32 %v14184_v22, %v9695_v21 }
  0x33   :  { %7228 = vmatpush.bf16.msra.mxu3 %v10152_v62  ;;  %v14280_v27 = vld [vmem:[#allocation5 + $0x494] sm:$0xf0]  ;;  %v10631_v30 = vld [vmem:[#allocation5 + $0x8d0] sm:$0xf]  ;;  %v14418_v32 = vld [vmem:[#allocation5 + $0x8e4] sm:$0xf0]  ;;  %v9888_v36 = vor.u32 %v14232_v25, %v9887_v23  ;;  %v10440_v40 = vor.u32 %v14370_v29, %v10439_v28 }
  0x34   :  { %7187 = vmatpush.bf16.msra.mxu0 %v9552_v4  ;;  %v10823_v33 = vld [vmem:[#allocation5 + $0xa50] sm:$0xf]  ;;  %v14466_v34 = vld [vmem:[#allocation5 + $0xa64] sm:$0xf0]  ;;  %v10080_v39 = vor.u32 %v14280_v27, %v10079_v26  ;;  %v10415_v41 = vld [vmem:[#allocation5 + $0x720] sm:$0xf]  ;;  %v10632_v43 = vor.u32 %v14418_v32, %v10631_v30 }
  0x35   :  { %7201 = vmatpush.bf16.msra.mxu1 %v9744_v5  ;;  %v11015_v37 = vld [vmem:[#allocation5 + $0xbd0] sm:$0xf]  ;;  %v14514_v38 = vld [vmem:[#allocation5 + $0xbe4] sm:$0xf0]  ;;  %v14364_v42 = vld [vmem:[#allocation5 + $0x734] sm:$0xf0]  ;;  %v10824_v44 = vor.u32 %v14466_v34, %v10823_v33 }
  0x36   :  { %7215 = vmatpush.bf16.msra.mxu2 %v9936_v6  ;;  %v10607_v45 = vld [vmem:[#allocation5 + $0x8a0] sm:$0xf]  ;;  %v14412_v46 = vld [vmem:[#allocation5 + $0x8b4] sm:$0xf0]  ;;  %v11016_v48 = vor.u32 %v14514_v38, %v11015_v37  ;;  %v9415_v54 = vld [vmem:[#allocation2 + $0x8] sm:$0xf]  ;;  %v10416_v55 = vor.u32 %v14364_v42, %v10415_v41 }
  0x37   :  { %7229 = vmatpush.bf16.msra.mxu3 %v10128_v10  ;;  %v10799_v47 = vld [vmem:[#allocation5 + $0xa20] sm:$0xf]  ;;  %v14460_v49 = vld [vmem:[#allocation5 + $0xa34] sm:$0xf0]  ;;  %v10391_v56 = vld [vmem:[#allocation5 + $0x6f0] sm:$0xf]  ;;  %v10608_v60 = vor.u32 %v14412_v46, %v10607_v45 }
  0x38   :  { %7188 = vmatpush.bf16.msra.mxu0 %v9528_v16  ;;  %v10991_v50 = vld [vmem:[#allocation5 + $0xba0] sm:$0xf]  ;;  %v14508_v51 = vld [vmem:[#allocation5 + $0xbb4] sm:$0xf0]  ;;  %v14358_v57 = vld [vmem:[#allocation5 + $0x704] sm:$0xf0]  ;;  %v10800_v61 = vor.u32 %v14460_v49, %v10799_v47 }
  0x39   :  { %7202 = vmatpush.bf16.msra.mxu1 %v9720_v19  ;;  %v9407_v52 = vld [vmem:[#allocation2] sm:$0xf]  ;;  %v14122_v59 = vld [vmem:[#allocation2 + $0x64] sm:$0xf0]  ;;  %v10583_v62 = vld [vmem:[#allocation5 + $0x870] sm:$0xf]  ;;  %v10992_v2 = vor.u32 %v14508_v51, %v10991_v50  ;;  %v10392_v9 = vor.u32 %v14358_v57, %v10391_v56 }
  0x3a   :  { %7216 = vmatpush.bf16.msra.mxu2 %v9912_v20  ;;  %v14121_v53 = vld [vmem:[#allocation2 + $0x5c] sm:$0xf0]  ;;  %v14406_v63 = vld [vmem:[#allocation5 + $0x884] sm:$0xf0]  ;;  %v10775_v0 = vld [vmem:[#allocation5 + $0x9f0] sm:$0xf]  ;;  %v15560_v1 = vor.u32 %v14122_v59, %v9415_v54 }
  0x3b   :  { %7230 = vmatpush.bf16.msra.mxu3 %v10104_v24  ;;  %v15558_v58 = vor.u32 %v14121_v53, %v9407_v52  ;;  %v14454_v3 = vld [vmem:[#allocation5 + $0xa04] sm:$0xf0]  ;;  %v10967_v4 = vld [vmem:[#allocation5 + $0xb70] sm:$0xf]  ;;  %v14109_v6 = vld [vmem:[#allocation2 + $0x4] sm:$0xf]  ;;  %v10584_v12 = vor.u32 %v14406_v63, %v10583_v62 }
  0x3c   :  { %7189 = vmatpush.bf16.msra.mxu0 %v9504_v31  ;;  %v14502_v5 = vld [vmem:[#allocation5 + $0xb84] sm:$0xf0]  ;;  %v9409_v7 = vld [vmem:[#allocation2 + $0x60] sm:$0xf0]  ;;  %v14110_v8 = vld [vmem:[#allocation2 + $0xc] sm:$0xf]  ;;  %v10776_v13 = vor.u32 %v14454_v3, %v10775_v0 }
  0x3d   :  { %7203 = vmatpush.bf16.msra.mxu1 %v9696_v35  ;;  %v15564_v10 = vor.u32 %v14109_v6, %v9409_v7  ;;  %v9417_v11 = vld [vmem:[#allocation2 + $0x68] sm:$0xf0]  ;;  %v10367_v14 = vld [vmem:[#allocation5 + $0x6c0] sm:$0xf]  ;;  %v14352_v15 = vld [vmem:[#allocation5 + $0x6d4] sm:$0xf0]  ;;  %v10968_v18 = vor.u32 %v14502_v5, %v10967_v4 }
  0x3e   :  { %7217 = vmatpush.bf16.msra.mxu2 %v9888_v36  ;;  %v10559_v16 = vld [vmem:[#allocation5 + $0x840] sm:$0xf]  ;;  %v15566_v17 = vor.u32 %v14110_v8, %v9417_v11  ;;  %v14400_v19 = vld [vmem:[#allocation5 + $0x854] sm:$0xf0]  ;;  %v10368_v24 = vor.u32 %v14352_v15, %v10367_v14  ;;  %v10343_v27 = vld [vmem:[#allocation5 + $0x690] sm:$0xf] }
  0x3f   :  { %7231 = vmatpush.bf16.msra.mxu3 %v10080_v39  ;;  %7190 = vmatmul.bf16.vlgmr.msra.gmra.mxu0 %v15558_v58  ;;  %v10751_v20 = vld [vmem:[#allocation5 + $0x9c0] sm:$0xf]  ;;  %v14448_v21 = vld [vmem:[#allocation5 + $0x9d4] sm:$0xf0]  ;;  %v10560_v25 = vor.u32 %v14400_v19, %v10559_v16  ;;  %v14346_v28 = vld [vmem:[#allocation5 + $0x6a4] sm:$0xf0] }
  0x40   :  { %7238 = vmatpush.bf16.msrb.mxu0 %v10440_v40  ;;  %7204 = vmatmul.bf16.vlgmr.msra.gmra.mxu1 %v15564_v10  ;;  %v10943_v22 = vld [vmem:[#allocation5 + $0xb40] sm:$0xf]  ;;  %v14496_v23 = vld [vmem:[#allocation5 + $0xb54] sm:$0xf0]  ;;  %v10752_v26 = vor.u32 %v14448_v21, %v10751_v20  ;;  %v10535_v29 = vld [vmem:[#allocation5 + $0x810] sm:$0xf]  ;;  %v10344_v36 = vor.u32 %v14346_v28, %v10343_v27 }
  0x41   :  { %7252 = vmatpush.bf16.msrb.mxu1 %v10632_v43  ;;  %7218 = vmatmul.bf16.vlgmr.msra.gmra.mxu2 %v15560_v1  ;;  %v10944_v30 = vor.u32 %v14496_v23, %v10943_v22  ;;  %v14394_v31 = vld [vmem:[#allocation5 + $0x824] sm:$0xf0]  ;;  %v10727_v32 = vld [vmem:[#allocation5 + $0x990] sm:$0xf]  ;;  %v10319_v39 = vld [vmem:[#allocation5 + $0x660] sm:$0xf] }
  0x42   :  { %7266 = vmatpush.bf16.msrb.mxu2 %v10824_v44  ;;  %7232 = vmatmul.bf16.vlgmr.msra.gmra.mxu3 %v15566_v17  ;;  %v14442_v33 = vld [vmem:[#allocation5 + $0x9a4] sm:$0xf0]  ;;  %v10919_v34 = vld [vmem:[#allocation5 + $0xb10] sm:$0xf]  ;;  %v10536_v37 = vor.u32 %v14394_v31, %v10535_v29  ;;  %v14340_v40 = vld [vmem:[#allocation5 + $0x674] sm:$0xf0] }
  0x43   :  { %7280 = vmatpush.bf16.msrb.mxu3 %v11016_v48  ;;  %v14490_v35 = vld [vmem:[#allocation5 + $0xb24] sm:$0xf0]  ;;  %v10728_v38 = vor.u32 %v14442_v33, %v10727_v32  ;;  %v10511_v41 = vld [vmem:[#allocation5 + $0x7e0] sm:$0xf]  ;;  %v14388_v43 = vld [vmem:[#allocation5 + $0x7f4] sm:$0xf0]  ;;  %v10320_v48 = vor.u32 %v14340_v40, %v10319_v39 }
  0x44   :  { %7239 = vmatpush.bf16.msrb.mxu0 %v10416_v55  ;;  %v10920_v42 = vor.u32 %v14490_v35, %v10919_v34  ;;  %v10703_v44 = vld [vmem:[#allocation5 + $0x960] sm:$0xf]  ;;  %v14436_v45 = vld [vmem:[#allocation5 + $0x974] sm:$0xf0]  ;;  %v10295_v49 = vld [vmem:[#allocation5 + $0x630] sm:$0xf]  ;;  %v10512_v50 = vor.u32 %v14388_v43, %v10511_v41 }
  0x45   :  { %7253 = vmatpush.bf16.msrb.mxu1 %v10608_v60  ;;  %v10895_v46 = vld [vmem:[#allocation5 + $0xae0] sm:$0xf]  ;;  %v14484_v47 = vld [vmem:[#allocation5 + $0xaf4] sm:$0xf0]  ;;  %v10704_v51 = vor.u32 %v14436_v45, %v10703_v44  ;;  %v14334_v52 = vld [vmem:[#allocation5 + $0x644] sm:$0xf0] }
  0x46   :  { %7267 = vmatpush.bf16.msrb.mxu2 %v10800_v61  ;;  %v10487_v53 = vld [vmem:[#allocation5 + $0x7b0] sm:$0xf]  ;;  %v14382_v54 = vld [vmem:[#allocation5 + $0x7c4] sm:$0xf0]  ;;  %v10896_v55 = vor.u32 %v14484_v47, %v10895_v46  ;;  %v10271_v61 = vld [vmem:[#allocation5 + $0x600] sm:$0xf]  ;;  %v10296_v63 = vor.u32 %v14334_v52, %v10295_v49 }
  0x47   :  { %7281 = vmatpush.bf16.msrb.mxu3 %v10992_v2  ;;  %v10679_v56 = vld [vmem:[#allocation5 + $0x930] sm:$0xf]  ;;  %v14430_v57 = vld [vmem:[#allocation5 + $0x944] sm:$0xf0]  ;;  %v14328_v62 = vld [vmem:[#allocation5 + $0x614] sm:$0xf0]  ;;  %v10488_v5 = vor.u32 %v14382_v54, %v10487_v53 }
  0x48   :  { %7240 = vmatpush.bf16.msrb.mxu0 %v10392_v9  ;;  %v10871_v59 = vld [vmem:[#allocation5 + $0xab0] sm:$0xf]  ;;  %v14478_v60 = vld [vmem:[#allocation5 + $0xac4] sm:$0xf0]  ;;  %v10463_v0 = vld [vmem:[#allocation5 + $0x780] sm:$0xf]  ;;  %v10680_v6 = vor.u32 %v14430_v57, %v10679_v56  ;;  %v10272_v19 = vor.u32 %v14328_v62, %v10271_v61 }
  0x49   :  { %7254 = vmatpush.bf16.msrb.mxu1 %v10584_v12  ;;  %v14376_v2 = vld [vmem:[#allocation5 + $0x794] sm:$0xf0]  ;;  %v10655_v3 = vld [vmem:[#allocation5 + $0x900] sm:$0xf]  ;;  %v11207_v9 = vld [vmem:[#allocation5 + $0xd50] sm:$0xf]  ;;  %v10872_v11 = vor.u32 %v14478_v60, %v10871_v59 }
  0x4a   :  { %7268 = vmatpush.bf16.msrb.mxu2 %v10776_v13  ;;  %v14424_v4 = vld [vmem:[#allocation5 + $0x914] sm:$0xf0]  ;;  %v10847_v7 = vld [vmem:[#allocation5 + $0xa80] sm:$0xf]  ;;  %v14562_v12 = vld [vmem:[#allocation5 + $0xd64] sm:$0xf0]  ;;  %v10464_v23 = vor.u32 %v14376_v2, %v10463_v0 }
  0x4b   :  { %7282 = vmatpush.bf16.msrb.mxu3 %v10968_v18  ;;  %v14472_v8 = vld [vmem:[#allocation5 + $0xa94] sm:$0xf0]  ;;  %v11399_v13 = vld [vmem:[#allocation5 + $0xed0] sm:$0xf]  ;;  %v14610_v14 = vld [vmem:[#allocation5 + $0xee4] sm:$0xf0]  ;;  %v11208_v29 = vor.u32 %v14562_v12, %v11207_v9 }
  0x4c   :  { %7241 = vmatpush.bf16.msrb.mxu0 %v10368_v24  ;;  %v11591_v15 = vld [vmem:[#allocation5 + $0x1050] sm:$0xf]  ;;  %v14658_v16 = vld [vmem:[#allocation5 + $0x1064] sm:$0xf0]  ;;  %v10656_v24 = vor.u32 %v14424_v4, %v10655_v3  ;;  %v14111_v27 = vld [vmem:[#allocation2 + $0x14] sm:$0xf]  ;;  %v10848_v28 = vor.u32 %v14472_v8, %v10847_v7  ;;  %v11400_v33 = vor.u32 %v14610_v14, %v11399_v13 }
  0x4d   :  { %7255 = vmatpush.bf16.msrb.mxu1 %v10560_v25  ;;  %v11783_v18 = vld [vmem:[#allocation5 + $0x11d0] sm:$0xf]  ;;  %v14706_v20 = vld [vmem:[#allocation5 + $0x11e4] sm:$0xf0]  ;;  %v9431_v25 = vld [vmem:[#allocation2 + $0x18] sm:$0xf]  ;;  %v11592_v34 = vor.u32 %v14658_v16, %v11591_v15 }
  0x4e   :  { %7269 = vmatpush.bf16.msrb.mxu2 %v10752_v26  ;;  %v9423_v21 = vld [vmem:[#allocation2 + $0x10] sm:$0xf]  ;;  %v14124_v26 = vld [vmem:[#allocation2 + $0x74] sm:$0xf0]  ;;  %v14112_v31 = vld [vmem:[#allocation2 + $0x1c] sm:$0xf] }
  0x4f   :  { %7283 = vmatpush.bf16.msrb.mxu3 %v10944_v30  ;;  %v14123_v22 = vld [vmem:[#allocation2 + $0x6c] sm:$0xf0]  ;;  %v9425_v30 = vld [vmem:[#allocation2 + $0x70] sm:$0xf0]  ;;  %v9433_v32 = vld [vmem:[#allocation2 + $0x78] sm:$0xf0]  ;;  %v15572_v43 = vor.u32 %v14124_v26, %v9431_v25 }
  0x50   :  { %7242 = vmatpush.bf16.msrb.mxu0 %v10344_v36  ;;  %v11183_v35 = vld [vmem:[#allocation5 + $0xd20] sm:$0xf]  ;;  %v14556_v36 = vld [vmem:[#allocation5 + $0xd34] sm:$0xf0]  ;;  %v15570_v39 = vor.u32 %v14123_v22, %v9423_v21  ;;  %v15574_v44 = vor.u32 %v14111_v27, %v9425_v30  ;;  %v15576_v47 = vor.u32 %v14112_v31, %v9433_v32  ;;  %v14550_v52 = vld [vmem:[#allocation5 + $0xd04] sm:$0xf0] }
  0x51   :  { %7256 = vmatpush.bf16.msrb.mxu1 %v10536_v37  ;;  %v11375_v37 = vld [vmem:[#allocation5 + $0xea0] sm:$0xf]  ;;  %v14604_v40 = vld [vmem:[#allocation5 + $0xeb4] sm:$0xf0]  ;;  %v11351_v53 = vld [vmem:[#allocation5 + $0xe70] sm:$0xf] }
  0x52   :  { %7270 = vmatpush.bf16.msrb.mxu2 %v10728_v38  ;;  %v11784_v38 = vor.u32 %v14706_v20, %v11783_v18  ;;  %v11567_v41 = vld [vmem:[#allocation5 + $0x1020] sm:$0xf]  ;;  %v14700_v46 = vld [vmem:[#allocation5 + $0x11b4] sm:$0xf0]  ;;  %v11376_v49 = vor.u32 %v14604_v40, %v11375_v37  ;;  %v11543_v56 = vld [vmem:[#allocation5 + $0xff0] sm:$0xf] }
  0x53   :  { %7284 = vmatpush.bf16.msrb.mxu3 %v10920_v42  ;;  %v14652_v42 = vld [vmem:[#allocation5 + $0x1034] sm:$0xf0]  ;;  %v11759_v45 = vld [vmem:[#allocation5 + $0x11a0] sm:$0xf]  ;;  %v14646_v57 = vld [vmem:[#allocation5 + $0x1004] sm:$0xf0] }
  0x54   :  { %7243 = vmatpush.bf16.msrb.mxu0 %v10320_v48  ;;  %v11184_v48 = vor.u32 %v14556_v36, %v11183_v35  ;;  %v11760_v54 = vor.u32 %v14700_v46, %v11759_v45  ;;  %v11735_v59 = vld [vmem:[#allocation5 + $0x1170] sm:$0xf]  ;;  %v14694_v60 = vld [vmem:[#allocation5 + $0x1184] sm:$0xf0]  ;;  %v11135_v0 = vld [vmem:[#allocation5 + $0xcc0] sm:$0xf] }
  0x55   :  { %7257 = vmatpush.bf16.msrb.mxu1 %v10512_v50  ;;  %v11568_v50 = vor.u32 %v14652_v42, %v11567_v41  ;;  %v14544_v2 = vld [vmem:[#allocation5 + $0xcd4] sm:$0xf0]  ;;  %v11327_v3 = vld [vmem:[#allocation5 + $0xe40] sm:$0xf]  ;;  %v11736_v4 = vor.u32 %v14694_v60, %v11735_v59  ;;  %v11111_v14 = vld [vmem:[#allocation5 + $0xc90] sm:$0xf] }
  0x56   :  { %7271 = vmatpush.bf16.msrb.mxu2 %v10704_v51  ;;  %v11159_v51 = vld [vmem:[#allocation5 + $0xcf0] sm:$0xf]  ;;  %v14640_v7 = vld [vmem:[#allocation5 + $0xfd4] sm:$0xf0]  ;;  %v11711_v8 = vld [vmem:[#allocation5 + $0x1140] sm:$0xf] }
  0x57   :  { %7285 = vmatpush.bf16.msrb.mxu3 %v10896_v55  ;;  %v14598_v55 = vld [vmem:[#allocation5 + $0xe84] sm:$0xf0]  ;;  %v11160_v61 = vor.u32 %v14550_v52, %v11159_v51  ;;  %v14688_v9 = vld [vmem:[#allocation5 + $0x1154] sm:$0xf0]  ;;  %v11303_v16 = vld [vmem:[#allocation5 + $0xe10] sm:$0xf] }
  0x58   :  { %7244 = vmatpush.bf16.msrb.mxu0 %v10296_v63  ;;  %v11352_v62 = vor.u32 %v14598_v55, %v11351_v53  ;;  %v11544_v63 = vor.u32 %v14646_v57, %v11543_v56  ;;  %v14538_v15 = vld [vmem:[#allocation5 + $0xca4] sm:$0xf0]  ;;  %v11712_v18 = vor.u32 %v14688_v9, %v11711_v8  ;;  %v11495_v20 = vld [vmem:[#allocation5 + $0xf90] sm:$0xf]  ;;  %v11087_v27 = vld [vmem:[#allocation5 + $0xc60] sm:$0xf] }
  0x59   :  { %7258 = vmatpush.bf16.msrb.mxu1 %v10488_v5  ;;  %v14592_v5 = vld [vmem:[#allocation5 + $0xe54] sm:$0xf0]  ;;  %v14634_v21 = vld [vmem:[#allocation5 + $0xfa4] sm:$0xf0]  ;;  %v11687_v22 = vld [vmem:[#allocation5 + $0x1110] sm:$0xf] }
  0x5a   :  { %7272 = vmatpush.bf16.msrb.mxu2 %v10680_v6  ;;  %v11519_v6 = vld [vmem:[#allocation5 + $0xfc0] sm:$0xf]  ;;  %v11328_v12 = vor.u32 %v14592_v5, %v11327_v3  ;;  %v11496_v26 = vor.u32 %v14634_v21, %v11495_v20  ;;  %v14580_v31 = vld [vmem:[#allocation5 + $0xdf4] sm:$0xf0]  ;;  %v11063_v37 = vld [vmem:[#allocation5 + $0xc30] sm:$0xf] }
  0x5b   :  { %7286 = vmatpush.bf16.msrb.mxu3 %v10872_v11  ;;  %v11136_v11 = vor.u32 %v14544_v2, %v11135_v0  ;;  %v11520_v13 = vor.u32 %v14640_v7, %v11519_v6  ;;  %v11471_v32 = vld [vmem:[#allocation5 + $0xf60] sm:$0xf]  ;;  %v14676_v35 = vld [vmem:[#allocation5 + $0x10f4] sm:$0xf0]  ;;  %v14526_v41 = vld [vmem:[#allocation5 + $0xc44] sm:$0xf0] }
  0x5c   :  { %7245 = vmatpush.bf16.msrb.mxu0 %v10272_v19  ;;  %v14586_v19 = vld [vmem:[#allocation5 + $0xe24] sm:$0xf0]  ;;  %v11255_v42 = vld [vmem:[#allocation5 + $0xdb0] sm:$0xf]  ;;  %v11039_v52 = vld [vmem:[#allocation5 + $0xc00] sm:$0xf] }
  0x5d   :  { %7259 = vmatpush.bf16.msrb.mxu1 %v10464_v23  ;;  %v14682_v23 = vld [vmem:[#allocation5 + $0x1124] sm:$0xf0]  ;;  %v11304_v25 = vor.u32 %v14586_v19, %v11303_v16  ;;  %v14520_v53 = vld [vmem:[#allocation5 + $0xc14] sm:$0xf0]  ;;  %v11231_v55 = vld [vmem:[#allocation5 + $0xd80] sm:$0xf] }
  0x5e   :  { %7273 = vmatpush.bf16.msrb.mxu2 %v10656_v24  ;;  %v11112_v24 = vor.u32 %v14538_v15, %v11111_v14  ;;  %v11688_v30 = vor.u32 %v14682_v23, %v11687_v22  ;;  %v14574_v45 = vld [vmem:[#allocation5 + $0xdc4] sm:$0xf0]  ;;  %v14568_v56 = vld [vmem:[#allocation5 + $0xd94] sm:$0xf0]  ;;  %v11423_v57 = vld [vmem:[#allocation5 + $0xf00] sm:$0xf]  ;;  %v11040_v9 = vor.u32 %v14520_v53, %v11039_v52 }
  0x5f   :  { %7287 = vmatpush.bf16.msrb.mxu3 %v10848_v28  ;;  %7246 = vmatmul.bf16.vlgmr.msrb.gmra.mxu0 %v15570_v39  ;;  %v14532_v28 = vld [vmem:[#allocation5 + $0xc74] sm:$0xf0]  ;;  %v14670_v51 = vld [vmem:[#allocation5 + $0x10c4] sm:$0xf0]  ;;  %v11256_v60 = vor.u32 %v14574_v45, %v11255_v42  ;;  %v11975_v0 = vld [vmem:[#allocation5 + $0x1350] sm:$0xf]  ;;  %v11232_v14 = vor.u32 %v14568_v56, %v11231_v55 }
  0x60   :  { %7294 = vmatpush.bf16.msra.mxu0 %v11208_v29  ;;  %7260 = vmatmul.bf16.vlgmr.msrb.gmra.mxu1 %v15574_v44  ;;  %v11279_v29 = vld [vmem:[#allocation5 + $0xde0] sm:$0xf]  ;;  %v11088_v36 = vor.u32 %v14532_v28, %v11087_v27  ;;  %v14616_v59 = vld [vmem:[#allocation5 + $0xf14] sm:$0xf0]  ;;  %v14754_v3 = vld [vmem:[#allocation5 + $0x1364] sm:$0xf0] }
  0x61   :  { %7308 = vmatpush.bf16.msra.mxu1 %v11400_v33  ;;  %7274 = vmatmul.bf16.vlgmr.msrb.gmra.mxu2 %v15572_v43  ;;  %v14628_v33 = vld [vmem:[#allocation5 + $0xf74] sm:$0xf0]  ;;  %v14802_v5 = vld [vmem:[#allocation5 + $0x14e4] sm:$0xf0]  ;;  %v12359_v6 = vld [vmem:[#allocation5 + $0x1650] sm:$0xf]  ;;  %v11424_v15 = vor.u32 %v14616_v59, %v11423_v57  ;;  %v11976_v21 = vor.u32 %v14754_v3, %v11975_v0 }
  0x62   :  { %7322 = vmatpush.bf16.msra.mxu2 %v11592_v34  ;;  %7288 = vmatmul.bf16.vlgmr.msrb.gmra.mxu3 %v15576_v47  ;;  %v11663_v34 = vld [vmem:[#allocation5 + $0x10e0] sm:$0xf]  ;;  %v11472_v40 = vor.u32 %v14628_v33, %v11471_v32  ;;  %v14850_v7 = vld [vmem:[#allocation5 + $0x1664] sm:$0xf0]  ;;  %v12551_v8 = vld [vmem:[#allocation5 + $0x17d0] sm:$0xf] }
  0x63   :  { %7336 = vmatpush.bf16.msra.mxu3 %v11784_v38  ;;  %v11280_v38 = vor.u32 %v14580_v31, %v11279_v29  ;;  %v11664_v46 = vor.u32 %v14676_v35, %v11663_v34  ;;  %v9447_v16 = vld [vmem:[#allocation2 + $0x28] sm:$0xf]  ;;  %v14113_v19 = vld [vmem:[#allocation2 + $0x24] sm:$0xf]  ;;  %v14114_v23 = vld [vmem:[#allocation2 + $0x2c] sm:$0xf] }
  0x64   :  { %7295 = vmatpush.bf16.msra.mxu0 %v11184_v48  ;;  %v11447_v48 = vld [vmem:[#allocation5 + $0xf30] sm:$0xf]  ;;  %v9441_v22 = vld [vmem:[#allocation2 + $0x80] sm:$0xf0]  ;;  %v11951_v27 = vld [vmem:[#allocation5 + $0x1320] sm:$0xf] }
  0x65   :  { %7309 = vmatpush.bf16.msra.mxu1 %v11376_v49  ;;  %v14622_v49 = vld [vmem:[#allocation5 + $0xf44] sm:$0xf0]  ;;  %v14748_v28 = vld [vmem:[#allocation5 + $0x1334] sm:$0xf0]  ;;  %v12143_v29 = vld [vmem:[#allocation5 + $0x14a0] sm:$0xf] }
  0x66   :  { %7323 = vmatpush.bf16.msra.mxu2 %v11568_v50  ;;  %v11639_v50 = vld [vmem:[#allocation5 + $0x10b0] sm:$0xf]  ;;  %v14796_v32 = vld [vmem:[#allocation5 + $0x14b4] sm:$0xf0]  ;;  %v12335_v33 = vld [vmem:[#allocation5 + $0x1620] sm:$0xf] }
  0x67   :  { %7337 = vmatpush.bf16.msra.mxu3 %v11760_v54  ;;  %v11064_v54 = vor.u32 %v14526_v41, %v11063_v37  ;;  %v11640_v2 = vor.u32 %v14670_v51, %v11639_v50  ;;  %v14844_v34 = vld [vmem:[#allocation5 + $0x1634] sm:$0xf0]  ;;  %v12527_v37 = vld [vmem:[#allocation5 + $0x17a0] sm:$0xf]  ;;  %v11952_v41 = vor.u32 %v14748_v28, %v11951_v27  ;;  %v12144_v42 = vor.u32 %v14796_v32, %v12143_v29  ;;  %v14790_v51 = vld [vmem:[#allocation5 + $0x1484] sm:$0xf0] }
  0x68   :  { %7296 = vmatpush.bf16.msra.mxu0 %v11160_v61  ;;  %v11448_v61 = vor.u32 %v14622_v49, %v11447_v48  ;;  %v12336_v45 = vor.u32 %v14844_v34, %v12335_v33  ;;  %v14742_v48 = vld [vmem:[#allocation5 + $0x1304] sm:$0xf0]  ;;  %v12119_v49 = vld [vmem:[#allocation5 + $0x1470] sm:$0xf]  ;;  %v14784_v0 = vld [vmem:[#allocation5 + $0x1454] sm:$0xf0] }
  0x69   :  { %7310 = vmatpush.bf16.msra.mxu1 %v11352_v62  ;;  %v11615_v62 = vld [vmem:[#allocation5 + $0x1080] sm:$0xf]  ;;  %v12311_v52 = vld [vmem:[#allocation5 + $0x15f0] sm:$0xf]  ;;  %v14838_v53 = vld [vmem:[#allocation5 + $0x1604] sm:$0xf0]  ;;  %v12120_v57 = vor.u32 %v14790_v51, %v12119_v49 }
  0x6a   :  { %7324 = vmatpush.bf16.msra.mxu2 %v11544_v63  ;;  %v14664_v63 = vld [vmem:[#allocation5 + $0x1094] sm:$0xf0]  ;;  %v14886_v55 = vld [vmem:[#allocation5 + $0x1784] sm:$0xf0]  ;;  %v12312_v59 = vor.u32 %v14838_v53, %v12311_v52  ;;  %v12239_v28 = vld [vmem:[#allocation5 + $0x1560] sm:$0xf] }
  0x6b   :  { %7338 = vmatpush.bf16.msra.mxu3 %v11736_v4  ;;  %v12167_v4 = vld [vmem:[#allocation5 + $0x14d0] sm:$0xf]  ;;  %v11616_v20 = vor.u32 %v14664_v63, %v11615_v62  ;;  %v12095_v62 = vld [vmem:[#allocation5 + $0x1440] sm:$0xf]  ;;  %v14832_v3 = vld [vmem:[#allocation5 + $0x15d4] sm:$0xf0] }
  0x6c   :  { %7297 = vmatpush.bf16.msra.mxu0 %v11136_v11  ;;  %v14898_v11 = vld [vmem:[#allocation5 + $0x17e4] sm:$0xf0]  ;;  %v14772_v27 = vld [vmem:[#allocation5 + $0x13f4] sm:$0xf0]  ;;  %v11831_v34 = vld [vmem:[#allocation5 + $0x1230] sm:$0xf] }
  0x6d   :  { %7311 = vmatpush.bf16.msra.mxu1 %v11328_v12  ;;  %v9439_v12 = vld [vmem:[#allocation2 + $0x20] sm:$0xf]  ;;  %v14820_v29 = vld [vmem:[#allocation5 + $0x1574] sm:$0xf0]  ;;  %v14814_v49 = vld [vmem:[#allocation5 + $0x1544] sm:$0xf0] }
  0x6e   :  { %7325 = vmatpush.bf16.msra.mxu2 %v11520_v13  ;;  %v14125_v13 = vld [vmem:[#allocation2 + $0x7c] sm:$0xf0]  ;;  %v14868_v32 = vld [vmem:[#allocation5 + $0x16f4] sm:$0xf0]  ;;  %v14862_v51 = vld [vmem:[#allocation5 + $0x16c4] sm:$0xf0] }
  0x6f   :  { %7339 = vmatpush.bf16.msra.mxu3 %v11712_v18  ;;  %v14126_v18 = vld [vmem:[#allocation2 + $0x84] sm:$0xf0]  ;;  %v15582_v31 = vor.u32 %v14125_v13, %v9439_v12  ;;  %v12071_v12 = vld [vmem:[#allocation5 + $0x1410] sm:$0xf]  ;;  %v11807_v52 = vld [vmem:[#allocation5 + $0x1200] sm:$0xf] }
  0x70   :  { %7298 = vmatpush.bf16.msra.mxu0 %v11112_v24  ;;  %v9449_v24 = vld [vmem:[#allocation2 + $0x88] sm:$0xf0]  ;;  %v15584_v35 = vor.u32 %v14126_v18, %v9447_v16  ;;  %v14826_v16 = vld [vmem:[#allocation5 + $0x15a4] sm:$0xf0]  ;;  %v12455_v18 = vld [vmem:[#allocation5 + $0x1710] sm:$0xf] }
  0x71   :  { %7312 = vmatpush.bf16.msra.mxu1 %v11304_v25  ;;  %v12168_v25 = vor.u32 %v14802_v5, %v12167_v4  ;;  %v12479_v4 = vld [vmem:[#allocation5 + $0x1740] sm:$0xf]  ;;  %v14880_v5 = vld [vmem:[#allocation5 + $0x1754] sm:$0xf0]  ;;  %s15501_s4 = smov [#allocation13]   ;;  %s9389_s7 = sshll.u32 %s16274_s6, 4  ;;  %s9390_s7 = int_to_ptr.hbm [resolvable:$true] %s9389_s7 }
  0x72   :  { %7326 = vmatpush.bf16.msra.mxu2 %v11496_v26  ;;  %v12360_v26 = vor.u32 %v14850_v7, %v12359_v6  ;;  %v12096_v7 = vor.u32 %v14784_v0, %v12095_v62  ;;  %v12480_v13 = vor.u32 %v14880_v5, %v12479_v4  ;;  %v14712_v53 = vld [vmem:[#allocation5 + $0x1214] sm:$0xf0]  ;;  %v12383_v62 = vld [vmem:[#allocation5 + $0x1680] sm:$0xf]  ;;  %v12743_v0 = vld [vmem:[#allocation5 + $0x1950] sm:$0xf] }
  0x73   :  { %7340 = vmatpush.bf16.msra.mxu3 %v11688_v30  ;;  %v12552_v30 = vor.u32 %v14898_v11, %v12551_v8  ;;  %v14730_v11 = vld [vmem:[#allocation5 + $0x12a4] sm:$0xf0]  ;;  %v12935_v4 = vld [vmem:[#allocation5 + $0x1ad0] sm:$0xf]  ;;  %s9387_s5 = sshll.u32 %s15501_s4, 4  ;;  %s9388_s5 = int_to_ptr.vmem [resolvable:$true] %s9387_s5 }
  0x74   :  { %7299 = vmatpush.bf16.msra.mxu0 %v11088_v36  ;;  %v15586_v36 = vor.u32 %v14113_v19, %v9441_v22  ;;  %v14874_v19 = vld [vmem:[#allocation5 + $0x1724] sm:$0xf0] }
  0x75   :  { %7313 = vmatpush.bf16.msra.mxu1 %v11280_v38  ;;  %v14892_v38 = vld [vmem:[#allocation5 + $0x17b4] sm:$0xf0]  ;;  %v14994_v5 = vld [vmem:[#allocation5 + $0x1ae4] sm:$0xf0] }
  0x76   :  { %7327 = vmatpush.bf16.msra.mxu2 %v11472_v40  ;;  %v15588_v40 = vor.u32 %v14114_v23, %v9449_v24  ;;  %v12528_v50 = vor.u32 %v14892_v38, %v12527_v37  ;;  %v11855_v23 = vld [vmem:[#allocation5 + $0x1260] sm:$0xf]  ;;  %v14724_v24 = vld [vmem:[#allocation5 + $0x1274] sm:$0xf0]  ;;  %v12240_v38 = vor.u32 %v14820_v29, %v12239_v28 }
  0x77   :  { %7341 = vmatpush.bf16.msra.mxu3 %v11664_v46  ;;  %v11927_v46 = vld [vmem:[#allocation5 + $0x12f0] sm:$0xf]  ;;  %v11856_v33 = vor.u32 %v14724_v24, %v11855_v23  ;;  %v14116_v23 = vld [vmem:[#allocation2 + $0x3c] sm:$0xf]  ;;  %v14940_v28 = vld [vmem:[#allocation5 + $0x1934] sm:$0xf0] }
  0x78   :  { %7300 = vmatpush.bf16.msra.mxu0 %v11064_v54  ;;  %v12503_v54 = vld [vmem:[#allocation5 + $0x1770] sm:$0xf]  ;;  %v11928_v56 = vor.u32 %v14742_v48, %v11927_v46  ;;  %v9465_v24 = vld [vmem:[#allocation2 + $0x98] sm:$0xf0]  ;;  %v12911_v29 = vld [vmem:[#allocation5 + $0x1aa0] sm:$0xf] }
  0x79   :  { %7314 = vmatpush.bf16.msra.mxu1 %v11256_v60  ;;  %v11903_v60 = vld [vmem:[#allocation5 + $0x12c0] sm:$0xf]  ;;  %v12504_v63 = vor.u32 %v14886_v55, %v12503_v54  ;;  %v12215_v48 = vld [vmem:[#allocation5 + $0x1530] sm:$0xf] }
  0x7a   :  { %7328 = vmatpush.bf16.msra.mxu2 %v11448_v61  ;;  %v14736_v61 = vld [vmem:[#allocation5 + $0x12d4] sm:$0xf0]  ;;  %v11999_v55 = vld [vmem:[#allocation5 + $0x1380] sm:$0xf] }
  0x7b   :  { %7342 = vmatpush.bf16.msra.mxu3 %v11640_v2  ;;  %v12287_v2 = vld [vmem:[#allocation5 + $0x15c0] sm:$0xf]  ;;  %v11904_v6 = vor.u32 %v14736_v61, %v11903_v60  ;;  %v12216_v61 = vor.u32 %v14814_v49, %v12215_v48 }
  0x7c   :  { %7301 = vmatpush.bf16.msra.mxu0 %v11040_v9  ;;  %v12288_v8 = vor.u32 %v14832_v3, %v12287_v2  ;;  %v11879_v9 = vld [vmem:[#allocation5 + $0x1290] sm:$0xf]  ;;  %v14946_v3 = vld [vmem:[#allocation5 + $0x1964] sm:$0xf0] }
  0x7d   :  { %7315 = vmatpush.bf16.msra.mxu1 %v11232_v14  ;;  %v14778_v14 = vld [vmem:[#allocation5 + $0x1424] sm:$0xf0] }
  0x7e   :  { %7329 = vmatpush.bf16.msra.mxu2 %v11424_v15  ;;  %v12263_v15 = vld [vmem:[#allocation5 + $0x1590] sm:$0xf] }
  0x7f   :  { %7343 = vmatpush.bf16.msra.mxu3 %v11616_v20  ;;  %7302 = vmatmul.bf16.vlgmr.msra.gmra.mxu0 %v15582_v31  ;;  %v11880_v20 = vor.u32 %v14730_v11, %v11879_v9  ;;  %v12264_v22 = vor.u32 %v14826_v16, %v12263_v15  ;;  %v11808_v9 = vor.u32 %v14712_v53, %v11807_v52  ;;  %v15090_v11 = vld [vmem:[#allocation5 + $0x1de4] sm:$0xf0]  ;;  %v9463_v16 = vld [vmem:[#allocation2 + $0x38] sm:$0xf]  ;;  %v12887_v53 = vld [vmem:[#allocation5 + $0x1a70] sm:$0xf] }
  0x80   :  { %7350 = vmatpush.bf16.msrb.mxu0 %v11976_v21  ;;  %7316 = vmatmul.bf16.vlgmr.msra.gmra.mxu1 %v15586_v36  ;;  %v12072_v21 = vor.u32 %v14778_v14, %v12071_v12  ;;  %v9455_v12 = vld [vmem:[#allocation2 + $0x30] sm:$0xf]  ;;  %v14934_v52 = vld [vmem:[#allocation5 + $0x1904] sm:$0xf0] }
  0x81   :  { %7364 = vmatpush.bf16.msrb.mxu1 %v12168_v25  ;;  %7330 = vmatmul.bf16.vlgmr.msra.gmra.mxu2 %v15584_v35  ;;  %v12047_v25 = vld [vmem:[#allocation5 + $0x13e0] sm:$0xf] }
  0x82   :  { %7378 = vmatpush.bf16.msrb.mxu2 %v12360_v26  ;;  %7344 = vmatmul.bf16.vlgmr.msra.gmra.mxu3 %v15588_v40  ;;  %v12456_v26 = vor.u32 %v14874_v19, %v12455_v18  ;;  %v12048_v37 = vor.u32 %v14772_v27, %v12047_v25  ;;  %v14128_v18 = vld [vmem:[#allocation2 + $0x94] sm:$0xf0]  ;;  %v14115_v19 = vld [vmem:[#allocation2 + $0x34] sm:$0xf]  ;;  %v12936_v25 = vor.u32 %v14994_v5, %v12935_v4  ;;  %v12719_v27 = vld [vmem:[#allocation5 + $0x1920] sm:$0xf] }
  0x83   :  { %7392 = vmatpush.bf16.msrb.mxu3 %v12552_v30  ;;  %v12431_v30 = vld [vmem:[#allocation5 + $0x16e0] sm:$0xf]  ;;  %v12720_v48 = vor.u32 %v14940_v28, %v12719_v27  ;;  %v14976_v5 = vld [vmem:[#allocation5 + $0x1a54] sm:$0xf0] }
  0x84   :  { %7351 = vmatpush.bf16.msrb.mxu0 %v11952_v41  ;;  %v14718_v41 = vld [vmem:[#allocation5 + $0x1244] sm:$0xf0]  ;;  %v12432_v46 = vor.u32 %v14868_v32, %v12431_v30  ;;  %v12623_v27 = vld [vmem:[#allocation5 + $0x1860] sm:$0xf]  ;;  %v14916_v28 = vld [vmem:[#allocation5 + $0x1874] sm:$0xf0] }
  0x85   :  { %7365 = vmatpush.bf16.msrb.mxu1 %v12144_v42  ;;  %v12023_v42 = vld [vmem:[#allocation5 + $0x13b0] sm:$0xf]  ;;  %v11832_v54 = vor.u32 %v14718_v41, %v11831_v34  ;;  %v13103_v34 = vld [vmem:[#allocation5 + $0x1c20] sm:$0xf] }
  0x86   :  { %7379 = vmatpush.bf16.msrb.mxu2 %v12336_v45  ;;  %v14766_v45 = vld [vmem:[#allocation5 + $0x13c4] sm:$0xf0] }
  0x87   :  { %7393 = vmatpush.bf16.msrb.mxu3 %v12528_v50  ;;  %v12407_v50 = vld [vmem:[#allocation5 + $0x16b0] sm:$0xf]  ;;  %v12024_v60 = vor.u32 %v14766_v45, %v12023_v42  ;;  %v13295_v42 = vld [vmem:[#allocation5 + $0x1da0] sm:$0xf]  ;;  %v15084_v45 = vld [vmem:[#allocation5 + $0x1db4] sm:$0xf0] }
  0x88   :  { %7352 = vmatpush.bf16.msrb.mxu0 %v11928_v56  ;;  %v14760_v56 = vld [vmem:[#allocation5 + $0x1394] sm:$0xf0]  ;;  %v12408_v2 = vor.u32 %v14862_v51, %v12407_v50  ;;  %v12695_v51 = vld [vmem:[#allocation5 + $0x18f0] sm:$0xf] }
  0x89   :  { %7366 = vmatpush.bf16.msrb.mxu1 %v12120_v57  ;;  %v12191_v57 = vld [vmem:[#allocation5 + $0x1500] sm:$0xf]  ;;  %v12000_v14 = vor.u32 %v14760_v56, %v11999_v55  ;;  %v14982_v55 = vld [vmem:[#allocation5 + $0x1a84] sm:$0xf0]  ;;  %v13079_v56 = vld [vmem:[#allocation5 + $0x1bf0] sm:$0xf] }
  0x8a   :  { %7380 = vmatpush.bf16.msrb.mxu2 %v12312_v59  ;;  %v14808_v59 = vld [vmem:[#allocation5 + $0x1514] sm:$0xf0] }
  0x8b   :  { %7394 = vmatpush.bf16.msrb.mxu3 %v12504_v63  ;;  %v14856_v63 = vld [vmem:[#allocation5 + $0x1694] sm:$0xf0]  ;;  %v12192_v15 = vor.u32 %v14808_v59, %v12191_v57  ;;  %v15030_v57 = vld [vmem:[#allocation5 + $0x1c04] sm:$0xf0]  ;;  %v13271_v59 = vld [vmem:[#allocation5 + $0x1d70] sm:$0xf] }
  0x8c   :  { %7353 = vmatpush.bf16.msrb.mxu0 %v11904_v6  ;;  %v13127_v6 = vld [vmem:[#allocation5 + $0x1c50] sm:$0xf] }
  0x8d   :  { %7367 = vmatpush.bf16.msrb.mxu1 %v12096_v7  ;;  %v15042_v7 = vld [vmem:[#allocation5 + $0x1c64] sm:$0xf0] }
  0x8e   :  { %7381 = vmatpush.bf16.msrb.mxu2 %v12288_v8  ;;  %v13319_v8 = vld [vmem:[#allocation5 + $0x1dd0] sm:$0xf] }
  0x8f   :  { %7395 = vmatpush.bf16.msrb.mxu3 %v12480_v13  ;;  %v14127_v13 = vld [vmem:[#allocation2 + $0x8c] sm:$0xf0]  ;;  %v13320_v30 = vor.u32 %v15090_v11, %v13319_v8  ;;  %v13247_v8 = vld [vmem:[#allocation5 + $0x1d40] sm:$0xf] }
  0x90   :  { %7354 = vmatpush.bf16.msrb.mxu0 %v11880_v20  ;;  %v12384_v20 = vor.u32 %v14856_v63, %v12383_v62  ;;  %v15594_v32 = vor.u32 %v14127_v13, %v9455_v12  ;;  %v12888_v62 = vor.u32 %v14982_v55, %v12887_v53  ;;  %v13080_v63 = vor.u32 %v15030_v57, %v13079_v56  ;;  %v12791_v53 = vld [vmem:[#allocation5 + $0x19b0] sm:$0xf]  ;;  %v15006_v57 = vld [vmem:[#allocation5 + $0x1b44] sm:$0xf0] }
  0x91   :  { %7368 = vmatpush.bf16.msrb.mxu1 %v12072_v21  ;;  %v12744_v21 = vor.u32 %v14946_v3, %v12743_v0  ;;  %v12671_v0 = vld [vmem:[#allocation5 + $0x18c0] sm:$0xf]  ;;  %v12983_v56 = vld [vmem:[#allocation5 + $0x1b30] sm:$0xf] }
  0x92   :  { %7382 = vmatpush.bf16.msrb.mxu2 %v12264_v22  ;;  %v9457_v22 = vld [vmem:[#allocation2 + $0x90] sm:$0xf0]  ;;  %v12863_v3 = vld [vmem:[#allocation5 + $0x1a40] sm:$0xf] }
  0x93   :  { %7396 = vmatpush.bf16.msrb.mxu3 %v12456_v26  ;;  %v13128_v26 = vor.u32 %v15042_v7, %v13127_v6  ;;  %v15598_v41 = vor.u32 %v14115_v19, %v9457_v22  ;;  %v13055_v6 = vld [vmem:[#allocation5 + $0x1bc0] sm:$0xf]  ;;  %v15024_v7 = vld [vmem:[#allocation5 + $0x1bd4] sm:$0xf0]  ;;  %v12864_v12 = vor.u32 %v14976_v5, %v12863_v3  ;;  %v14970_v19 = vld [vmem:[#allocation5 + $0x1a24] sm:$0xf0] }
  0x94   :  { %7355 = vmatpush.bf16.msrb.mxu0 %v11856_v33  ;;  %v14988_v33 = vld [vmem:[#allocation5 + $0x1ab4] sm:$0xf0]  ;;  %v13056_v13 = vor.u32 %v15024_v7, %v13055_v6  ;;  %v13223_v22 = vld [vmem:[#allocation5 + $0x1d10] sm:$0xf]  ;;  %v12959_v3 = vld [vmem:[#allocation5 + $0x1b00] sm:$0xf]  ;;  %v12984_v6 = vor.u32 %v15006_v57, %v12983_v56 }
  0x95   :  { %7369 = vmatpush.bf16.msrb.mxu1 %v12048_v37  ;;  %v15036_v37 = vld [vmem:[#allocation5 + $0x1c34] sm:$0xf0]  ;;  %v12912_v49 = vor.u32 %v14988_v33, %v12911_v29  ;;  %v12815_v29 = vld [vmem:[#allocation5 + $0x19e0] sm:$0xf] }
  0x96   :  { %7383 = vmatpush.bf16.msrb.mxu2 %v12240_v38  ;;  %v15596_v38 = vor.u32 %v14128_v18, %v9463_v16  ;;  %v13104_v50 = vor.u32 %v15036_v37, %v13103_v34  ;;  %v12839_v16 = vld [vmem:[#allocation5 + $0x1a10] sm:$0xf]  ;;  %v14964_v33 = vld [vmem:[#allocation5 + $0x19f4] sm:$0xf0]  ;;  %v13007_v34 = vld [vmem:[#allocation5 + $0x1b60] sm:$0xf] }
  0x97   :  { %7397 = vmatpush.bf16.msrb.mxu3 %v12432_v46  ;;  %v15600_v46 = vor.u32 %v14116_v23, %v9465_v24  ;;  %v15066_v23 = vld [vmem:[#allocation5 + $0x1d24] sm:$0xf0]  ;;  %v15012_v37 = vld [vmem:[#allocation5 + $0x1b74] sm:$0xf0]  ;;  %v13151_v7 = vld [vmem:[#allocation5 + $0x1c80] sm:$0xf] }
  0x98   :  { %7356 = vmatpush.bf16.msrb.mxu0 %v11832_v54  ;;  %v13296_v54 = vor.u32 %v15084_v45, %v13295_v42  ;;  %v13199_v42 = vld [vmem:[#allocation5 + $0x1ce0] sm:$0xf]  ;;  %v15060_v45 = vld [vmem:[#allocation5 + $0x1cf4] sm:$0xf0] }
  0x99   :  { %7370 = vmatpush.bf16.msrb.mxu1 %v12024_v60  ;;  %v15078_v60 = vld [vmem:[#allocation5 + $0x1d84] sm:$0xf0]  ;;  %v13200_v55 = vor.u32 %v15060_v45, %v13199_v42  ;;  %v13487_v45 = vld [vmem:[#allocation5 + $0x1f20] sm:$0xf] }
  0x9a   :  { %7384 = vmatpush.bf16.msrb.mxu2 %v12216_v61  ;;  %v12696_v61 = vor.u32 %v14934_v52, %v12695_v51  ;;  %v13272_v4 = vor.u32 %v15078_v60, %v13271_v59  ;;  %v13008_v51 = vor.u32 %v15012_v37, %v13007_v34  ;;  %v14910_v52 = vld [vmem:[#allocation5 + $0x1844] sm:$0xf0]  ;;  %v13175_v59 = vld [vmem:[#allocation5 + $0x1cb0] sm:$0xf]  ;;  %v9481_v34 = vld [vmem:[#allocation2 + $0xa8] sm:$0xf0] }
  0x9b   :  { %7398 = vmatpush.bf16.msrb.mxu3 %v12408_v2  ;;  %v14928_v2 = vld [vmem:[#allocation5 + $0x18d4] sm:$0xf0]  ;;  %v15054_v60 = vld [vmem:[#allocation5 + $0x1cc4] sm:$0xf0]  ;;  %v14063_v57 = vld [vmem:[#allocation5 + $0x23a0] sm:$0xf] }
  0x9c   :  { %7357 = vmatpush.bf16.msrb.mxu0 %v11808_v9  ;;  %v15072_v9 = vld [vmem:[#allocation5 + $0x1d54] sm:$0xf0]  ;;  %v12672_v11 = vor.u32 %v14928_v2, %v12671_v0  ;;  %v12767_v0 = vld [vmem:[#allocation5 + $0x1980] sm:$0xf] }
  0x9d   :  { %7371 = vmatpush.bf16.msrb.mxu1 %v12000_v14  ;;  %v12647_v14 = vld [vmem:[#allocation5 + $0x1890] sm:$0xf]  ;;  %v13248_v18 = vor.u32 %v15072_v9, %v13247_v8  ;;  %v14952_v2 = vld [vmem:[#allocation5 + $0x1994] sm:$0xf0] }
  0x9e   :  { %7385 = vmatpush.bf16.msrb.mxu2 %v12192_v15  ;;  %v14922_v15 = vld [vmem:[#allocation5 + $0x18a4] sm:$0xf0]  ;;  %v15048_v8 = vld [vmem:[#allocation5 + $0x1c94] sm:$0xf0]  ;;  %v13511_v9 = vld [vmem:[#allocation5 + $0x1f50] sm:$0xf] }
  0x9f   :  { %7399 = vmatpush.bf16.msrb.mxu3 %v12384_v20  ;;  %7358 = vmatmul.bf16.vlgmr.msrb.gmra.mxu0 %v15594_v32  ;;  %v13031_v20 = vld [vmem:[#allocation5 + $0x1b90] sm:$0xf]  ;;  %v12648_v24 = vor.u32 %v14922_v15, %v12647_v14  ;;  %v15186_v14 = vld [vmem:[#allocation5 + $0x20e4] sm:$0xf0] }
  0xa0   :  { %7406 = vmatpush.bf16.msra.mxu0 %v12744_v21  ;;  %7372 = vmatmul.bf16.vlgmr.msrb.gmra.mxu1 %v15598_v41  ;;  %v15018_v21 = vld [vmem:[#allocation5 + $0x1ba4] sm:$0xf0]  ;;  %v13895_v15 = vld [vmem:[#allocation5 + $0x2250] sm:$0xf] }
  0xa1   :  { %7420 = vmatpush.bf16.msra.mxu1 %v12936_v25  ;;  %7386 = vmatmul.bf16.vlgmr.msrb.gmra.mxu2 %v15596_v38  ;;  %v12840_v25 = vor.u32 %v14970_v19, %v12839_v16  ;;  %v15234_v16 = vld [vmem:[#allocation5 + $0x2264] sm:$0xf0] }
  0xa2   :  { %7434 = vmatpush.bf16.msra.mxu2 %v13128_v26  ;;  %7400 = vmatmul.bf16.vlgmr.msrb.gmra.mxu3 %v15600_v46  ;;  %v13032_v26 = vor.u32 %v15018_v21, %v13031_v20  ;;  %v15282_v20 = vld [vmem:[#allocation5 + $0x23e4] sm:$0xf0]  ;;  %v9471_v21 = vld [vmem:[#allocation2 + $0x40] sm:$0xf]  ;;  %v13896_v42 = vor.u32 %v15234_v16, %v13895_v15 }
  0xa3   :  { %7448 = vmatpush.bf16.msra.mxu3 %v13320_v30  ;;  %v13224_v30 = vor.u32 %v15066_v23, %v13223_v22  ;;  %v14129_v22 = vld [vmem:[#allocation2 + $0x9c] sm:$0xf0]  ;;  %v12768_v23 = vor.u32 %v14952_v2, %v12767_v0  ;;  %v15126_v2 = vld [vmem:[#allocation5 + $0x1f04] sm:$0xf0] }
  0xa4   :  { %7407 = vmatpush.bf16.msra.mxu0 %v12720_v48  ;;  %v12624_v48 = vor.u32 %v14916_v28, %v12623_v27  ;;  %v14117_v27 = vld [vmem:[#allocation2 + $0x44] sm:$0xf]  ;;  %v13152_v28 = vor.u32 %v15048_v8, %v13151_v7  ;;  %v13847_v7 = vld [vmem:[#allocation5 + $0x21f0] sm:$0xf]  ;;  %v15222_v8 = vld [vmem:[#allocation5 + $0x2204] sm:$0xf0] }
  0xa5   :  { %7421 = vmatpush.bf16.msra.mxu1 %v12912_v49  ;;  %v12599_v49 = vld [vmem:[#allocation5 + $0x1830] sm:$0xf]  ;;  %v13848_v15 = vor.u32 %v15222_v8, %v13847_v7  ;;  %v13439_v16 = vld [vmem:[#allocation5 + $0x1ec0] sm:$0xf] }
  0xa6   :  { %7435 = vmatpush.bf16.msra.mxu2 %v13104_v50  ;;  %v12816_v50 = vor.u32 %v14964_v33, %v12815_v29  ;;  %v14118_v33 = vld [vmem:[#allocation2 + $0x4c] sm:$0xf]  ;;  %v13967_v8 = vld [vmem:[#allocation5 + $0x22e0] sm:$0xf] }
  0xa7   :  { %7449 = vmatpush.bf16.msra.mxu3 %v13296_v54  ;;  %v14958_v54 = vld [vmem:[#allocation5 + $0x19c4] sm:$0xf0] }
  0xa8   :  { %7408 = vmatpush.bf16.msra.mxu0 %v12696_v61  ;;  %v12575_v61 = vld [vmem:[#allocation5 + $0x1800] sm:$0xf]  ;;  %v12792_v5 = vor.u32 %v14958_v54, %v12791_v53  ;;  %v15228_v54 = vld [vmem:[#allocation5 + $0x2234] sm:$0xf0] }
  0xa9   :  { %7422 = vmatpush.bf16.msra.mxu1 %v12888_v62  ;;  %v14904_v62 = vld [vmem:[#allocation5 + $0x1814] sm:$0xf0]  ;;  %v13871_v53 = vld [vmem:[#allocation5 + $0x2220] sm:$0xf] }
  0xaa   :  { %7436 = vmatpush.bf16.msra.mxu2 %v13080_v63  ;;  %v12600_v63 = vor.u32 %v14910_v52, %v12599_v49  ;;  %v12576_v19 = vor.u32 %v14904_v62, %v12575_v61  ;;  %v13679_v49 = vld [vmem:[#allocation5 + $0x20a0] sm:$0xf]  ;;  %v15180_v52 = vld [vmem:[#allocation5 + $0x20b4] sm:$0xf0]  ;;  %v13463_v62 = vld [vmem:[#allocation5 + $0x1ef0] sm:$0xf]  ;;  %v13872_v0 = vor.u32 %v15228_v54, %v13871_v53 }
  0xab   :  { %7450 = vmatpush.bf16.msra.mxu3 %v13272_v4  ;;  %v15000_v4 = vld [vmem:[#allocation5 + $0x1b14] sm:$0xf0] }
  0xac   :  { %7409 = vmatpush.bf16.msra.mxu0 %v12672_v11  ;;  %v13176_v11 = vor.u32 %v15054_v60, %v13175_v59  ;;  %v15276_v59 = vld [vmem:[#allocation5 + $0x23b4] sm:$0xf0]  ;;  %v15612_v60 = vor.u32 %v14118_v33, %v9481_v34  ;;  %v13415_v33 = vld [vmem:[#allocation5 + $0x1e90] sm:$0xf]  ;;  %v15114_v34 = vld [vmem:[#allocation5 + $0x1ea4] sm:$0xf0] }
  0xad   :  { %7423 = vmatpush.bf16.msra.mxu1 %v12864_v12  ;;  %v15138_v12 = vld [vmem:[#allocation5 + $0x1f64] sm:$0xf0]  ;;  %v13416_v54 = vor.u32 %v15114_v34, %v13415_v33  ;;  %v13535_v33 = vld [vmem:[#allocation5 + $0x1f80] sm:$0xf]  ;;  %v15144_v34 = vld [vmem:[#allocation5 + $0x1f94] sm:$0xf0] }
  0xae   :  { %7437 = vmatpush.bf16.msra.mxu2 %v13056_v13  ;;  %v13703_v13 = vld [vmem:[#allocation5 + $0x20d0] sm:$0xf]  ;;  %v13512_v29 = vor.u32 %v15138_v12, %v13511_v9  ;;  %v13464_v12 = vor.u32 %v15126_v2, %v13463_v62  ;;  %v13391_v62 = vld [vmem:[#allocation5 + $0x1e60] sm:$0xf] }
  0xaf   :  { %7451 = vmatpush.bf16.msra.mxu3 %v13248_v18  ;;  %v14087_v18 = vld [vmem:[#allocation5 + $0x23d0] sm:$0xf]  ;;  %v13704_v37 = vor.u32 %v15186_v14, %v13703_v13 }
  0xb0   :  { %7410 = vmatpush.bf16.msra.mxu0 %v12648_v24  ;;  %v12960_v24 = vor.u32 %v15000_v4, %v12959_v3  ;;  %v13655_v3 = vld [vmem:[#allocation5 + $0x2070] sm:$0xf]  ;;  %v15614_v4 = vld [vmem:[#allocation7] sm:$0x3f] }
  0xb1   :  { %7424 = vmatpush.bf16.msra.mxu1 %v12840_v25  ;;  %v9479_v25 = vld [vmem:[#allocation2 + $0x48] sm:$0xf]  ;;  %v14039_v9 = vld [vmem:[#allocation5 + $0x2370] sm:$0xf]  ;;  %v16275_v13 = vperm.slane %v15614_v4, 0 }
  0xb2   :  { %7438 = vmatpush.bf16.msra.mxu2 %v13032_v26  ;;  %v14130_v26 = vld [vmem:[#allocation2 + $0xa4] sm:$0xf0] }
  0xb3   :  { %7452 = vmatpush.bf16.msra.mxu3 %v13224_v30  ;;  %v9473_v30 = vld [vmem:[#allocation2 + $0xa0] sm:$0xf0] }
  0xb4   :  { %7411 = vmatpush.bf16.msra.mxu0 %v12624_v48  ;;  %v15132_v48 = vld [vmem:[#allocation5 + $0x1f34] sm:$0xf0]  ;;  %v15610_v56 = vor.u32 %v14117_v27, %v9473_v30 }
  0xb5   :  { %7425 = vmatpush.bf16.msra.mxu1 %v12816_v50  ;;  %v14088_v50 = vor.u32 %v15282_v20, %v14087_v18  ;;  %v13488_v61 = vor.u32 %v15132_v48, %v13487_v45  ;;  %v15120_v18 = vld [vmem:[#allocation5 + $0x1ed4] sm:$0xf0]  ;;  %v15162_v45 = vld [vmem:[#allocation5 + $0x2024] sm:$0xf0]  ;;  %v13799_v48 = vld [vmem:[#allocation5 + $0x2190] sm:$0xf] }
  0xb6   :  { %7439 = vmatpush.bf16.msra.mxu2 %v13008_v51  ;;  %v15606_v51 = vor.u32 %v14129_v22, %v9471_v21  ;;  %v15168_v21 = vld [vmem:[#allocation5 + $0x2054] sm:$0xf0]  ;;  %v13823_v22 = vld [vmem:[#allocation5 + $0x21c0] sm:$0xf]  ;;  %v13440_v27 = vor.u32 %v15120_v18, %v13439_v16  ;;  %v15102_v18 = vld [vmem:[#allocation5 + $0x1e44] sm:$0xf0] }
  0xb7   :  { %7453 = vmatpush.bf16.msra.mxu3 %v13200_v55  ;;  %v15608_v55 = vor.u32 %v14130_v26, %v9479_v25  ;;  %v15264_v25 = vld [vmem:[#allocation5 + $0x2354] sm:$0xf0] }
  0xb8   :  { %7412 = vmatpush.bf16.msra.mxu0 %v12600_v63  ;;  %v13680_v63 = vor.u32 %v15180_v52, %v13679_v49  ;;  %v15210_v49 = vld [vmem:[#allocation5 + $0x21a4] sm:$0xf0] }
  0xb9   :  { %7426 = vmatpush.bf16.msra.mxu1 %v12792_v5  ;;  %v14064_v5 = vor.u32 %v15276_v59, %v14063_v57  ;;  %v15258_v52 = vld [vmem:[#allocation5 + $0x2324] sm:$0xf0] }
  0xba   :  { %7440 = vmatpush.bf16.msra.mxu2 %v12984_v6  ;;  %v15174_v6 = vld [vmem:[#allocation5 + $0x2084] sm:$0xf0] }
  0xbb   :  { %7454 = vmatpush.bf16.msra.mxu3 %v13176_v11  ;;  %v15270_v11 = vld [vmem:[#allocation5 + $0x2384] sm:$0xf0]  ;;  %v13656_v14 = vor.u32 %v15174_v6, %v13655_v3  ;;  %v15156_v3 = vld [vmem:[#allocation5 + $0x1ff4] sm:$0xf0] }
  0xbc   :  { %7413 = vmatpush.bf16.msra.mxu0 %v12576_v19  ;;  %v13631_v19 = vld [vmem:[#allocation5 + $0x2040] sm:$0xf]  ;;  %v14040_v20 = vor.u32 %v15270_v11, %v14039_v9  ;;  %v7191_v26 = vpop.f32.mrf.mxu0  ;;  %v15204_v6 = vld [vmem:[#allocation5 + $0x2174] sm:$0xf0] }
  0xbd   :  { %7427 = vmatpush.bf16.msra.mxu1 %v12768_v23  ;;  %v15216_v23 = vld [vmem:[#allocation5 + $0x21d4] sm:$0xf0]  ;;  %v7205_v53 = vpop.f32.mrf.mxu1 }
  0xbe   :  { %7441 = vmatpush.bf16.msra.mxu2 %v12960_v24  ;;  %v14015_v24 = vld [vmem:[#allocation5 + $0x2340] sm:$0xf]  ;;  %v13824_v30 = vor.u32 %v15216_v23, %v13823_v22  ;;  %v15252_v9 = vld [vmem:[#allocation5 + $0x22f4] sm:$0xf0]  ;;  %v13751_v22 = vld [vmem:[#allocation5 + $0x2130] sm:$0xf] }
  0xbf   :  { %7455 = vmatpush.bf16.msra.mxu3 %v13152_v28  ;;  %7414 = vmatmul.bf16.vlgmr.msra.gmra.mxu0 %v15606_v51  ;;  %v7192_v28 = vadd.f32 %v7191_v26, %v16275_v13  ;;  %v15198_v23 = vld [vmem:[#allocation5 + $0x2144] sm:$0xf0]  ;;  %v14601_v13 = vld [vmem:[#allocation5 + $0xea4] sm:$0xf] }
  0xc0   :  { %7462 = vmatpush.bf16.msrb.mxu0 %v13512_v29  ;;  %7428 = vmatmul.bf16.vlgmr.msra.gmra.mxu1 %v15610_v56  ;;  %v13632_v29 = vor.u32 %v15168_v21, %v13631_v19  ;;  %v13559_v19 = vld [vmem:[#allocation5 + $0x1fb0] sm:$0xf]  ;;  %v13968_v21 = vor.u32 %v15252_v9, %v13967_v8  ;;  %v15246_v26 = vld [vmem:[#allocation5 + $0x22c4] sm:$0xf0]  ;;  %v9495_v8 = vld [vmem:[#allocation2 + $0x58] sm:$0xf] }
  0xc1   :  { %7476 = vmatpush.bf16.msrb.mxu1 %v13704_v37  ;;  %7442 = vmatmul.bf16.vlgmr.msra.gmra.mxu2 %v15608_v55  ;;  %v13607_v37 = vld [vmem:[#allocation5 + $0x2010] sm:$0xf]  ;;  %v7206_v57 = vadd.f32 %v7205_v53, %v7192_v28  ;;  %v15096_v28 = vld [vmem:[#allocation5 + $0x1e14] sm:$0xf0] }
  0xc2   :  { %7490 = vmatpush.bf16.msrb.mxu2 %v13896_v42  ;;  %7456 = vmatmul.bf16.vlgmr.msra.gmra.mxu3 %v15612_v60  ;;  %v14016_v42 = vor.u32 %v15264_v25, %v14015_v24  ;;  %v13608_v59 = vor.u32 %v15162_v45, %v13607_v37  ;;  %v13943_v24 = vld [vmem:[#allocation5 + $0x22b0] sm:$0xf]  ;;  %v13727_v37 = vld [vmem:[#allocation5 + $0x2100] sm:$0xf]  ;;  %v14132_v9 = vld [vmem:[#allocation2 + $0xb4] sm:$0xf0] }
  0xc3   :  { %7504 = vmatpush.bf16.msrb.mxu3 %v14088_v50  ;;  %v13991_v50 = vld [vmem:[#allocation5 + $0x2310] sm:$0xf]  ;;  %v13944_v53 = vor.u32 %v15246_v26, %v13943_v24  ;;  %v14217_v24 = vld [vmem:[#allocation5 + $0x2a4] sm:$0xf] }
  0xc4   :  { %7463 = vmatpush.bf16.msrb.mxu0 %v13488_v61  ;;  %v13800_v61 = vor.u32 %v15210_v49, %v13799_v48  ;;  %v13992_v2 = vor.u32 %v15258_v52, %v13991_v50  ;;  %v7219_v7 = vpop.f32.mrf.mxu2  ;;  %v13752_v48 = vor.u32 %v15198_v23, %v13751_v22  ;;  %v13919_v49 = vld [vmem:[#allocation5 + $0x2280] sm:$0xf]  ;;  %v15240_v50 = vld [vmem:[#allocation5 + $0x2294] sm:$0xf0]  ;;  %v14175_v52 = vld [vmem:[#allocation5 + $0x154] sm:$0xf] }
  0xc5   :  { %7477 = vmatpush.bf16.msrb.mxu1 %v13680_v63  ;;  %v15108_v63 = vld [vmem:[#allocation5 + $0x1e74] sm:$0xf0]  ;;  %v7220_v11 = vadd.f32 %v7219_v7, %v7206_v57  ;;  %v7233_v25 = vpop.f32.mrf.mxu3  ;;  %v14223_v57 = vld [vmem:[#allocation5 + $0x2d4] sm:$0xf]  ;;  %v14169_v22 = vld [vmem:[#allocation5 + $0x124] sm:$0xf] }
  0xc6   :  { %7491 = vmatpush.bf16.msrb.mxu2 %v13872_v0  ;;  %v13583_v0 = vld [vmem:[#allocation5 + $0x1fe0] sm:$0xf]  ;;  %v9649_v23 = vld [vmem:[#allocation5 + $0x138] sm:$0xf0] }
  0xc7   :  { %7505 = vmatpush.bf16.msrb.mxu3 %v14064_v5  ;;  %v13775_v5 = vld [vmem:[#allocation5 + $0x2160] sm:$0xf] }
  0xc8   :  { %7464 = vmatpush.bf16.msrb.mxu0 %v13464_v12  ;;  %v13392_v12 = vor.u32 %v15108_v63, %v13391_v62  ;;  %v13776_v16 = vor.u32 %v15204_v6, %v13775_v5  ;;  %v10057_v62 = vld [vmem:[#allocation5 + $0x468] sm:$0xf0]  ;;  %v14319_v63 = vld [vmem:[#allocation5 + $0x5d4] sm:$0xf]  ;;  %v14131_v5 = vld [vmem:[#allocation2 + $0xac] sm:$0xf0]  ;;  %v13536_v6 = vor.u32 %v15144_v34, %v13535_v33  ;;  %v15629_v33 = vor.u32 %v14132_v9, %v9495_v8 }
  0xc9   :  { %7478 = vmatpush.bf16.msrb.mxu1 %v13656_v14  ;;  %v13367_v14 = vld [vmem:[#allocation5 + $0x1e30] sm:$0xf]  ;;  %v14157_v8 = vld [vmem:[#allocation5 + $0xc4] sm:$0xf]  ;;  %v9601_v9 = vld [vmem:[#allocation5 + $0xd8] sm:$0xf0] }
  0xca   :  { %7492 = vmatpush.bf16.msrb.mxu2 %v13848_v15  ;;  %v13584_v15 = vor.u32 %v15156_v3, %v13583_v0  ;;  %v9487_v3 = vld [vmem:[#allocation2 + $0x50] sm:$0xf] }
  0xcb   :  { %7506 = vmatpush.bf16.msrb.mxu3 %v14040_v20  ;;  %v15150_v20 = vld [vmem:[#allocation5 + $0x1fc4] sm:$0xf0]  ;;  %v15627_v26 = vor.u32 %v14131_v5, %v9487_v3 }
  0xcc   :  { %7465 = vmatpush.bf16.msrb.mxu0 %v13440_v27  ;;  %v13343_v27 = vld [vmem:[#allocation5 + $0x1e00] sm:$0xf]  ;;  %v13560_v45 = vor.u32 %v15150_v20, %v13559_v19  ;;  %v15641_v5 = vpop.f32.mrf.mxu2 }
  0xcd   :  { %7479 = vmatpush.bf16.msrb.mxu1 %v13632_v29  ;;  %v15623_v29 = vadd.f32 %v7233_v25, %v7220_v11  ;;  %v13344_v0 = vor.u32 %v15096_v28, %v13343_v27  ;;  %v14119_v11 = vld [vmem:[#allocation2 + $0x54] sm:$0xf]  ;;  %v9841_v27 = vld [vmem:[#allocation5 + $0x2b8] sm:$0xf0]  ;;  %v14265_v28 = vld [vmem:[#allocation5 + $0x424] sm:$0xf] }
  0xce   :  { %7493 = vmatpush.bf16.msrb.mxu2 %v13824_v30  ;;  %v13368_v30 = vor.u32 %v15102_v18, %v13367_v14  ;;  %v9497_v18 = vld [vmem:[#allocation2 + $0xb8] sm:$0xf0]  ;;  %16281 = vst [vmem:[#allocation20_spill] sm:$0xff] %v15641_v5 }
  0xcf   :  { %7507 = vmatpush.bf16.msrb.mxu3 %v14016_v42  ;;  %v15192_v42 = vld [vmem:[#allocation5 + $0x2114] sm:$0xf0] }
  0xd0   :  { %7466 = vmatpush.bf16.msrb.mxu0 %v13416_v54  ;;  %v9673_v54 = vld [vmem:[#allocation5 + $0x168] sm:$0xf0]  ;;  %v13728_v7 = vor.u32 %v15192_v42, %v13727_v37  ;;  %v14313_v37 = vld [vmem:[#allocation5 + $0x5a4] sm:$0xf]  ;;  %v10225_v42 = vld [vmem:[#allocation5 + $0x5b8] sm:$0xf0] }
  0xd1   :  { %7480 = vmatpush.bf16.msrb.mxu1 %v13608_v59  ;;  %v9865_v59 = vld [vmem:[#allocation5 + $0x2e8] sm:$0xf0]  ;;  %v9676_v14 = vor.u32 %v14175_v52, %v9673_v54 }
  0xd2   :  { %7494 = vmatpush.bf16.msrb.mxu2 %v13800_v61  ;;  %v14271_v61 = vld [vmem:[#allocation5 + $0x454] sm:$0xf]  ;;  %v9868_v19 = vor.u32 %v14223_v57, %v9865_v59  ;;  %v9625_v54 = vld [vmem:[#allocation5 + $0x108] sm:$0xf0]  ;;  %v10228_v59 = vor.u32 %v14313_v37, %v10225_v42 }
  0xd3   :  { %7508 = vmatpush.bf16.msrb.mxu3 %v13992_v2  ;;  %v10249_v2 = vld [vmem:[#allocation5 + $0x5e8] sm:$0xf0]  ;;  %v10060_v20 = vor.u32 %v14271_v61, %v10057_v62  ;;  %v14211_v57 = vld [vmem:[#allocation5 + $0x274] sm:$0xf] }
  0xd4   :  { %7467 = vmatpush.bf16.msrb.mxu0 %v13392_v12  ;;  %v13920_v12 = vor.u32 %v15240_v50, %v13919_v49  ;;  %v10252_v25 = vor.u32 %v14319_v63, %v10249_v2  ;;  %v9652_v49 = vor.u32 %v14169_v22, %v9649_v23  ;;  %v9844_v50 = vor.u32 %v14217_v24, %v9841_v27  ;;  %v9817_v61 = vld [vmem:[#allocation5 + $0x288] sm:$0xf0]  ;;  %v14259_v62 = vld [vmem:[#allocation5 + $0x3f4] sm:$0xf]  ;;  %v10177_v22 = vld [vmem:[#allocation5 + $0x558] sm:$0xf0] }
  0xd5   :  { %7481 = vmatpush.bf16.msrb.mxu1 %v13584_v15  ;;  %v9489_v15 = vld [vmem:[#allocation2 + $0xb0] sm:$0xf0]  ;;  %v10009_v63 = vld [vmem:[#allocation5 + $0x408] sm:$0xf0]  ;;  %v9604_v24 = vor.u32 %v14157_v8, %v9601_v9  ;;  %v14241_v8 = vld [vmem:[#allocation5 + $0x364] sm:$0xf] }
  0xd6   :  { %7495 = vmatpush.bf16.msrb.mxu2 %v13776_v16  ;;  %v14120_v16 = vld [vmem:[#allocation2 + $0x5c] sm:$0xf]  ;;  %v15631_v34 = vor.u32 %v14119_v11, %v9489_v15  ;;  %v10201_v2 = vld [vmem:[#allocation5 + $0x588] sm:$0xf0]  ;;  %v14205_v11 = vld [vmem:[#allocation5 + $0x244] sm:$0xf] }
  0xd7   :  { %7509 = vmatpush.bf16.msrb.mxu3 %v13968_v21  ;;  %v15625_v21 = vpop.f32.mrf.mxu0  ;;  %v9793_v15 = vld [vmem:[#allocation5 + $0x258] sm:$0xf0]  ;;  %v9577_v37 = vld [vmem:[#allocation5 + $0xa8] sm:$0xf0]  ;;  %v14199_v42 = vld [vmem:[#allocation5 + $0x214] sm:$0xf] }
  0xd8   :  { %7468 = vmatpush.bf16.msrb.mxu0 %v13368_v30  ;;  %v10033_v30 = vld [vmem:[#allocation5 + $0x438] sm:$0xf0] }
  0xd9   :  { %7482 = vmatpush.bf16.msrb.mxu1 %v13560_v45  ;;  %v15633_v45 = vpop.f32.mrf.mxu1  ;;  %v10036_v52 = vor.u32 %v14265_v28, %v10033_v30  ;;  %v14151_v30 = vld [vmem:[#allocation5 + $0x94] sm:$0xf]  ;;  %v9937_v9 = vld [vmem:[#allocation5 + $0x378] sm:$0xf0] }
  0xda   :  { %7496 = vmatpush.bf16.msrb.mxu2 %v13752_v48  ;;  %16280 = vst [vmem:[#allocation19_spill] sm:$0xff] %v15633_v45  ;;  %v15635_v48 = vor.u32 %v14120_v16, %v9497_v18  ;;  %v14253_v16 = vld [vmem:[#allocation5 + $0x3c4] sm:$0xf]  ;;  %v9985_v18 = vld [vmem:[#allocation5 + $0x3d8] sm:$0xf0] }
  0xdb   :  { %7510 = vmatpush.bf16.msrb.mxu3 %v13944_v53  ;;  %v14163_v53 = vld [vmem:[#allocation5 + $0xf4] sm:$0xf]  ;;  %v9988_v27 = vor.u32 %v14253_v16, %v9985_v18 }
  0xdc   :  { %7469 = vmatpush.bf16.msrb.mxu0 %v13344_v0  ;;  %v14307_v0 = vld [vmem:[#allocation5 + $0x574] sm:$0xf]  ;;  %v9628_v3 = vor.u32 %v14163_v53, %v9625_v54  ;;  %v9961_v54 = vld [vmem:[#allocation5 + $0x3a8] sm:$0xf0] }
  0xdd   :  { %7483 = vmatpush.bf16.msrb.mxu1 %v13536_v6  ;;  %v9820_v6 = vor.u32 %v14211_v57, %v9817_v61  ;;  %v14247_v53 = vld [vmem:[#allocation5 + $0x394] sm:$0xf]  ;;  %v9580_v61 = vor.u32 %v14151_v30, %v9577_v37  ;;  %v9913_v37 = vld [vmem:[#allocation5 + $0x348] sm:$0xf0] }
  0xde   :  { %7497 = vmatpush.bf16.msrb.mxu2 %v13728_v7  ;;  %v10012_v7 = vor.u32 %v14259_v62, %v10009_v63  ;;  %v14295_v57 = vld [vmem:[#allocation5 + $0x514] sm:$0xf]  ;;  %v9964_v62 = vor.u32 %v14247_v53, %v9961_v54  ;;  %v14145_v63 = vld [vmem:[#allocation5 + $0x64] sm:$0xf]  ;;  %v9505_v53 = vld [vmem:[#allocation5 + $0x18] sm:$0xf0] }
  0xdf   :  { %7511 = vmatpush.bf16.msrb.mxu3 %v13920_v12  ;;  %7470 = vmatmul.bf16.vlgmr.msrb.gmra.mxu0 %v15627_v26  ;;  %v10204_v12 = vor.u32 %v14307_v0, %v10201_v2  ;;  %v9553_v0 = vld [vmem:[#allocation5 + $0x78] sm:$0xf0]  ;;  %v14193_v2 = vld [vmem:[#allocation5 + $0x1e4] sm:$0xf]  ;;  %v14235_v30 = vld [vmem:[#allocation5 + $0x334] sm:$0xf] }
  0xe0   :  { %7518 = vmatpush.bf16.msra.mxu0 %v9676_v14  ;;  %7484 = vmatmul.bf16.vlgmr.msrb.gmra.mxu1 %v15631_v34  ;;  %v15643_v14 = vpop.f32.mrf.mxu3  ;;  %v9556_v18 = vor.u32 %v14145_v63, %v9553_v0  ;;  %v9889_v63 = vld [vmem:[#allocation5 + $0x318] sm:$0xf0]  ;;  %v14277_v0 = vld [vmem:[#allocation5 + $0x484] sm:$0xf] }
  0xe1   :  { %7532 = vmatpush.bf16.msra.mxu1 %v9868_v19  ;;  %7498 = vmatmul.bf16.vlgmr.msrb.gmra.mxu2 %v15629_v33  ;;  %16282 = vst [vmem:[#allocation21_spill] sm:$0xff] %v15643_v14  ;;  %v7247_v19 = vpop.f32.mrf.mxu0  ;;  %v7261_v28 = vpop.f32.mrf.mxu1  ;;  %v10615_v14 = vld [vmem:[#allocation5 + $0x8a8] sm:$0xf] }
  0xe2   :  { %7546 = vmatpush.bf16.msra.mxu2 %v10060_v20  ;;  %7512 = vmatmul.bf16.vlgmr.msrb.gmra.mxu3 %v15635_v48  ;;  %v14301_v20 = vld [vmem:[#allocation5 + $0x544] sm:$0xf]  ;;  %v7248_v23 = vadd.f32 %v7247_v19, %v15623_v29 }
  0xe3   :  { %7560 = vmatpush.bf16.msra.mxu3 %v10252_v25  ;;  %v9796_v25 = vor.u32 %v14205_v11, %v9793_v15  ;;  %v10129_v15 = vld [vmem:[#allocation5 + $0x4f8] sm:$0xf0] }
  0xe4   :  { %7519 = vmatpush.bf16.msra.mxu0 %v9652_v49  ;;  %v10180_v49 = vor.u32 %v14301_v20, %v10177_v22  ;;  %v9940_v22 = vor.u32 %v14241_v8, %v9937_v9  ;;  %v10633_v9 = vld [vmem:[#allocation5 + $0x8e8] sm:$0xf0] }
  0xe5   :  { %7533 = vmatpush.bf16.msra.mxu1 %v9844_v50  ;;  %v7262_v50 = vadd.f32 %v7261_v28, %v7248_v23  ;;  %v14139_v23 = vld [vmem:[#allocation5 + $0x34] sm:$0xf]  ;;  %v9721_v28 = vld [vmem:[#allocation5 + $0x1c8] sm:$0xf0] }
  0xe6   :  { %7547 = vmatpush.bf16.msra.mxu2 %v10036_v52  ;;  %v9769_v52 = vld [vmem:[#allocation5 + $0x228] sm:$0xf0] }
  0xe7   :  { %7561 = vmatpush.bf16.msra.mxu3 %v10228_v59  ;;  %v10153_v59 = vld [vmem:[#allocation5 + $0x528] sm:$0xf0]  ;;  %v9772_v29 = vor.u32 %v14199_v42, %v9769_v52  ;;  %v14283_v42 = vld [vmem:[#allocation5 + $0x4b4] sm:$0xf]  ;;  %v14133_v52 = vld [vmem:[#allocation5 + $0x4] sm:$0xf] }
  0xe8   :  { %7520 = vmatpush.bf16.msra.mxu0 %v9628_v3  ;;  %v10156_v3 = vor.u32 %v14295_v57, %v10153_v59  ;;  %v7289_v16 = vpop.f32.mrf.mxu3  ;;  %v9916_v57 = vor.u32 %v14235_v30, %v9913_v37  ;;  %v14181_v59 = vld [vmem:[#allocation5 + $0x184] sm:$0xf]  ;;  %v9508_v8 = vor.u32 %v14133_v52, %v9505_v53 }
  0xe9   :  { %7534 = vmatpush.bf16.msra.mxu1 %v9820_v6  ;;  %v7275_v6 = vpop.f32.mrf.mxu2  ;;  %v14409_v30 = vld [vmem:[#allocation5 + $0x8a4] sm:$0xf]  ;;  %v15648_v52 = vpop.f32.mrf.mxu0 }
  0xea   :  { %7548 = vmatpush.bf16.msra.mxu2 %v10012_v7  ;;  %v9745_v7 = vld [vmem:[#allocation5 + $0x1f8] sm:$0xf0]  ;;  %v7276_v11 = vadd.f32 %v7275_v6, %v7262_v50  ;;  %v10441_v6 = vld [vmem:[#allocation5 + $0x768] sm:$0xf0]  ;;  %16283 = vst [vmem:[#allocation22_spill] sm:$0xff] %v15648_v52 }
  0xeb   :  { %7562 = vmatpush.bf16.msra.mxu3 %v10204_v12  ;;  %v14289_v12 = vld [vmem:[#allocation5 + $0x4e4] sm:$0xf]  ;;  %v9748_v20 = vor.u32 %v14193_v2, %v9745_v7  ;;  %v10081_v2 = vld [vmem:[#allocation5 + $0x498] sm:$0xf0]  ;;  %v14415_v7 = vld [vmem:[#allocation5 + $0x8d4] sm:$0xf] }
  0xec   :  { %7521 = vmatpush.bf16.msra.mxu0 %v9604_v24  ;;  %v15646_v19 = vadd.f32 %v7289_v16, %v7276_v11  ;;  %v9529_v24 = vld [vmem:[#allocation5 + $0x48] sm:$0xf0]  ;;  %v14463_v11 = vld [vmem:[#allocation5 + $0xa54] sm:$0xf]  ;;  %v14505_v53 = vld [vmem:[#allocation5 + $0xba4] sm:$0xf] }
  0xed   :  { %7535 = vmatpush.bf16.msra.mxu1 %v9796_v25  ;;  %v14187_v25 = vld [vmem:[#allocation5 + $0x1b4] sm:$0xf]  ;;  %v9532_v50 = vor.u32 %v14139_v23, %v9529_v24  ;;  %v10636_v24 = vor.u32 %v14415_v7, %v10633_v9  ;;  %v10777_v7 = vld [vmem:[#allocation5 + $0xa08] sm:$0xf0]  ;;  %v14365_v52 = vld [vmem:[#allocation5 + $0x73c] sm:$0xf0] }
  0xee   :  { %7549 = vmatpush.bf16.msra.mxu2 %v9988_v27  ;;  %v10132_v27 = vor.u32 %v14289_v12, %v10129_v15  ;;  %v9724_v54 = vor.u32 %v14187_v25, %v9721_v28  ;;  %v10825_v12 = vld [vmem:[#allocation5 + $0xa68] sm:$0xf0]  ;;  %v10417_v28 = vld [vmem:[#allocation5 + $0x738] sm:$0xf0] }
  0xef   :  { %7563 = vmatpush.bf16.msra.mxu3 %v10180_v49  ;;  %v10105_v49 = vld [vmem:[#allocation5 + $0x4c8] sm:$0xf0]  ;;  %v10828_v25 = vor.u32 %v14463_v11, %v10825_v12 }
  0xf0   :  { %7522 = vmatpush.bf16.msra.mxu0 %v9580_v61  ;;  %v9697_v61 = vld [vmem:[#allocation5 + $0x198] sm:$0xf0]  ;;  %v10969_v9 = vld [vmem:[#allocation5 + $0xb88] sm:$0xf0] }
  0xf1   :  { %7536 = vmatpush.bf16.msra.mxu1 %v9772_v29  ;;  %v14229_v29 = vld [vmem:[#allocation5 + $0x304] sm:$0xf]  ;;  %v9700_v15 = vor.u32 %v14181_v59, %v9697_v61 }
  0xf2   :  { %7550 = vmatpush.bf16.msra.mxu2 %v9964_v62  ;;  %v10108_v62 = vor.u32 %v14283_v42, %v10105_v49  ;;  %v9892_v16 = vor.u32 %v14229_v29, %v9889_v63  ;;  %v10609_v42 = vld [vmem:[#allocation5 + $0x8b8] sm:$0xf0]  ;;  %v14457_v49 = vld [vmem:[#allocation5 + $0xa24] sm:$0xf]  ;;  %v10393_v63 = vld [vmem:[#allocation5 + $0x708] sm:$0xf0] }
  0xf3   :  { %7564 = vmatpush.bf16.msra.mxu3 %v10156_v3  ;;  %v14367_v3 = vld [vmem:[#allocation5 + $0x754] sm:$0xf]  ;;  %v10612_v61 = vor.u32 %v14409_v30, %v10609_v42  ;;  %v10945_v42 = vld [vmem:[#allocation5 + $0xb58] sm:$0xf0] }
  0xf4   :  { %7523 = vmatpush.bf16.msra.mxu0 %v9556_v18  ;;  %v14511_v18 = vld [vmem:[#allocation5 + $0xbd4] sm:$0xf]  ;;  %v10444_v23 = vor.u32 %v14367_v3, %v10441_v6  ;;  %v10585_v3 = vld [vmem:[#allocation5 + $0x888] sm:$0xf0] }
  0xf5   :  { %7537 = vmatpush.bf16.msra.mxu1 %v9748_v20  ;;  %v11017_v20 = vld [vmem:[#allocation5 + $0xbe8] sm:$0xf0]  ;;  %v14451_v6 = vld [vmem:[#allocation5 + $0x9f4] sm:$0xf] }
  0xf6   :  { %7551 = vmatpush.bf16.msra.mxu2 %v9940_v22  ;;  %v10084_v22 = vor.u32 %v14277_v0, %v10081_v2  ;;  %v11020_v37 = vor.u32 %v14511_v18, %v11017_v20  ;;  %v14403_v0 = vld [vmem:[#allocation5 + $0x874] sm:$0xf]  ;;  %v10369_v18 = vld [vmem:[#allocation5 + $0x6d8] sm:$0xf0]  ;;  %v14397_v20 = vld [vmem:[#allocation5 + $0x844] sm:$0xf] }
  0xf7   :  { %7565 = vmatpush.bf16.msra.mxu3 %v10132_v27  ;;  %v14361_v27 = vld [vmem:[#allocation5 + $0x724] sm:$0xf]  ;;  %v10588_v12 = vor.u32 %v14403_v0, %v10585_v3  ;;  %v14439_v3 = vld [vmem:[#allocation5 + $0x994] sm:$0xf] }
  0xf8   :  { %7524 = vmatpush.bf16.msra.mxu0 %v9532_v50  ;;  %v10801_v50 = vld [vmem:[#allocation5 + $0xa38] sm:$0xf0]  ;;  %v10420_v59 = vor.u32 %v14361_v27, %v10417_v28  ;;  %v15658_v28 = vpop.f32.mrf.mxu3 }
  0xf9   :  { %7538 = vmatpush.bf16.msra.mxu1 %v9724_v54  ;;  %v10993_v54 = vld [vmem:[#allocation5 + $0xbb8] sm:$0xf0]  ;;  %v10804_v29 = vor.u32 %v14457_v49, %v10801_v50  ;;  %16286 = vst [vmem:[#allocation25_spill] sm:$0xff] %v15658_v28 }
  0xfa   :  { %7552 = vmatpush.bf16.msra.mxu2 %v9916_v57  ;;  %v15650_v57 = vpop.f32.mrf.mxu1  ;;  %v10996_v2 = vor.u32 %v14505_v53, %v10993_v54  ;;  %v10753_v27 = vld [vmem:[#allocation5 + $0x9d8] sm:$0xf0] }
  0xfb   :  { %7566 = vmatpush.bf16.msra.mxu3 %v10108_v62  ;;  %16284 = vst [vmem:[#allocation23_spill] sm:$0xff] %v15650_v57  ;;  %v14355_v62 = vld [vmem:[#allocation5 + $0x6f4] sm:$0xf]  ;;  %v11569_v28 = vld [vmem:[#allocation5 + $0x1038] sm:$0xf0] }
  0xfc   :  { %7525 = vmatpush.bf16.msra.mxu0 %v9508_v8  ;;  %v14499_v8 = vld [vmem:[#allocation5 + $0xb74] sm:$0xf]  ;;  %v10396_v11 = vor.u32 %v14355_v62, %v10393_v63  ;;  %v7303_v30 = vpop.f32.mrf.mxu0  ;;  %v14299_v57 = vld [vmem:[#allocation5 + $0x52c] sm:$0xf0] }
  0xfd   :  { %7539 = vmatpush.bf16.msra.mxu1 %v9700_v15  ;;  %v10780_v15 = vor.u32 %v14451_v6, %v10777_v7  ;;  %v7304_v49 = vadd.f32 %v7303_v30, %v15646_v19  ;;  %v14391_v62 = vld [vmem:[#allocation5 + $0x814] sm:$0xf]  ;;  %v10729_v6 = vld [vmem:[#allocation5 + $0x9a8] sm:$0xf0] }
  0xfe   :  { %7553 = vmatpush.bf16.msra.mxu2 %v9892_v16  ;;  %v14349_v16 = vld [vmem:[#allocation5 + $0x6c4] sm:$0xf]  ;;  %v14487_v7 = vld [vmem:[#allocation5 + $0xb14] sm:$0xf] }
  0xff   :  { %7567 = vmatpush.bf16.msra.mxu3 %v10084_v22  ;;  %7526 = vmatmul.bf16.vlgmr.msra.gmra.mxu0 %v15558_v58  ;;  %v15656_v22 = vpop.f32.mrf.mxu2  ;;  %v10372_v50 = vor.u32 %v14349_v16, %v10369_v18  ;;  %v14385_v16 = vld [vmem:[#allocation5 + $0x7e4] sm:$0xf] }
 0x100   :  { %7574 = vmatpush.bf16.msrb.mxu0 %v10444_v23  ;;  %7540 = vmatmul.bf16.vlgmr.msra.gmra.mxu1 %v15564_v10  ;;  %16285 = vst [vmem:[#allocation24_spill] sm:$0xff] %v15656_v22  ;;  %v10972_v23 = vor.u32 %v14499_v8, %v10969_v9  ;;  %v10921_v8 = vld [vmem:[#allocation5 + $0xb28] sm:$0xf0] }
 0x101   :  { %7588 = vmatpush.bf16.msrb.mxu1 %v10636_v24  ;;  %7554 = vmatmul.bf16.vlgmr.msra.gmra.mxu2 %v15560_v1  ;;  %v10561_v24 = vld [vmem:[#allocation5 + $0x858] sm:$0xf0]  ;;  %v10924_v18 = vor.u32 %v14487_v7, %v10921_v8  ;;  %v14325_v8 = vld [vmem:[#allocation5 + $0x604] sm:$0xf] }
 0x102   :  { %7602 = vmatpush.bf16.msrb.mxu2 %v10828_v25  ;;  %7568 = vmatmul.bf16.vlgmr.msra.gmra.mxu3 %v15566_v17  ;;  %v14445_v25 = vld [vmem:[#allocation5 + $0x9c4] sm:$0xf]  ;;  %v7317_v53 = vpop.f32.mrf.mxu1  ;;  %v10564_v54 = vor.u32 %v14397_v20, %v10561_v24 }
 0x103   :  { %7616 = vmatpush.bf16.msrb.mxu3 %v11020_v37  ;;  %v14493_v37 = vld [vmem:[#allocation5 + $0xb44] sm:$0xf]  ;;  %v7318_v0 = vadd.f32 %v7317_v53, %v7304_v49 }
 0x104   :  { %7575 = vmatpush.bf16.msrb.mxu0 %v10420_v59  ;;  %v10756_v59 = vor.u32 %v14445_v25, %v10753_v27  ;;  %v10948_v63 = vor.u32 %v14493_v37, %v10945_v42  ;;  %v14433_v24 = vld [vmem:[#allocation5 + $0x964] sm:$0xf]  ;;  %v10705_v25 = vld [vmem:[#allocation5 + $0x978] sm:$0xf0]  ;;  %v15663_v22 = vpop.f32.mrf.mxu0 }
 0x105   :  { %7589 = vmatpush.bf16.msrb.mxu1 %v10612_v61  ;;  %v14343_v61 = vld [vmem:[#allocation5 + $0x694] sm:$0xf]  ;;  %v7345_v30 = vpop.f32.mrf.mxu3  ;;  %v14481_v37 = vld [vmem:[#allocation5 + $0xae4] sm:$0xf]  ;;  %v10897_v42 = vld [vmem:[#allocation5 + $0xaf8] sm:$0xf0] }
 0x106   :  { %7603 = vmatpush.bf16.msrb.mxu2 %v10804_v29  ;;  %v10345_v29 = vld [vmem:[#allocation5 + $0x6a8] sm:$0xf0]  ;;  %16287 = vst [vmem:[#allocation26_spill] sm:$0xff] %v15663_v22 }
 0x107   :  { %7617 = vmatpush.bf16.msrb.mxu3 %v10996_v2  ;;  %v10537_v2 = vld [vmem:[#allocation5 + $0x828] sm:$0xf0]  ;;  %v10348_v9 = vor.u32 %v14343_v61, %v10345_v29  ;;  %v7331_v20 = vpop.f32.mrf.mxu2  ;;  %v14379_v29 = vld [vmem:[#allocation5 + $0x7b4] sm:$0xf] }
 0x108   :  { %7576 = vmatpush.bf16.msrb.mxu0 %v10396_v11  ;;  %v10540_v19 = vor.u32 %v14391_v62, %v10537_v2  ;;  %v10732_v11 = vor.u32 %v14439_v3, %v10729_v6  ;;  %v7332_v27 = vadd.f32 %v7331_v20, %v7318_v0  ;;  %v10297_v61 = vld [vmem:[#allocation5 + $0x648] sm:$0xf0]  ;;  %v10900_v62 = vor.u32 %v14481_v37, %v10897_v42  ;;  %v14427_v2 = vld [vmem:[#allocation5 + $0x934] sm:$0xf] }
 0x109   :  { %7590 = vmatpush.bf16.msrb.mxu1 %v10588_v12  ;;  %v14337_v12 = vld [vmem:[#allocation5 + $0x664] sm:$0xf]  ;;  %v10681_v3 = vld [vmem:[#allocation5 + $0x948] sm:$0xf0]  ;;  %v14475_v0 = vld [vmem:[#allocation5 + $0xab4] sm:$0xf] }
 0x10a   :  { %7604 = vmatpush.bf16.msrb.mxu2 %v10780_v15  ;;  %v10321_v15 = vld [vmem:[#allocation5 + $0x678] sm:$0xf0]  ;;  %v10873_v6 = vld [vmem:[#allocation5 + $0xac8] sm:$0xf0] }
 0x10b   :  { %7618 = vmatpush.bf16.msrb.mxu3 %v10972_v23  ;;  %v10513_v23 = vld [vmem:[#allocation5 + $0x7f8] sm:$0xf0]  ;;  %v10324_v49 = vor.u32 %v14337_v12, %v10321_v15  ;;  %v14373_v12 = vld [vmem:[#allocation5 + $0x784] sm:$0xf]  ;;  %v10876_v20 = vor.u32 %v14475_v0, %v10873_v6  ;;  %v11401_v42 = vld [vmem:[#allocation5 + $0xee8] sm:$0xf0] }
 0x10c   :  { %7577 = vmatpush.bf16.msrb.mxu0 %v10372_v50  ;;  %v15661_v50 = vadd.f32 %v7345_v30, %v7332_v27  ;;  %v10516_v53 = vor.u32 %v14385_v16, %v10513_v23  ;;  %v10465_v15 = vld [vmem:[#allocation5 + $0x798] sm:$0xf0]  ;;  %v14421_v16 = vld [vmem:[#allocation5 + $0x904] sm:$0xf]  ;;  %v11209_v27 = vld [vmem:[#allocation5 + $0xd68] sm:$0xf0] }
 0x10d   :  { %7591 = vmatpush.bf16.msrb.mxu1 %v10564_v54  ;;  %v10708_v54 = vor.u32 %v14433_v24, %v10705_v25  ;;  %v14469_v23 = vld [vmem:[#allocation5 + $0xa84] sm:$0xf]  ;;  %v10849_v24 = vld [vmem:[#allocation5 + $0xa98] sm:$0xf0]  ;;  %v14559_v25 = vld [vmem:[#allocation5 + $0xd54] sm:$0xf] }
 0x10e   :  { %7605 = vmatpush.bf16.msrb.mxu2 %v10756_v59  ;;  %v14331_v59 = vld [vmem:[#allocation5 + $0x634] sm:$0xf]  ;;  %v14553_v0 = vld [vmem:[#allocation5 + $0xd24] sm:$0xf]  ;;  %v11185_v6 = vld [vmem:[#allocation5 + $0xd38] sm:$0xf0] }
 0x10f   :  { %7619 = vmatpush.bf16.msrb.mxu3 %v10948_v63  ;;  %v10489_v63 = vld [vmem:[#allocation5 + $0x7c8] sm:$0xf0]  ;;  %v10300_v7 = vor.u32 %v14331_v59, %v10297_v61  ;;  %v14607_v30 = vld [vmem:[#allocation5 + $0xed4] sm:$0xf] }
 0x110   :  { %7578 = vmatpush.bf16.msrb.mxu0 %v10348_v9  ;;  %v10273_v9 = vld [vmem:[#allocation5 + $0x618] sm:$0xf0]  ;;  %v11593_v59 = vld [vmem:[#allocation5 + $0x1068] sm:$0xf0]  ;;  %v14703_v61 = vld [vmem:[#allocation5 + $0x11d4] sm:$0xf] }
 0x111   :  { %7592 = vmatpush.bf16.msrb.mxu1 %v10540_v19  ;;  %v10492_v19 = vor.u32 %v14379_v29, %v10489_v63  ;;  %v10276_v37 = vor.u32 %v14325_v8, %v10273_v9  ;;  %v11785_v29 = vld [vmem:[#allocation5 + $0x11e8] sm:$0xf0]  ;;  %v11212_v63 = vor.u32 %v14559_v25, %v11209_v27  ;;  %v11377_v8 = vld [vmem:[#allocation5 + $0xeb8] sm:$0xf0]  ;;  %v14649_v9 = vld [vmem:[#allocation5 + $0x1024] sm:$0xf] }
 0x112   :  { %7606 = vmatpush.bf16.msrb.mxu2 %v10732_v11  ;;  %v10684_v11 = vor.u32 %v14427_v2, %v10681_v3  ;;  %v11404_v2 = vor.u32 %v14607_v30, %v11401_v42  ;;  %v11353_v27 = vld [vmem:[#allocation5 + $0xe88] sm:$0xf0]  ;;  %v14643_v30 = vld [vmem:[#allocation5 + $0xff4] sm:$0xf] }
 0x113   :  { %7620 = vmatpush.bf16.msrb.mxu3 %v10924_v18  ;;  %v10657_v18 = vld [vmem:[#allocation5 + $0x918] sm:$0xf0]  ;;  %v14691_v42 = vld [vmem:[#allocation5 + $0x1174] sm:$0xf] }
 0x114   :  { %7579 = vmatpush.bf16.msrb.mxu0 %v10324_v49  ;;  %v14655_v49 = vld [vmem:[#allocation5 + $0x1054] sm:$0xf] }
 0x115   :  { %7593 = vmatpush.bf16.msrb.mxu1 %v10516_v53  ;;  %v10468_v53 = vor.u32 %v14373_v12, %v10465_v15  ;;  %v11596_v3 = vor.u32 %v14655_v49, %v11593_v59  ;;  %v15665_v12 = vpop.f32.mrf.mxu1  ;;  %v11188_v15 = vor.u32 %v14553_v0, %v11185_v6  ;;  %v11737_v49 = vld [vmem:[#allocation5 + $0x1188] sm:$0xf0]  ;;  %v15673_v0 = vpop.f32.mrf.mxu3 }
 0x116   :  { %7607 = vmatpush.bf16.msrb.mxu2 %v10708_v54  ;;  %v10660_v54 = vor.u32 %v14421_v16, %v10657_v18  ;;  %16288 = vst [vmem:[#allocation27_spill] sm:$0xff] %v15665_v12  ;;  %v11380_v16 = vor.u32 %v14601_v13, %v11377_v8  ;;  %v14547_v18 = vld [vmem:[#allocation5 + $0xcf4] sm:$0xf]  ;;  %v11713_v8 = vld [vmem:[#allocation5 + $0x1158] sm:$0xf0] }
 0x117   :  { %7621 = vmatpush.bf16.msrb.mxu3 %v10900_v62  ;;  %v10852_v62 = vor.u32 %v14469_v23, %v10849_v24  ;;  %v11161_v23 = vld [vmem:[#allocation5 + $0xd08] sm:$0xf0]  ;;  %v14595_v24 = vld [vmem:[#allocation5 + $0xe74] sm:$0xf]  ;;  %16290 = vst [vmem:[#allocation29_spill] sm:$0xff] %v15673_v0 }
 0x118   :  { %7580 = vmatpush.bf16.msrb.mxu0 %v10300_v7  ;;  %v11788_v7 = vor.u32 %v14703_v61, %v11785_v29  ;;  %v11164_v13 = vor.u32 %v14547_v18, %v11161_v23  ;;  %v14589_v61 = vld [vmem:[#allocation5 + $0xe44] sm:$0xf]  ;;  %v15671_v29 = vpop.f32.mrf.mxu2  ;;  %v11113_v18 = vld [vmem:[#allocation5 + $0xca8] sm:$0xf0]  ;;  %v14583_v23 = vld [vmem:[#allocation5 + $0xe14] sm:$0xf] }
 0x119   :  { %7594 = vmatpush.bf16.msrb.mxu1 %v10492_v19  ;;  %v14697_v19 = vld [vmem:[#allocation5 + $0x11a4] sm:$0xf]  ;;  %16289 = vst [vmem:[#allocation28_spill] sm:$0xff] %v15671_v29  ;;  %v11953_v0 = vld [vmem:[#allocation5 + $0x1338] sm:$0xf0] }
 0x11a   :  { %7608 = vmatpush.bf16.msrb.mxu2 %v10684_v11  ;;  %v11761_v11 = vld [vmem:[#allocation5 + $0x11b8] sm:$0xf0]  ;;  %v14793_v29 = vld [vmem:[#allocation5 + $0x14a4] sm:$0xf] }
 0x11b   :  { %7622 = vmatpush.bf16.msrb.mxu3 %v10876_v20  ;;  %v11572_v20 = vor.u32 %v14649_v9, %v11569_v28  ;;  %v11764_v25 = vor.u32 %v14697_v19, %v11761_v11  ;;  %v11356_v28 = vor.u32 %v14595_v24, %v11353_v27  ;;  %v11305_v27 = vld [vmem:[#allocation5 + $0xe28] sm:$0xf0]  ;;  %v12337_v12 = vld [vmem:[#allocation5 + $0x1638] sm:$0xf0] }
 0x11c   :  { %7581 = vmatpush.bf16.msrb.mxu0 %v10276_v37  ;;  %v11545_v37 = vld [vmem:[#allocation5 + $0x1008] sm:$0xf0]  ;;  %v7359_v6 = vpop.f32.mrf.mxu0 }
 0x11d   :  { %7595 = vmatpush.bf16.msrb.mxu1 %v10468_v53  ;;  %v11548_v59 = vor.u32 %v14643_v30, %v11545_v37  ;;  %v14541_v53 = vld [vmem:[#allocation5 + $0xcc4] sm:$0xf]  ;;  %v7360_v9 = vadd.f32 %v7359_v6, %v15661_v50  ;;  %v7373_v11 = vpop.f32.mrf.mxu1  ;;  %v14631_v30 = vld [vmem:[#allocation5 + $0xf94] sm:$0xf]  ;;  %v11497_v37 = vld [vmem:[#allocation5 + $0xfa8] sm:$0xf0]  ;;  %v11308_v50 = vor.u32 %v14583_v23, %v11305_v27 }
 0x11e   :  { %7609 = vmatpush.bf16.msrb.mxu2 %v10660_v54  ;;  %v11137_v54 = vld [vmem:[#allocation5 + $0xcd8] sm:$0xf0]  ;;  %v14571_v23 = vld [vmem:[#allocation5 + $0xdb4] sm:$0xf]  ;;  %v11257_v27 = vld [vmem:[#allocation5 + $0xdc8] sm:$0xf0] }
 0x11f   :  { %7623 = vmatpush.bf16.msrb.mxu3 %v10852_v62  ;;  %7582 = vmatmul.bf16.vlgmr.msrb.gmra.mxu0 %v15570_v39  ;;  %v11740_v62 = vor.u32 %v14691_v42, %v11737_v49  ;;  %v11140_v19 = vor.u32 %v14541_v53, %v11137_v54  ;;  %v14679_v42 = vld [vmem:[#allocation5 + $0x1114] sm:$0xf]  ;;  %v11689_v49 = vld [vmem:[#allocation5 + $0x1128] sm:$0xf0]  ;;  %v11089_v53 = vld [vmem:[#allocation5 + $0xc78] sm:$0xf0] }
 0x120   :  { %7630 = vmatpush.bf16.msra.mxu0 %v11212_v63  ;;  %7596 = vmatmul.bf16.vlgmr.msrb.gmra.mxu1 %v15574_v44  ;;  %v11329_v63 = vld [vmem:[#allocation5 + $0xe58] sm:$0xf0]  ;;  %v14577_v54 = vld [vmem:[#allocation5 + $0xde4] sm:$0xf] }
 0x121   :  { %7644 = vmatpush.bf16.msra.mxu1 %v11404_v2  ;;  %7610 = vmatmul.bf16.vlgmr.msrb.gmra.mxu2 %v15572_v43  ;;  %v14637_v2 = vld [vmem:[#allocation5 + $0xfc4] sm:$0xf] }
 0x122   :  { %7658 = vmatpush.bf16.msra.mxu2 %v11596_v3  ;;  %7624 = vmatmul.bf16.vlgmr.msrb.gmra.mxu3 %v15576_v47  ;;  %v11521_v3 = vld [vmem:[#allocation5 + $0xfd8] sm:$0xf0] }
 0x123   :  { %7672 = vmatpush.bf16.msra.mxu3 %v11788_v7  ;;  %v14685_v7 = vld [vmem:[#allocation5 + $0x1144] sm:$0xf] }
 0x124   :  { %7631 = vmatpush.bf16.msra.mxu0 %v11188_v15  ;;  %v11332_v15 = vor.u32 %v14589_v61, %v11329_v63  ;;  %v11716_v24 = vor.u32 %v14685_v7, %v11713_v8  ;;  %v11692_v61 = vor.u32 %v14679_v42, %v11689_v49  ;;  %v7387_v63 = vpop.f32.mrf.mxu2  ;;  %v14673_v8 = vld [vmem:[#allocation5 + $0x10e4] sm:$0xf]  ;;  %v11641_v42 = vld [vmem:[#allocation5 + $0x10c8] sm:$0xf0]  ;;  %v15678_v22 = vpop.f32.mrf.mxu0 }
 0x125   :  { %7645 = vmatpush.bf16.msra.mxu1 %v11380_v16  ;;  %v11524_v16 = vor.u32 %v14637_v2, %v11521_v3  ;;  %v14625_v2 = vld [vmem:[#allocation5 + $0xf64] sm:$0xf]  ;;  %v11473_v3 = vld [vmem:[#allocation5 + $0xf78] sm:$0xf0]  ;;  %v7401_v7 = vpop.f32.mrf.mxu3  ;;  %16291 = vst [vmem:[#allocation30_spill] sm:$0xff] %v15678_v22 }
 0x126   :  { %7659 = vmatpush.bf16.msra.mxu2 %v11572_v20  ;;  %v14535_v20 = vld [vmem:[#allocation5 + $0xc94] sm:$0xf] }
 0x127   :  { %7673 = vmatpush.bf16.msra.mxu3 %v11764_v25  ;;  %v7374_v25 = vadd.f32 %v7373_v11, %v7360_v9  ;;  %v11665_v9 = vld [vmem:[#allocation5 + $0x10f8] sm:$0xf0] }
 0x128   :  { %7632 = vmatpush.bf16.msra.mxu0 %v11164_v13  ;;  %v11116_v13 = vor.u32 %v14535_v20, %v11113_v18  ;;  %v14523_v20 = vld [vmem:[#allocation5 + $0xc34] sm:$0xf]  ;;  %v11065_v18 = vld [vmem:[#allocation5 + $0xc48] sm:$0xf0] }
 0x129   :  { %7646 = vmatpush.bf16.msra.mxu1 %v11356_v28  ;;  %v11500_v28 = vor.u32 %v14631_v30, %v11497_v37  ;;  %v7388_v6 = vadd.f32 %v7387_v63, %v7374_v25  ;;  %v14619_v30 = vld [vmem:[#allocation5 + $0xf34] sm:$0xf]  ;;  %v11449_v37 = vld [vmem:[#allocation5 + $0xf48] sm:$0xf0]  ;;  %v11068_v49 = vor.u32 %v14523_v20, %v11065_v18  ;;  %v14613_v63 = vld [vmem:[#allocation5 + $0xf04] sm:$0xf] }
 0x12a   :  { %7660 = vmatpush.bf16.msra.mxu2 %v11548_v59  ;;  %v14529_v59 = vld [vmem:[#allocation5 + $0xc64] sm:$0xf]  ;;  %v14667_v25 = vld [vmem:[#allocation5 + $0x10b4] sm:$0xf]  ;;  %v12361_v18 = vld [vmem:[#allocation5 + $0x1668] sm:$0xf0] }
 0x12b   :  { %7674 = vmatpush.bf16.msra.mxu3 %v11740_v62  ;;  %v11281_v62 = vld [vmem:[#allocation5 + $0xdf8] sm:$0xf0]  ;;  %v15676_v11 = vadd.f32 %v7401_v7, %v7388_v6  ;;  %v14751_v6 = vld [vmem:[#allocation5 + $0x1354] sm:$0xf]  ;;  %v11977_v7 = vld [vmem:[#allocation5 + $0x1368] sm:$0xf0] }
 0x12c   :  { %7633 = vmatpush.bf16.msra.mxu0 %v11140_v19  ;;  %v11092_v19 = vor.u32 %v14529_v59, %v11089_v53  ;;  %v11041_v59 = vld [vmem:[#allocation5 + $0xc18] sm:$0xf0]  ;;  %v14565_v53 = vld [vmem:[#allocation5 + $0xd84] sm:$0xf]  ;;  %v14847_v20 = vld [vmem:[#allocation5 + $0x1654] sm:$0xf] }
 0x12d   :  { %7647 = vmatpush.bf16.msra.mxu1 %v11332_v15  ;;  %v11284_v15 = vor.u32 %v14577_v54, %v11281_v62  ;;  %v11233_v54 = vld [vmem:[#allocation5 + $0xd98] sm:$0xf0]  ;;  %v11644_v62 = vor.u32 %v14667_v25, %v11641_v42  ;;  %v12364_v25 = vor.u32 %v14847_v20, %v12361_v18  ;;  %v14745_v42 = vld [vmem:[#allocation5 + $0x1324] sm:$0xf] }
 0x12e   :  { %7661 = vmatpush.bf16.msra.mxu2 %v11524_v16  ;;  %v11476_v16 = vor.u32 %v14625_v2, %v11473_v3  ;;  %v14661_v2 = vld [vmem:[#allocation5 + $0x1084] sm:$0xf]  ;;  %v11617_v3 = vld [vmem:[#allocation5 + $0x1098] sm:$0xf0] }
 0x12f   :  { %7675 = vmatpush.bf16.msra.mxu3 %v11716_v24  ;;  %v11668_v24 = vor.u32 %v14673_v8, %v11665_v9  ;;  %v14799_v8 = vld [vmem:[#allocation5 + $0x14d4] sm:$0xf]  ;;  %v14733_v18 = vld [vmem:[#allocation5 + $0x12c4] sm:$0xf] }
 0x130   :  { %7634 = vmatpush.bf16.msra.mxu0 %v11116_v13  ;;  %v14517_v13 = vld [vmem:[#allocation5 + $0xc04] sm:$0xf] }
 0x131   :  { %7648 = vmatpush.bf16.msra.mxu1 %v11308_v50  ;;  %v11260_v50 = vor.u32 %v14571_v23, %v11257_v27  ;;  %v11044_v9 = vor.u32 %v14517_v13, %v11041_v59  ;;  %v14895_v23 = vld [vmem:[#allocation5 + $0x17d4] sm:$0xf]  ;;  %v12553_v27 = vld [vmem:[#allocation5 + $0x17e8] sm:$0xf0]  ;;  %v12145_v13 = vld [vmem:[#allocation5 + $0x14b8] sm:$0xf0] }
 0x132   :  { %7662 = vmatpush.bf16.msra.mxu2 %v11500_v28  ;;  %v11452_v28 = vor.u32 %v14619_v30, %v11449_v37  ;;  %v11980_v30 = vor.u32 %v14751_v6, %v11977_v7  ;;  %v14841_v59 = vld [vmem:[#allocation5 + $0x1624] sm:$0xf]  ;;  %v12121_v7 = vld [vmem:[#allocation5 + $0x1488] sm:$0xf0] }
 0x133   :  { %7676 = vmatpush.bf16.msra.mxu3 %v11692_v61  ;;  %v11425_v61 = vld [vmem:[#allocation5 + $0xf18] sm:$0xf0] }
 0x134   :  { %7635 = vmatpush.bf16.msra.mxu0 %v11092_v19  ;;  %v12169_v19 = vld [vmem:[#allocation5 + $0x14e8] sm:$0xf0] }
 0x135   :  { %7649 = vmatpush.bf16.msra.mxu1 %v11284_v15  ;;  %v11236_v15 = vor.u32 %v14565_v53, %v11233_v54  ;;  %v12172_v37 = vor.u32 %v14799_v8, %v12169_v19  ;;  %v15680_v53 = vpop.f32.mrf.mxu1  ;;  %v11956_v54 = vor.u32 %v14745_v42, %v11953_v0  ;;  %v14835_v8 = vld [vmem:[#allocation5 + $0x15f4] sm:$0xf]  ;;  %v12505_v0 = vld [vmem:[#allocation5 + $0x1788] sm:$0xf0] }
 0x136   :  { %7663 = vmatpush.bf16.msra.mxu2 %v11476_v16  ;;  %v11428_v16 = vor.u32 %v14613_v63, %v11425_v61  ;;  %16292 = vst [vmem:[#allocation31_spill] sm:$0xff] %v15680_v53  ;;  %v12148_v63 = vor.u32 %v14793_v29, %v12145_v13  ;;  %v14739_v61 = vld [vmem:[#allocation5 + $0x12f4] sm:$0xf]  ;;  %v12481_v13 = vld [vmem:[#allocation5 + $0x1758] sm:$0xf0] }
 0x137   :  { %7677 = vmatpush.bf16.msra.mxu3 %v11668_v24  ;;  %v11620_v24 = vor.u32 %v14661_v2, %v11617_v3  ;;  %v11929_v2 = vld [vmem:[#allocation5 + $0x1308] sm:$0xf0]  ;;  %v14787_v3 = vld [vmem:[#allocation5 + $0x1474] sm:$0xf]  ;;  %v13105_v53 = vld [vmem:[#allocation5 + $0x1c38] sm:$0xf0] }
 0x138   :  { %7636 = vmatpush.bf16.msra.mxu0 %v11068_v49  ;;  %v12556_v49 = vor.u32 %v14895_v23, %v12553_v27  ;;  %v14883_v19 = vld [vmem:[#allocation5 + $0x1774] sm:$0xf]  ;;  %v12124_v29 = vor.u32 %v14787_v3, %v12121_v7  ;;  %v15686_v23 = vpop.f32.mrf.mxu2  ;;  %v12073_v7 = vld [vmem:[#allocation5 + $0x1428] sm:$0xf0] }
 0x139   :  { %7650 = vmatpush.bf16.msra.mxu1 %v11260_v50  ;;  %v14889_v50 = vld [vmem:[#allocation5 + $0x17a4] sm:$0xf]  ;;  %16293 = vst [vmem:[#allocation32_spill] sm:$0xff] %v15686_v23  ;;  %v12508_v27 = vor.u32 %v14883_v19, %v12505_v0  ;;  %v14871_v19 = vld [vmem:[#allocation5 + $0x1714] sm:$0xf] }
 0x13a   :  { %7664 = vmatpush.bf16.msra.mxu2 %v11452_v28  ;;  %v12529_v28 = vld [vmem:[#allocation5 + $0x17b8] sm:$0xf0]  ;;  %v12457_v0 = vld [vmem:[#allocation5 + $0x1728] sm:$0xf0]  ;;  %v14985_v23 = vld [vmem:[#allocation5 + $0x1aa4] sm:$0xf] }
 0x13b   :  { %7678 = vmatpush.bf16.msra.mxu3 %v11644_v62  ;;  %v12340_v62 = vor.u32 %v14841_v59, %v12337_v12  ;;  %v12532_v6 = vor.u32 %v14889_v50, %v12529_v28  ;;  %v11932_v12 = vor.u32 %v14739_v61, %v11929_v2  ;;  %v11881_v61 = vld [vmem:[#allocation5 + $0x12a8] sm:$0xf0]  ;;  %v14775_v2 = vld [vmem:[#allocation5 + $0x1414] sm:$0xf] }
 0x13c   :  { %7637 = vmatpush.bf16.msra.mxu0 %v11044_v9  ;;  %v12313_v9 = vld [vmem:[#allocation5 + $0x1608] sm:$0xf0]  ;;  %v7415_v42 = vpop.f32.mrf.mxu0 }
 0x13d   :  { %7651 = vmatpush.bf16.msra.mxu1 %v11236_v15  ;;  %v12316_v20 = vor.u32 %v14835_v8, %v12313_v9  ;;  %v11905_v15 = vld [vmem:[#allocation5 + $0x12d8] sm:$0xf0]  ;;  %v7416_v59 = vadd.f32 %v7415_v42, %v15676_v11  ;;  %v7429_v28 = vpop.f32.mrf.mxu1  ;;  %v14823_v8 = vld [vmem:[#allocation5 + $0x1594] sm:$0xf]  ;;  %v12265_v9 = vld [vmem:[#allocation5 + $0x15a8] sm:$0xf0]  ;;  %v12076_v11 = vor.u32 %v14775_v2, %v12073_v7 }
 0x13e   :  { %7665 = vmatpush.bf16.msra.mxu2 %v11428_v16  ;;  %v14781_v16 = vld [vmem:[#allocation5 + $0x1444] sm:$0xf]  ;;  %v11908_v50 = vor.u32 %v14733_v18, %v11905_v15  ;;  %v11857_v18 = vld [vmem:[#allocation5 + $0x1278] sm:$0xf0]  ;;  %v14763_v2 = vld [vmem:[#allocation5 + $0x13b4] sm:$0xf] }
 0x13f   :  { %7679 = vmatpush.bf16.msra.mxu3 %v11620_v24  ;;  %7638 = vmatmul.bf16.vlgmr.msra.gmra.mxu0 %v15582_v31  ;;  %v12097_v24 = vld [vmem:[#allocation5 + $0x1458] sm:$0xf0]  ;;  %v14769_v15 = vld [vmem:[#allocation5 + $0x13e4] sm:$0xf]  ;;  %v12025_v7 = vld [vmem:[#allocation5 + $0x13c8] sm:$0xf0] }
 0x140   :  { %7686 = vmatpush.bf16.msrb.mxu0 %v11980_v30  ;;  %7652 = vmatmul.bf16.vlgmr.msra.gmra.mxu1 %v15586_v36  ;;  %v14829_v30 = vld [vmem:[#allocation5 + $0x15c4] sm:$0xf] }
 0x141   :  { %7700 = vmatpush.bf16.msrb.mxu1 %v12172_v37  ;;  %7666 = vmatmul.bf16.vlgmr.msra.gmra.mxu2 %v15584_v35  ;;  %v12289_v37 = vld [vmem:[#allocation5 + $0x15d8] sm:$0xf0] }
 0x142   :  { %7714 = vmatpush.bf16.msrb.mxu2 %v12364_v25  ;;  %7680 = vmatmul.bf16.vlgmr.msra.gmra.mxu3 %v15588_v40  ;;  %v15688_v25 = vpop.f32.mrf.mxu3 }
 0x143   :  { %7728 = vmatpush.bf16.msrb.mxu3 %v12556_v49  ;;  %16294 = vst [vmem:[#allocation33_spill] sm:$0xff] %v15688_v25  ;;  %v14877_v49 = vld [vmem:[#allocation5 + $0x1744] sm:$0xf]  ;;  %v12721_v25 = vld [vmem:[#allocation5 + $0x1938] sm:$0xf0] }
 0x144   :  { %7687 = vmatpush.bf16.msrb.mxu0 %v11956_v54  ;;  %v12100_v54 = vor.u32 %v14781_v16, %v12097_v24  ;;  %v12484_v3 = vor.u32 %v14877_v49, %v12481_v13  ;;  %v12460_v16 = vor.u32 %v14871_v19, %v12457_v0  ;;  %v7443_v24 = vpop.f32.mrf.mxu2  ;;  %v14865_v13 = vld [vmem:[#allocation5 + $0x16e4] sm:$0xf]  ;;  %v12409_v19 = vld [vmem:[#allocation5 + $0x16c8] sm:$0xf0]  ;;  %v15693_v22 = vpop.f32.mrf.mxu0 }
 0x145   :  { %7701 = vmatpush.bf16.msrb.mxu1 %v12148_v63  ;;  %v12292_v63 = vor.u32 %v14829_v30, %v12289_v37  ;;  %v14817_v30 = vld [vmem:[#allocation5 + $0x1564] sm:$0xf]  ;;  %v12241_v37 = vld [vmem:[#allocation5 + $0x1578] sm:$0xf0]  ;;  %16295 = vst [vmem:[#allocation34_spill] sm:$0xff] %v15693_v22 }
 0x146   :  { %7715 = vmatpush.bf16.msrb.mxu2 %v12340_v62  ;;  %v14727_v62 = vld [vmem:[#allocation5 + $0x1294] sm:$0xf]  ;;  %v10039_v22 = vld [vmem:[#allocation5 + $0x428] sm:$0xf] }
 0x147   :  { %7729 = vmatpush.bf16.msrb.mxu3 %v12532_v6  ;;  %v7430_v6 = vadd.f32 %v7429_v28, %v7416_v59  ;;  %v12433_v59 = vld [vmem:[#allocation5 + $0x16f8] sm:$0xf0] }
 0x148   :  { %7688 = vmatpush.bf16.msrb.mxu0 %v11932_v12  ;;  %v11884_v12 = vor.u32 %v14727_v62, %v11881_v61  ;;  %v14715_v62 = vld [vmem:[#allocation5 + $0x1234] sm:$0xf]  ;;  %v11833_v61 = vld [vmem:[#allocation5 + $0x1248] sm:$0xf0] }
 0x149   :  { %7702 = vmatpush.bf16.msrb.mxu1 %v12124_v29  ;;  %v12268_v29 = vor.u32 %v14823_v8, %v12265_v9  ;;  %v7444_v42 = vadd.f32 %v7443_v24, %v7430_v6  ;;  %v14811_v8 = vld [vmem:[#allocation5 + $0x1534] sm:$0xf]  ;;  %v12217_v9 = vld [vmem:[#allocation5 + $0x1548] sm:$0xf0]  ;;  %v11836_v0 = vor.u32 %v14715_v62, %v11833_v61  ;;  %v14805_v24 = vld [vmem:[#allocation5 + $0x1504] sm:$0xf] }
 0x14a   :  { %7716 = vmatpush.bf16.msrb.mxu2 %v12316_v20  ;;  %v14721_v20 = vld [vmem:[#allocation5 + $0x1264] sm:$0xf]  ;;  %v7457_v49 = vpop.f32.mrf.mxu3  ;;  %v14859_v6 = vld [vmem:[#allocation5 + $0x16b4] sm:$0xf]  ;;  %v13129_v61 = vld [vmem:[#allocation5 + $0x1c68] sm:$0xf0] }
 0x14b   :  { %7730 = vmatpush.bf16.msrb.mxu3 %v12508_v27  ;;  %v12049_v27 = vld [vmem:[#allocation5 + $0x13f8] sm:$0xf0]  ;;  %v15691_v28 = vadd.f32 %v7457_v49, %v7444_v42  ;;  %v14943_v42 = vld [vmem:[#allocation5 + $0x1954] sm:$0xf]  ;;  %v12745_v49 = vld [vmem:[#allocation5 + $0x1968] sm:$0xf0] }
 0x14c   :  { %7689 = vmatpush.bf16.msrb.mxu0 %v11908_v50  ;;  %v11860_v50 = vor.u32 %v14721_v20, %v11857_v18  ;;  %v11809_v20 = vld [vmem:[#allocation5 + $0x1218] sm:$0xf0]  ;;  %v14757_v18 = vld [vmem:[#allocation5 + $0x1384] sm:$0xf]  ;;  %v15039_v62 = vld [vmem:[#allocation5 + $0x1c54] sm:$0xf] }
 0x14d   :  { %7703 = vmatpush.bf16.msrb.mxu1 %v12100_v54  ;;  %v12052_v54 = vor.u32 %v14769_v15, %v12049_v27  ;;  %v12001_v15 = vld [vmem:[#allocation5 + $0x1398] sm:$0xf0]  ;;  %v12412_v27 = vor.u32 %v14859_v6, %v12409_v19  ;;  %v13132_v6 = vor.u32 %v15039_v62, %v13129_v61  ;;  %v14937_v19 = vld [vmem:[#allocation5 + $0x1924] sm:$0xf] }
 0x14e   :  { %7717 = vmatpush.bf16.msrb.mxu2 %v12292_v63  ;;  %v12244_v63 = vor.u32 %v14817_v30, %v12241_v37  ;;  %v14853_v30 = vld [vmem:[#allocation5 + $0x1684] sm:$0xf]  ;;  %v12385_v37 = vld [vmem:[#allocation5 + $0x1698] sm:$0xf0] }
 0x14f   :  { %7731 = vmatpush.bf16.msrb.mxu3 %v12484_v3  ;;  %v12436_v3 = vor.u32 %v14865_v13, %v12433_v59  ;;  %v14991_v13 = vld [vmem:[#allocation5 + $0x1ad4] sm:$0xf]  ;;  %v14925_v61 = vld [vmem:[#allocation5 + $0x18c4] sm:$0xf] }
 0x150   :  { %7690 = vmatpush.bf16.msrb.mxu0 %v11884_v12  ;;  %v14709_v12 = vld [vmem:[#allocation5 + $0x1204] sm:$0xf] }
 0x151   :  { %7704 = vmatpush.bf16.msrb.mxu1 %v12076_v11  ;;  %v12028_v11 = vor.u32 %v14763_v2, %v12025_v7  ;;  %v11812_v59 = vor.u32 %v14709_v12, %v11809_v20  ;;  %v15087_v2 = vld [vmem:[#allocation5 + $0x1dd4] sm:$0xf]  ;;  %v13321_v7 = vld [vmem:[#allocation5 + $0x1de8] sm:$0xf0]  ;;  %v12913_v12 = vld [vmem:[#allocation5 + $0x1ab8] sm:$0xf0] }
 0x152   :  { %7718 = vmatpush.bf16.msrb.mxu2 %v12268_v29  ;;  %v12220_v29 = vor.u32 %v14811_v8, %v12217_v9  ;;  %v12748_v8 = vor.u32 %v14943_v42, %v12745_v49  ;;  %v15033_v20 = vld [vmem:[#allocation5 + $0x1c24] sm:$0xf]  ;;  %v12889_v49 = vld [vmem:[#allocation5 + $0x1a88] sm:$0xf0] }
 0x153   :  { %7732 = vmatpush.bf16.msrb.mxu3 %v12460_v16  ;;  %v12193_v16 = vld [vmem:[#allocation5 + $0x1518] sm:$0xf0] }
 0x154   :  { %7691 = vmatpush.bf16.msrb.mxu0 %v11860_v50  ;;  %v12937_v50 = vld [vmem:[#allocation5 + $0x1ae8] sm:$0xf0] }
 0x155   :  { %7705 = vmatpush.bf16.msrb.mxu1 %v12052_v54  ;;  %v12004_v54 = vor.u32 %v14757_v18, %v12001_v15  ;;  %v12940_v9 = vor.u32 %v14991_v13, %v12937_v50  ;;  %v15695_v18 = vpop.f32.mrf.mxu1  ;;  %v12724_v15 = vor.u32 %v14937_v19, %v12721_v25  ;;  %v15027_v13 = vld [vmem:[#allocation5 + $0x1bf4] sm:$0xf]  ;;  %v13273_v25 = vld [vmem:[#allocation5 + $0x1d88] sm:$0xf0] }
 0x156   :  { %7719 = vmatpush.bf16.msrb.mxu2 %v12244_v63  ;;  %v12196_v63 = vor.u32 %v14805_v24, %v12193_v16  ;;  %16296 = vst [vmem:[#allocation35_spill] sm:$0xff] %v15695_v18  ;;  %v12916_v24 = vor.u32 %v14985_v23, %v12913_v12  ;;  %v14931_v16 = vld [vmem:[#allocation5 + $0x18f4] sm:$0xf]  ;;  %v13249_v12 = vld [vmem:[#allocation5 + $0x1d58] sm:$0xf0] }
 0x157   :  { %7733 = vmatpush.bf16.msrb.mxu3 %v12436_v3  ;;  %v12388_v3 = vor.u32 %v14853_v30, %v12385_v37  ;;  %v12697_v30 = vld [vmem:[#allocation5 + $0x1908] sm:$0xf0]  ;;  %v14979_v37 = vld [vmem:[#allocation5 + $0x1a74] sm:$0xf] }
 0x158   :  { %7692 = vmatpush.bf16.msrb.mxu0 %v11836_v0  ;;  %v13324_v0 = vor.u32 %v15087_v2, %v13321_v7  ;;  %v15075_v50 = vld [vmem:[#allocation5 + $0x1d74] sm:$0xf]  ;;  %v12892_v23 = vor.u32 %v14979_v37, %v12889_v49  ;;  %v15701_v2 = vpop.f32.mrf.mxu2  ;;  %v12841_v49 = vld [vmem:[#allocation5 + $0x1a28] sm:$0xf0] }
 0x159   :  { %7706 = vmatpush.bf16.msrb.mxu1 %v12028_v11  ;;  %v15081_v11 = vld [vmem:[#allocation5 + $0x1da4] sm:$0xf]  ;;  %16297 = vst [vmem:[#allocation36_spill] sm:$0xff] %v15701_v2  ;;  %v13276_v7 = vor.u32 %v15075_v50, %v13273_v25  ;;  %v15063_v50 = vld [vmem:[#allocation5 + $0x1d14] sm:$0xf] }
 0x15a   :  { %7720 = vmatpush.bf16.msrb.mxu2 %v12220_v29  ;;  %v13297_v29 = vld [vmem:[#allocation5 + $0x1db8] sm:$0xf0]  ;;  %v13225_v25 = vld [vmem:[#allocation5 + $0x1d28] sm:$0xf0] }
 0x15b   :  { %7734 = vmatpush.bf16.msrb.mxu3 %v12412_v27  ;;  %v13108_v27 = vor.u32 %v15033_v20, %v13105_v53  ;;  %v13300_v42 = vor.u32 %v15081_v11, %v13297_v29  ;;  %v12700_v53 = vor.u32 %v14931_v16, %v12697_v30  ;;  %v12649_v16 = vld [vmem:[#allocation5 + $0x18a8] sm:$0xf0]  ;;  %v14967_v30 = vld [vmem:[#allocation5 + $0x1a14] sm:$0xf]  ;;  %v13873_v2 = vld [vmem:[#allocation5 + $0x2238] sm:$0xf0] }
 0x15c   :  { %7693 = vmatpush.bf16.msrb.mxu0 %v11812_v59  ;;  %v13081_v59 = vld [vmem:[#allocation5 + $0x1c08] sm:$0xf0]  ;;  %v7471_v19 = vpop.f32.mrf.mxu0 }
 0x15d   :  { %7707 = vmatpush.bf16.msrb.mxu1 %v12004_v54  ;;  %v13084_v62 = vor.u32 %v15027_v13, %v13081_v59  ;;  %v12673_v54 = vld [vmem:[#allocation5 + $0x18d8] sm:$0xf0]  ;;  %v7472_v20 = vadd.f32 %v7471_v19, %v15691_v28  ;;  %v7485_v29 = vpop.f32.mrf.mxu1  ;;  %v15015_v13 = vld [vmem:[#allocation5 + $0x1b94] sm:$0xf]  ;;  %v13033_v59 = vld [vmem:[#allocation5 + $0x1ba8] sm:$0xf0]  ;;  %v12844_v28 = vor.u32 %v14967_v30, %v12841_v49 }
 0x15e   :  { %7721 = vmatpush.bf16.msrb.mxu2 %v12196_v63  ;;  %v14973_v63 = vld [vmem:[#allocation5 + $0x1a44] sm:$0xf]  ;;  %v12676_v11 = vor.u32 %v14925_v61, %v12673_v54  ;;  %v12625_v61 = vld [vmem:[#allocation5 + $0x1878] sm:$0xf0]  ;;  %v14955_v30 = vld [vmem:[#allocation5 + $0x19b4] sm:$0xf] }
 0x15f   :  { %7735 = vmatpush.bf16.msrb.mxu3 %v12388_v3  ;;  %7694 = vmatmul.bf16.vlgmr.msrb.gmra.mxu0 %v15594_v32  ;;  %v12865_v3 = vld [vmem:[#allocation5 + $0x1a58] sm:$0xf0]  ;;  %v14961_v54 = vld [vmem:[#allocation5 + $0x19e4] sm:$0xf]  ;;  %v12793_v49 = vld [vmem:[#allocation5 + $0x19c8] sm:$0xf0] }
 0x160   :  { %7742 = vmatpush.bf16.msra.mxu0 %v12748_v8  ;;  %7708 = vmatmul.bf16.vlgmr.msrb.gmra.mxu1 %v15598_v41  ;;  %v15021_v8 = vld [vmem:[#allocation5 + $0x1bc4] sm:$0xf] }
 0x161   :  { %7756 = vmatpush.bf16.msra.mxu1 %v12940_v9  ;;  %7722 = vmatmul.bf16.vlgmr.msrb.gmra.mxu2 %v15596_v38  ;;  %v13057_v9 = vld [vmem:[#allocation5 + $0x1bd8] sm:$0xf0] }
 0x162   :  { %7770 = vmatpush.bf16.msra.mxu2 %v13132_v6  ;;  %7736 = vmatmul.bf16.vlgmr.msrb.gmra.mxu3 %v15600_v46  ;;  %v15703_v6 = vpop.f32.mrf.mxu3 }
 0x163   :  { %7784 = vmatpush.bf16.msra.mxu3 %v13324_v0  ;;  %16298 = vst [vmem:[#allocation37_spill] sm:$0xff] %v15703_v6  ;;  %v15069_v0 = vld [vmem:[#allocation5 + $0x1d44] sm:$0xf] }
 0x164   :  { %7743 = vmatpush.bf16.msra.mxu0 %v12724_v15  ;;  %v12868_v15 = vor.u32 %v14973_v63, %v12865_v3  ;;  %v13252_v37 = vor.u32 %v15069_v0, %v13249_v12  ;;  %v13228_v63 = vor.u32 %v15063_v50, %v13225_v25  ;;  %v7499_v3 = vpop.f32.mrf.mxu2  ;;  %v15057_v12 = vld [vmem:[#allocation5 + $0x1ce4] sm:$0xf]  ;;  %v13177_v50 = vld [vmem:[#allocation5 + $0x1cc8] sm:$0xf0]  ;;  %v15708_v18 = vpop.f32.mrf.mxu0 }
 0x165   :  { %7757 = vmatpush.bf16.msra.mxu1 %v12916_v24  ;;  %v13060_v24 = vor.u32 %v15021_v8, %v13057_v9  ;;  %v15009_v8 = vld [vmem:[#allocation5 + $0x1b64] sm:$0xf]  ;;  %v13009_v9 = vld [vmem:[#allocation5 + $0x1b78] sm:$0xf0]  ;;  %16300 = vst [vmem:[#allocation39_spill] sm:$0xff] %v15708_v18 }
 0x166   :  { %7771 = vmatpush.bf16.msra.mxu2 %v13108_v27  ;;  %v14919_v27 = vld [vmem:[#allocation5 + $0x1894] sm:$0xf]  ;;  %v15177_v6 = vld [vmem:[#allocation5 + $0x20a4] sm:$0xf]  ;;  %v14173_v18 = vld [vmem:[#allocation5 + $0x13c] sm:$0xf0] }
 0x167   :  { %7785 = vmatpush.bf16.msra.mxu3 %v13300_v42  ;;  %v7486_v42 = vadd.f32 %v7485_v29, %v7472_v20  ;;  %v13201_v20 = vld [vmem:[#allocation5 + $0x1cf8] sm:$0xf0] }
 0x168   :  { %7744 = vmatpush.bf16.msra.mxu0 %v12700_v53  ;;  %v12652_v53 = vor.u32 %v14919_v27, %v12649_v16  ;;  %v14907_v27 = vld [vmem:[#allocation5 + $0x1834] sm:$0xf]  ;;  %v12601_v16 = vld [vmem:[#allocation5 + $0x1848] sm:$0xf0] }
 0x169   :  { %7758 = vmatpush.bf16.msra.mxu1 %v12892_v23  ;;  %v13036_v23 = vor.u32 %v15015_v13, %v13033_v59  ;;  %v7500_v19 = vadd.f32 %v7499_v3, %v7486_v42  ;;  %v15003_v13 = vld [vmem:[#allocation5 + $0x1b34] sm:$0xf]  ;;  %v12985_v59 = vld [vmem:[#allocation5 + $0x1b48] sm:$0xf0]  ;;  %v12604_v25 = vor.u32 %v14907_v27, %v12601_v16  ;;  %v14997_v3 = vld [vmem:[#allocation5 + $0x1b04] sm:$0xf] }
 0x16a   :  { %7772 = vmatpush.bf16.msra.mxu2 %v13084_v62  ;;  %v14913_v62 = vld [vmem:[#allocation5 + $0x1864] sm:$0xf]  ;;  %v7513_v0 = vpop.f32.mrf.mxu3  ;;  %v15051_v42 = vld [vmem:[#allocation5 + $0x1cb4] sm:$0xf]  ;;  %v13897_v16 = vld [vmem:[#allocation5 + $0x2268] sm:$0xf0] }
 0x16b   :  { %7786 = vmatpush.bf16.msra.mxu3 %v13276_v7  ;;  %v12817_v7 = vld [vmem:[#allocation5 + $0x19f8] sm:$0xf0]  ;;  %v15706_v29 = vadd.f32 %v7513_v0, %v7500_v19  ;;  %v15135_v19 = vld [vmem:[#allocation5 + $0x1f54] sm:$0xf]  ;;  %v13513_v0 = vld [vmem:[#allocation5 + $0x1f68] sm:$0xf0] }
 0x16c   :  { %7745 = vmatpush.bf16.msra.mxu0 %v12676_v11  ;;  %v12628_v11 = vor.u32 %v14913_v62, %v12625_v61  ;;  %v12577_v62 = vld [vmem:[#allocation5 + $0x1818] sm:$0xf0]  ;;  %v14949_v61 = vld [vmem:[#allocation5 + $0x1984] sm:$0xf]  ;;  %v15231_v27 = vld [vmem:[#allocation5 + $0x2254] sm:$0xf] }
 0x16d   :  { %7759 = vmatpush.bf16.msra.mxu1 %v12868_v15  ;;  %16299 = vst [vmem:[#allocation38_spill] sm:$0xff] %v15706_v29  ;;  %v12820_v15 = vor.u32 %v14961_v54, %v12817_v7  ;;  %v12769_v54 = vld [vmem:[#allocation5 + $0x1998] sm:$0xf0]  ;;  %v13180_v7 = vor.u32 %v15051_v42, %v13177_v50  ;;  %v13900_v42 = vor.u32 %v15231_v27, %v13897_v16  ;;  %v15129_v50 = vld [vmem:[#allocation5 + $0x1f24] sm:$0xf] }
 0x16e   :  { %7773 = vmatpush.bf16.msra.mxu2 %v13060_v24  ;;  %v13012_v24 = vor.u32 %v15009_v8, %v13009_v9  ;;  %v15045_v8 = vld [vmem:[#allocation5 + $0x1c84] sm:$0xf]  ;;  %v13153_v9 = vld [vmem:[#allocation5 + $0x1c98] sm:$0xf0] }
 0x16f   :  { %7787 = vmatpush.bf16.msra.mxu3 %v13252_v37  ;;  %v13204_v37 = vor.u32 %v15057_v12, %v13201_v20  ;;  %v15183_v12 = vld [vmem:[#allocation5 + $0x20d4] sm:$0xf]  ;;  %v13489_v29 = vld [vmem:[#allocation5 + $0x1f38] sm:$0xf0] }
 0x170   :  { %7746 = vmatpush.bf16.msra.mxu0 %v12652_v53  ;;  %v14901_v53 = vld [vmem:[#allocation5 + $0x1804] sm:$0xf] }
 0x171   :  { %7760 = vmatpush.bf16.msra.mxu1 %v12844_v28  ;;  %v12796_v28 = vor.u32 %v14955_v30, %v12793_v49  ;;  %v12580_v20 = vor.u32 %v14901_v53, %v12577_v62  ;;  %v15279_v30 = vld [vmem:[#allocation5 + $0x23d4] sm:$0xf]  ;;  %v14089_v49 = vld [vmem:[#allocation5 + $0x23e8] sm:$0xf0]  ;;  %v13681_v53 = vld [vmem:[#allocation5 + $0x20b8] sm:$0xf0] }
 0x172   :  { %7774 = vmatpush.bf16.msra.mxu2 %v13036_v23  ;;  %v12988_v23 = vor.u32 %v15003_v13, %v12985_v59  ;;  %v13516_v13 = vor.u32 %v15135_v19, %v13513_v0  ;;  %v15225_v62 = vld [vmem:[#allocation5 + $0x2224] sm:$0xf]  ;;  %v13657_v0 = vld [vmem:[#allocation5 + $0x2088] sm:$0xf0] }
 0x173   :  { %7788 = vmatpush.bf16.msra.mxu3 %v13228_v63  ;;  %v12961_v63 = vld [vmem:[#allocation5 + $0x1b18] sm:$0xf0] }
 0x174   :  { %7747 = vmatpush.bf16.msra.mxu0 %v12628_v11  ;;  %v13705_v11 = vld [vmem:[#allocation5 + $0x20e8] sm:$0xf0] }
 0x175   :  { %7761 = vmatpush.bf16.msra.mxu1 %v12820_v15  ;;  %v12772_v15 = vor.u32 %v14949_v61, %v12769_v54  ;;  %v13708_v59 = vor.u32 %v15183_v12, %v13705_v11  ;;  %v13492_v61 = vor.u32 %v15129_v50, %v13489_v29  ;;  %v15710_v54 = vpop.f32.mrf.mxu1  ;;  %v15219_v12 = vld [vmem:[#allocation5 + $0x21f4] sm:$0xf]  ;;  %v14041_v11 = vld [vmem:[#allocation5 + $0x2388] sm:$0xf0]  ;;  %v13825_v50 = vld [vmem:[#allocation5 + $0x21d8] sm:$0xf0] }
 0x176   :  { %7775 = vmatpush.bf16.msra.mxu2 %v13012_v24  ;;  %v12964_v24 = vor.u32 %v14997_v3, %v12961_v63  ;;  %16301 = vst [vmem:[#allocation40_spill] sm:$0xff] %v15710_v54  ;;  %v13684_v3 = vor.u32 %v15177_v6, %v13681_v53  ;;  %v15123_v63 = vld [vmem:[#allocation5 + $0x1ef4] sm:$0xf]  ;;  %v15716_v6 = vld [vmem:[#allocation7] sm:$0x3f] }
 0x177   :  { %7789 = vmatpush.bf16.msra.mxu3 %v13204_v37  ;;  %v13156_v37 = vor.u32 %v15045_v8, %v13153_v9  ;;  %v13465_v8 = vld [vmem:[#allocation5 + $0x1f08] sm:$0xf0]  ;;  %v15171_v9 = vld [vmem:[#allocation5 + $0x2074] sm:$0xf]  ;;  %v16276_v27 = vperm.slane %v15716_v6, 1 }
 0x178   :  { %7748 = vmatpush.bf16.msra.mxu0 %v12604_v25  ;;  %v14092_v25 = vor.u32 %v15279_v30, %v14089_v49  ;;  %v15267_v29 = vld [vmem:[#allocation5 + $0x2374] sm:$0xf]  ;;  %v13660_v16 = vor.u32 %v15171_v9, %v13657_v0  ;;  %v13441_v30 = vld [vmem:[#allocation5 + $0x1ed8] sm:$0xf0]  ;;  %v15165_v49 = vld [vmem:[#allocation5 + $0x2044] sm:$0xf] }
 0x179   :  { %7762 = vmatpush.bf16.msra.mxu1 %v12796_v28  ;;  %v15273_v28 = vld [vmem:[#allocation5 + $0x23a4] sm:$0xf]  ;;  %v14017_v53 = vld [vmem:[#allocation5 + $0x2358] sm:$0xf0]  ;;  %v15159_v9 = vld [vmem:[#allocation5 + $0x2014] sm:$0xf] }
 0x17a   :  { %7776 = vmatpush.bf16.msra.mxu2 %v12988_v23  ;;  %v14065_v23 = vld [vmem:[#allocation5 + $0x23b8] sm:$0xf0]  ;;  %v9655_v54 = vld [vmem:[#allocation5 + $0x128] sm:$0xf] }
 0x17b   :  { %7790 = vmatpush.bf16.msra.mxu3 %v13180_v7  ;;  %v13876_v7 = vor.u32 %v15225_v62, %v13873_v2  ;;  %v14068_v19 = vor.u32 %v15273_v28, %v14065_v23  ;;  %v13468_v2 = vor.u32 %v15123_v63, %v13465_v8  ;;  %v15721_v28 = vpop.f32.mrf.mxu3  ;;  %v15111_v63 = vld [vmem:[#allocation5 + $0x1e94] sm:$0xf]  ;;  %v13417_v8 = vld [vmem:[#allocation5 + $0x1ea8] sm:$0xf0] }
 0x17c   :  { %7749 = vmatpush.bf16.msra.mxu0 %v12580_v20  ;;  %v13849_v20 = vld [vmem:[#allocation5 + $0x2208] sm:$0xf0]  ;;  %v7527_v62 = vpop.f32.mrf.mxu0  ;;  %16303 = vst [vmem:[#allocation42_spill] sm:$0xff] %v15721_v28  ;;  %v15255_v28 = vld [vmem:[#allocation5 + $0x2314] sm:$0xf] }
 0x17d   :  { %7763 = vmatpush.bf16.msra.mxu1 %v12772_v15  ;;  %v13852_v15 = vor.u32 %v15219_v12, %v13849_v20  ;;  %v13609_v12 = vld [vmem:[#allocation5 + $0x2028] sm:$0xf0]  ;;  %v15207_v20 = vld [vmem:[#allocation5 + $0x2194] sm:$0xf] }
 0x17e   :  { %7777 = vmatpush.bf16.msra.mxu2 %v12964_v24  ;;  %v15117_v24 = vld [vmem:[#allocation5 + $0x1ec4] sm:$0xf] }
 0x17f   :  { %7791 = vmatpush.bf16.msra.mxu3 %v13156_v37  ;;  %7750 = vmatmul.bf16.vlgmr.msra.gmra.mxu0 %v15606_v51  ;;  %v15719_v37 = vpop.f32.mrf.mxu2  ;;  %v13444_v23 = vor.u32 %v15117_v24, %v13441_v30  ;;  %v13420_v24 = vor.u32 %v15111_v63, %v13417_v8  ;;  %v15105_v30 = vld [vmem:[#allocation5 + $0x1e64] sm:$0xf]  ;;  %v15099_v63 = vld [vmem:[#allocation5 + $0x1e34] sm:$0xf]  ;;  %v13369_v8 = vld [vmem:[#allocation5 + $0x1e48] sm:$0xf0] }
 0x180   :  { %7798 = vmatpush.bf16.msrb.mxu0 %v13516_v13  ;;  %7764 = vmatmul.bf16.vlgmr.msra.gmra.mxu1 %v15610_v56  ;;  %16302 = vst [vmem:[#allocation41_spill] sm:$0xff] %v15719_v37  ;;  %v14044_v13 = vor.u32 %v15267_v29, %v14041_v11  ;;  %v13801_v29 = vld [vmem:[#allocation5 + $0x21a8] sm:$0xf0] }
 0x181   :  { %7812 = vmatpush.bf16.msrb.mxu1 %v13708_v59  ;;  %7778 = vmatmul.bf16.vlgmr.msra.gmra.mxu2 %v15608_v55  ;;  %v13633_v59 = vld [vmem:[#allocation5 + $0x2058] sm:$0xf0]  ;;  %v13945_v37 = vld [vmem:[#allocation5 + $0x22c8] sm:$0xf0] }
 0x182   :  { %7826 = vmatpush.bf16.msrb.mxu2 %v13900_v42  ;;  %7792 = vmatmul.bf16.vlgmr.msra.gmra.mxu3 %v15612_v60  ;;  %v15213_v42 = vld [vmem:[#allocation5 + $0x21c4] sm:$0xf] }
 0x183   :  { %7840 = vmatpush.bf16.msrb.mxu3 %v14092_v25  ;;  %v15261_v25 = vld [vmem:[#allocation5 + $0x2344] sm:$0xf] }
 0x184   :  { %7799 = vmatpush.bf16.msrb.mxu0 %v13492_v61  ;;  %v7528_v61 = vadd.f32 %v7527_v62, %v16276_v27  ;;  %v14020_v0 = vor.u32 %v15261_v25, %v14017_v53  ;;  %v13777_v25 = vld [vmem:[#allocation5 + $0x2178] sm:$0xf0]  ;;  %v15249_v62 = vld [vmem:[#allocation5 + $0x22e4] sm:$0xf] }
 0x185   :  { %7813 = vmatpush.bf16.msrb.mxu1 %v13684_v3  ;;  %v13636_v3 = vor.u32 %v15165_v49, %v13633_v59  ;;  %v13393_v49 = vld [vmem:[#allocation5 + $0x1e78] sm:$0xf0]  ;;  %v15153_v59 = vld [vmem:[#allocation5 + $0x1fe4] sm:$0xf] }
 0x186   :  { %7827 = vmatpush.bf16.msrb.mxu2 %v13876_v7  ;;  %v13828_v7 = vor.u32 %v15213_v42, %v13825_v50  ;;  %v13585_v50 = vld [vmem:[#allocation5 + $0x1ff8] sm:$0xf0] }
 0x187   :  { %7841 = vmatpush.bf16.msrb.mxu3 %v14068_v19  ;;  %v7541_v19 = vpop.f32.mrf.mxu1  ;;  %v7555_v53 = vpop.f32.mrf.mxu2  ;;  %v13969_v27 = vld [vmem:[#allocation5 + $0x22f8] sm:$0xf0] }
 0x188   :  { %7800 = vmatpush.bf16.msrb.mxu0 %v13468_v2  ;;  %v7542_v11 = vadd.f32 %v7541_v19, %v7528_v61  ;;  %v13993_v2 = vld [vmem:[#allocation5 + $0x2328] sm:$0xf0]  ;;  %v13396_v19 = vor.u32 %v15105_v30, %v13393_v49  ;;  %v13345_v30 = vld [vmem:[#allocation5 + $0x1e18] sm:$0xf0]  ;;  %v15141_v49 = vld [vmem:[#allocation5 + $0x1f84] sm:$0xf] }
 0x189   :  { %7814 = vmatpush.bf16.msrb.mxu1 %v13660_v16  ;;  %v13612_v16 = vor.u32 %v15159_v9, %v13609_v12  ;;  %v13996_v42 = vor.u32 %v15255_v28, %v13993_v2  ;;  %v15147_v9 = vld [vmem:[#allocation5 + $0x1fb4] sm:$0xf]  ;;  %v13972_v28 = vor.u32 %v15249_v62, %v13969_v27  ;;  %v15237_v27 = vld [vmem:[#allocation5 + $0x2284] sm:$0xf]  ;;  %v14179_v62 = vld [vmem:[#allocation5 + $0x16c] sm:$0xf0] }
 0x18a   :  { %7828 = vmatpush.bf16.msrb.mxu2 %v13852_v15  ;;  %v13804_v15 = vor.u32 %v15207_v20, %v13801_v29  ;;  %v7556_v61 = vadd.f32 %v7555_v53, %v7542_v11  ;;  %v15195_v20 = vld [vmem:[#allocation5 + $0x2134] sm:$0xf]  ;;  %v13753_v29 = vld [vmem:[#allocation5 + $0x2148] sm:$0xf0]  ;;  %v13372_v11 = vor.u32 %v15099_v63, %v13369_v8  ;;  %v9679_v53 = vld [vmem:[#allocation5 + $0x158] sm:$0xf] }
 0x18b   :  { %7842 = vmatpush.bf16.msrb.mxu3 %v14044_v13  ;;  %v15201_v13 = vld [vmem:[#allocation5 + $0x2164] sm:$0xf]  ;;  %v15243_v2 = vld [vmem:[#allocation5 + $0x22b4] sm:$0xf]  ;;  %v10063_v63 = vld [vmem:[#allocation5 + $0x458] sm:$0xf] }
 0x18c   :  { %7801 = vmatpush.bf16.msrb.mxu0 %v13444_v23  ;;  %v7569_v23 = vpop.f32.mrf.mxu3  ;;  %v14275_v8 = vld [vmem:[#allocation5 + $0x46c] sm:$0xf0] }
 0x18d   :  { %7815 = vmatpush.bf16.msrb.mxu1 %v13636_v3  ;;  %v13588_v3 = vor.u32 %v15153_v59, %v13585_v50  ;;  %v15725_v12 = vadd.f32 %v7569_v23, %v7556_v61  ;;  %v13537_v59 = vld [vmem:[#allocation5 + $0x1f98] sm:$0xf0]  ;;  %v15189_v50 = vld [vmem:[#allocation5 + $0x2104] sm:$0xf]  ;;  %v9871_v61 = vld [vmem:[#allocation5 + $0x2d8] sm:$0xf] }
 0x18e   :  { %7829 = vmatpush.bf16.msrb.mxu2 %v13828_v7  ;;  %v13780_v7 = vor.u32 %v15201_v13, %v13777_v25  ;;  %v13948_v13 = vor.u32 %v15243_v2, %v13945_v37  ;;  %v13921_v25 = vld [vmem:[#allocation5 + $0x2298] sm:$0xf0]  ;;  %v14227_v23 = vld [vmem:[#allocation5 + $0x2ec] sm:$0xf0]  ;;  %v9680_v37 = vor.u32 %v14179_v62, %v9679_v53  ;;  %v15727_v2 = vpop.f32.mrf.mxu0  ;;  %v9823_v53 = vld [vmem:[#allocation5 + $0x278] sm:$0xf] }
 0x18f   :  { %7843 = vmatpush.bf16.msrb.mxu3 %v14020_v0  ;;  %v13561_v0 = vld [vmem:[#allocation5 + $0x1fc8] sm:$0xf0] }
 0x190   :  { %7802 = vmatpush.bf16.msrb.mxu0 %v13420_v24  ;;  %v15093_v24 = vld [vmem:[#allocation5 + $0x1e04] sm:$0xf] }
 0x191   :  { %7816 = vmatpush.bf16.msrb.mxu1 %v13612_v16  ;;  %v13564_v16 = vor.u32 %v15147_v9, %v13561_v0  ;;  %v10255_v9 = vld [vmem:[#allocation5 + $0x5d8] sm:$0xf]  ;;  %v14323_v0 = vld [vmem:[#allocation5 + $0x5ec] sm:$0xf0] }
 0x192   :  { %7830 = vmatpush.bf16.msrb.mxu2 %v13804_v15  ;;  %v13756_v15 = vor.u32 %v15195_v20, %v13753_v29  ;;  %v9872_v20 = vor.u32 %v14227_v23, %v9871_v61  ;;  %v10064_v29 = vor.u32 %v14275_v8, %v10063_v63  ;;  %v14215_v61 = vld [vmem:[#allocation5 + $0x28c] sm:$0xf0]  ;;  %v10207_v63 = vld [vmem:[#allocation5 + $0x578] sm:$0xf] }
 0x193   :  { %7844 = vmatpush.bf16.msrb.mxu3 %v13996_v42  ;;  %v13729_v42 = vld [vmem:[#allocation5 + $0x2118] sm:$0xf0]  ;;  %v14263_v23 = vld [vmem:[#allocation5 + $0x40c] sm:$0xf0]  ;;  %v9824_v8 = vor.u32 %v14215_v61, %v9823_v53  ;;  %v9775_v53 = vld [vmem:[#allocation5 + $0x218] sm:$0xf] }
 0x194   :  { %7803 = vmatpush.bf16.msrb.mxu0 %v13396_v19  ;;  %v13348_v19 = vor.u32 %v15093_v24, %v13345_v30  ;;  %v10256_v24 = vor.u32 %v14323_v0, %v10255_v9  ;;  %v14221_v30 = vld [vmem:[#allocation5 + $0x2bc] sm:$0xf0]  ;;  %v9799_v0 = vld [vmem:[#allocation5 + $0x248] sm:$0xf] }
 0x195   :  { %7817 = vmatpush.bf16.msrb.mxu1 %v13588_v3  ;;  %v13540_v3 = vor.u32 %v15141_v49, %v13537_v59  ;;  %v14317_v49 = vld [vmem:[#allocation5 + $0x5bc] sm:$0xf0]  ;;  %v15729_v59 = vpop.f32.mrf.mxu1 }
 0x196   :  { %7831 = vmatpush.bf16.msrb.mxu2 %v13780_v7  ;;  %v13732_v7 = vor.u32 %v15189_v50, %v13729_v42  ;;  %16304 = vst [vmem:[#allocation43_spill] sm:$0xff] %v15729_v59  ;;  %v9656_v50 = vor.u32 %v14173_v18, %v9655_v54  ;;  %v14311_v18 = vld [vmem:[#allocation5 + $0x58c] sm:$0xf0]  ;;  %v15735_v54 = vpop.f32.mrf.mxu2  ;;  %v14161_v9 = vld [vmem:[#allocation5 + $0xdc] sm:$0xf0] }
 0x197   :  { %7845 = vmatpush.bf16.msrb.mxu3 %v13972_v28  ;;  %v13924_v28 = vor.u32 %v15237_v27, %v13921_v25  ;;  %v9631_v27 = vld [vmem:[#allocation5 + $0xf8] sm:$0xf]  ;;  %v14167_v25 = vld [vmem:[#allocation5 + $0x10c] sm:$0xf0]  ;;  %16305 = vst [vmem:[#allocation44_spill] sm:$0xff] %v15735_v54 }
 0x198   :  { %7804 = vmatpush.bf16.msrb.mxu0 %v13372_v11  ;;  %v9847_v11 = vld [vmem:[#allocation5 + $0x2a8] sm:$0xf]  ;;  %v14410_v54 = vld [vmem:[#allocation5 + $0x8ac] sm:$0xf]  ;;  %v14267_v59 = vld [vmem:[#allocation5 + $0x434] sm:$0xf] }
 0x199   :  { %7818 = vmatpush.bf16.msrb.mxu1 %v13564_v16  ;;  %v14269_v16 = vld [vmem:[#allocation5 + $0x43c] sm:$0xf0] }
 0x19a   :  { %7832 = vmatpush.bf16.msrb.mxu2 %v13756_v15  ;;  %v10231_v15 = vld [vmem:[#allocation5 + $0x5a8] sm:$0xf]  ;;  %v10040_v42 = vor.u32 %v14269_v16, %v10039_v22  ;;  %v9632_v22 = vor.u32 %v14167_v25, %v9631_v27  ;;  %v14305_v16 = vld [vmem:[#allocation5 + $0x55c] sm:$0xf0]  ;;  %v9583_v27 = vld [vmem:[#allocation5 + $0x98] sm:$0xf] }
 0x19b   :  { %7846 = vmatpush.bf16.msrb.mxu3 %v13948_v13  ;;  %v9848_v13 = vor.u32 %v14221_v30, %v9847_v11  ;;  %v10232_v62 = vor.u32 %v14317_v49, %v10231_v15  ;;  %v14257_v11 = vld [vmem:[#allocation5 + $0x3dc] sm:$0xf0]  ;;  %v10183_v30 = vld [vmem:[#allocation5 + $0x548] sm:$0xf]  ;;  %v14155_v25 = vld [vmem:[#allocation5 + $0xac] sm:$0xf0] }
 0x19c   :  { %7805 = vmatpush.bf16.msrb.mxu0 %v13348_v19  ;;  %v10015_v19 = vld [vmem:[#allocation5 + $0x3f8] sm:$0xf] }
 0x19d   :  { %7819 = vmatpush.bf16.msrb.mxu1 %v13540_v3  ;;  %v10016_v3 = vor.u32 %v14263_v23, %v10015_v19  ;;  %v14203_v19 = vld [vmem:[#allocation5 + $0x22c] sm:$0xf0]  ;;  %v9967_v23 = vld [vmem:[#allocation5 + $0x398] sm:$0xf] }
 0x19e   :  { %7833 = vmatpush.bf16.msrb.mxu2 %v13732_v7  ;;  %v9607_v7 = vld [vmem:[#allocation5 + $0xc8] sm:$0xf] }
 0x19f   :  { %7847 = vmatpush.bf16.msrb.mxu3 %v13924_v28  ;;  %7806 = vmatmul.bf16.vlgmr.msrb.gmra.mxu0 %v15627_v26  ;;  %v10208_v28 = vor.u32 %v14311_v18, %v10207_v63  ;;  %v9608_v49 = vor.u32 %v14161_v9, %v9607_v7  ;;  %v14251_v63 = vld [vmem:[#allocation5 + $0x3ac] sm:$0xf0]  ;;  %v10159_v18 = vld [vmem:[#allocation5 + $0x518] sm:$0xf]  ;;  %v14149_v7 = vld [vmem:[#allocation5 + $0x7c] sm:$0xf0] }
 0x1a0   :  { %7854 = vmatpush.bf16.msra.mxu0 %v9680_v37  ;;  %7820 = vmatmul.bf16.vlgmr.msrb.gmra.mxu1 %v15631_v34  ;;  %v15737_v37 = vpop.f32.mrf.mxu3  ;;  %v9751_v9 = vld [vmem:[#allocation5 + $0x1e8] sm:$0xf] }
 0x1a1   :  { %7868 = vmatpush.bf16.msra.mxu1 %v9872_v20  ;;  %7834 = vmatmul.bf16.vlgmr.msrb.gmra.mxu2 %v15629_v33  ;;  %16306 = vst [vmem:[#allocation45_spill] sm:$0xff] %v15737_v37  ;;  %v14209_v20 = vld [vmem:[#allocation5 + $0x25c] sm:$0xf0] }
 0x1a2   :  { %7882 = vmatpush.bf16.msra.mxu2 %v10064_v29  ;;  %7848 = vmatmul.bf16.vlgmr.msrb.gmra.mxu3 %v15635_v48  ;;  %v9991_v29 = vld [vmem:[#allocation5 + $0x3c8] sm:$0xf]  ;;  %v14461_v37 = vld [vmem:[#allocation5 + $0xa3c] sm:$0xf0] }
 0x1a3   :  { %7896 = vmatpush.bf16.msra.mxu3 %v10256_v24  ;;  %v7583_v24 = vpop.f32.mrf.mxu0 }
 0x1a4   :  { %7855 = vmatpush.bf16.msra.mxu0 %v9656_v50  ;;  %v7584_v15 = vadd.f32 %v7583_v24, %v15725_v12  ;;  %v9800_v50 = vor.u32 %v14209_v20, %v9799_v0  ;;  %v9776_v12 = vor.u32 %v14203_v19, %v9775_v53  ;;  %v10160_v0 = vor.u32 %v14299_v57, %v10159_v18  ;;  %v7611_v20 = vpop.f32.mrf.mxu2  ;;  %v9727_v53 = vld [vmem:[#allocation5 + $0x1b8] sm:$0xf] }
 0x1a5   :  { %7869 = vmatpush.bf16.msra.mxu1 %v9848_v13  ;;  %v9992_v13 = vor.u32 %v14257_v11, %v9991_v29  ;;  %v9943_v29 = vld [vmem:[#allocation5 + $0x368] sm:$0xf]  ;;  %v14245_v11 = vld [vmem:[#allocation5 + $0x37c] sm:$0xf0]  ;;  %v9919_v19 = vld [vmem:[#allocation5 + $0x338] sm:$0xf] }
 0x1a6   :  { %7883 = vmatpush.bf16.msra.mxu2 %v10040_v42  ;;  %v7597_v42 = vpop.f32.mrf.mxu1 }
 0x1a7   :  { %7897 = vmatpush.bf16.msra.mxu3 %v10232_v62  ;;  %v10184_v62 = vor.u32 %v14305_v16, %v10183_v30  ;;  %v7598_v61 = vadd.f32 %v7597_v42, %v7584_v15  ;;  %v10135_v30 = vld [vmem:[#allocation5 + $0x4e8] sm:$0xf]  ;;  %v14293_v16 = vld [vmem:[#allocation5 + $0x4fc] sm:$0xf0]  ;;  %v9944_v42 = vor.u32 %v14245_v11, %v9943_v29 }
 0x1a8   :  { %7856 = vmatpush.bf16.msra.mxu0 %v9632_v22  ;;  %v9584_v22 = vor.u32 %v14155_v25, %v9583_v27  ;;  %v7625_v15 = vpop.f32.mrf.mxu3  ;;  %v9535_v27 = vld [vmem:[#allocation5 + $0x38] sm:$0xf]  ;;  %v14143_v25 = vld [vmem:[#allocation5 + $0x4c] sm:$0xf0]  ;;  %v10136_v57 = vor.u32 %v14293_v16, %v10135_v30  ;;  %v10087_v29 = vld [vmem:[#allocation5 + $0x488] sm:$0xf] }
 0x1a9   :  { %7870 = vmatpush.bf16.msra.mxu1 %v9824_v8  ;;  %v9968_v8 = vor.u32 %v14251_v63, %v9967_v23  ;;  %v7612_v24 = vadd.f32 %v7611_v20, %v7598_v61  ;;  %v14239_v23 = vld [vmem:[#allocation5 + $0x34c] sm:$0xf0]  ;;  %v10111_v61 = vld [vmem:[#allocation5 + $0x4b8] sm:$0xf]  ;;  %v9536_v18 = vor.u32 %v14143_v25, %v9535_v27  ;;  %v9895_v20 = vld [vmem:[#allocation5 + $0x308] sm:$0xf] }
 0x1aa   :  { %7884 = vmatpush.bf16.msra.mxu2 %v10016_v3  ;;  %v9559_v3 = vld [vmem:[#allocation5 + $0x68] sm:$0xf]  ;;  %v14287_v63 = vld [vmem:[#allocation5 + $0x4cc] sm:$0xf0]  ;;  %v14281_v11 = vld [vmem:[#allocation5 + $0x49c] sm:$0xf0] }
 0x1ab   :  { %7898 = vmatpush.bf16.msra.mxu3 %v10208_v28  ;;  %v14197_v28 = vld [vmem:[#allocation5 + $0x1fc] sm:$0xf0]  ;;  %v14371_v30 = vld [vmem:[#allocation5 + $0x76c] sm:$0xf0]  ;;  %v10639_v16 = vld [vmem:[#allocation5 + $0x8d8] sm:$0xf]  ;;  %v15742_v5 = vpop.f32.mrf.mxu0 }
 0x1ac   :  { %7857 = vmatpush.bf16.msra.mxu0 %v9608_v49  ;;  %v9560_v49 = vor.u32 %v14149_v7, %v9559_v3  ;;  %v14137_v3 = vld [vmem:[#allocation5 + $0x1c] sm:$0xf0]  ;;  %v9703_v7 = vld [vmem:[#allocation5 + $0x188] sm:$0xf]  ;;  %v10831_v27 = vld [vmem:[#allocation5 + $0xa58] sm:$0xf] }
 0x1ad   :  { %7871 = vmatpush.bf16.msra.mxu1 %v9800_v50  ;;  %v15740_v50 = vadd.f32 %v7625_v15, %v7612_v24  ;;  %v10447_v24 = vld [vmem:[#allocation5 + $0x758] sm:$0xf]  ;;  %v14467_v25 = vld [vmem:[#allocation5 + $0xa6c] sm:$0xf0]  ;;  %16307 = vst [vmem:[#allocation46_spill] sm:$0xff] %v15742_v5 }
 0x1ae   :  { %7885 = vmatpush.bf16.msra.mxu2 %v9992_v13  ;;  %v9752_v13 = vor.u32 %v14197_v28, %v9751_v9  ;;  %v14185_v9 = vld [vmem:[#allocation5 + $0x19c] sm:$0xf0]  ;;  %v10112_v28 = vor.u32 %v14287_v63, %v10111_v61  ;;  %v10832_v61 = vor.u32 %v14467_v25, %v10831_v27  ;;  %v10423_v63 = vld [vmem:[#allocation5 + $0x728] sm:$0xf]  ;;  %v14503_v27 = vld [vmem:[#allocation5 + $0xb8c] sm:$0xf0] }
 0x1af   :  { %7899 = vmatpush.bf16.msra.mxu3 %v10184_v62  ;;  %v14191_v62 = vld [vmem:[#allocation5 + $0x1cc] sm:$0xf0]  ;;  %v10375_v25 = vld [vmem:[#allocation5 + $0x6c8] sm:$0xf] }
 0x1b0   :  { %7858 = vmatpush.bf16.msra.mxu0 %v9584_v22  ;;  %v9511_v22 = vld [vmem:[#allocation5 + $0x8] sm:$0xf] }
 0x1b1   :  { %7872 = vmatpush.bf16.msra.mxu1 %v9776_v12  ;;  %v9728_v12 = vor.u32 %v14191_v62, %v9727_v53  ;;  %v9512_v15 = vor.u32 %v14137_v3, %v9511_v22  ;;  %v11023_v53 = vld [vmem:[#allocation5 + $0xbd8] sm:$0xf]  ;;  %v14515_v62 = vld [vmem:[#allocation5 + $0xbec] sm:$0xf0]  ;;  %v14413_v22 = vld [vmem:[#allocation5 + $0x8bc] sm:$0xf0] }
 0x1b2   :  { %7886 = vmatpush.bf16.msra.mxu2 %v9968_v8  ;;  %v9920_v8 = vor.u32 %v14239_v23, %v9919_v19  ;;  %v10448_v19 = vor.u32 %v14371_v30, %v10447_v24  ;;  %v10807_v3 = vld [vmem:[#allocation5 + $0xa28] sm:$0xf]  ;;  %v14407_v30 = vld [vmem:[#allocation5 + $0x88c] sm:$0xf0] }
 0x1b3   :  { %7900 = vmatpush.bf16.msra.mxu3 %v10160_v0  ;;  %v14233_v0 = vld [vmem:[#allocation5 + $0x31c] sm:$0xf0] }
 0x1b4   :  { %7859 = vmatpush.bf16.msra.mxu0 %v9560_v49  ;;  %v14419_v49 = vld [vmem:[#allocation5 + $0x8ec] sm:$0xf0] }
 0x1b5   :  { %7873 = vmatpush.bf16.msra.mxu1 %v9752_v13  ;;  %v9704_v13 = vor.u32 %v14185_v9, %v9703_v7  ;;  %v10640_v23 = vor.u32 %v14419_v49, %v10639_v16  ;;  %v15744_v7 = vpop.f32.mrf.mxu1  ;;  %v10424_v9 = vor.u32 %v14365_v52, %v10423_v63  ;;  %v10783_v16 = vld [vmem:[#allocation5 + $0x9f8] sm:$0xf] }
 0x1b6   :  { %7887 = vmatpush.bf16.msra.mxu2 %v9944_v42  ;;  %v9896_v42 = vor.u32 %v14233_v0, %v9895_v20  ;;  %16308 = vst [vmem:[#allocation47_spill] sm:$0xff] %v15744_v7  ;;  %v10616_v20 = vor.u32 %v14413_v22, %v10615_v14  ;;  %v10399_v0 = vld [vmem:[#allocation5 + $0x6f8] sm:$0xf]  ;;  %v14497_v22 = vld [vmem:[#allocation5 + $0xb5c] sm:$0xf0] }
 0x1b7   :  { %7901 = vmatpush.bf16.msra.mxu3 %v10136_v57  ;;  %v10088_v57 = vor.u32 %v14281_v11, %v10087_v29  ;;  %v14359_v29 = vld [vmem:[#allocation5 + $0x70c] sm:$0xf0]  ;;  %v10591_v11 = vld [vmem:[#allocation5 + $0x878] sm:$0xf]  ;;  %v14653_v7 = vld [vmem:[#allocation5 + $0x103c] sm:$0xf0] }
 0x1b8   :  { %7860 = vmatpush.bf16.msra.mxu0 %v9536_v18  ;;  %v11024_v18 = vor.u32 %v14515_v62, %v11023_v53  ;;  %v10975_v49 = vld [vmem:[#allocation5 + $0xb78] sm:$0xf]  ;;  %v10400_v52 = vor.u32 %v14359_v29, %v10399_v0  ;;  %v10592_v14 = vor.u32 %v14407_v30, %v10591_v11  ;;  %v15750_v53 = vpop.f32.mrf.mxu2  ;;  %v14347_v0 = vld [vmem:[#allocation5 + $0x6ac] sm:$0xf0] }
 0x1b9   :  { %7874 = vmatpush.bf16.msra.mxu1 %v9728_v12  ;;  %v10999_v12 = vld [vmem:[#allocation5 + $0xba8] sm:$0xf]  ;;  %16309 = vst [vmem:[#allocation48_spill] sm:$0xff] %v15750_v53  ;;  %v10976_v62 = vor.u32 %v14503_v27, %v10975_v49  ;;  %v10543_v29 = vld [vmem:[#allocation5 + $0x818] sm:$0xf] }
 0x1ba   :  { %7888 = vmatpush.bf16.msra.mxu2 %v9920_v8  ;;  %v14509_v8 = vld [vmem:[#allocation5 + $0xbbc] sm:$0xf0]  ;;  %v14395_v30 = vld [vmem:[#allocation5 + $0x82c] sm:$0xf0]  ;;  %v10927_v49 = vld [vmem:[#allocation5 + $0xb18] sm:$0xf] }
 0x1bb   :  { %7902 = vmatpush.bf16.msra.mxu3 %v10112_v28  ;;  %v10808_v28 = vor.u32 %v14461_v37, %v10807_v3  ;;  %v11000_v24 = vor.u32 %v14509_v8, %v10999_v12  ;;  %v14491_v27 = vld [vmem:[#allocation5 + $0xb2c] sm:$0xf0]  ;;  %v11383_v53 = vld [vmem:[#allocation5 + $0xea8] sm:$0xf] }
 0x1bc   :  { %7861 = vmatpush.bf16.msra.mxu0 %v9512_v15  ;;  %v14455_v15 = vld [vmem:[#allocation5 + $0xa0c] sm:$0xf0]  ;;  %v7639_v63 = vpop.f32.mrf.mxu0 }
 0x1bd   :  { %7875 = vmatpush.bf16.msra.mxu1 %v9704_v13  ;;  %v10784_v37 = vor.u32 %v14455_v15, %v10783_v16  ;;  %v14353_v13 = vld [vmem:[#allocation5 + $0x6dc] sm:$0xf0]  ;;  %v7640_v3 = vadd.f32 %v7639_v63, %v15740_v50  ;;  %v7653_v8 = vpop.f32.mrf.mxu1  ;;  %v10735_v16 = vld [vmem:[#allocation5 + $0x998] sm:$0xf]  ;;  %v14443_v15 = vld [vmem:[#allocation5 + $0x9ac] sm:$0xf0]  ;;  %v10544_v50 = vor.u32 %v14395_v30, %v10543_v29 }
 0x1be   :  { %7889 = vmatpush.bf16.msra.mxu2 %v9896_v42  ;;  %v10567_v42 = vld [vmem:[#allocation5 + $0x848] sm:$0xf]  ;;  %v10376_v12 = vor.u32 %v14353_v13, %v10375_v25  ;;  %v14341_v25 = vld [vmem:[#allocation5 + $0x67c] sm:$0xf0]  ;;  %v10495_v29 = vld [vmem:[#allocation5 + $0x7b8] sm:$0xf] }
 0x1bf   :  { %7903 = vmatpush.bf16.msra.mxu3 %v10088_v57  ;;  %7862 = vmatmul.bf16.vlgmr.msra.gmra.mxu0 %v15558_v58  ;;  %v14401_v57 = vld [vmem:[#allocation5 + $0x85c] sm:$0xf0]  ;;  %v10519_v13 = vld [vmem:[#allocation5 + $0x7e8] sm:$0xf]  ;;  %v14383_v30 = vld [vmem:[#allocation5 + $0x7cc] sm:$0xf0] }
 0x1c0   :  { %7910 = vmatpush.bf16.msrb.mxu0 %v10448_v19  ;;  %7876 = vmatmul.bf16.vlgmr.msra.gmra.mxu1 %v15564_v10  ;;  %v10759_v19 = vld [vmem:[#allocation5 + $0x9c8] sm:$0xf] }
 0x1c1   :  { %7924 = vmatpush.bf16.msrb.mxu1 %v10640_v23  ;;  %7890 = vmatmul.bf16.vlgmr.msra.gmra.mxu2 %v15560_v1  ;;  %v14449_v23 = vld [vmem:[#allocation5 + $0x9dc] sm:$0xf0] }
 0x1c2   :  { %7938 = vmatpush.bf16.msrb.mxu2 %v10832_v61  ;;  %7904 = vmatmul.bf16.vlgmr.msra.gmra.mxu3 %v15566_v17  ;;  %v15752_v61 = vpop.f32.mrf.mxu3 }
 0x1c3   :  { %7952 = vmatpush.bf16.msrb.mxu3 %v11024_v18  ;;  %16310 = vst [vmem:[#allocation49_spill] sm:$0xff] %v15752_v61  ;;  %v10951_v18 = vld [vmem:[#allocation5 + $0xb48] sm:$0xf]  ;;  %v14557_v61 = vld [vmem:[#allocation5 + $0xd3c] sm:$0xf0] }
 0x1c4   :  { %7911 = vmatpush.bf16.msrb.mxu0 %v10424_v9  ;;  %v10568_v9 = vor.u32 %v14401_v57, %v10567_v42  ;;  %v10952_v11 = vor.u32 %v14497_v22, %v10951_v18  ;;  %v10928_v42 = vor.u32 %v14491_v27, %v10927_v49  ;;  %v7667_v57 = vpop.f32.mrf.mxu2  ;;  %v10903_v22 = vld [vmem:[#allocation5 + $0xae8] sm:$0xf]  ;;  %v14479_v49 = vld [vmem:[#allocation5 + $0xacc] sm:$0xf0]  ;;  %v15757_v5 = vpop.f32.mrf.mxu0 }
 0x1c5   :  { %7925 = vmatpush.bf16.msrb.mxu1 %v10616_v20  ;;  %v10760_v20 = vor.u32 %v14449_v23, %v10759_v19  ;;  %v10711_v19 = vld [vmem:[#allocation5 + $0x968] sm:$0xf]  ;;  %v14437_v23 = vld [vmem:[#allocation5 + $0x97c] sm:$0xf0]  ;;  %16311 = vst [vmem:[#allocation50_spill] sm:$0xff] %v15757_v5 }
 0x1c6   :  { %7939 = vmatpush.bf16.msrb.mxu2 %v10808_v28  ;;  %v10351_v28 = vld [vmem:[#allocation5 + $0x698] sm:$0xf] }
 0x1c7   :  { %7953 = vmatpush.bf16.msrb.mxu3 %v11000_v24  ;;  %v7654_v24 = vadd.f32 %v7653_v8, %v7640_v3  ;;  %v14485_v3 = vld [vmem:[#allocation5 + $0xafc] sm:$0xf0] }
 0x1c8   :  { %7912 = vmatpush.bf16.msrb.mxu0 %v10400_v52  ;;  %v10352_v52 = vor.u32 %v14347_v0, %v10351_v28  ;;  %v10303_v28 = vld [vmem:[#allocation5 + $0x638] sm:$0xf]  ;;  %v14335_v0 = vld [vmem:[#allocation5 + $0x64c] sm:$0xf0] }
 0x1c9   :  { %7926 = vmatpush.bf16.msrb.mxu1 %v10592_v14  ;;  %v10736_v14 = vor.u32 %v14443_v15, %v10735_v16  ;;  %v7668_v63 = vadd.f32 %v7667_v57, %v7654_v24  ;;  %v10687_v16 = vld [vmem:[#allocation5 + $0x938] sm:$0xf]  ;;  %v14431_v15 = vld [vmem:[#allocation5 + $0x94c] sm:$0xf0]  ;;  %v10304_v27 = vor.u32 %v14335_v0, %v10303_v28  ;;  %v10663_v57 = vld [vmem:[#allocation5 + $0x908] sm:$0xf] }
 0x1ca   :  { %7940 = vmatpush.bf16.msrb.mxu2 %v10784_v37  ;;  %v10327_v37 = vld [vmem:[#allocation5 + $0x668] sm:$0xf]  ;;  %v7681_v18 = vpop.f32.mrf.mxu3  ;;  %v10879_v24 = vld [vmem:[#allocation5 + $0xab8] sm:$0xf]  ;;  %v14659_v0 = vld [vmem:[#allocation5 + $0x106c] sm:$0xf0] }
 0x1cb   :  { %7954 = vmatpush.bf16.msrb.mxu3 %v10976_v62  ;;  %v14389_v62 = vld [vmem:[#allocation5 + $0x7fc] sm:$0xf0]  ;;  %v15755_v8 = vadd.f32 %v7681_v18, %v7668_v63  ;;  %v11215_v63 = vld [vmem:[#allocation5 + $0xd58] sm:$0xf]  ;;  %v14563_v18 = vld [vmem:[#allocation5 + $0xd6c] sm:$0xf0] }
 0x1cc   :  { %7913 = vmatpush.bf16.msrb.mxu0 %v10376_v12  ;;  %v10328_v12 = vor.u32 %v14341_v25, %v10327_v37  ;;  %v14329_v37 = vld [vmem:[#allocation5 + $0x61c] sm:$0xf0]  ;;  %v10471_v25 = vld [vmem:[#allocation5 + $0x788] sm:$0xf]  ;;  %v11599_v28 = vld [vmem:[#allocation5 + $0x1058] sm:$0xf] }
 0x1cd   :  { %7927 = vmatpush.bf16.msrb.mxu1 %v10568_v9  ;;  %v10520_v9 = vor.u32 %v14389_v62, %v10519_v13  ;;  %v14377_v13 = vld [vmem:[#allocation5 + $0x79c] sm:$0xf0]  ;;  %v10880_v62 = vor.u32 %v14479_v49, %v10879_v24  ;;  %v11600_v24 = vor.u32 %v14659_v0, %v11599_v28  ;;  %v11191_v49 = vld [vmem:[#allocation5 + $0xd28] sm:$0xf] }
 0x1ce   :  { %7941 = vmatpush.bf16.msrb.mxu2 %v10760_v20  ;;  %v10712_v20 = vor.u32 %v14437_v23, %v10711_v19  ;;  %v10855_v19 = vld [vmem:[#allocation5 + $0xa88] sm:$0xf]  ;;  %v14473_v23 = vld [vmem:[#allocation5 + $0xa9c] sm:$0xf0] }
 0x1cf   :  { %7955 = vmatpush.bf16.msrb.mxu3 %v10952_v11  ;;  %v10904_v11 = vor.u32 %v14485_v3, %v10903_v22  ;;  %v11407_v22 = vld [vmem:[#allocation5 + $0xed8] sm:$0xf]  ;;  %v11143_v0 = vld [vmem:[#allocation5 + $0xcc8] sm:$0xf] }
 0x1d0   :  { %7914 = vmatpush.bf16.msrb.mxu0 %v10352_v52  ;;  %v10279_v52 = vld [vmem:[#allocation5 + $0x608] sm:$0xf] }
 0x1d1   :  { %7928 = vmatpush.bf16.msrb.mxu1 %v10544_v50  ;;  %v10496_v50 = vor.u32 %v14383_v30, %v10495_v29  ;;  %v10280_v3 = vor.u32 %v14329_v37, %v10279_v52  ;;  %v11791_v29 = vld [vmem:[#allocation5 + $0x11d8] sm:$0xf]  ;;  %v14707_v30 = vld [vmem:[#allocation5 + $0x11ec] sm:$0xf0]  ;;  %v14605_v52 = vld [vmem:[#allocation5 + $0xebc] sm:$0xf0] }
 0x1d2   :  { %7942 = vmatpush.bf16.msrb.mxu2 %v10736_v14  ;;  %v10688_v14 = vor.u32 %v14431_v15, %v10687_v16  ;;  %v11216_v16 = vor.u32 %v14563_v18, %v11215_v63  ;;  %v11575_v37 = vld [vmem:[#allocation5 + $0x1028] sm:$0xf]  ;;  %v14599_v18 = vld [vmem:[#allocation5 + $0xe8c] sm:$0xf0] }
 0x1d3   :  { %7956 = vmatpush.bf16.msrb.mxu3 %v10928_v42  ;;  %v14425_v42 = vld [vmem:[#allocation5 + $0x91c] sm:$0xf0] }
 0x1d4   :  { %7915 = vmatpush.bf16.msrb.mxu0 %v10328_v12  ;;  %v14611_v12 = vld [vmem:[#allocation5 + $0xeec] sm:$0xf0] }
 0x1d5   :  { %7929 = vmatpush.bf16.msrb.mxu1 %v10520_v9  ;;  %v10472_v9 = vor.u32 %v14377_v13, %v10471_v25  ;;  %v11408_v15 = vor.u32 %v14611_v12, %v11407_v22  ;;  %v15759_v25 = vpop.f32.mrf.mxu1  ;;  %v11192_v13 = vor.u32 %v14557_v61, %v11191_v49  ;;  %v11551_v22 = vld [vmem:[#allocation5 + $0xff8] sm:$0xf]  ;;  %v14695_v61 = vld [vmem:[#allocation5 + $0x118c] sm:$0xf0] }
 0x1d6   :  { %7943 = vmatpush.bf16.msrb.mxu2 %v10712_v20  ;;  %v10664_v20 = vor.u32 %v14425_v42, %v10663_v57  ;;  %16312 = vst [vmem:[#allocation51_spill] sm:$0xff] %v15759_v25  ;;  %v11384_v57 = vor.u32 %v14605_v52, %v11383_v53  ;;  %v11167_v42 = vld [vmem:[#allocation5 + $0xcf8] sm:$0xf]  ;;  %v14689_v52 = vld [vmem:[#allocation5 + $0x115c] sm:$0xf0] }
 0x1d7   :  { %7957 = vmatpush.bf16.msrb.mxu3 %v10904_v11  ;;  %v10856_v11 = vor.u32 %v14473_v23, %v10855_v19  ;;  %v14551_v19 = vld [vmem:[#allocation5 + $0xd0c] sm:$0xf0]  ;;  %v11359_v23 = vld [vmem:[#allocation5 + $0xe78] sm:$0xf]  ;;  %v14845_v25 = vld [vmem:[#allocation5 + $0x163c] sm:$0xf0] }
 0x1d8   :  { %7916 = vmatpush.bf16.msrb.mxu0 %v10304_v27  ;;  %v11792_v27 = vor.u32 %v14707_v30, %v11791_v29  ;;  %v11743_v12 = vld [vmem:[#allocation5 + $0x1178] sm:$0xf]  ;;  %v11360_v53 = vor.u32 %v14599_v18, %v11359_v23  ;;  %v15765_v29 = vpop.f32.mrf.mxu2  ;;  %v14587_v18 = vld [vmem:[#allocation5 + $0xe2c] sm:$0xf0] }
 0x1d9   :  { %7930 = vmatpush.bf16.msrb.mxu1 %v10496_v50  ;;  %v11767_v50 = vld [vmem:[#allocation5 + $0x11a8] sm:$0xf]  ;;  %16313 = vst [vmem:[#allocation52_spill] sm:$0xff] %v15765_v29  ;;  %v11744_v30 = vor.u32 %v14695_v61, %v11743_v12  ;;  %v11695_v12 = vld [vmem:[#allocation5 + $0x1118] sm:$0xf] }
 0x1da   :  { %7944 = vmatpush.bf16.msrb.mxu2 %v10688_v14  ;;  %v14701_v14 = vld [vmem:[#allocation5 + $0x11bc] sm:$0xf0]  ;;  %v14683_v61 = vld [vmem:[#allocation5 + $0x112c] sm:$0xf0]  ;;  %v12151_v29 = vld [vmem:[#allocation5 + $0x14a8] sm:$0xf] }
 0x1db   :  { %7958 = vmatpush.bf16.msrb.mxu3 %v10880_v62  ;;  %v11576_v62 = vor.u32 %v14653_v7, %v11575_v37  ;;  %v11768_v63 = vor.u32 %v14701_v14, %v11767_v50  ;;  %v11168_v7 = vor.u32 %v14551_v19, %v11167_v42  ;;  %v14539_v42 = vld [vmem:[#allocation5 + $0xcac] sm:$0xf0]  ;;  %v11311_v19 = vld [vmem:[#allocation5 + $0xe18] sm:$0xf] }
 0x1dc   :  { %7917 = vmatpush.bf16.msrb.mxu0 %v10280_v3  ;;  %v14647_v3 = vld [vmem:[#allocation5 + $0x100c] sm:$0xf0]  ;;  %v7695_v49 = vpop.f32.mrf.mxu0 }
 0x1dd   :  { %7931 = vmatpush.bf16.msrb.mxu1 %v10472_v9  ;;  %v11552_v28 = vor.u32 %v14647_v3, %v11551_v22  ;;  %v14545_v9 = vld [vmem:[#allocation5 + $0xcdc] sm:$0xf0]  ;;  %v7696_v37 = vadd.f32 %v7695_v49, %v15755_v8  ;;  %v7709_v14 = vpop.f32.mrf.mxu1  ;;  %v11503_v22 = vld [vmem:[#allocation5 + $0xf98] sm:$0xf]  ;;  %v14635_v3 = vld [vmem:[#allocation5 + $0xfac] sm:$0xf0]  ;;  %v11312_v8 = vor.u32 %v14587_v18, %v11311_v19 }
 0x1de   :  { %7945 = vmatpush.bf16.msrb.mxu2 %v10664_v20  ;;  %v11335_v20 = vld [vmem:[#allocation5 + $0xe48] sm:$0xf]  ;;  %v11144_v50 = vor.u32 %v14545_v9, %v11143_v0  ;;  %v14533_v0 = vld [vmem:[#allocation5 + $0xc7c] sm:$0xf0]  ;;  %v11263_v19 = vld [vmem:[#allocation5 + $0xdb8] sm:$0xf] }
 0x1df   :  { %7959 = vmatpush.bf16.msrb.mxu3 %v10856_v11  ;;  %7918 = vmatmul.bf16.vlgmr.msrb.gmra.mxu0 %v15570_v39  ;;  %v14593_v11 = vld [vmem:[#allocation5 + $0xe5c] sm:$0xf0]  ;;  %v11287_v9 = vld [vmem:[#allocation5 + $0xde8] sm:$0xf]  ;;  %v14575_v18 = vld [vmem:[#allocation5 + $0xdcc] sm:$0xf0] }
 0x1e0   :  { %7966 = vmatpush.bf16.msra.mxu0 %v11216_v16  ;;  %7932 = vmatmul.bf16.vlgmr.msrb.gmra.mxu1 %v15574_v44  ;;  %v11527_v16 = vld [vmem:[#allocation5 + $0xfc8] sm:$0xf] }
 0x1e1   :  { %7980 = vmatpush.bf16.msra.mxu1 %v11408_v15  ;;  %7946 = vmatmul.bf16.vlgmr.msrb.gmra.mxu2 %v15572_v43  ;;  %v14641_v15 = vld [vmem:[#allocation5 + $0xfdc] sm:$0xf0] }
 0x1e2   :  { %7994 = vmatpush.bf16.msra.mxu2 %v11600_v24  ;;  %7960 = vmatmul.bf16.vlgmr.msrb.gmra.mxu3 %v15576_v47  ;;  %v15767_v24 = vpop.f32.mrf.mxu3 }
 0x1e3   :  { %8008 = vmatpush.bf16.msra.mxu3 %v11792_v27  ;;  %16314 = vst [vmem:[#allocation53_spill] sm:$0xff] %v15767_v24  ;;  %v11719_v27 = vld [vmem:[#allocation5 + $0x1148] sm:$0xf]  ;;  %v14749_v24 = vld [vmem:[#allocation5 + $0x133c] sm:$0xf0] }
 0x1e4   :  { %7967 = vmatpush.bf16.msra.mxu0 %v11192_v13  ;;  %v11336_v13 = vor.u32 %v14593_v11, %v11335_v20  ;;  %v11720_v23 = vor.u32 %v14689_v52, %v11719_v27  ;;  %v11696_v20 = vor.u32 %v14683_v61, %v11695_v12  ;;  %v7723_v11 = vpop.f32.mrf.mxu2  ;;  %v11671_v52 = vld [vmem:[#allocation5 + $0x10e8] sm:$0xf]  ;;  %v14671_v12 = vld [vmem:[#allocation5 + $0x10cc] sm:$0xf0]  ;;  %v15772_v5 = vpop.f32.mrf.mxu0 }
 0x1e5   :  { %7981 = vmatpush.bf16.msra.mxu1 %v11384_v57  ;;  %v11528_v57 = vor.u32 %v14641_v15, %v11527_v16  ;;  %v11479_v16 = vld [vmem:[#allocation5 + $0xf68] sm:$0xf]  ;;  %v14629_v15 = vld [vmem:[#allocation5 + $0xf7c] sm:$0xf0]  ;;  %16315 = vst [vmem:[#allocation54_spill] sm:$0xff] %v15772_v5 }
 0x1e6   :  { %7995 = vmatpush.bf16.msra.mxu2 %v11576_v62  ;;  %v11119_v62 = vld [vmem:[#allocation5 + $0xc98] sm:$0xf] }
 0x1e7   :  { %8009 = vmatpush.bf16.msra.mxu3 %v11768_v63  ;;  %v7710_v63 = vadd.f32 %v7709_v14, %v7696_v37  ;;  %v14677_v37 = vld [vmem:[#allocation5 + $0x10fc] sm:$0xf0] }
 0x1e8   :  { %7968 = vmatpush.bf16.msra.mxu0 %v11168_v7  ;;  %v11120_v7 = vor.u32 %v14539_v42, %v11119_v62  ;;  %v11071_v62 = vld [vmem:[#allocation5 + $0xc38] sm:$0xf]  ;;  %v14527_v42 = vld [vmem:[#allocation5 + $0xc4c] sm:$0xf0] }
 0x1e9   :  { %7982 = vmatpush.bf16.msra.mxu1 %v11360_v53  ;;  %v11504_v53 = vor.u32 %v14635_v3, %v11503_v22  ;;  %v7724_v49 = vadd.f32 %v7723_v11, %v7710_v63  ;;  %v11455_v22 = vld [vmem:[#allocation5 + $0xf38] sm:$0xf]  ;;  %v14623_v3 = vld [vmem:[#allocation5 + $0xf4c] sm:$0xf0]  ;;  %v11072_v61 = vor.u32 %v14527_v42, %v11071_v62  ;;  %v11431_v11 = vld [vmem:[#allocation5 + $0xf08] sm:$0xf] }
 0x1ea   :  { %7996 = vmatpush.bf16.msra.mxu2 %v11552_v28  ;;  %v11095_v28 = vld [vmem:[#allocation5 + $0xc68] sm:$0xf]  ;;  %v7737_v27 = vpop.f32.mrf.mxu3  ;;  %v11647_v63 = vld [vmem:[#allocation5 + $0x10b8] sm:$0xf]  ;;  %v14851_v42 = vld [vmem:[#allocation5 + $0x166c] sm:$0xf0] }
 0x1eb   :  { %8010 = vmatpush.bf16.msra.mxu3 %v11744_v30  ;;  %v14581_v30 = vld [vmem:[#allocation5 + $0xdfc] sm:$0xf0]  ;;  %v15770_v14 = vadd.f32 %v7737_v27, %v7724_v49  ;;  %v11983_v49 = vld [vmem:[#allocation5 + $0x1358] sm:$0xf]  ;;  %v14755_v27 = vld [vmem:[#allocation5 + $0x136c] sm:$0xf0] }
 0x1ec   :  { %7969 = vmatpush.bf16.msra.mxu0 %v11144_v50  ;;  %v11096_v50 = vor.u32 %v14533_v0, %v11095_v28  ;;  %v14521_v28 = vld [vmem:[#allocation5 + $0xc1c] sm:$0xf0]  ;;  %v11239_v0 = vld [vmem:[#allocation5 + $0xd88] sm:$0xf]  ;;  %v12367_v62 = vld [vmem:[#allocation5 + $0x1658] sm:$0xf] }
 0x1ed   :  { %7983 = vmatpush.bf16.msra.mxu1 %v11336_v13  ;;  %v11288_v13 = vor.u32 %v14581_v30, %v11287_v9  ;;  %v14569_v9 = vld [vmem:[#allocation5 + $0xd9c] sm:$0xf0]  ;;  %v11648_v30 = vor.u32 %v14671_v12, %v11647_v63  ;;  %v12368_v63 = vor.u32 %v14851_v42, %v12367_v62  ;;  %v11959_v12 = vld [vmem:[#allocation5 + $0x1328] sm:$0xf] }
 0x1ee   :  { %7997 = vmatpush.bf16.msra.mxu2 %v11528_v57  ;;  %v11480_v57 = vor.u32 %v14629_v15, %v11479_v16  ;;  %v11623_v16 = vld [vmem:[#allocation5 + $0x1088] sm:$0xf]  ;;  %v14665_v15 = vld [vmem:[#allocation5 + $0x109c] sm:$0xf0] }
 0x1ef   :  { %8011 = vmatpush.bf16.msra.mxu3 %v11720_v23  ;;  %v11672_v23 = vor.u32 %v14677_v37, %v11671_v52  ;;  %v12175_v52 = vld [vmem:[#allocation5 + $0x14d8] sm:$0xf]  ;;  %v11911_v42 = vld [vmem:[#allocation5 + $0x12c8] sm:$0xf] }
 0x1f0   :  { %7970 = vmatpush.bf16.msra.mxu0 %v11120_v7  ;;  %v11047_v7 = vld [vmem:[#allocation5 + $0xc08] sm:$0xf] }
 0x1f1   :  { %7984 = vmatpush.bf16.msra.mxu1 %v11312_v8  ;;  %v11264_v8 = vor.u32 %v14575_v18, %v11263_v19  ;;  %v11048_v37 = vor.u32 %v14521_v28, %v11047_v7  ;;  %v12559_v19 = vld [vmem:[#allocation5 + $0x17d8] sm:$0xf]  ;;  %v14899_v18 = vld [vmem:[#allocation5 + $0x17ec] sm:$0xf0]  ;;  %v14797_v7 = vld [vmem:[#allocation5 + $0x14bc] sm:$0xf0] }
 0x1f2   :  { %7998 = vmatpush.bf16.msra.mxu2 %v11504_v53  ;;  %v11456_v53 = vor.u32 %v14623_v3, %v11455_v22  ;;  %v11984_v22 = vor.u32 %v14755_v27, %v11983_v49  ;;  %v12343_v28 = vld [vmem:[#allocation5 + $0x1628] sm:$0xf]  ;;  %v14791_v27 = vld [vmem:[#allocation5 + $0x148c] sm:$0xf0] }
 0x1f3   :  { %8012 = vmatpush.bf16.msra.mxu3 %v11696_v20  ;;  %v14617_v20 = vld [vmem:[#allocation5 + $0xf1c] sm:$0xf0] }
 0x1f4   :  { %7971 = vmatpush.bf16.msra.mxu0 %v11096_v50  ;;  %v14803_v50 = vld [vmem:[#allocation5 + $0x14ec] sm:$0xf0] }
 0x1f5   :  { %7985 = vmatpush.bf16.msra.mxu1 %v11288_v13  ;;  %v11240_v13 = vor.u32 %v14569_v9, %v11239_v0  ;;  %v12176_v3 = vor.u32 %v14803_v50, %v12175_v52  ;;  %v15774_v0 = vpop.f32.mrf.mxu1  ;;  %v11960_v9 = vor.u32 %v14749_v24, %v11959_v12  ;;  %v12319_v52 = vld [vmem:[#allocation5 + $0x15f8] sm:$0xf]  ;;  %v14887_v24 = vld [vmem:[#allocation5 + $0x178c] sm:$0xf0] }
 0x1f6   :  { %7999 = vmatpush.bf16.msra.mxu2 %v11480_v57  ;;  %v11432_v57 = vor.u32 %v14617_v20, %v11431_v11  ;;  %16316 = vst [vmem:[#allocation55_spill] sm:$0xff] %v15774_v0  ;;  %v12152_v11 = vor.u32 %v14797_v7, %v12151_v29  ;;  %v11935_v20 = vld [vmem:[#allocation5 + $0x12f8] sm:$0xf]  ;;  %v14881_v7 = vld [vmem:[#allocation5 + $0x175c] sm:$0xf0] }
 0x1f7   :  { %8013 = vmatpush.bf16.msra.mxu3 %v11672_v23  ;;  %v11624_v23 = vor.u32 %v14665_v15, %v11623_v16  ;;  %v14743_v16 = vld [vmem:[#allocation5 + $0x130c] sm:$0xf0]  ;;  %v12127_v15 = vld [vmem:[#allocation5 + $0x1478] sm:$0xf]  ;;  %v15037_v0 = vld [vmem:[#allocation5 + $0x1c3c] sm:$0xf0] }
 0x1f8   :  { %7972 = vmatpush.bf16.msra.mxu0 %v11072_v61  ;;  %v12560_v61 = vor.u32 %v14899_v18, %v12559_v19  ;;  %v12511_v50 = vld [vmem:[#allocation5 + $0x1778] sm:$0xf]  ;;  %v12128_v29 = vor.u32 %v14791_v27, %v12127_v15  ;;  %v15780_v19 = vpop.f32.mrf.mxu2  ;;  %v14779_v27 = vld [vmem:[#allocation5 + $0x142c] sm:$0xf0] }
 0x1f9   :  { %7986 = vmatpush.bf16.msra.mxu1 %v11264_v8  ;;  %v12535_v8 = vld [vmem:[#allocation5 + $0x17a8] sm:$0xf]  ;;  %16317 = vst [vmem:[#allocation56_spill] sm:$0xff] %v15780_v19  ;;  %v12512_v18 = vor.u32 %v14887_v24, %v12511_v50  ;;  %v12463_v50 = vld [vmem:[#allocation5 + $0x1718] sm:$0xf] }
 0x1fa   :  { %8000 = vmatpush.bf16.msra.mxu2 %v11456_v53  ;;  %v14893_v53 = vld [vmem:[#allocation5 + $0x17bc] sm:$0xf0]  ;;  %v14875_v24 = vld [vmem:[#allocation5 + $0x172c] sm:$0xf0]  ;;  %v12919_v19 = vld [vmem:[#allocation5 + $0x1aa8] sm:$0xf] }
 0x1fb   :  { %8014 = vmatpush.bf16.msra.mxu3 %v11648_v30  ;;  %v12344_v30 = vor.u32 %v14845_v25, %v12343_v28  ;;  %v12536_v49 = vor.u32 %v14893_v53, %v12535_v8  ;;  %v11936_v25 = vor.u32 %v14743_v16, %v11935_v20  ;;  %v14731_v20 = vld [vmem:[#allocation5 + $0x12ac] sm:$0xf0]  ;;  %v12079_v16 = vld [vmem:[#allocation5 + $0x1418] sm:$0xf] }
 0x1fc   :  { %7973 = vmatpush.bf16.msra.mxu0 %v11048_v37  ;;  %v14839_v37 = vld [vmem:[#allocation5 + $0x160c] sm:$0xf0]  ;;  %v7751_v12 = vpop.f32.mrf.mxu0 }
 0x1fd   :  { %7987 = vmatpush.bf16.msra.mxu1 %v11240_v13  ;;  %v12320_v62 = vor.u32 %v14839_v37, %v12319_v52  ;;  %v14737_v13 = vld [vmem:[#allocation5 + $0x12dc] sm:$0xf0]  ;;  %v7752_v28 = vadd.f32 %v7751_v12, %v15770_v14  ;;  %v7765_v53 = vpop.f32.mrf.mxu1  ;;  %v12271_v52 = vld [vmem:[#allocation5 + $0x1598] sm:$0xf]  ;;  %v14827_v37 = vld [vmem:[#allocation5 + $0x15ac] sm:$0xf0]  ;;  %v12080_v14 = vor.u32 %v14779_v27, %v12079_v16 }
 0x1fe   :  { %8001 = vmatpush.bf16.msra.mxu2 %v11432_v57  ;;  %v12103_v57 = vld [vmem:[#allocation5 + $0x1448] sm:$0xf]  ;;  %v11912_v8 = vor.u32 %v14737_v13, %v11911_v42  ;;  %v14725_v42 = vld [vmem:[#allocation5 + $0x127c] sm:$0xf0]  ;;  %v12031_v16 = vld [vmem:[#allocation5 + $0x13b8] sm:$0xf] }
 0x1ff   :  { %8015 = vmatpush.bf16.msra.mxu3 %v11624_v23  ;;  %7974 = vmatmul.bf16.vlgmr.msra.gmra.mxu0 %v15582_v31  ;;  %v14785_v23 = vld [vmem:[#allocation5 + $0x145c] sm:$0xf0]  ;;  %v12055_v13 = vld [vmem:[#allocation5 + $0x13e8] sm:$0xf]  ;;  %v14767_v27 = vld [vmem:[#allocation5 + $0x13cc] sm:$0xf0] }
 0x200   :  { %8022 = vmatpush.bf16.msrb.mxu0 %v11984_v22  ;;  %7988 = vmatmul.bf16.vlgmr.msra.gmra.mxu1 %v15586_v36  ;;  %v12295_v22 = vld [vmem:[#allocation5 + $0x15c8] sm:$0xf] }
 0x201   :  { %8036 = vmatpush.bf16.msrb.mxu1 %v12176_v3  ;;  %8002 = vmatmul.bf16.vlgmr.msra.gmra.mxu2 %v15584_v35  ;;  %v14833_v3 = vld [vmem:[#allocation5 + $0x15dc] sm:$0xf0] }
 0x202   :  { %8050 = vmatpush.bf16.msrb.mxu2 %v12368_v63  ;;  %8016 = vmatmul.bf16.vlgmr.msra.gmra.mxu3 %v15588_v40  ;;  %v15782_v63 = vpop.f32.mrf.mxu3 }
 0x203   :  { %8064 = vmatpush.bf16.msrb.mxu3 %v12560_v61  ;;  %16318 = vst [vmem:[#allocation57_spill] sm:$0xff] %v15782_v63  ;;  %v12487_v61 = vld [vmem:[#allocation5 + $0x1748] sm:$0xf]  ;;  %v14941_v63 = vld [vmem:[#allocation5 + $0x193c] sm:$0xf0] }
 0x204   :  { %8023 = vmatpush.bf16.msrb.mxu0 %v11960_v9  ;;  %v12104_v9 = vor.u32 %v14785_v23, %v12103_v57  ;;  %v12488_v15 = vor.u32 %v14881_v7, %v12487_v61  ;;  %v12464_v57 = vor.u32 %v14875_v24, %v12463_v50  ;;  %v7779_v23 = vpop.f32.mrf.mxu2  ;;  %v12439_v7 = vld [vmem:[#allocation5 + $0x16e8] sm:$0xf]  ;;  %v14863_v50 = vld [vmem:[#allocation5 + $0x16cc] sm:$0xf0]  ;;  %v15787_v5 = vpop.f32.mrf.mxu0 }
 0x205   :  { %8037 = vmatpush.bf16.msrb.mxu1 %v12152_v11  ;;  %v12296_v11 = vor.u32 %v14833_v3, %v12295_v22  ;;  %v12247_v22 = vld [vmem:[#allocation5 + $0x1568] sm:$0xf]  ;;  %v14821_v3 = vld [vmem:[#allocation5 + $0x157c] sm:$0xf0]  ;;  %16319 = vst [vmem:[#allocation58_spill] sm:$0xff] %v15787_v5 }
 0x206   :  { %8051 = vmatpush.bf16.msrb.mxu2 %v12344_v30  ;;  %v11887_v30 = vld [vmem:[#allocation5 + $0x1298] sm:$0xf]  ;;  %v14266_v5 = vld [vmem:[#allocation5 + $0x42c] sm:$0xf] }
 0x207   :  { %8065 = vmatpush.bf16.msrb.mxu3 %v12536_v49  ;;  %v7766_v49 = vadd.f32 %v7765_v53, %v7752_v28  ;;  %v14869_v28 = vld [vmem:[#allocation5 + $0x16fc] sm:$0xf0] }
 0x208   :  { %8024 = vmatpush.bf16.msrb.mxu0 %v11936_v25  ;;  %v11888_v25 = vor.u32 %v14731_v20, %v11887_v30  ;;  %v11839_v30 = vld [vmem:[#allocation5 + $0x1238] sm:$0xf]  ;;  %v14719_v20 = vld [vmem:[#allocation5 + $0x124c] sm:$0xf0] }
 0x209   :  { %8038 = vmatpush.bf16.msrb.mxu1 %v12128_v29  ;;  %v12272_v29 = vor.u32 %v14827_v37, %v12271_v52  ;;  %v7780_v12 = vadd.f32 %v7779_v23, %v7766_v49  ;;  %v12223_v52 = vld [vmem:[#allocation5 + $0x1538] sm:$0xf]  ;;  %v14815_v37 = vld [vmem:[#allocation5 + $0x154c] sm:$0xf0]  ;;  %v11840_v24 = vor.u32 %v14719_v20, %v11839_v30  ;;  %v12199_v23 = vld [vmem:[#allocation5 + $0x1508] sm:$0xf] }
 0x20a   :  { %8052 = vmatpush.bf16.msrb.mxu2 %v12320_v62  ;;  %v11863_v62 = vld [vmem:[#allocation5 + $0x1268] sm:$0xf]  ;;  %v7793_v61 = vpop.f32.mrf.mxu3  ;;  %v12415_v49 = vld [vmem:[#allocation5 + $0x16b8] sm:$0xf]  ;;  %v15043_v20 = vld [vmem:[#allocation5 + $0x1c6c] sm:$0xf0] }
 0x20b   :  { %8066 = vmatpush.bf16.msrb.mxu3 %v12512_v18  ;;  %v14773_v18 = vld [vmem:[#allocation5 + $0x13fc] sm:$0xf0]  ;;  %v15785_v53 = vadd.f32 %v7793_v61, %v7780_v12  ;;  %v12751_v12 = vld [vmem:[#allocation5 + $0x1958] sm:$0xf]  ;;  %v14947_v61 = vld [vmem:[#allocation5 + $0x196c] sm:$0xf0] }
 0x20c   :  { %8025 = vmatpush.bf16.msrb.mxu0 %v11912_v8  ;;  %v11864_v8 = vor.u32 %v14725_v42, %v11863_v62  ;;  %v14713_v62 = vld [vmem:[#allocation5 + $0x121c] sm:$0xf0]  ;;  %v12007_v42 = vld [vmem:[#allocation5 + $0x1388] sm:$0xf]  ;;  %v13135_v30 = vld [vmem:[#allocation5 + $0x1c58] sm:$0xf] }
 0x20d   :  { %8039 = vmatpush.bf16.msrb.mxu1 %v12104_v9  ;;  %v12056_v9 = vor.u32 %v14773_v18, %v12055_v13  ;;  %v14761_v13 = vld [vmem:[#allocation5 + $0x139c] sm:$0xf0]  ;;  %v12416_v18 = vor.u32 %v14863_v50, %v12415_v49  ;;  %v13136_v49 = vor.u32 %v15043_v20, %v13135_v30  ;;  %v12727_v50 = vld [vmem:[#allocation5 + $0x1928] sm:$0xf] }
 0x20e   :  { %8053 = vmatpush.bf16.msrb.mxu2 %v12296_v11  ;;  %v12248_v11 = vor.u32 %v14821_v3, %v12247_v22  ;;  %v12391_v22 = vld [vmem:[#allocation5 + $0x1688] sm:$0xf]  ;;  %v14857_v3 = vld [vmem:[#allocation5 + $0x169c] sm:$0xf0] }
 0x20f   :  { %8067 = vmatpush.bf16.msrb.mxu3 %v12488_v15  ;;  %v12440_v15 = vor.u32 %v14869_v28, %v12439_v7  ;;  %v12943_v7 = vld [vmem:[#allocation5 + $0x1ad8] sm:$0xf]  ;;  %v12679_v20 = vld [vmem:[#allocation5 + $0x18c8] sm:$0xf] }
 0x210   :  { %8026 = vmatpush.bf16.msrb.mxu0 %v11888_v25  ;;  %v11815_v25 = vld [vmem:[#allocation5 + $0x1208] sm:$0xf] }
 0x211   :  { %8040 = vmatpush.bf16.msrb.mxu1 %v12080_v14  ;;  %v12032_v14 = vor.u32 %v14767_v27, %v12031_v16  ;;  %v11816_v28 = vor.u32 %v14713_v62, %v11815_v25  ;;  %v13327_v16 = vld [vmem:[#allocation5 + $0x1dd8] sm:$0xf]  ;;  %v15091_v27 = vld [vmem:[#allocation5 + $0x1dec] sm:$0xf0]  ;;  %v14989_v25 = vld [vmem:[#allocation5 + $0x1abc] sm:$0xf0] }
 0x212   :  { %8054 = vmatpush.bf16.msrb.mxu2 %v12272_v29  ;;  %v12224_v29 = vor.u32 %v14815_v37, %v12223_v52  ;;  %v12752_v52 = vor.u32 %v14947_v61, %v12751_v12  ;;  %v13111_v62 = vld [vmem:[#allocation5 + $0x1c28] sm:$0xf]  ;;  %v14983_v61 = vld [vmem:[#allocation5 + $0x1a8c] sm:$0xf0] }
 0x213   :  { %8068 = vmatpush.bf16.msrb.mxu3 %v12464_v57  ;;  %v14809_v57 = vld [vmem:[#allocation5 + $0x151c] sm:$0xf0] }
 0x214   :  { %8027 = vmatpush.bf16.msrb.mxu0 %v11864_v8  ;;  %v14995_v8 = vld [vmem:[#allocation5 + $0x1aec] sm:$0xf0] }
 0x215   :  { %8041 = vmatpush.bf16.msrb.mxu1 %v12056_v9  ;;  %v12008_v9 = vor.u32 %v14761_v13, %v12007_v42  ;;  %v12944_v37 = vor.u32 %v14995_v8, %v12943_v7  ;;  %v15789_v42 = vpop.f32.mrf.mxu1  ;;  %v12728_v13 = vor.u32 %v14941_v63, %v12727_v50  ;;  %v13087_v7 = vld [vmem:[#allocation5 + $0x1bf8] sm:$0xf]  ;;  %v15079_v63 = vld [vmem:[#allocation5 + $0x1d8c] sm:$0xf0] }
 0x216   :  { %8055 = vmatpush.bf16.msrb.mxu2 %v12248_v11  ;;  %v12200_v11 = vor.u32 %v14809_v57, %v12199_v23  ;;  %16320 = vst [vmem:[#allocation59_spill] sm:$0xff] %v15789_v42  ;;  %v12920_v23 = vor.u32 %v14989_v25, %v12919_v19  ;;  %v12703_v57 = vld [vmem:[#allocation5 + $0x18f8] sm:$0xf]  ;;  %v15073_v25 = vld [vmem:[#allocation5 + $0x1d5c] sm:$0xf0] }
 0x217   :  { %8069 = vmatpush.bf16.msrb.mxu3 %v12440_v15  ;;  %v12392_v15 = vor.u32 %v14857_v3, %v12391_v22  ;;  %v14935_v22 = vld [vmem:[#allocation5 + $0x190c] sm:$0xf0]  ;;  %v12895_v3 = vld [vmem:[#allocation5 + $0x1a78] sm:$0xf] }
 0x218   :  { %8028 = vmatpush.bf16.msrb.mxu0 %v11840_v24  ;;  %v13328_v24 = vor.u32 %v15091_v27, %v13327_v16  ;;  %v13279_v8 = vld [vmem:[#allocation5 + $0x1d78] sm:$0xf]  ;;  %v12896_v19 = vor.u32 %v14983_v61, %v12895_v3  ;;  %v15795_v16 = vpop.f32.mrf.mxu2  ;;  %v14971_v61 = vld [vmem:[#allocation5 + $0x1a2c] sm:$0xf0] }
 0x219   :  { %8042 = vmatpush.bf16.msrb.mxu1 %v12032_v14  ;;  %v13303_v14 = vld [vmem:[#allocation5 + $0x1da8] sm:$0xf]  ;;  %16321 = vst [vmem:[#allocation60_spill] sm:$0xff] %v15795_v16  ;;  %v13280_v27 = vor.u32 %v15079_v63, %v13279_v8  ;;  %v13231_v8 = vld [vmem:[#allocation5 + $0x1d18] sm:$0xf] }
 0x21a   :  { %8056 = vmatpush.bf16.msrb.mxu2 %v12224_v29  ;;  %v15085_v29 = vld [vmem:[#allocation5 + $0x1dbc] sm:$0xf0]  ;;  %v15067_v63 = vld [vmem:[#allocation5 + $0x1d2c] sm:$0xf0] }
 0x21b   :  { %8070 = vmatpush.bf16.msrb.mxu3 %v12416_v18  ;;  %v13112_v18 = vor.u32 %v15037_v0, %v13111_v62  ;;  %v13304_v12 = vor.u32 %v15085_v29, %v13303_v14  ;;  %v12704_v0 = vor.u32 %v14935_v22, %v12703_v57  ;;  %v14923_v57 = vld [vmem:[#allocation5 + $0x18ac] sm:$0xf0]  ;;  %v12847_v22 = vld [vmem:[#allocation5 + $0x1a18] sm:$0xf]  ;;  %v15229_v16 = vld [vmem:[#allocation5 + $0x223c] sm:$0xf0] }
 0x21c   :  { %8029 = vmatpush.bf16.msrb.mxu0 %v11816_v28  ;;  %v15031_v28 = vld [vmem:[#allocation5 + $0x1c0c] sm:$0xf0]  ;;  %v7807_v50 = vpop.f32.mrf.mxu0 }
 0x21d   :  { %8043 = vmatpush.bf16.msrb.mxu1 %v12008_v9  ;;  %v13088_v30 = vor.u32 %v15031_v28, %v13087_v7  ;;  %v14929_v9 = vld [vmem:[#allocation5 + $0x18dc] sm:$0xf0]  ;;  %v7808_v62 = vadd.f32 %v7807_v50, %v15785_v53  ;;  %v7821_v29 = vpop.f32.mrf.mxu1  ;;  %v13039_v7 = vld [vmem:[#allocation5 + $0x1b98] sm:$0xf]  ;;  %v15019_v28 = vld [vmem:[#allocation5 + $0x1bac] sm:$0xf0]  ;;  %v12848_v53 = vor.u32 %v14971_v61, %v12847_v22 }
 0x21e   :  { %8057 = vmatpush.bf16.msrb.mxu2 %v12200_v11  ;;  %v12871_v11 = vld [vmem:[#allocation5 + $0x1a48] sm:$0xf]  ;;  %v12680_v14 = vor.u32 %v14929_v9, %v12679_v20  ;;  %v14917_v20 = vld [vmem:[#allocation5 + $0x187c] sm:$0xf0]  ;;  %v12799_v22 = vld [vmem:[#allocation5 + $0x19b8] sm:$0xf] }
 0x21f   :  { %8071 = vmatpush.bf16.msrb.mxu3 %v12392_v15  ;;  %8030 = vmatmul.bf16.vlgmr.msrb.gmra.mxu0 %v15594_v32  ;;  %v14977_v15 = vld [vmem:[#allocation5 + $0x1a5c] sm:$0xf0]  ;;  %v12823_v9 = vld [vmem:[#allocation5 + $0x19e8] sm:$0xf]  ;;  %v14959_v61 = vld [vmem:[#allocation5 + $0x19cc] sm:$0xf0] }
 0x220   :  { %8078 = vmatpush.bf16.msra.mxu0 %v12752_v52  ;;  %8044 = vmatmul.bf16.vlgmr.msrb.gmra.mxu1 %v15598_v41  ;;  %v13063_v52 = vld [vmem:[#allocation5 + $0x1bc8] sm:$0xf] }
 0x221   :  { %8092 = vmatpush.bf16.msra.mxu1 %v12944_v37  ;;  %8058 = vmatmul.bf16.vlgmr.msrb.gmra.mxu2 %v15596_v38  ;;  %v15025_v37 = vld [vmem:[#allocation5 + $0x1bdc] sm:$0xf0] }
 0x222   :  { %8106 = vmatpush.bf16.msra.mxu2 %v13136_v49  ;;  %8072 = vmatmul.bf16.vlgmr.msrb.gmra.mxu3 %v15600_v46  ;;  %v15797_v49 = vpop.f32.mrf.mxu3 }
 0x223   :  { %8120 = vmatpush.bf16.msra.mxu3 %v13328_v24  ;;  %16322 = vst [vmem:[#allocation61_spill] sm:$0xff] %v15797_v49  ;;  %v13255_v24 = vld [vmem:[#allocation5 + $0x1d48] sm:$0xf] }
 0x224   :  { %8079 = vmatpush.bf16.msra.mxu0 %v12728_v13  ;;  %v12872_v13 = vor.u32 %v14977_v15, %v12871_v11  ;;  %v13256_v3 = vor.u32 %v15073_v25, %v13255_v24  ;;  %v13232_v11 = vor.u32 %v15067_v63, %v13231_v8  ;;  %v7835_v15 = vpop.f32.mrf.mxu2  ;;  %v13207_v25 = vld [vmem:[#allocation5 + $0x1ce8] sm:$0xf]  ;;  %v15055_v8 = vld [vmem:[#allocation5 + $0x1ccc] sm:$0xf0]  ;;  %v15802_v42 = vpop.f32.mrf.mxu0 }
 0x225   :  { %8093 = vmatpush.bf16.msra.mxu1 %v12920_v23  ;;  %v13064_v23 = vor.u32 %v15025_v37, %v13063_v52  ;;  %v13015_v52 = vld [vmem:[#allocation5 + $0x1b68] sm:$0xf]  ;;  %v15013_v37 = vld [vmem:[#allocation5 + $0x1b7c] sm:$0xf0]  ;;  %16324 = vst [vmem:[#allocation63_spill] sm:$0xff] %v15802_v42 }
 0x226   :  { %8107 = vmatpush.bf16.msra.mxu2 %v13112_v18  ;;  %v12655_v18 = vld [vmem:[#allocation5 + $0x1898] sm:$0xf]  ;;  %v13687_v49 = vld [vmem:[#allocation5 + $0x20a8] sm:$0xf]  ;;  %v9657_v42 = vld [vmem:[#allocation5 + $0x140] sm:$0xf0] }
 0x227   :  { %8121 = vmatpush.bf16.msra.mxu3 %v13304_v12  ;;  %v7822_v12 = vadd.f32 %v7821_v29, %v7808_v62  ;;  %v15061_v62 = vld [vmem:[#allocation5 + $0x1cfc] sm:$0xf0] }
 0x228   :  { %8080 = vmatpush.bf16.msra.mxu0 %v12704_v0  ;;  %v12656_v0 = vor.u32 %v14923_v57, %v12655_v18  ;;  %v12607_v18 = vld [vmem:[#allocation5 + $0x1838] sm:$0xf]  ;;  %v14911_v57 = vld [vmem:[#allocation5 + $0x184c] sm:$0xf0] }
 0x229   :  { %8094 = vmatpush.bf16.msra.mxu1 %v12896_v19  ;;  %v13040_v19 = vor.u32 %v15019_v28, %v13039_v7  ;;  %v7836_v50 = vadd.f32 %v7835_v15, %v7822_v12  ;;  %v12991_v7 = vld [vmem:[#allocation5 + $0x1b38] sm:$0xf]  ;;  %v15007_v28 = vld [vmem:[#allocation5 + $0x1b4c] sm:$0xf0]  ;;  %v12608_v63 = vor.u32 %v14911_v57, %v12607_v18  ;;  %v12967_v15 = vld [vmem:[#allocation5 + $0x1b08] sm:$0xf] }
 0x22a   :  { %8108 = vmatpush.bf16.msra.mxu2 %v13088_v30  ;;  %v12631_v30 = vld [vmem:[#allocation5 + $0x1868] sm:$0xf]  ;;  %v7849_v24 = vpop.f32.mrf.mxu3  ;;  %v13183_v12 = vld [vmem:[#allocation5 + $0x1cb8] sm:$0xf]  ;;  %v15235_v57 = vld [vmem:[#allocation5 + $0x226c] sm:$0xf0] }
 0x22b   :  { %8122 = vmatpush.bf16.msra.mxu3 %v13280_v27  ;;  %v14965_v27 = vld [vmem:[#allocation5 + $0x19fc] sm:$0xf0]  ;;  %v15800_v29 = vadd.f32 %v7849_v24, %v7836_v50  ;;  %v13519_v50 = vld [vmem:[#allocation5 + $0x1f58] sm:$0xf]  ;;  %v15139_v24 = vld [vmem:[#allocation5 + $0x1f6c] sm:$0xf0] }
 0x22c   :  { %8081 = vmatpush.bf16.msra.mxu0 %v12680_v14  ;;  %v12632_v14 = vor.u32 %v14917_v20, %v12631_v30  ;;  %v14905_v30 = vld [vmem:[#allocation5 + $0x181c] sm:$0xf0]  ;;  %v12775_v20 = vld [vmem:[#allocation5 + $0x1988] sm:$0xf]  ;;  %v13903_v18 = vld [vmem:[#allocation5 + $0x2258] sm:$0xf] }
 0x22d   :  { %8095 = vmatpush.bf16.msra.mxu1 %v12872_v13  ;;  %16323 = vst [vmem:[#allocation62_spill] sm:$0xff] %v15800_v29  ;;  %v12824_v13 = vor.u32 %v14965_v27, %v12823_v9  ;;  %v14953_v9 = vld [vmem:[#allocation5 + $0x199c] sm:$0xf0]  ;;  %v13184_v27 = vor.u32 %v15055_v8, %v13183_v12  ;;  %v13904_v12 = vor.u32 %v15235_v57, %v13903_v18  ;;  %v13495_v8 = vld [vmem:[#allocation5 + $0x1f28] sm:$0xf] }
 0x22e   :  { %8109 = vmatpush.bf16.msra.mxu2 %v13064_v23  ;;  %v13016_v23 = vor.u32 %v15013_v37, %v13015_v52  ;;  %v13159_v52 = vld [vmem:[#allocation5 + $0x1c88] sm:$0xf]  ;;  %v15049_v37 = vld [vmem:[#allocation5 + $0x1c9c] sm:$0xf0] }
 0x22f   :  { %8123 = vmatpush.bf16.msra.mxu3 %v13256_v3  ;;  %v13208_v3 = vor.u32 %v15061_v62, %v13207_v25  ;;  %v13711_v25 = vld [vmem:[#allocation5 + $0x20d8] sm:$0xf]  ;;  %v15133_v29 = vld [vmem:[#allocation5 + $0x1f3c] sm:$0xf0] }
 0x230   :  { %8082 = vmatpush.bf16.msra.mxu0 %v12656_v0  ;;  %v12583_v0 = vld [vmem:[#allocation5 + $0x1808] sm:$0xf] }
 0x231   :  { %8096 = vmatpush.bf16.msra.mxu1 %v12848_v53  ;;  %v12800_v53 = vor.u32 %v14959_v61, %v12799_v22  ;;  %v12584_v62 = vor.u32 %v14905_v30, %v12583_v0  ;;  %v14095_v22 = vld [vmem:[#allocation5 + $0x23d8] sm:$0xf]  ;;  %v15283_v61 = vld [vmem:[#allocation5 + $0x23ec] sm:$0xf0]  ;;  %v15181_v0 = vld [vmem:[#allocation5 + $0x20bc] sm:$0xf0] }
 0x232   :  { %8110 = vmatpush.bf16.msra.mxu2 %v13040_v19  ;;  %v12992_v19 = vor.u32 %v15007_v28, %v12991_v7  ;;  %v13520_v7 = vor.u32 %v15139_v24, %v13519_v50  ;;  %v13879_v30 = vld [vmem:[#allocation5 + $0x2228] sm:$0xf]  ;;  %v15175_v24 = vld [vmem:[#allocation5 + $0x208c] sm:$0xf0] }
 0x233   :  { %8124 = vmatpush.bf16.msra.mxu3 %v13232_v11  ;;  %v15001_v11 = vld [vmem:[#allocation5 + $0x1b1c] sm:$0xf0] }
 0x234   :  { %8083 = vmatpush.bf16.msra.mxu0 %v12632_v14  ;;  %v15187_v14 = vld [vmem:[#allocation5 + $0x20ec] sm:$0xf0] }
 0x235   :  { %8097 = vmatpush.bf16.msra.mxu1 %v12824_v13  ;;  %v12776_v13 = vor.u32 %v14953_v9, %v12775_v20  ;;  %v13712_v28 = vor.u32 %v15187_v14, %v13711_v25  ;;  %v13496_v20 = vor.u32 %v15133_v29, %v13495_v8  ;;  %v15804_v9 = vpop.f32.mrf.mxu1  ;;  %v13855_v25 = vld [vmem:[#allocation5 + $0x21f8] sm:$0xf]  ;;  %v15271_v14 = vld [vmem:[#allocation5 + $0x238c] sm:$0xf0]  ;;  %v15217_v8 = vld [vmem:[#allocation5 + $0x21dc] sm:$0xf0] }
 0x236   :  { %8111 = vmatpush.bf16.msra.mxu2 %v13016_v23  ;;  %v12968_v23 = vor.u32 %v15001_v11, %v12967_v15  ;;  %16325 = vst [vmem:[#allocation64_spill] sm:$0xff] %v15804_v9  ;;  %v13688_v15 = vor.u32 %v15181_v0, %v13687_v49  ;;  %v13471_v11 = vld [vmem:[#allocation5 + $0x1ef8] sm:$0xf]  ;;  %v15810_v49 = vld [vmem:[#allocation7] sm:$0x3f] }
 0x237   :  { %8125 = vmatpush.bf16.msra.mxu3 %v13208_v3  ;;  %v13160_v3 = vor.u32 %v15049_v37, %v13159_v52  ;;  %v15127_v52 = vld [vmem:[#allocation5 + $0x1f0c] sm:$0xf0]  ;;  %v13663_v37 = vld [vmem:[#allocation5 + $0x2078] sm:$0xf]  ;;  %v16277_v18 = vperm.slane %v15810_v49, 2 }
 0x238   :  { %8084 = vmatpush.bf16.msra.mxu0 %v12608_v63  ;;  %v14096_v63 = vor.u32 %v15283_v61, %v14095_v22  ;;  %v14047_v29 = vld [vmem:[#allocation5 + $0x2378] sm:$0xf]  ;;  %v13664_v57 = vor.u32 %v15175_v24, %v13663_v37  ;;  %v15121_v22 = vld [vmem:[#allocation5 + $0x1edc] sm:$0xf0]  ;;  %v13639_v61 = vld [vmem:[#allocation5 + $0x2048] sm:$0xf] }
 0x239   :  { %8098 = vmatpush.bf16.msra.mxu1 %v12800_v53  ;;  %v14071_v53 = vld [vmem:[#allocation5 + $0x23a8] sm:$0xf]  ;;  %v15265_v0 = vld [vmem:[#allocation5 + $0x235c] sm:$0xf0]  ;;  %v13615_v37 = vld [vmem:[#allocation5 + $0x2018] sm:$0xf] }
 0x23a   :  { %8112 = vmatpush.bf16.msra.mxu2 %v12992_v19  ;;  %v15277_v19 = vld [vmem:[#allocation5 + $0x23bc] sm:$0xf0]  ;;  %v14170_v9 = vld [vmem:[#allocation5 + $0x12c] sm:$0xf] }
 0x23b   :  { %8126 = vmatpush.bf16.msra.mxu3 %v13184_v27  ;;  %v13880_v27 = vor.u32 %v15229_v16, %v13879_v30  ;;  %v14072_v50 = vor.u32 %v15277_v19, %v14071_v53  ;;  %v13472_v16 = vor.u32 %v15127_v52, %v13471_v11  ;;  %v15815_v53 = vpop.f32.mrf.mxu3  ;;  %v13423_v11 = vld [vmem:[#allocation5 + $0x1e98] sm:$0xf]  ;;  %v15115_v52 = vld [vmem:[#allocation5 + $0x1eac] sm:$0xf0] }
 0x23c   :  { %8085 = vmatpush.bf16.msra.mxu0 %v12584_v62  ;;  %v15223_v62 = vld [vmem:[#allocation5 + $0x220c] sm:$0xf0]  ;;  %v7863_v30 = vpop.f32.mrf.mxu0  ;;  %16327 = vst [vmem:[#allocation66_spill] sm:$0xff] %v15815_v53  ;;  %v13999_v53 = vld [vmem:[#allocation5 + $0x2318] sm:$0xf] }
 0x23d   :  { %8099 = vmatpush.bf16.msra.mxu1 %v12776_v13  ;;  %v13856_v13 = vor.u32 %v15223_v62, %v13855_v25  ;;  %v15163_v25 = vld [vmem:[#allocation5 + $0x202c] sm:$0xf0]  ;;  %v13807_v62 = vld [vmem:[#allocation5 + $0x2198] sm:$0xf] }
 0x23e   :  { %8113 = vmatpush.bf16.msra.mxu2 %v12968_v23  ;;  %v13447_v23 = vld [vmem:[#allocation5 + $0x1ec8] sm:$0xf] }
 0x23f   :  { %8127 = vmatpush.bf16.msra.mxu3 %v13160_v3  ;;  %8086 = vmatmul.bf16.vlgmr.msra.gmra.mxu0 %v15606_v51  ;;  %v15813_v3 = vpop.f32.mrf.mxu2  ;;  %v13448_v19 = vor.u32 %v15121_v22, %v13447_v23  ;;  %v13424_v23 = vor.u32 %v15115_v52, %v13423_v11  ;;  %v13399_v22 = vld [vmem:[#allocation5 + $0x1e68] sm:$0xf]  ;;  %v13375_v11 = vld [vmem:[#allocation5 + $0x1e38] sm:$0xf]  ;;  %v15103_v52 = vld [vmem:[#allocation5 + $0x1e4c] sm:$0xf0] }
 0x240   :  { %8134 = vmatpush.bf16.msrb.mxu0 %v13520_v7  ;;  %8100 = vmatmul.bf16.vlgmr.msra.gmra.mxu1 %v15610_v56  ;;  %16326 = vst [vmem:[#allocation65_spill] sm:$0xff] %v15813_v3  ;;  %v14048_v7 = vor.u32 %v15271_v14, %v14047_v29  ;;  %v15211_v29 = vld [vmem:[#allocation5 + $0x21ac] sm:$0xf0] }
 0x241   :  { %8148 = vmatpush.bf16.msrb.mxu1 %v13712_v28  ;;  %8114 = vmatmul.bf16.vlgmr.msra.gmra.mxu2 %v15608_v55  ;;  %v15169_v28 = vld [vmem:[#allocation5 + $0x205c] sm:$0xf0]  ;;  %v15247_v3 = vld [vmem:[#allocation5 + $0x22cc] sm:$0xf0] }
 0x242   :  { %8162 = vmatpush.bf16.msrb.mxu2 %v13904_v12  ;;  %8128 = vmatmul.bf16.vlgmr.msra.gmra.mxu3 %v15612_v60  ;;  %v13831_v12 = vld [vmem:[#allocation5 + $0x21c8] sm:$0xf] }
 0x243   :  { %8176 = vmatpush.bf16.msrb.mxu3 %v14096_v63  ;;  %v14023_v63 = vld [vmem:[#allocation5 + $0x2348] sm:$0xf] }
 0x244   :  { %8135 = vmatpush.bf16.msrb.mxu0 %v13496_v20  ;;  %v7864_v20 = vadd.f32 %v7863_v30, %v16277_v18  ;;  %v14024_v24 = vor.u32 %v15265_v0, %v14023_v63  ;;  %v15205_v63 = vld [vmem:[#allocation5 + $0x217c] sm:$0xf0]  ;;  %v13975_v30 = vld [vmem:[#allocation5 + $0x22e8] sm:$0xf] }
 0x245   :  { %8149 = vmatpush.bf16.msrb.mxu1 %v13688_v15  ;;  %v13640_v15 = vor.u32 %v15169_v28, %v13639_v61  ;;  %v15109_v61 = vld [vmem:[#allocation5 + $0x1e7c] sm:$0xf0]  ;;  %v13591_v28 = vld [vmem:[#allocation5 + $0x1fe8] sm:$0xf] }
 0x246   :  { %8163 = vmatpush.bf16.msrb.mxu2 %v13880_v27  ;;  %v13832_v27 = vor.u32 %v15217_v8, %v13831_v12  ;;  %v15157_v8 = vld [vmem:[#allocation5 + $0x1ffc] sm:$0xf0] }
 0x247   :  { %8177 = vmatpush.bf16.msrb.mxu3 %v14072_v50  ;;  %v7877_v50 = vpop.f32.mrf.mxu1  ;;  %v7891_v0 = vpop.f32.mrf.mxu2  ;;  %v15253_v18 = vld [vmem:[#allocation5 + $0x22fc] sm:$0xf0] }
 0x248   :  { %8136 = vmatpush.bf16.msrb.mxu0 %v13472_v16  ;;  %v7878_v14 = vadd.f32 %v7877_v50, %v7864_v20  ;;  %v15259_v16 = vld [vmem:[#allocation5 + $0x232c] sm:$0xf0]  ;;  %v13400_v50 = vor.u32 %v15109_v61, %v13399_v22  ;;  %v15097_v22 = vld [vmem:[#allocation5 + $0x1e1c] sm:$0xf0]  ;;  %v13543_v61 = vld [vmem:[#allocation5 + $0x1f88] sm:$0xf] }
 0x249   :  { %8150 = vmatpush.bf16.msrb.mxu1 %v13664_v57  ;;  %v13616_v57 = vor.u32 %v15163_v25, %v13615_v37  ;;  %v14000_v12 = vor.u32 %v15259_v16, %v13999_v53  ;;  %v13567_v37 = vld [vmem:[#allocation5 + $0x1fb8] sm:$0xf]  ;;  %v13976_v53 = vor.u32 %v15253_v18, %v13975_v30  ;;  %v13927_v18 = vld [vmem:[#allocation5 + $0x2288] sm:$0xf]  ;;  %v9681_v30 = vld [vmem:[#allocation5 + $0x170] sm:$0xf0] }
 0x24a   :  { %8164 = vmatpush.bf16.msrb.mxu2 %v13856_v13  ;;  %v13808_v13 = vor.u32 %v15211_v29, %v13807_v62  ;;  %v7892_v20 = vadd.f32 %v7891_v0, %v7878_v14  ;;  %v13759_v62 = vld [vmem:[#allocation5 + $0x2138] sm:$0xf]  ;;  %v15199_v29 = vld [vmem:[#allocation5 + $0x214c] sm:$0xf0]  ;;  %v13376_v14 = vor.u32 %v15103_v52, %v13375_v11  ;;  %v14176_v0 = vld [vmem:[#allocation5 + $0x15c] sm:$0xf] }
 0x24b   :  { %8178 = vmatpush.bf16.msrb.mxu3 %v14048_v7  ;;  %v13783_v7 = vld [vmem:[#allocation5 + $0x2168] sm:$0xf]  ;;  %v13951_v16 = vld [vmem:[#allocation5 + $0x22b8] sm:$0xf]  ;;  %v14272_v11 = vld [vmem:[#allocation5 + $0x45c] sm:$0xf] }
 0x24c   :  { %8137 = vmatpush.bf16.msrb.mxu0 %v13448_v19  ;;  %v7905_v19 = vpop.f32.mrf.mxu3  ;;  %v10065_v52 = vld [vmem:[#allocation5 + $0x470] sm:$0xf0] }
 0x24d   :  { %8151 = vmatpush.bf16.msrb.mxu1 %v13640_v15  ;;  %v13592_v15 = vor.u32 %v15157_v8, %v13591_v28  ;;  %v15819_v25 = vadd.f32 %v7905_v19, %v7892_v20  ;;  %v15145_v28 = vld [vmem:[#allocation5 + $0x1f9c] sm:$0xf0]  ;;  %v13735_v8 = vld [vmem:[#allocation5 + $0x2108] sm:$0xf]  ;;  %v14224_v20 = vld [vmem:[#allocation5 + $0x2dc] sm:$0xf] }
 0x24e   :  { %8165 = vmatpush.bf16.msrb.mxu2 %v13832_v27  ;;  %v13784_v27 = vor.u32 %v15205_v63, %v13783_v7  ;;  %v13952_v7 = vor.u32 %v15247_v3, %v13951_v16  ;;  %v15241_v63 = vld [vmem:[#allocation5 + $0x229c] sm:$0xf0]  ;;  %v9873_v19 = vld [vmem:[#allocation5 + $0x2f0] sm:$0xf0]  ;;  %v9684_v3 = vor.u32 %v14176_v0, %v9681_v30  ;;  %v15821_v16 = vpop.f32.mrf.mxu0  ;;  %v14212_v0 = vld [vmem:[#allocation5 + $0x27c] sm:$0xf] }
 0x24f   :  { %8179 = vmatpush.bf16.msrb.mxu3 %v14024_v24  ;;  %v15151_v24 = vld [vmem:[#allocation5 + $0x1fcc] sm:$0xf0] }
 0x250   :  { %8138 = vmatpush.bf16.msrb.mxu0 %v13424_v23  ;;  %v13351_v23 = vld [vmem:[#allocation5 + $0x1e08] sm:$0xf] }
 0x251   :  { %8152 = vmatpush.bf16.msrb.mxu1 %v13616_v57  ;;  %v13568_v57 = vor.u32 %v15151_v24, %v13567_v37  ;;  %v14320_v37 = vld [vmem:[#allocation5 + $0x5dc] sm:$0xf]  ;;  %v10257_v24 = vld [vmem:[#allocation5 + $0x5f0] sm:$0xf0] }
 0x252   :  { %8166 = vmatpush.bf16.msrb.mxu2 %v13808_v13  ;;  %v13760_v13 = vor.u32 %v15199_v29, %v13759_v62  ;;  %v9876_v62 = vor.u32 %v14224_v20, %v9873_v19  ;;  %v10068_v29 = vor.u32 %v14272_v11, %v10065_v52  ;;  %v9825_v20 = vld [vmem:[#allocation5 + $0x290] sm:$0xf0]  ;;  %v14308_v11 = vld [vmem:[#allocation5 + $0x57c] sm:$0xf] }
 0x253   :  { %8180 = vmatpush.bf16.msrb.mxu3 %v14000_v12  ;;  %v15193_v12 = vld [vmem:[#allocation5 + $0x211c] sm:$0xf0]  ;;  %v10017_v19 = vld [vmem:[#allocation5 + $0x410] sm:$0xf0]  ;;  %v9828_v52 = vor.u32 %v14212_v0, %v9825_v20  ;;  %v14200_v0 = vld [vmem:[#allocation5 + $0x21c] sm:$0xf] }
 0x254   :  { %8139 = vmatpush.bf16.msrb.mxu0 %v13400_v50  ;;  %v13352_v50 = vor.u32 %v15097_v22, %v13351_v23  ;;  %v10260_v23 = vor.u32 %v14320_v37, %v10257_v24  ;;  %v9849_v22 = vld [vmem:[#allocation5 + $0x2c0] sm:$0xf0]  ;;  %v14206_v24 = vld [vmem:[#allocation5 + $0x24c] sm:$0xf] }
 0x255   :  { %8153 = vmatpush.bf16.msrb.mxu1 %v13592_v15  ;;  %v13544_v15 = vor.u32 %v15145_v28, %v13543_v61  ;;  %v10233_v61 = vld [vmem:[#allocation5 + $0x5c0] sm:$0xf0]  ;;  %v15823_v28 = vpop.f32.mrf.mxu1 }
 0x256   :  { %8167 = vmatpush.bf16.msrb.mxu2 %v13784_v27  ;;  %v13736_v27 = vor.u32 %v15193_v12, %v13735_v8  ;;  %16328 = vst [vmem:[#allocation67_spill] sm:$0xff] %v15823_v28  ;;  %v9660_v8 = vor.u32 %v14170_v9, %v9657_v42  ;;  %v10209_v42 = vld [vmem:[#allocation5 + $0x590] sm:$0xf0]  ;;  %v15829_v9 = vpop.f32.mrf.mxu2  ;;  %v9609_v37 = vld [vmem:[#allocation5 + $0xe0] sm:$0xf0] }
 0x257   :  { %8181 = vmatpush.bf16.msrb.mxu3 %v13976_v53  ;;  %v13928_v53 = vor.u32 %v15241_v63, %v13927_v18  ;;  %v14164_v18 = vld [vmem:[#allocation5 + $0xfc] sm:$0xf]  ;;  %v9633_v63 = vld [vmem:[#allocation5 + $0x110] sm:$0xf0]  ;;  %16329 = vst [vmem:[#allocation68_spill] sm:$0xff] %v15829_v9 }
 0x258   :  { %8140 = vmatpush.bf16.msrb.mxu0 %v13376_v14  ;;  %v14218_v14 = vld [vmem:[#allocation5 + $0x2ac] sm:$0xf]  ;;  %v10425_v9 = vld [vmem:[#allocation5 + $0x740] sm:$0xf0] }
 0x259   :  { %8154 = vmatpush.bf16.msrb.mxu1 %v13568_v57  ;;  %v10041_v57 = vld [vmem:[#allocation5 + $0x440] sm:$0xf0] }
 0x25a   :  { %8168 = vmatpush.bf16.msrb.mxu2 %v13760_v13  ;;  %v14314_v13 = vld [vmem:[#allocation5 + $0x5ac] sm:$0xf]  ;;  %v10044_v12 = vor.u32 %v14266_v5, %v10041_v57  ;;  %v9636_v5 = vor.u32 %v14164_v18, %v9633_v63  ;;  %v10185_v57 = vld [vmem:[#allocation5 + $0x560] sm:$0xf0]  ;;  %v14152_v18 = vld [vmem:[#allocation5 + $0x9c] sm:$0xf] }
 0x25b   :  { %8182 = vmatpush.bf16.msrb.mxu3 %v13952_v7  ;;  %v9852_v7 = vor.u32 %v14218_v14, %v9849_v22  ;;  %v10236_v30 = vor.u32 %v14314_v13, %v10233_v61  ;;  %v9993_v14 = vld [vmem:[#allocation5 + $0x3e0] sm:$0xf0]  ;;  %v14302_v22 = vld [vmem:[#allocation5 + $0x54c] sm:$0xf]  ;;  %v9585_v63 = vld [vmem:[#allocation5 + $0xb0] sm:$0xf0] }
 0x25c   :  { %8141 = vmatpush.bf16.msrb.mxu0 %v13352_v50  ;;  %v14260_v50 = vld [vmem:[#allocation5 + $0x3fc] sm:$0xf]  ;;  %v10809_v28 = vld [vmem:[#allocation5 + $0xa40] sm:$0xf0] }
 0x25d   :  { %8155 = vmatpush.bf16.msrb.mxu1 %v13544_v15  ;;  %v10020_v15 = vor.u32 %v14260_v50, %v10017_v19  ;;  %v9777_v50 = vld [vmem:[#allocation5 + $0x230] sm:$0xf0]  ;;  %v14248_v19 = vld [vmem:[#allocation5 + $0x39c] sm:$0xf] }
 0x25e   :  { %8169 = vmatpush.bf16.msrb.mxu2 %v13736_v27  ;;  %v14158_v27 = vld [vmem:[#allocation5 + $0xcc] sm:$0xf] }
 0x25f   :  { %8183 = vmatpush.bf16.msrb.mxu3 %v13928_v53  ;;  %8142 = vmatmul.bf16.vlgmr.msrb.gmra.mxu0 %v15627_v26  ;;  %v10212_v53 = vor.u32 %v14308_v11, %v10209_v42  ;;  %v9612_v61 = vor.u32 %v14158_v27, %v9609_v37  ;;  %v9969_v11 = vld [vmem:[#allocation5 + $0x3b0] sm:$0xf0]  ;;  %v14296_v42 = vld [vmem:[#allocation5 + $0x51c] sm:$0xf]  ;;  %v9561_v27 = vld [vmem:[#allocation5 + $0x80] sm:$0xf0] }
 0x260   :  { %8190 = vmatpush.bf16.msra.mxu0 %v9684_v3  ;;  %8156 = vmatmul.bf16.vlgmr.msrb.gmra.mxu1 %v15631_v34  ;;  %v15831_v3 = vpop.f32.mrf.mxu3  ;;  %v14194_v37 = vld [vmem:[#allocation5 + $0x1ec] sm:$0xf] }
 0x261   :  { %8204 = vmatpush.bf16.msra.mxu1 %v9876_v62  ;;  %8170 = vmatmul.bf16.vlgmr.msrb.gmra.mxu2 %v15629_v33  ;;  %16330 = vst [vmem:[#allocation69_spill] sm:$0xff] %v15831_v3  ;;  %v9801_v62 = vld [vmem:[#allocation5 + $0x260] sm:$0xf0]  ;;  %v10161_v3 = vld [vmem:[#allocation5 + $0x530] sm:$0xf0] }
 0x262   :  { %8218 = vmatpush.bf16.msra.mxu2 %v10068_v29  ;;  %8184 = vmatmul.bf16.vlgmr.msrb.gmra.mxu3 %v15635_v48  ;;  %v14254_v29 = vld [vmem:[#allocation5 + $0x3cc] sm:$0xf] }
 0x263   :  { %8232 = vmatpush.bf16.msra.mxu3 %v10260_v23  ;;  %v7919_v23 = vpop.f32.mrf.mxu0 }
 0x264   :  { %8191 = vmatpush.bf16.msra.mxu0 %v9660_v8  ;;  %v7920_v13 = vadd.f32 %v7919_v23, %v15819_v25  ;;  %v9804_v8 = vor.u32 %v14206_v24, %v9801_v62  ;;  %v9780_v25 = vor.u32 %v14200_v0, %v9777_v50  ;;  %v10164_v24 = vor.u32 %v14296_v42, %v10161_v3  ;;  %v7947_v62 = vpop.f32.mrf.mxu2  ;;  %v14188_v0 = vld [vmem:[#allocation5 + $0x1bc] sm:$0xf] }
 0x265   :  { %8205 = vmatpush.bf16.msra.mxu1 %v9852_v7  ;;  %v9996_v7 = vor.u32 %v14254_v29, %v9993_v14  ;;  %v14242_v29 = vld [vmem:[#allocation5 + $0x36c] sm:$0xf]  ;;  %v9945_v14 = vld [vmem:[#allocation5 + $0x380] sm:$0xf0]  ;;  %v14236_v50 = vld [vmem:[#allocation5 + $0x33c] sm:$0xf] }
 0x266   :  { %8219 = vmatpush.bf16.msra.mxu2 %v10044_v12  ;;  %v7933_v12 = vpop.f32.mrf.mxu1 }
 0x267   :  { %8233 = vmatpush.bf16.msra.mxu3 %v10236_v30  ;;  %v10188_v30 = vor.u32 %v14302_v22, %v10185_v57  ;;  %v7934_v20 = vadd.f32 %v7933_v12, %v7920_v13  ;;  %v14290_v22 = vld [vmem:[#allocation5 + $0x4ec] sm:$0xf]  ;;  %v10137_v57 = vld [vmem:[#allocation5 + $0x500] sm:$0xf0]  ;;  %v9948_v12 = vor.u32 %v14242_v29, %v9945_v14 }
 0x268   :  { %8192 = vmatpush.bf16.msra.mxu0 %v9636_v5  ;;  %v9588_v5 = vor.u32 %v14152_v18, %v9585_v63  ;;  %v7961_v13 = vpop.f32.mrf.mxu3  ;;  %v14140_v18 = vld [vmem:[#allocation5 + $0x3c] sm:$0xf]  ;;  %v9537_v63 = vld [vmem:[#allocation5 + $0x50] sm:$0xf0]  ;;  %v10140_v3 = vor.u32 %v14290_v22, %v10137_v57  ;;  %v14278_v29 = vld [vmem:[#allocation5 + $0x48c] sm:$0xf] }
 0x269   :  { %8206 = vmatpush.bf16.msra.mxu1 %v9828_v52  ;;  %v9972_v52 = vor.u32 %v14248_v19, %v9969_v11  ;;  %v7948_v23 = vadd.f32 %v7947_v62, %v7934_v20  ;;  %v9921_v19 = vld [vmem:[#allocation5 + $0x350] sm:$0xf0]  ;;  %v14284_v20 = vld [vmem:[#allocation5 + $0x4bc] sm:$0xf]  ;;  %v9540_v42 = vor.u32 %v14140_v18, %v9537_v63  ;;  %v14230_v62 = vld [vmem:[#allocation5 + $0x30c] sm:$0xf] }
 0x26a   :  { %8220 = vmatpush.bf16.msra.mxu2 %v10020_v15  ;;  %v14146_v15 = vld [vmem:[#allocation5 + $0x6c] sm:$0xf]  ;;  %v10113_v11 = vld [vmem:[#allocation5 + $0x4d0] sm:$0xf0]  ;;  %v10089_v14 = vld [vmem:[#allocation5 + $0x4a0] sm:$0xf0] }
 0x26b   :  { %8234 = vmatpush.bf16.msra.mxu3 %v10212_v53  ;;  %v9753_v53 = vld [vmem:[#allocation5 + $0x200] sm:$0xf0]  ;;  %v10449_v22 = vld [vmem:[#allocation5 + $0x770] sm:$0xf0]  ;;  %v14416_v57 = vld [vmem:[#allocation5 + $0x8dc] sm:$0xf]  ;;  %v15836_v45 = vpop.f32.mrf.mxu0 }
 0x26c   :  { %8193 = vmatpush.bf16.msra.mxu0 %v9612_v61  ;;  %v9564_v61 = vor.u32 %v14146_v15, %v9561_v27  ;;  %v9513_v15 = vld [vmem:[#allocation5 + $0x20] sm:$0xf0]  ;;  %v14182_v27 = vld [vmem:[#allocation5 + $0x18c] sm:$0xf]  ;;  %v14464_v18 = vld [vmem:[#allocation5 + $0xa5c] sm:$0xf] }
 0x26d   :  { %8207 = vmatpush.bf16.msra.mxu1 %v9804_v8  ;;  %v15834_v8 = vadd.f32 %v7961_v13, %v7948_v23  ;;  %v14368_v23 = vld [vmem:[#allocation5 + $0x75c] sm:$0xf]  ;;  %v10833_v63 = vld [vmem:[#allocation5 + $0xa70] sm:$0xf0]  ;;  %16331 = vst [vmem:[#allocation70_spill] sm:$0xff] %v15836_v45 }
 0x26e   :  { %8221 = vmatpush.bf16.msra.mxu2 %v9996_v7  ;;  %v9756_v7 = vor.u32 %v14194_v37, %v9753_v53  ;;  %v9705_v37 = vld [vmem:[#allocation5 + $0x1a0] sm:$0xf0]  ;;  %v10116_v53 = vor.u32 %v14284_v20, %v10113_v11  ;;  %v10836_v20 = vor.u32 %v14464_v18, %v10833_v63  ;;  %v14362_v11 = vld [vmem:[#allocation5 + $0x72c] sm:$0xf]  ;;  %v10977_v18 = vld [vmem:[#allocation5 + $0xb90] sm:$0xf0] }
 0x26f   :  { %8235 = vmatpush.bf16.msra.mxu3 %v10188_v30  ;;  %v9729_v30 = vld [vmem:[#allocation5 + $0x1d0] sm:$0xf0]  ;;  %v14350_v63 = vld [vmem:[#allocation5 + $0x6cc] sm:$0xf] }
 0x270   :  { %8194 = vmatpush.bf16.msra.mxu0 %v9588_v5  ;;  %v14134_v5 = vld [vmem:[#allocation5 + $0xc] sm:$0xf] }
 0x271   :  { %8208 = vmatpush.bf16.msra.mxu1 %v9780_v25  ;;  %v9732_v25 = vor.u32 %v14188_v0, %v9729_v30  ;;  %v9516_v13 = vor.u32 %v14134_v5, %v9513_v15  ;;  %v14512_v0 = vld [vmem:[#allocation5 + $0xbdc] sm:$0xf]  ;;  %v11025_v30 = vld [vmem:[#allocation5 + $0xbf0] sm:$0xf0]  ;;  %v10617_v5 = vld [vmem:[#allocation5 + $0x8c0] sm:$0xf0] }
 0x272   :  { %8222 = vmatpush.bf16.msra.mxu2 %v9972_v52  ;;  %v9924_v52 = vor.u32 %v14236_v50, %v9921_v19  ;;  %v10452_v50 = vor.u32 %v14368_v23, %v10449_v22  ;;  %v14458_v15 = vld [vmem:[#allocation5 + $0xa2c] sm:$0xf]  ;;  %v10593_v22 = vld [vmem:[#allocation5 + $0x890] sm:$0xf0] }
 0x273   :  { %8236 = vmatpush.bf16.msra.mxu3 %v10164_v24  ;;  %v9897_v24 = vld [vmem:[#allocation5 + $0x320] sm:$0xf0] }
 0x274   :  { %8195 = vmatpush.bf16.msra.mxu0 %v9564_v61  ;;  %v10641_v61 = vld [vmem:[#allocation5 + $0x8f0] sm:$0xf0] }
 0x275   :  { %8209 = vmatpush.bf16.msra.mxu1 %v9756_v7  ;;  %v9708_v7 = vor.u32 %v14182_v27, %v9705_v37  ;;  %v10644_v19 = vor.u32 %v14416_v57, %v10641_v61  ;;  %v15838_v27 = vpop.f32.mrf.mxu1  ;;  %v10428_v37 = vor.u32 %v14362_v11, %v10425_v9  ;;  %v14452_v57 = vld [vmem:[#allocation5 + $0x9fc] sm:$0xf] }
 0x276   :  { %8223 = vmatpush.bf16.msra.mxu2 %v9948_v12  ;;  %v9900_v12 = vor.u32 %v14230_v62, %v9897_v24  ;;  %16332 = vst [vmem:[#allocation71_spill] sm:$0xff] %v15838_v27  ;;  %v10620_v62 = vor.u32 %v14410_v54, %v10617_v5  ;;  %v14356_v24 = vld [vmem:[#allocation5 + $0x6fc] sm:$0xf]  ;;  %v10953_v5 = vld [vmem:[#allocation5 + $0xb60] sm:$0xf0] }
 0x277   :  { %8237 = vmatpush.bf16.msra.mxu3 %v10140_v3  ;;  %v10092_v3 = vor.u32 %v14278_v29, %v10089_v14  ;;  %v10401_v29 = vld [vmem:[#allocation5 + $0x710] sm:$0xf0]  ;;  %v14404_v14 = vld [vmem:[#allocation5 + $0x87c] sm:$0xf]  ;;  %v11577_v27 = vld [vmem:[#allocation5 + $0x1040] sm:$0xf0] }
 0x278   :  { %8196 = vmatpush.bf16.msra.mxu0 %v9540_v42  ;;  %v11028_v42 = vor.u32 %v14512_v0, %v11025_v30  ;;  %v14500_v61 = vld [vmem:[#allocation5 + $0xb7c] sm:$0xf]  ;;  %v10404_v9 = vor.u32 %v14356_v24, %v10401_v29  ;;  %v10596_v54 = vor.u32 %v14404_v14, %v10593_v22  ;;  %v15844_v0 = vpop.f32.mrf.mxu2  ;;  %v10353_v24 = vld [vmem:[#allocation5 + $0x6b0] sm:$0xf0] }
 0x279   :  { %8210 = vmatpush.bf16.msra.mxu1 %v9732_v25  ;;  %v14506_v25 = vld [vmem:[#allocation5 + $0xbac] sm:$0xf]  ;;  %16333 = vst [vmem:[#allocation72_spill] sm:$0xff] %v15844_v0  ;;  %v10980_v30 = vor.u32 %v14500_v61, %v10977_v18  ;;  %v14392_v29 = vld [vmem:[#allocation5 + $0x81c] sm:$0xf] }
 0x27a   :  { %8224 = vmatpush.bf16.msra.mxu2 %v9924_v52  ;;  %v11001_v52 = vld [vmem:[#allocation5 + $0xbc0] sm:$0xf0]  ;;  %v10545_v22 = vld [vmem:[#allocation5 + $0x830] sm:$0xf0]  ;;  %v14488_v61 = vld [vmem:[#allocation5 + $0xb1c] sm:$0xf] }
 0x27b   :  { %8238 = vmatpush.bf16.msra.mxu3 %v10116_v53  ;;  %v10812_v53 = vor.u32 %v14458_v15, %v10809_v28  ;;  %v11004_v23 = vor.u32 %v14506_v25, %v11001_v52  ;;  %v10929_v18 = vld [vmem:[#allocation5 + $0xb30] sm:$0xf0]  ;;  %v14602_v0 = vld [vmem:[#allocation5 + $0xeac] sm:$0xf] }
 0x27c   :  { %8197 = vmatpush.bf16.msra.mxu0 %v9516_v13  ;;  %v10785_v13 = vld [vmem:[#allocation5 + $0xa10] sm:$0xf0]  ;;  %v7975_v11 = vpop.f32.mrf.mxu0 }
 0x27d   :  { %8211 = vmatpush.bf16.msra.mxu1 %v9708_v7  ;;  %v10788_v28 = vor.u32 %v14452_v57, %v10785_v13  ;;  %v10377_v7 = vld [vmem:[#allocation5 + $0x6e0] sm:$0xf0]  ;;  %v7976_v15 = vadd.f32 %v7975_v11, %v15834_v8  ;;  %v7989_v52 = vpop.f32.mrf.mxu1  ;;  %v14440_v57 = vld [vmem:[#allocation5 + $0x99c] sm:$0xf]  ;;  %v10737_v13 = vld [vmem:[#allocation5 + $0x9b0] sm:$0xf0]  ;;  %v10548_v8 = vor.u32 %v14392_v29, %v10545_v22 }
 0x27e   :  { %8225 = vmatpush.bf16.msra.mxu2 %v9900_v12  ;;  %v14398_v12 = vld [vmem:[#allocation5 + $0x84c] sm:$0xf]  ;;  %v10380_v25 = vor.u32 %v14350_v63, %v10377_v7  ;;  %v10329_v63 = vld [vmem:[#allocation5 + $0x680] sm:$0xf0]  ;;  %v14380_v29 = vld [vmem:[#allocation5 + $0x7bc] sm:$0xf] }
 0x27f   :  { %8239 = vmatpush.bf16.msra.mxu3 %v10092_v3  ;;  %8198 = vmatmul.bf16.vlgmr.msra.gmra.mxu0 %v15558_v58  ;;  %v10569_v3 = vld [vmem:[#allocation5 + $0x860] sm:$0xf0]  ;;  %v14386_v7 = vld [vmem:[#allocation5 + $0x7ec] sm:$0xf]  ;;  %v10497_v22 = vld [vmem:[#allocation5 + $0x7d0] sm:$0xf0] }
 0x280   :  { %8246 = vmatpush.bf16.msrb.mxu0 %v10452_v50  ;;  %8212 = vmatmul.bf16.vlgmr.msra.gmra.mxu1 %v15564_v10  ;;  %v14446_v50 = vld [vmem:[#allocation5 + $0x9cc] sm:$0xf] }
 0x281   :  { %8260 = vmatpush.bf16.msrb.mxu1 %v10644_v19  ;;  %8226 = vmatmul.bf16.vlgmr.msra.gmra.mxu2 %v15560_v1  ;;  %v10761_v19 = vld [vmem:[#allocation5 + $0x9e0] sm:$0xf0] }
 0x282   :  { %8274 = vmatpush.bf16.msrb.mxu2 %v10836_v20  ;;  %8240 = vmatmul.bf16.vlgmr.msra.gmra.mxu3 %v15566_v17  ;;  %v15846_v20 = vpop.f32.mrf.mxu3 }
 0x283   :  { %8288 = vmatpush.bf16.msrb.mxu3 %v11028_v42  ;;  %16334 = vst [vmem:[#allocation73_spill] sm:$0xff] %v15846_v20  ;;  %v14494_v42 = vld [vmem:[#allocation5 + $0xb4c] sm:$0xf]  ;;  %v11193_v20 = vld [vmem:[#allocation5 + $0xd40] sm:$0xf0] }
 0x284   :  { %8247 = vmatpush.bf16.msrb.mxu0 %v10428_v37  ;;  %v10572_v37 = vor.u32 %v14398_v12, %v10569_v3  ;;  %v10956_v14 = vor.u32 %v14494_v42, %v10953_v5  ;;  %v10932_v12 = vor.u32 %v14488_v61, %v10929_v18  ;;  %v8003_v3 = vpop.f32.mrf.mxu2  ;;  %v14482_v5 = vld [vmem:[#allocation5 + $0xaec] sm:$0xf]  ;;  %v10881_v61 = vld [vmem:[#allocation5 + $0xad0] sm:$0xf0]  ;;  %v15851_v45 = vpop.f32.mrf.mxu0 }
 0x285   :  { %8261 = vmatpush.bf16.msrb.mxu1 %v10620_v62  ;;  %v10764_v62 = vor.u32 %v14446_v50, %v10761_v19  ;;  %v14434_v50 = vld [vmem:[#allocation5 + $0x96c] sm:$0xf]  ;;  %v10713_v19 = vld [vmem:[#allocation5 + $0x980] sm:$0xf0]  ;;  %16335 = vst [vmem:[#allocation74_spill] sm:$0xff] %v15851_v45 }
 0x286   :  { %8275 = vmatpush.bf16.msrb.mxu2 %v10812_v53  ;;  %v14344_v53 = vld [vmem:[#allocation5 + $0x69c] sm:$0xf] }
 0x287   :  { %8289 = vmatpush.bf16.msrb.mxu3 %v11004_v23  ;;  %v7990_v23 = vadd.f32 %v7989_v52, %v7976_v15  ;;  %v10905_v15 = vld [vmem:[#allocation5 + $0xb00] sm:$0xf0] }
 0x288   :  { %8248 = vmatpush.bf16.msrb.mxu0 %v10404_v9  ;;  %v10356_v9 = vor.u32 %v14344_v53, %v10353_v24  ;;  %v14332_v53 = vld [vmem:[#allocation5 + $0x63c] sm:$0xf]  ;;  %v10305_v24 = vld [vmem:[#allocation5 + $0x650] sm:$0xf0] }
 0x289   :  { %8262 = vmatpush.bf16.msrb.mxu1 %v10596_v54  ;;  %v10740_v54 = vor.u32 %v14440_v57, %v10737_v13  ;;  %v8004_v11 = vadd.f32 %v8003_v3, %v7990_v23  ;;  %v14428_v57 = vld [vmem:[#allocation5 + $0x93c] sm:$0xf]  ;;  %v10689_v13 = vld [vmem:[#allocation5 + $0x950] sm:$0xf0]  ;;  %v10308_v18 = vor.u32 %v14332_v53, %v10305_v24  ;;  %v14422_v3 = vld [vmem:[#allocation5 + $0x90c] sm:$0xf] }
 0x28a   :  { %8276 = vmatpush.bf16.msrb.mxu2 %v10788_v28  ;;  %v14338_v28 = vld [vmem:[#allocation5 + $0x66c] sm:$0xf]  ;;  %v8017_v42 = vpop.f32.mrf.mxu3  ;;  %v14476_v23 = vld [vmem:[#allocation5 + $0xabc] sm:$0xf]  ;;  %v11601_v24 = vld [vmem:[#allocation5 + $0x1070] sm:$0xf0] }
 0x28b   :  { %8290 = vmatpush.bf16.msrb.mxu3 %v10980_v30  ;;  %v10521_v30 = vld [vmem:[#allocation5 + $0x800] sm:$0xf0]  ;;  %v15849_v52 = vadd.f32 %v8017_v42, %v8004_v11  ;;  %v14560_v11 = vld [vmem:[#allocation5 + $0xd5c] sm:$0xf]  ;;  %v11217_v42 = vld [vmem:[#allocation5 + $0xd70] sm:$0xf0] }
 0x28c   :  { %8249 = vmatpush.bf16.msrb.mxu0 %v10380_v25  ;;  %v10332_v25 = vor.u32 %v14338_v28, %v10329_v63  ;;  %v10281_v28 = vld [vmem:[#allocation5 + $0x620] sm:$0xf0]  ;;  %v14374_v63 = vld [vmem:[#allocation5 + $0x78c] sm:$0xf]  ;;  %v14656_v53 = vld [vmem:[#allocation5 + $0x105c] sm:$0xf] }
 0x28d   :  { %8263 = vmatpush.bf16.msrb.mxu1 %v10572_v37  ;;  %v10524_v37 = vor.u32 %v14386_v7, %v10521_v30  ;;  %v10473_v7 = vld [vmem:[#allocation5 + $0x7a0] sm:$0xf0]  ;;  %v10884_v30 = vor.u32 %v14476_v23, %v10881_v61  ;;  %v11604_v23 = vor.u32 %v14656_v53, %v11601_v24  ;;  %v14554_v61 = vld [vmem:[#allocation5 + $0xd2c] sm:$0xf] }
 0x28e   :  { %8277 = vmatpush.bf16.msrb.mxu2 %v10764_v62  ;;  %v10716_v62 = vor.u32 %v14434_v50, %v10713_v19  ;;  %v14470_v50 = vld [vmem:[#allocation5 + $0xa8c] sm:$0xf]  ;;  %v10857_v19 = vld [vmem:[#allocation5 + $0xaa0] sm:$0xf0] }
 0x28f   :  { %8291 = vmatpush.bf16.msrb.mxu3 %v10956_v14  ;;  %v10908_v14 = vor.u32 %v14482_v5, %v10905_v15  ;;  %v14608_v5 = vld [vmem:[#allocation5 + $0xedc] sm:$0xf]  ;;  %v14542_v24 = vld [vmem:[#allocation5 + $0xccc] sm:$0xf] }
 0x290   :  { %8250 = vmatpush.bf16.msrb.mxu0 %v10356_v9  ;;  %v14326_v9 = vld [vmem:[#allocation5 + $0x60c] sm:$0xf] }
 0x291   :  { %8264 = vmatpush.bf16.msrb.mxu1 %v10548_v8  ;;  %v10500_v8 = vor.u32 %v14380_v29, %v10497_v22  ;;  %v10284_v15 = vor.u32 %v14326_v9, %v10281_v28  ;;  %v14704_v29 = vld [vmem:[#allocation5 + $0x11dc] sm:$0xf]  ;;  %v11793_v22 = vld [vmem:[#allocation5 + $0x11f0] sm:$0xf0]  ;;  %v11385_v9 = vld [vmem:[#allocation5 + $0xec0] sm:$0xf0] }
 0x292   :  { %8278 = vmatpush.bf16.msrb.mxu2 %v10740_v54  ;;  %v10692_v54 = vor.u32 %v14428_v57, %v10689_v13  ;;  %v11220_v57 = vor.u32 %v14560_v11, %v11217_v42  ;;  %v14650_v28 = vld [vmem:[#allocation5 + $0x102c] sm:$0xf]  ;;  %v11361_v42 = vld [vmem:[#allocation5 + $0xe90] sm:$0xf0] }
 0x293   :  { %8292 = vmatpush.bf16.msrb.mxu3 %v10932_v12  ;;  %v10665_v12 = vld [vmem:[#allocation5 + $0x920] sm:$0xf0] }
 0x294   :  { %8251 = vmatpush.bf16.msrb.mxu0 %v10332_v25  ;;  %v11409_v25 = vld [vmem:[#allocation5 + $0xef0] sm:$0xf0] }
 0x295   :  { %8265 = vmatpush.bf16.msrb.mxu1 %v10524_v37  ;;  %v10476_v37 = vor.u32 %v14374_v63, %v10473_v7  ;;  %v11412_v13 = vor.u32 %v14608_v5, %v11409_v25  ;;  %v15853_v63 = vpop.f32.mrf.mxu1  ;;  %v11196_v7 = vor.u32 %v14554_v61, %v11193_v20  ;;  %v14644_v5 = vld [vmem:[#allocation5 + $0xffc] sm:$0xf]  ;;  %v11745_v20 = vld [vmem:[#allocation5 + $0x1190] sm:$0xf0] }
 0x296   :  { %8279 = vmatpush.bf16.msrb.mxu2 %v10716_v62  ;;  %v10668_v62 = vor.u32 %v14422_v3, %v10665_v12  ;;  %16336 = vst [vmem:[#allocation75_spill] sm:$0xff] %v15853_v63  ;;  %v11388_v3 = vor.u32 %v14602_v0, %v11385_v9  ;;  %v14548_v12 = vld [vmem:[#allocation5 + $0xcfc] sm:$0xf]  ;;  %v11721_v9 = vld [vmem:[#allocation5 + $0x1160] sm:$0xf0] }
 0x297   :  { %8293 = vmatpush.bf16.msrb.mxu3 %v10908_v14  ;;  %v10860_v14 = vor.u32 %v14470_v50, %v10857_v19  ;;  %v11169_v50 = vld [vmem:[#allocation5 + $0xd10] sm:$0xf0]  ;;  %v14596_v19 = vld [vmem:[#allocation5 + $0xe7c] sm:$0xf]  ;;  %v12345_v63 = vld [vmem:[#allocation5 + $0x1640] sm:$0xf0] }
 0x298   :  { %8252 = vmatpush.bf16.msrb.mxu0 %v10308_v18  ;;  %v11796_v18 = vor.u32 %v14704_v29, %v11793_v22  ;;  %v14692_v25 = vld [vmem:[#allocation5 + $0x117c] sm:$0xf]  ;;  %v11364_v0 = vor.u32 %v14596_v19, %v11361_v42  ;;  %v15859_v29 = vpop.f32.mrf.mxu2  ;;  %v11313_v42 = vld [vmem:[#allocation5 + $0xe30] sm:$0xf0] }
 0x299   :  { %8266 = vmatpush.bf16.msrb.mxu1 %v10500_v8  ;;  %v14698_v8 = vld [vmem:[#allocation5 + $0x11ac] sm:$0xf]  ;;  %16337 = vst [vmem:[#allocation76_spill] sm:$0xff] %v15859_v29  ;;  %v11748_v22 = vor.u32 %v14692_v25, %v11745_v20  ;;  %v14680_v25 = vld [vmem:[#allocation5 + $0x111c] sm:$0xf] }
 0x29a   :  { %8280 = vmatpush.bf16.msrb.mxu2 %v10692_v54  ;;  %v11769_v54 = vld [vmem:[#allocation5 + $0x11c0] sm:$0xf0]  ;;  %v11697_v20 = vld [vmem:[#allocation5 + $0x1130] sm:$0xf0]  ;;  %v14794_v29 = vld [vmem:[#allocation5 + $0x14ac] sm:$0xf] }
 0x29b   :  { %8294 = vmatpush.bf16.msrb.mxu3 %v10884_v30  ;;  %v11580_v30 = vor.u32 %v14650_v28, %v11577_v27  ;;  %v11772_v11 = vor.u32 %v14698_v8, %v11769_v54  ;;  %v11172_v27 = vor.u32 %v14548_v12, %v11169_v50  ;;  %v11121_v12 = vld [vmem:[#allocation5 + $0xcb0] sm:$0xf0]  ;;  %v14584_v50 = vld [vmem:[#allocation5 + $0xe1c] sm:$0xf] }
 0x29c   :  { %8253 = vmatpush.bf16.msrb.mxu0 %v10284_v15  ;;  %v11553_v15 = vld [vmem:[#allocation5 + $0x1010] sm:$0xf0]  ;;  %v8031_v61 = vpop.f32.mrf.mxu0 }
 0x29d   :  { %8267 = vmatpush.bf16.msrb.mxu1 %v10476_v37  ;;  %v11556_v53 = vor.u32 %v14644_v5, %v11553_v15  ;;  %v11145_v37 = vld [vmem:[#allocation5 + $0xce0] sm:$0xf0]  ;;  %v8032_v28 = vadd.f32 %v8031_v61, %v15849_v52  ;;  %v8045_v54 = vpop.f32.mrf.mxu1  ;;  %v14632_v5 = vld [vmem:[#allocation5 + $0xf9c] sm:$0xf]  ;;  %v11505_v15 = vld [vmem:[#allocation5 + $0xfb0] sm:$0xf0]  ;;  %v11316_v52 = vor.u32 %v14584_v50, %v11313_v42 }
 0x29e   :  { %8281 = vmatpush.bf16.msrb.mxu2 %v10668_v62  ;;  %v14590_v62 = vld [vmem:[#allocation5 + $0xe4c] sm:$0xf]  ;;  %v11148_v8 = vor.u32 %v14542_v24, %v11145_v37  ;;  %v11097_v24 = vld [vmem:[#allocation5 + $0xc80] sm:$0xf0]  ;;  %v14572_v50 = vld [vmem:[#allocation5 + $0xdbc] sm:$0xf] }
 0x29f   :  { %8295 = vmatpush.bf16.msrb.mxu3 %v10860_v14  ;;  %8254 = vmatmul.bf16.vlgmr.msrb.gmra.mxu0 %v15570_v39  ;;  %v11337_v14 = vld [vmem:[#allocation5 + $0xe60] sm:$0xf0]  ;;  %v14578_v37 = vld [vmem:[#allocation5 + $0xdec] sm:$0xf]  ;;  %v11265_v42 = vld [vmem:[#allocation5 + $0xdd0] sm:$0xf0] }
 0x2a0   :  { %8302 = vmatpush.bf16.msra.mxu0 %v11220_v57  ;;  %8268 = vmatmul.bf16.vlgmr.msrb.gmra.mxu1 %v15574_v44  ;;  %v14638_v57 = vld [vmem:[#allocation5 + $0xfcc] sm:$0xf] }
 0x2a1   :  { %8316 = vmatpush.bf16.msra.mxu1 %v11412_v13  ;;  %8282 = vmatmul.bf16.vlgmr.msrb.gmra.mxu2 %v15572_v43  ;;  %v11529_v13 = vld [vmem:[#allocation5 + $0xfe0] sm:$0xf0] }
 0x2a2   :  { %8330 = vmatpush.bf16.msra.mxu2 %v11604_v23  ;;  %8296 = vmatmul.bf16.vlgmr.msrb.gmra.mxu3 %v15576_v47  ;;  %v15861_v23 = vpop.f32.mrf.mxu3 }
 0x2a3   :  { %8344 = vmatpush.bf16.msra.mxu3 %v11796_v18  ;;  %16338 = vst [vmem:[#allocation77_spill] sm:$0xff] %v15861_v23  ;;  %v14686_v18 = vld [vmem:[#allocation5 + $0x114c] sm:$0xf]  ;;  %v11961_v23 = vld [vmem:[#allocation5 + $0x1340] sm:$0xf0] }
 0x2a4   :  { %8303 = vmatpush.bf16.msra.mxu0 %v11196_v7  ;;  %v11340_v7 = vor.u32 %v14590_v62, %v11337_v14  ;;  %v11724_v19 = vor.u32 %v14686_v18, %v11721_v9  ;;  %v11700_v62 = vor.u32 %v14680_v25, %v11697_v20  ;;  %v8059_v14 = vpop.f32.mrf.mxu2  ;;  %v14674_v9 = vld [vmem:[#allocation5 + $0x10ec] sm:$0xf]  ;;  %v11649_v25 = vld [vmem:[#allocation5 + $0x10d0] sm:$0xf0]  ;;  %v15866_v45 = vpop.f32.mrf.mxu0 }
 0x2a5   :  { %8317 = vmatpush.bf16.msra.mxu1 %v11388_v3  ;;  %v11532_v3 = vor.u32 %v14638_v57, %v11529_v13  ;;  %v14626_v57 = vld [vmem:[#allocation5 + $0xf6c] sm:$0xf]  ;;  %v11481_v13 = vld [vmem:[#allocation5 + $0xf80] sm:$0xf0]  ;;  %16339 = vst [vmem:[#allocation78_spill] sm:$0xff] %v15866_v45 }
 0x2a6   :  { %8331 = vmatpush.bf16.msra.mxu2 %v11580_v30  ;;  %v14536_v30 = vld [vmem:[#allocation5 + $0xc9c] sm:$0xf] }
 0x2a7   :  { %8345 = vmatpush.bf16.msra.mxu3 %v11772_v11  ;;  %v8046_v11 = vadd.f32 %v8045_v54, %v8032_v28  ;;  %v11673_v28 = vld [vmem:[#allocation5 + $0x1100] sm:$0xf0] }
 0x2a8   :  { %8304 = vmatpush.bf16.msra.mxu0 %v11172_v27  ;;  %v11124_v27 = vor.u32 %v14536_v30, %v11121_v12  ;;  %v14524_v30 = vld [vmem:[#allocation5 + $0xc3c] sm:$0xf]  ;;  %v11073_v12 = vld [vmem:[#allocation5 + $0xc50] sm:$0xf0] }
 0x2a9   :  { %8318 = vmatpush.bf16.msra.mxu1 %v11364_v0  ;;  %v11508_v0 = vor.u32 %v14632_v5, %v11505_v15  ;;  %v8060_v61 = vadd.f32 %v8059_v14, %v8046_v11  ;;  %v14620_v5 = vld [vmem:[#allocation5 + $0xf3c] sm:$0xf]  ;;  %v11457_v15 = vld [vmem:[#allocation5 + $0xf50] sm:$0xf0]  ;;  %v11076_v20 = vor.u32 %v14524_v30, %v11073_v12  ;;  %v14614_v14 = vld [vmem:[#allocation5 + $0xf0c] sm:$0xf] }
 0x2aa   :  { %8332 = vmatpush.bf16.msra.mxu2 %v11556_v53  ;;  %v14530_v53 = vld [vmem:[#allocation5 + $0xc6c] sm:$0xf]  ;;  %v8073_v18 = vpop.f32.mrf.mxu3  ;;  %v14668_v11 = vld [vmem:[#allocation5 + $0x10bc] sm:$0xf]  ;;  %v12369_v12 = vld [vmem:[#allocation5 + $0x1670] sm:$0xf0] }
 0x2ab   :  { %8346 = vmatpush.bf16.msra.mxu3 %v11748_v22  ;;  %v11289_v22 = vld [vmem:[#allocation5 + $0xe00] sm:$0xf0]  ;;  %v15864_v54 = vadd.f32 %v8073_v18, %v8060_v61  ;;  %v14752_v61 = vld [vmem:[#allocation5 + $0x135c] sm:$0xf]  ;;  %v11985_v18 = vld [vmem:[#allocation5 + $0x1370] sm:$0xf0] }
 0x2ac   :  { %8305 = vmatpush.bf16.msra.mxu0 %v11148_v8  ;;  %v11100_v8 = vor.u32 %v14530_v53, %v11097_v24  ;;  %v11049_v53 = vld [vmem:[#allocation5 + $0xc20] sm:$0xf0]  ;;  %v14566_v24 = vld [vmem:[#allocation5 + $0xd8c] sm:$0xf]  ;;  %v14848_v30 = vld [vmem:[#allocation5 + $0x165c] sm:$0xf] }
 0x2ad   :  { %8319 = vmatpush.bf16.msra.mxu1 %v11340_v7  ;;  %v11292_v7 = vor.u32 %v14578_v37, %v11289_v22  ;;  %v11241_v37 = vld [vmem:[#allocation5 + $0xda0] sm:$0xf0]  ;;  %v11652_v22 = vor.u32 %v14668_v11, %v11649_v25  ;;  %v12372_v11 = vor.u32 %v14848_v30, %v12369_v12  ;;  %v14746_v25 = vld [vmem:[#allocation5 + $0x132c] sm:$0xf] }
 0x2ae   :  { %8333 = vmatpush.bf16.msra.mxu2 %v11532_v3  ;;  %v11484_v3 = vor.u32 %v14626_v57, %v11481_v13  ;;  %v14662_v57 = vld [vmem:[#allocation5 + $0x108c] sm:$0xf]  ;;  %v11625_v13 = vld [vmem:[#allocation5 + $0x10a0] sm:$0xf0] }
 0x2af   :  { %8347 = vmatpush.bf16.msra.mxu3 %v11724_v19  ;;  %v11676_v19 = vor.u32 %v14674_v9, %v11673_v28  ;;  %v14800_v9 = vld [vmem:[#allocation5 + $0x14dc] sm:$0xf]  ;;  %v14734_v12 = vld [vmem:[#allocation5 + $0x12cc] sm:$0xf] }
 0x2b0   :  { %8306 = vmatpush.bf16.msra.mxu0 %v11124_v27  ;;  %v14518_v27 = vld [vmem:[#allocation5 + $0xc0c] sm:$0xf] }
 0x2b1   :  { %8320 = vmatpush.bf16.msra.mxu1 %v11316_v52  ;;  %v11268_v52 = vor.u32 %v14572_v50, %v11265_v42  ;;  %v11052_v28 = vor.u32 %v14518_v27, %v11049_v53  ;;  %v14896_v50 = vld [vmem:[#allocation5 + $0x17dc] sm:$0xf]  ;;  %v12561_v42 = vld [vmem:[#allocation5 + $0x17f0] sm:$0xf0]  ;;  %v12153_v27 = vld [vmem:[#allocation5 + $0x14c0] sm:$0xf0] }
 0x2b2   :  { %8334 = vmatpush.bf16.msra.mxu2 %v11508_v0  ;;  %v11460_v0 = vor.u32 %v14620_v5, %v11457_v15  ;;  %v11988_v5 = vor.u32 %v14752_v61, %v11985_v18  ;;  %v14842_v53 = vld [vmem:[#allocation5 + $0x162c] sm:$0xf]  ;;  %v12129_v18 = vld [vmem:[#allocation5 + $0x1490] sm:$0xf0] }
 0x2b3   :  { %8348 = vmatpush.bf16.msra.mxu3 %v11700_v62  ;;  %v11433_v62 = vld [vmem:[#allocation5 + $0xf20] sm:$0xf0] }
 0x2b4   :  { %8307 = vmatpush.bf16.msra.mxu0 %v11100_v8  ;;  %v12177_v8 = vld [vmem:[#allocation5 + $0x14f0] sm:$0xf0] }
 0x2b5   :  { %8321 = vmatpush.bf16.msra.mxu1 %v11292_v7  ;;  %v11244_v7 = vor.u32 %v14566_v24, %v11241_v37  ;;  %v12180_v15 = vor.u32 %v14800_v9, %v12177_v8  ;;  %v15868_v24 = vpop.f32.mrf.mxu1  ;;  %v11964_v37 = vor.u32 %v14746_v25, %v11961_v23  ;;  %v14836_v9 = vld [vmem:[#allocation5 + $0x15fc] sm:$0xf]  ;;  %v12513_v23 = vld [vmem:[#allocation5 + $0x1790] sm:$0xf0] }
 0x2b6   :  { %8335 = vmatpush.bf16.msra.mxu2 %v11484_v3  ;;  %v11436_v3 = vor.u32 %v14614_v14, %v11433_v62  ;;  %16340 = vst [vmem:[#allocation79_spill] sm:$0xff] %v15868_v24  ;;  %v12156_v14 = vor.u32 %v14794_v29, %v12153_v27  ;;  %v14740_v62 = vld [vmem:[#allocation5 + $0x12fc] sm:$0xf]  ;;  %v12489_v27 = vld [vmem:[#allocation5 + $0x1760] sm:$0xf0] }
 0x2b7   :  { %8349 = vmatpush.bf16.msra.mxu3 %v11676_v19  ;;  %v11628_v19 = vor.u32 %v14662_v57, %v11625_v13  ;;  %v11937_v57 = vld [vmem:[#allocation5 + $0x1310] sm:$0xf0]  ;;  %v14788_v13 = vld [vmem:[#allocation5 + $0x147c] sm:$0xf]  ;;  %v13113_v24 = vld [vmem:[#allocation5 + $0x1c40] sm:$0xf0] }
 0x2b8   :  { %8308 = vmatpush.bf16.msra.mxu0 %v11076_v20  ;;  %v12564_v20 = vor.u32 %v14896_v50, %v12561_v42  ;;  %v14884_v8 = vld [vmem:[#allocation5 + $0x177c] sm:$0xf]  ;;  %v12132_v29 = vor.u32 %v14788_v13, %v12129_v18  ;;  %v15874_v50 = vpop.f32.mrf.mxu2  ;;  %v12081_v18 = vld [vmem:[#allocation5 + $0x1430] sm:$0xf0] }
 0x2b9   :  { %8322 = vmatpush.bf16.msra.mxu1 %v11268_v52  ;;  %v14890_v52 = vld [vmem:[#allocation5 + $0x17ac] sm:$0xf]  ;;  %16341 = vst [vmem:[#allocation80_spill] sm:$0xff] %v15874_v50  ;;  %v12516_v42 = vor.u32 %v14884_v8, %v12513_v23  ;;  %v14872_v8 = vld [vmem:[#allocation5 + $0x171c] sm:$0xf] }
 0x2ba   :  { %8336 = vmatpush.bf16.msra.mxu2 %v11460_v0  ;;  %v12537_v0 = vld [vmem:[#allocation5 + $0x17c0] sm:$0xf0]  ;;  %v12465_v23 = vld [vmem:[#allocation5 + $0x1730] sm:$0xf0]  ;;  %v14986_v50 = vld [vmem:[#allocation5 + $0x1aac] sm:$0xf] }
 0x2bb   :  { %8350 = vmatpush.bf16.msra.mxu3 %v11652_v22  ;;  %v12348_v22 = vor.u32 %v14842_v53, %v12345_v63  ;;  %v12540_v61 = vor.u32 %v14890_v52, %v12537_v0  ;;  %v11940_v63 = vor.u32 %v14740_v62, %v11937_v57  ;;  %v11889_v62 = vld [vmem:[#allocation5 + $0x12b0] sm:$0xf0]  ;;  %v14776_v57 = vld [vmem:[#allocation5 + $0x141c] sm:$0xf] }
 0x2bc   :  { %8309 = vmatpush.bf16.msra.mxu0 %v11052_v28  ;;  %v12321_v28 = vld [vmem:[#allocation5 + $0x1610] sm:$0xf0]  ;;  %v8087_v25 = vpop.f32.mrf.mxu0 }
 0x2bd   :  { %8323 = vmatpush.bf16.msra.mxu1 %v11244_v7  ;;  %v12324_v30 = vor.u32 %v14836_v9, %v12321_v28  ;;  %v11913_v7 = vld [vmem:[#allocation5 + $0x12e0] sm:$0xf0]  ;;  %v8088_v53 = vadd.f32 %v8087_v25, %v15864_v54  ;;  %v8101_v0 = vpop.f32.mrf.mxu1  ;;  %v14824_v9 = vld [vmem:[#allocation5 + $0x159c] sm:$0xf]  ;;  %v12273_v28 = vld [vmem:[#allocation5 + $0x15b0] sm:$0xf0]  ;;  %v12084_v54 = vor.u32 %v14776_v57, %v12081_v18 }
 0x2be   :  { %8337 = vmatpush.bf16.msra.mxu2 %v11436_v3  ;;  %v14782_v3 = vld [vmem:[#allocation5 + $0x144c] sm:$0xf]  ;;  %v11916_v52 = vor.u32 %v14734_v12, %v11913_v7  ;;  %v11865_v12 = vld [vmem:[#allocation5 + $0x1280] sm:$0xf0]  ;;  %v14764_v57 = vld [vmem:[#allocation5 + $0x13bc] sm:$0xf] }
 0x2bf   :  { %8351 = vmatpush.bf16.msra.mxu3 %v11628_v19  ;;  %8310 = vmatmul.bf16.vlgmr.msra.gmra.mxu0 %v15582_v31  ;;  %v12105_v19 = vld [vmem:[#allocation5 + $0x1460] sm:$0xf0]  ;;  %v14770_v7 = vld [vmem:[#allocation5 + $0x13ec] sm:$0xf]  ;;  %v12033_v18 = vld [vmem:[#allocation5 + $0x13d0] sm:$0xf0] }
 0x2c0   :  { %8358 = vmatpush.bf16.msrb.mxu0 %v11988_v5  ;;  %8324 = vmatmul.bf16.vlgmr.msra.gmra.mxu1 %v15586_v36  ;;  %v14830_v5 = vld [vmem:[#allocation5 + $0x15cc] sm:$0xf] }
 0x2c1   :  { %8372 = vmatpush.bf16.msrb.mxu1 %v12180_v15  ;;  %8338 = vmatmul.bf16.vlgmr.msra.gmra.mxu2 %v15584_v35  ;;  %v12297_v15 = vld [vmem:[#allocation5 + $0x15e0] sm:$0xf0] }
 0x2c2   :  { %8386 = vmatpush.bf16.msrb.mxu2 %v12372_v11  ;;  %8352 = vmatmul.bf16.vlgmr.msra.gmra.mxu3 %v15588_v40  ;;  %v15876_v11 = vpop.f32.mrf.mxu3 }
 0x2c3   :  { %8400 = vmatpush.bf16.msrb.mxu3 %v12564_v20  ;;  %16342 = vst [vmem:[#allocation81_spill] sm:$0xff] %v15876_v11  ;;  %v14878_v20 = vld [vmem:[#allocation5 + $0x174c] sm:$0xf]  ;;  %v12729_v11 = vld [vmem:[#allocation5 + $0x1940] sm:$0xf0] }
 0x2c4   :  { %8359 = vmatpush.bf16.msrb.mxu0 %v11964_v37  ;;  %v12108_v37 = vor.u32 %v14782_v3, %v12105_v19  ;;  %v12492_v13 = vor.u32 %v14878_v20, %v12489_v27  ;;  %v12468_v3 = vor.u32 %v14872_v8, %v12465_v23  ;;  %v8115_v19 = vpop.f32.mrf.mxu2  ;;  %v14866_v27 = vld [vmem:[#allocation5 + $0x16ec] sm:$0xf]  ;;  %v12417_v8 = vld [vmem:[#allocation5 + $0x16d0] sm:$0xf0]  ;;  %v15881_v45 = vpop.f32.mrf.mxu0 }
 0x2c5   :  { %8373 = vmatpush.bf16.msrb.mxu1 %v12156_v14  ;;  %v12300_v14 = vor.u32 %v14830_v5, %v12297_v15  ;;  %v14818_v5 = vld [vmem:[#allocation5 + $0x156c] sm:$0xf]  ;;  %v12249_v15 = vld [vmem:[#allocation5 + $0x1580] sm:$0xf0]  ;;  %16343 = vst [vmem:[#allocation82_spill] sm:$0xff] %v15881_v45 }
 0x2c6   :  { %8387 = vmatpush.bf16.msrb.mxu2 %v12348_v22  ;;  %v14728_v22 = vld [vmem:[#allocation5 + $0x129c] sm:$0xf]  ;;  %v10047_v45 = vld [vmem:[#allocation5 + $0x430] sm:$0xf] }
 0x2c7   :  { %8401 = vmatpush.bf16.msrb.mxu3 %v12540_v61  ;;  %v8102_v61 = vadd.f32 %v8101_v0, %v8088_v53  ;;  %v12441_v53 = vld [vmem:[#allocation5 + $0x1700] sm:$0xf0] }
 0x2c8   :  { %8360 = vmatpush.bf16.msrb.mxu0 %v11940_v63  ;;  %v11892_v63 = vor.u32 %v14728_v22, %v11889_v62  ;;  %v14716_v22 = vld [vmem:[#allocation5 + $0x123c] sm:$0xf]  ;;  %v11841_v62 = vld [vmem:[#allocation5 + $0x1250] sm:$0xf0] }
 0x2c9   :  { %8374 = vmatpush.bf16.msrb.mxu1 %v12132_v29  ;;  %v12276_v29 = vor.u32 %v14824_v9, %v12273_v28  ;;  %v8116_v25 = vadd.f32 %v8115_v19, %v8102_v61  ;;  %v14812_v9 = vld [vmem:[#allocation5 + $0x153c] sm:$0xf]  ;;  %v12225_v28 = vld [vmem:[#allocation5 + $0x1550] sm:$0xf0]  ;;  %v11844_v23 = vor.u32 %v14716_v22, %v11841_v62  ;;  %v14806_v19 = vld [vmem:[#allocation5 + $0x150c] sm:$0xf] }
 0x2ca   :  { %8388 = vmatpush.bf16.msrb.mxu2 %v12324_v30  ;;  %v14722_v30 = vld [vmem:[#allocation5 + $0x126c] sm:$0xf]  ;;  %v8129_v20 = vpop.f32.mrf.mxu3  ;;  %v14860_v61 = vld [vmem:[#allocation5 + $0x16bc] sm:$0xf]  ;;  %v13137_v62 = vld [vmem:[#allocation5 + $0x1c70] sm:$0xf0] }
 0x2cb   :  { %8402 = vmatpush.bf16.msrb.mxu3 %v12516_v42  ;;  %v12057_v42 = vld [vmem:[#allocation5 + $0x1400] sm:$0xf0]  ;;  %v15879_v0 = vadd.f32 %v8129_v20, %v8116_v25  ;;  %v14944_v25 = vld [vmem:[#allocation5 + $0x195c] sm:$0xf]  ;;  %v12753_v20 = vld [vmem:[#allocation5 + $0x1970] sm:$0xf0] }
 0x2cc   :  { %8361 = vmatpush.bf16.msrb.mxu0 %v11916_v52  ;;  %v11868_v52 = vor.u32 %v14722_v30, %v11865_v12  ;;  %v11817_v30 = vld [vmem:[#allocation5 + $0x1220] sm:$0xf0]  ;;  %v14758_v12 = vld [vmem:[#allocation5 + $0x138c] sm:$0xf]  ;;  %v15040_v22 = vld [vmem:[#allocation5 + $0x1c5c] sm:$0xf] }
 0x2cd   :  { %8375 = vmatpush.bf16.msrb.mxu1 %v12108_v37  ;;  %v12060_v37 = vor.u32 %v14770_v7, %v12057_v42  ;;  %v12009_v7 = vld [vmem:[#allocation5 + $0x13a0] sm:$0xf0]  ;;  %v12420_v42 = vor.u32 %v14860_v61, %v12417_v8  ;;  %v13140_v61 = vor.u32 %v15040_v22, %v13137_v62  ;;  %v14938_v8 = vld [vmem:[#allocation5 + $0x192c] sm:$0xf] }
 0x2ce   :  { %8389 = vmatpush.bf16.msrb.mxu2 %v12300_v14  ;;  %v12252_v14 = vor.u32 %v14818_v5, %v12249_v15  ;;  %v14854_v5 = vld [vmem:[#allocation5 + $0x168c] sm:$0xf]  ;;  %v12393_v15 = vld [vmem:[#allocation5 + $0x16a0] sm:$0xf0] }
 0x2cf   :  { %8403 = vmatpush.bf16.msrb.mxu3 %v12492_v13  ;;  %v12444_v13 = vor.u32 %v14866_v27, %v12441_v53  ;;  %v14992_v27 = vld [vmem:[#allocation5 + $0x1adc] sm:$0xf]  ;;  %v14926_v62 = vld [vmem:[#allocation5 + $0x18cc] sm:$0xf] }
 0x2d0   :  { %8362 = vmatpush.bf16.msrb.mxu0 %v11892_v63  ;;  %v14710_v63 = vld [vmem:[#allocation5 + $0x120c] sm:$0xf] }
 0x2d1   :  { %8376 = vmatpush.bf16.msrb.mxu1 %v12084_v54  ;;  %v12036_v54 = vor.u32 %v14764_v57, %v12033_v18  ;;  %v11820_v53 = vor.u32 %v14710_v63, %v11817_v30  ;;  %v15088_v57 = vld [vmem:[#allocation5 + $0x1ddc] sm:$0xf]  ;;  %v13329_v18 = vld [vmem:[#allocation5 + $0x1df0] sm:$0xf0]  ;;  %v12921_v63 = vld [vmem:[#allocation5 + $0x1ac0] sm:$0xf0] }
 0x2d2   :  { %8390 = vmatpush.bf16.msrb.mxu2 %v12276_v29  ;;  %v12228_v29 = vor.u32 %v14812_v9, %v12225_v28  ;;  %v12756_v9 = vor.u32 %v14944_v25, %v12753_v20  ;;  %v15034_v30 = vld [vmem:[#allocation5 + $0x1c2c] sm:$0xf]  ;;  %v12897_v20 = vld [vmem:[#allocation5 + $0x1a90] sm:$0xf0] }
 0x2d3   :  { %8404 = vmatpush.bf16.msrb.mxu3 %v12468_v3  ;;  %v12201_v3 = vld [vmem:[#allocation5 + $0x1520] sm:$0xf0] }
 0x2d4   :  { %8363 = vmatpush.bf16.msrb.mxu0 %v11868_v52  ;;  %v12945_v52 = vld [vmem:[#allocation5 + $0x1af0] sm:$0xf0] }
 0x2d5   :  { %8377 = vmatpush.bf16.msrb.mxu1 %v12060_v37  ;;  %v12012_v37 = vor.u32 %v14758_v12, %v12009_v7  ;;  %v12948_v28 = vor.u32 %v14992_v27, %v12945_v52  ;;  %v15883_v12 = vpop.f32.mrf.mxu1  ;;  %v12732_v7 = vor.u32 %v14938_v8, %v12729_v11  ;;  %v15028_v27 = vld [vmem:[#allocation5 + $0x1bfc] sm:$0xf]  ;;  %v13281_v11 = vld [vmem:[#allocation5 + $0x1d90] sm:$0xf0] }
 0x2d6   :  { %8391 = vmatpush.bf16.msrb.mxu2 %v12252_v14  ;;  %v12204_v14 = vor.u32 %v14806_v19, %v12201_v3  ;;  %16344 = vst [vmem:[#allocation83_spill] sm:$0xff] %v15883_v12  ;;  %v12924_v19 = vor.u32 %v14986_v50, %v12921_v63  ;;  %v14932_v3 = vld [vmem:[#allocation5 + $0x18fc] sm:$0xf]  ;;  %v13257_v63 = vld [vmem:[#allocation5 + $0x1d60] sm:$0xf0] }
 0x2d7   :  { %8405 = vmatpush.bf16.msrb.mxu3 %v12444_v13  ;;  %v12396_v13 = vor.u32 %v14854_v5, %v12393_v15  ;;  %v12705_v5 = vld [vmem:[#allocation5 + $0x1910] sm:$0xf0]  ;;  %v14980_v15 = vld [vmem:[#allocation5 + $0x1a7c] sm:$0xf] }
 0x2d8   :  { %8364 = vmatpush.bf16.msrb.mxu0 %v11844_v23  ;;  %v13332_v23 = vor.u32 %v15088_v57, %v13329_v18  ;;  %v15076_v52 = vld [vmem:[#allocation5 + $0x1d7c] sm:$0xf]  ;;  %v12900_v50 = vor.u32 %v14980_v15, %v12897_v20  ;;  %v15889_v57 = vpop.f32.mrf.mxu2  ;;  %v12849_v20 = vld [vmem:[#allocation5 + $0x1a30] sm:$0xf0] }
 0x2d9   :  { %8378 = vmatpush.bf16.msrb.mxu1 %v12036_v54  ;;  %v15082_v54 = vld [vmem:[#allocation5 + $0x1dac] sm:$0xf]  ;;  %16345 = vst [vmem:[#allocation84_spill] sm:$0xff] %v15889_v57  ;;  %v13284_v18 = vor.u32 %v15076_v52, %v13281_v11  ;;  %v15064_v52 = vld [vmem:[#allocation5 + $0x1d1c] sm:$0xf] }
 0x2da   :  { %8392 = vmatpush.bf16.msrb.mxu2 %v12228_v29  ;;  %v13305_v29 = vld [vmem:[#allocation5 + $0x1dc0] sm:$0xf0]  ;;  %v13233_v11 = vld [vmem:[#allocation5 + $0x1d30] sm:$0xf0] }
 0x2db   :  { %8406 = vmatpush.bf16.msrb.mxu3 %v12420_v42  ;;  %v13116_v42 = vor.u32 %v15034_v30, %v13113_v24  ;;  %v13308_v25 = vor.u32 %v15082_v54, %v13305_v29  ;;  %v12708_v24 = vor.u32 %v14932_v3, %v12705_v5  ;;  %v12657_v3 = vld [vmem:[#allocation5 + $0x18b0] sm:$0xf0]  ;;  %v14968_v5 = vld [vmem:[#allocation5 + $0x1a1c] sm:$0xf]  ;;  %v13881_v57 = vld [vmem:[#allocation5 + $0x2240] sm:$0xf0] }
 0x2dc   :  { %8365 = vmatpush.bf16.msrb.mxu0 %v11820_v53  ;;  %v13089_v53 = vld [vmem:[#allocation5 + $0x1c10] sm:$0xf0]  ;;  %v8143_v8 = vpop.f32.mrf.mxu0 }
 0x2dd   :  { %8379 = vmatpush.bf16.msrb.mxu1 %v12012_v37  ;;  %v13092_v22 = vor.u32 %v15028_v27, %v13089_v53  ;;  %v12681_v37 = vld [vmem:[#allocation5 + $0x18e0] sm:$0xf0]  ;;  %v8144_v30 = vadd.f32 %v8143_v8, %v15879_v0  ;;  %v8157_v29 = vpop.f32.mrf.mxu1  ;;  %v15016_v27 = vld [vmem:[#allocation5 + $0x1b9c] sm:$0xf]  ;;  %v13041_v53 = vld [vmem:[#allocation5 + $0x1bb0] sm:$0xf0]  ;;  %v12852_v0 = vor.u32 %v14968_v5, %v12849_v20 }
 0x2de   :  { %8393 = vmatpush.bf16.msrb.mxu2 %v12204_v14  ;;  %v14974_v14 = vld [vmem:[#allocation5 + $0x1a4c] sm:$0xf]  ;;  %v12684_v54 = vor.u32 %v14926_v62, %v12681_v37  ;;  %v12633_v62 = vld [vmem:[#allocation5 + $0x1880] sm:$0xf0]  ;;  %v14956_v5 = vld [vmem:[#allocation5 + $0x19bc] sm:$0xf] }
 0x2df   :  { %8407 = vmatpush.bf16.msrb.mxu3 %v12396_v13  ;;  %8366 = vmatmul.bf16.vlgmr.msrb.gmra.mxu0 %v15594_v32  ;;  %v12873_v13 = vld [vmem:[#allocation5 + $0x1a60] sm:$0xf0]  ;;  %v14962_v37 = vld [vmem:[#allocation5 + $0x19ec] sm:$0xf]  ;;  %v12801_v20 = vld [vmem:[#allocation5 + $0x19d0] sm:$0xf0] }
 0x2e0   :  { %8414 = vmatpush.bf16.msra.mxu0 %v12756_v9  ;;  %8380 = vmatmul.bf16.vlgmr.msrb.gmra.mxu1 %v15598_v41  ;;  %v15022_v9 = vld [vmem:[#allocation5 + $0x1bcc] sm:$0xf] }
 0x2e1   :  { %8428 = vmatpush.bf16.msra.mxu1 %v12948_v28  ;;  %8394 = vmatmul.bf16.vlgmr.msrb.gmra.mxu2 %v15596_v38  ;;  %v13065_v28 = vld [vmem:[#allocation5 + $0x1be0] sm:$0xf0] }
 0x2e2   :  { %8442 = vmatpush.bf16.msra.mxu2 %v13140_v61  ;;  %8408 = vmatmul.bf16.vlgmr.msrb.gmra.mxu3 %v15600_v46  ;;  %v15891_v61 = vpop.f32.mrf.mxu3 }
 0x2e3   :  { %8456 = vmatpush.bf16.msra.mxu3 %v13332_v23  ;;  %16346 = vst [vmem:[#allocation85_spill] sm:$0xff] %v15891_v61  ;;  %v15070_v23 = vld [vmem:[#allocation5 + $0x1d4c] sm:$0xf] }
 0x2e4   :  { %8415 = vmatpush.bf16.msra.mxu0 %v12732_v7  ;;  %v12876_v7 = vor.u32 %v14974_v14, %v12873_v13  ;;  %v13260_v15 = vor.u32 %v15070_v23, %v13257_v63  ;;  %v13236_v14 = vor.u32 %v15064_v52, %v13233_v11  ;;  %v8171_v13 = vpop.f32.mrf.mxu2  ;;  %v15058_v63 = vld [vmem:[#allocation5 + $0x1cec] sm:$0xf]  ;;  %v13185_v52 = vld [vmem:[#allocation5 + $0x1cd0] sm:$0xf0]  ;;  %v15896_v12 = vpop.f32.mrf.mxu0 }
 0x2e5   :  { %8429 = vmatpush.bf16.msra.mxu1 %v12924_v19  ;;  %v13068_v19 = vor.u32 %v15022_v9, %v13065_v28  ;;  %v15010_v9 = vld [vmem:[#allocation5 + $0x1b6c] sm:$0xf]  ;;  %v13017_v28 = vld [vmem:[#allocation5 + $0x1b80] sm:$0xf0]  ;;  %16348 = vst [vmem:[#allocation87_spill] sm:$0xff] %v15896_v12 }
 0x2e6   :  { %8443 = vmatpush.bf16.msra.mxu2 %v13116_v42  ;;  %v14920_v42 = vld [vmem:[#allocation5 + $0x189c] sm:$0xf]  ;;  %v15178_v61 = vld [vmem:[#allocation5 + $0x20ac] sm:$0xf]  ;;  %v14174_v12 = vld [vmem:[#allocation5 + $0x144] sm:$0xf0] }
 0x2e7   :  { %8457 = vmatpush.bf16.msra.mxu3 %v13308_v25  ;;  %v8158_v25 = vadd.f32 %v8157_v29, %v8144_v30  ;;  %v13209_v30 = vld [vmem:[#allocation5 + $0x1d00] sm:$0xf0] }
 0x2e8   :  { %8416 = vmatpush.bf16.msra.mxu0 %v12708_v24  ;;  %v12660_v24 = vor.u32 %v14920_v42, %v12657_v3  ;;  %v14908_v42 = vld [vmem:[#allocation5 + $0x183c] sm:$0xf]  ;;  %v12609_v3 = vld [vmem:[#allocation5 + $0x1850] sm:$0xf0] }
 0x2e9   :  { %8430 = vmatpush.bf16.msra.mxu1 %v12900_v50  ;;  %v13044_v50 = vor.u32 %v15016_v27, %v13041_v53  ;;  %v8172_v8 = vadd.f32 %v8171_v13, %v8158_v25  ;;  %v15004_v27 = vld [vmem:[#allocation5 + $0x1b3c] sm:$0xf]  ;;  %v12993_v53 = vld [vmem:[#allocation5 + $0x1b50] sm:$0xf0]  ;;  %v12612_v11 = vor.u32 %v14908_v42, %v12609_v3  ;;  %v14998_v13 = vld [vmem:[#allocation5 + $0x1b0c] sm:$0xf] }
 0x2ea   :  { %8444 = vmatpush.bf16.msra.mxu2 %v13092_v22  ;;  %v14914_v22 = vld [vmem:[#allocation5 + $0x186c] sm:$0xf]  ;;  %v8185_v23 = vpop.f32.mrf.mxu3  ;;  %v15052_v25 = vld [vmem:[#allocation5 + $0x1cbc] sm:$0xf]  ;;  %v13905_v3 = vld [vmem:[#allocation5 + $0x2270] sm:$0xf0] }
 0x2eb   :  { %8458 = vmatpush.bf16.msra.mxu3 %v13284_v18  ;;  %v12825_v18 = vld [vmem:[#allocation5 + $0x1a00] sm:$0xf0]  ;;  %v15894_v29 = vadd.f32 %v8185_v23, %v8172_v8  ;;  %v15136_v8 = vld [vmem:[#allocation5 + $0x1f5c] sm:$0xf]  ;;  %v13521_v23 = vld [vmem:[#allocation5 + $0x1f70] sm:$0xf0] }
 0x2ec   :  { %8417 = vmatpush.bf16.msra.mxu0 %v12684_v54  ;;  %v12636_v54 = vor.u32 %v14914_v22, %v12633_v62  ;;  %v12585_v22 = vld [vmem:[#allocation5 + $0x1820] sm:$0xf0]  ;;  %v14950_v62 = vld [vmem:[#allocation5 + $0x198c] sm:$0xf]  ;;  %v15232_v42 = vld [vmem:[#allocation5 + $0x225c] sm:$0xf] }
 0x2ed   :  { %8431 = vmatpush.bf16.msra.mxu1 %v12876_v7  ;;  %16347 = vst [vmem:[#allocation86_spill] sm:$0xff] %v15894_v29  ;;  %v12828_v7 = vor.u32 %v14962_v37, %v12825_v18  ;;  %v12777_v37 = vld [vmem:[#allocation5 + $0x19a0] sm:$0xf0]  ;;  %v13188_v18 = vor.u32 %v15052_v25, %v13185_v52  ;;  %v13908_v25 = vor.u32 %v15232_v42, %v13905_v3  ;;  %v15130_v52 = vld [vmem:[#allocation5 + $0x1f2c] sm:$0xf] }
 0x2ee   :  { %8445 = vmatpush.bf16.msra.mxu2 %v13068_v19  ;;  %v13020_v19 = vor.u32 %v15010_v9, %v13017_v28  ;;  %v15046_v9 = vld [vmem:[#allocation5 + $0x1c8c] sm:$0xf]  ;;  %v13161_v28 = vld [vmem:[#allocation5 + $0x1ca0] sm:$0xf0] }
 0x2ef   :  { %8459 = vmatpush.bf16.msra.mxu3 %v13260_v15  ;;  %v13212_v15 = vor.u32 %v15058_v63, %v13209_v30  ;;  %v15184_v63 = vld [vmem:[#allocation5 + $0x20dc] sm:$0xf]  ;;  %v13497_v29 = vld [vmem:[#allocation5 + $0x1f40] sm:$0xf0] }
 0x2f0   :  { %8418 = vmatpush.bf16.msra.mxu0 %v12660_v24  ;;  %v14902_v24 = vld [vmem:[#allocation5 + $0x180c] sm:$0xf] }
 0x2f1   :  { %8432 = vmatpush.bf16.msra.mxu1 %v12852_v0  ;;  %v12804_v0 = vor.u32 %v14956_v5, %v12801_v20  ;;  %v12588_v30 = vor.u32 %v14902_v24, %v12585_v22  ;;  %v15280_v5 = vld [vmem:[#allocation5 + $0x23dc] sm:$0xf]  ;;  %v14097_v20 = vld [vmem:[#allocation5 + $0x23f0] sm:$0xf0]  ;;  %v13689_v24 = vld [vmem:[#allocation5 + $0x20c0] sm:$0xf0] }
 0x2f2   :  { %8446 = vmatpush.bf16.msra.mxu2 %v13044_v50  ;;  %v12996_v50 = vor.u32 %v15004_v27, %v12993_v53  ;;  %v13524_v27 = vor.u32 %v15136_v8, %v13521_v23  ;;  %v15226_v22 = vld [vmem:[#allocation5 + $0x222c] sm:$0xf]  ;;  %v13665_v23 = vld [vmem:[#allocation5 + $0x2090] sm:$0xf0] }
 0x2f3   :  { %8460 = vmatpush.bf16.msra.mxu3 %v13236_v14  ;;  %v12969_v14 = vld [vmem:[#allocation5 + $0x1b20] sm:$0xf0] }
 0x2f4   :  { %8419 = vmatpush.bf16.msra.mxu0 %v12636_v54  ;;  %v13713_v54 = vld [vmem:[#allocation5 + $0x20f0] sm:$0xf0] }
 0x2f5   :  { %8433 = vmatpush.bf16.msra.mxu1 %v12828_v7  ;;  %v12780_v7 = vor.u32 %v14950_v62, %v12777_v37  ;;  %v13716_v53 = vor.u32 %v15184_v63, %v13713_v54  ;;  %v13500_v62 = vor.u32 %v15130_v52, %v13497_v29  ;;  %v15898_v37 = vpop.f32.mrf.mxu1  ;;  %v15220_v63 = vld [vmem:[#allocation5 + $0x21fc] sm:$0xf]  ;;  %v14049_v54 = vld [vmem:[#allocation5 + $0x2390] sm:$0xf0]  ;;  %v13833_v52 = vld [vmem:[#allocation5 + $0x21e0] sm:$0xf0] }
 0x2f6   :  { %8447 = vmatpush.bf16.msra.mxu2 %v13020_v19  ;;  %v12972_v19 = vor.u32 %v14998_v13, %v12969_v14  ;;  %16349 = vst [vmem:[#allocation88_spill] sm:$0xff] %v15898_v37  ;;  %v13692_v13 = vor.u32 %v15178_v61, %v13689_v24  ;;  %v15124_v14 = vld [vmem:[#allocation5 + $0x1efc] sm:$0xf]  ;;  %v15904_v61 = vld [vmem:[#allocation7] sm:$0x3f] }
 0x2f7   :  { %8461 = vmatpush.bf16.msra.mxu3 %v13212_v15  ;;  %v13164_v15 = vor.u32 %v15046_v9, %v13161_v28  ;;  %v13473_v9 = vld [vmem:[#allocation5 + $0x1f10] sm:$0xf0]  ;;  %v15172_v28 = vld [vmem:[#allocation5 + $0x207c] sm:$0xf]  ;;  %16350 = vst [vmem:[#allocation89_spill] sm:$0xff] %v15904_v61  ;;  %v16278_v42 = vperm.slane %v15904_v61, 3 }
 0x2f8   :  { %8420 = vmatpush.bf16.msra.mxu0 %v12612_v11  ;;  %v14100_v11 = vor.u32 %v15280_v5, %v14097_v20  ;;  %v15268_v29 = vld [vmem:[#allocation5 + $0x237c] sm:$0xf]  ;;  %v13668_v3 = vor.u32 %v15172_v28, %v13665_v23  ;;  %v13449_v5 = vld [vmem:[#allocation5 + $0x1ee0] sm:$0xf0]  ;;  %v15166_v20 = vld [vmem:[#allocation5 + $0x204c] sm:$0xf] }
 0x2f9   :  { %8434 = vmatpush.bf16.msra.mxu1 %v12804_v0  ;;  %v15274_v0 = vld [vmem:[#allocation5 + $0x23ac] sm:$0xf]  ;;  %v14025_v24 = vld [vmem:[#allocation5 + $0x2360] sm:$0xf0]  ;;  %v15160_v28 = vld [vmem:[#allocation5 + $0x201c] sm:$0xf] }
 0x2fa   :  { %8448 = vmatpush.bf16.msra.mxu2 %v12996_v50  ;;  %v14073_v50 = vld [vmem:[#allocation5 + $0x23c0] sm:$0xf0]  ;;  %v9663_v37 = vld [vmem:[#allocation5 + $0x130] sm:$0xf] }
 0x2fb   :  { %8462 = vmatpush.bf16.msra.mxu3 %v13188_v18  ;;  %v13884_v18 = vor.u32 %v15226_v22, %v13881_v57  ;;  %v14076_v8 = vor.u32 %v15274_v0, %v14073_v50  ;;  %v13476_v57 = vor.u32 %v15124_v14, %v13473_v9  ;;  %v15909_v0 = vpop.f32.mrf.mxu3  ;;  %v15112_v14 = vld [vmem:[#allocation5 + $0x1e9c] sm:$0xf]  ;;  %v13425_v9 = vld [vmem:[#allocation5 + $0x1eb0] sm:$0xf0] }
 0x2fc   :  { %8421 = vmatpush.bf16.msra.mxu0 %v12588_v30  ;;  %v13857_v30 = vld [vmem:[#allocation5 + $0x2210] sm:$0xf0]  ;;  %v8199_v22 = vpop.f32.mrf.mxu0  ;;  %16352 = vst [vmem:[#allocation91_spill] sm:$0xff] %v15909_v0  ;;  %v15256_v0 = vld [vmem:[#allocation5 + $0x231c] sm:$0xf] }
 0x2fd   :  { %8435 = vmatpush.bf16.msra.mxu1 %v12780_v7  ;;  %v13860_v7 = vor.u32 %v15220_v63, %v13857_v30  ;;  %v13617_v63 = vld [vmem:[#allocation5 + $0x2030] sm:$0xf0]  ;;  %v15208_v30 = vld [vmem:[#allocation5 + $0x219c] sm:$0xf] }
 0x2fe   :  { %8449 = vmatpush.bf16.msra.mxu2 %v12972_v19  ;;  %v15118_v19 = vld [vmem:[#allocation5 + $0x1ecc] sm:$0xf] }
 0x2ff   :  { %8463 = vmatpush.bf16.msra.mxu3 %v13164_v15  ;;  %8422 = vmatmul.bf16.vlgmr.msra.gmra.mxu0 %v15606_v51  ;;  %v15907_v15 = vpop.f32.mrf.mxu2  ;;  %v13452_v50 = vor.u32 %v15118_v19, %v13449_v5  ;;  %v13428_v19 = vor.u32 %v15112_v14, %v13425_v9  ;;  %v15106_v5 = vld [vmem:[#allocation5 + $0x1e6c] sm:$0xf]  ;;  %v15100_v14 = vld [vmem:[#allocation5 + $0x1e3c] sm:$0xf]  ;;  %v13377_v9 = vld [vmem:[#allocation5 + $0x1e50] sm:$0xf0] }
 0x300   :  { %8470 = vmatpush.bf16.msrb.mxu0 %v13524_v27  ;;  %8436 = vmatmul.bf16.vlgmr.msra.gmra.mxu1 %v15610_v56  ;;  %16351 = vst [vmem:[#allocation90_spill] sm:$0xff] %v15907_v15  ;;  %v14052_v27 = vor.u32 %v15268_v29, %v14049_v54  ;;  %v13809_v29 = vld [vmem:[#allocation5 + $0x21b0] sm:$0xf0] }
 0x301   :  { %8484 = vmatpush.bf16.msrb.mxu1 %v13716_v53  ;;  %8450 = vmatmul.bf16.vlgmr.msra.gmra.mxu2 %v15608_v55  ;;  %v13641_v53 = vld [vmem:[#allocation5 + $0x2060] sm:$0xf0]  ;;  %v13953_v15 = vld [vmem:[#allocation5 + $0x22d0] sm:$0xf0] }
 0x302   :  { %8498 = vmatpush.bf16.msrb.mxu2 %v13908_v25  ;;  %8464 = vmatmul.bf16.vlgmr.msra.gmra.mxu3 %v15612_v60  ;;  %v15214_v25 = vld [vmem:[#allocation5 + $0x21cc] sm:$0xf] }
 0x303   :  { %8512 = vmatpush.bf16.msrb.mxu3 %v14100_v11  ;;  %v15262_v11 = vld [vmem:[#allocation5 + $0x234c] sm:$0xf] }
 0x304   :  { %8471 = vmatpush.bf16.msrb.mxu0 %v13500_v62  ;;  %v8200_v62 = vadd.f32 %v8199_v22, %v16278_v42  ;;  %v14028_v23 = vor.u32 %v15262_v11, %v14025_v24  ;;  %v13785_v11 = vld [vmem:[#allocation5 + $0x2180] sm:$0xf0]  ;;  %v15250_v22 = vld [vmem:[#allocation5 + $0x22ec] sm:$0xf] }
 0x305   :  { %8485 = vmatpush.bf16.msrb.mxu1 %v13692_v13  ;;  %v13644_v13 = vor.u32 %v15166_v20, %v13641_v53  ;;  %v13401_v20 = vld [vmem:[#allocation5 + $0x1e80] sm:$0xf0]  ;;  %v15154_v53 = vld [vmem:[#allocation5 + $0x1fec] sm:$0xf] }
 0x306   :  { %8499 = vmatpush.bf16.msrb.mxu2 %v13884_v18  ;;  %v13836_v18 = vor.u32 %v15214_v25, %v13833_v52  ;;  %v13593_v52 = vld [vmem:[#allocation5 + $0x2000] sm:$0xf0] }
 0x307   :  { %8513 = vmatpush.bf16.msrb.mxu3 %v14076_v8  ;;  %v8213_v8 = vpop.f32.mrf.mxu1  ;;  %v8227_v24 = vpop.f32.mrf.mxu2  ;;  %v13977_v42 = vld [vmem:[#allocation5 + $0x2300] sm:$0xf0] }
 0x308   :  { %8472 = vmatpush.bf16.msrb.mxu0 %v13476_v57  ;;  %v8214_v54 = vadd.f32 %v8213_v8, %v8200_v62  ;;  %v14001_v57 = vld [vmem:[#allocation5 + $0x2330] sm:$0xf0]  ;;  %v13404_v8 = vor.u32 %v15106_v5, %v13401_v20  ;;  %v13353_v5 = vld [vmem:[#allocation5 + $0x1e20] sm:$0xf0]  ;;  %v15142_v20 = vld [vmem:[#allocation5 + $0x1f8c] sm:$0xf] }
 0x309   :  { %8486 = vmatpush.bf16.msrb.mxu1 %v13668_v3  ;;  %v13620_v3 = vor.u32 %v15160_v28, %v13617_v63  ;;  %v14004_v25 = vor.u32 %v15256_v0, %v14001_v57  ;;  %v15148_v28 = vld [vmem:[#allocation5 + $0x1fbc] sm:$0xf]  ;;  %v13980_v0 = vor.u32 %v15250_v22, %v13977_v42  ;;  %v15238_v42 = vld [vmem:[#allocation5 + $0x228c] sm:$0xf]  ;;  %v14180_v22 = vld [vmem:[#allocation5 + $0x174] sm:$0xf0] }
 0x30a   :  { %8500 = vmatpush.bf16.msrb.mxu2 %v13860_v7  ;;  %v13812_v7 = vor.u32 %v15208_v30, %v13809_v29  ;;  %v8228_v62 = vadd.f32 %v8227_v24, %v8214_v54  ;;  %v15196_v30 = vld [vmem:[#allocation5 + $0x213c] sm:$0xf]  ;;  %v13761_v29 = vld [vmem:[#allocation5 + $0x2150] sm:$0xf0]  ;;  %v13380_v54 = vor.u32 %v15100_v14, %v13377_v9  ;;  %v9687_v24 = vld [vmem:[#allocation5 + $0x160] sm:$0xf] }
 0x30b   :  { %8514 = vmatpush.bf16.msrb.mxu3 %v14052_v27  ;;  %v15202_v27 = vld [vmem:[#allocation5 + $0x216c] sm:$0xf]  ;;  %v15244_v57 = vld [vmem:[#allocation5 + $0x22bc] sm:$0xf]  ;;  %v10071_v14 = vld [vmem:[#allocation5 + $0x460] sm:$0xf] }
 0x30c   :  { %8473 = vmatpush.bf16.msrb.mxu0 %v13452_v50  ;;  %v8241_v50 = vpop.f32.mrf.mxu3  ;;  %v14276_v9 = vld [vmem:[#allocation5 + $0x474] sm:$0xf0] }
 0x30d   :  { %8487 = vmatpush.bf16.msrb.mxu1 %v13644_v13  ;;  %v13596_v13 = vor.u32 %v15154_v53, %v13593_v52  ;;  %v15913_v63 = vadd.f32 %v8241_v50, %v8228_v62  ;;  %v13545_v53 = vld [vmem:[#allocation5 + $0x1fa0] sm:$0xf0]  ;;  %v15190_v52 = vld [vmem:[#allocation5 + $0x210c] sm:$0xf]  ;;  %v9879_v62 = vld [vmem:[#allocation5 + $0x2e0] sm:$0xf] }
 0x30e   :  { %8501 = vmatpush.bf16.msrb.mxu2 %v13836_v18  ;;  %v13788_v18 = vor.u32 %v15202_v27, %v13785_v11  ;;  %v13956_v27 = vor.u32 %v15244_v57, %v13953_v15  ;;  %v13929_v11 = vld [vmem:[#allocation5 + $0x22a0] sm:$0xf0]  ;;  %v14228_v50 = vld [vmem:[#allocation5 + $0x2f4] sm:$0xf0]  ;;  %v9688_v15 = vor.u32 %v14180_v22, %v9687_v24  ;;  %v15915_v57 = vpop.f32.mrf.mxu0  ;;  %v9831_v24 = vld [vmem:[#allocation5 + $0x280] sm:$0xf] }
 0x30f   :  { %8515 = vmatpush.bf16.msrb.mxu3 %v14028_v23  ;;  %v13569_v23 = vld [vmem:[#allocation5 + $0x1fd0] sm:$0xf0]  ;;  %16353 = vst [vmem:[#allocation92_spill] sm:$0xff] %v15915_v57  ;;  %v14462_v57 = vld [vmem:[#allocation5 + $0xa44] sm:$0xf0] }
 0x310   :  { %8474 = vmatpush.bf16.msrb.mxu0 %v13428_v19  ;;  %v15094_v19 = vld [vmem:[#allocation5 + $0x1e0c] sm:$0xf] }
 0x311   :  { %8488 = vmatpush.bf16.msrb.mxu1 %v13620_v3  ;;  %v13572_v3 = vor.u32 %v15148_v28, %v13569_v23  ;;  %v10263_v28 = vld [vmem:[#allocation5 + $0x5e0] sm:$0xf]  ;;  %v14324_v23 = vld [vmem:[#allocation5 + $0x5f4] sm:$0xf0] }
 0x312   :  { %8502 = vmatpush.bf16.msrb.mxu2 %v13812_v7  ;;  %v13764_v7 = vor.u32 %v15196_v30, %v13761_v29  ;;  %v9880_v30 = vor.u32 %v14228_v50, %v9879_v62  ;;  %v10072_v29 = vor.u32 %v14276_v9, %v10071_v14  ;;  %v14216_v62 = vld [vmem:[#allocation5 + $0x294] sm:$0xf0]  ;;  %v10215_v14 = vld [vmem:[#allocation5 + $0x580] sm:$0xf] }
 0x313   :  { %8516 = vmatpush.bf16.msrb.mxu3 %v14004_v25  ;;  %v13737_v25 = vld [vmem:[#allocation5 + $0x2120] sm:$0xf0]  ;;  %v14264_v50 = vld [vmem:[#allocation5 + $0x414] sm:$0xf0]  ;;  %v9832_v9 = vor.u32 %v14216_v62, %v9831_v24  ;;  %v9783_v24 = vld [vmem:[#allocation5 + $0x220] sm:$0xf] }
 0x314   :  { %8475 = vmatpush.bf16.msrb.mxu0 %v13404_v8  ;;  %v13356_v8 = vor.u32 %v15094_v19, %v13353_v5  ;;  %v10264_v19 = vor.u32 %v14324_v23, %v10263_v28  ;;  %v14222_v5 = vld [vmem:[#allocation5 + $0x2c4] sm:$0xf0]  ;;  %v9807_v23 = vld [vmem:[#allocation5 + $0x250] sm:$0xf] }
 0x315   :  { %8489 = vmatpush.bf16.msrb.mxu1 %v13596_v13  ;;  %v13548_v13 = vor.u32 %v15142_v20, %v13545_v53  ;;  %v14318_v20 = vld [vmem:[#allocation5 + $0x5c4] sm:$0xf0]  ;;  %v15917_v53 = vpop.f32.mrf.mxu1 }
 0x316   :  { %8503 = vmatpush.bf16.msrb.mxu2 %v13788_v18  ;;  %v13740_v18 = vor.u32 %v15190_v52, %v13737_v25  ;;  %16354 = vst [vmem:[#allocation93_spill] sm:$0xff] %v15917_v53  ;;  %v9664_v52 = vor.u32 %v14174_v12, %v9663_v37  ;;  %v14312_v12 = vld [vmem:[#allocation5 + $0x594] sm:$0xf0]  ;;  %v15923_v37 = vpop.f32.mrf.mxu2  ;;  %v14162_v28 = vld [vmem:[#allocation5 + $0xe4] sm:$0xf0] }
 0x317   :  { %8517 = vmatpush.bf16.msrb.mxu3 %v13980_v0  ;;  %v13932_v0 = vor.u32 %v15238_v42, %v13929_v11  ;;  %v9639_v42 = vld [vmem:[#allocation5 + $0x100] sm:$0xf]  ;;  %v14168_v11 = vld [vmem:[#allocation5 + $0x114] sm:$0xf0]  ;;  %16355 = vst [vmem:[#allocation94_spill] sm:$0xff] %v15923_v37 }
 0x318   :  { %8476 = vmatpush.bf16.msrb.mxu0 %v13380_v54  ;;  %v9855_v54 = vld [vmem:[#allocation5 + $0x2b0] sm:$0xf]  ;;  %v14366_v37 = vld [vmem:[#allocation5 + $0x744] sm:$0xf0] }
 0x319   :  { %8490 = vmatpush.bf16.msrb.mxu1 %v13572_v3  ;;  %v14270_v3 = vld [vmem:[#allocation5 + $0x444] sm:$0xf0]  ;;  %v10623_v53 = vld [vmem:[#allocation5 + $0x8b0] sm:$0xf] }
 0x31a   :  { %8504 = vmatpush.bf16.msrb.mxu2 %v13764_v7  ;;  %v10239_v7 = vld [vmem:[#allocation5 + $0x5b0] sm:$0xf]  ;;  %v10048_v25 = vor.u32 %v14270_v3, %v10047_v45  ;;  %v9640_v45 = vor.u32 %v14168_v11, %v9639_v42  ;;  %v14306_v3 = vld [vmem:[#allocation5 + $0x564] sm:$0xf0]  ;;  %v9591_v42 = vld [vmem:[#allocation5 + $0xa0] sm:$0xf] }
 0x31b   :  { %8518 = vmatpush.bf16.msrb.mxu3 %v13956_v27  ;;  %v9856_v27 = vor.u32 %v14222_v5, %v9855_v54  ;;  %v10240_v22 = vor.u32 %v14318_v20, %v10239_v7  ;;  %v14258_v54 = vld [vmem:[#allocation5 + $0x3e4] sm:$0xf0]  ;;  %v10191_v5 = vld [vmem:[#allocation5 + $0x550] sm:$0xf]  ;;  %v14156_v11 = vld [vmem:[#allocation5 + $0xb4] sm:$0xf0] }
 0x31c   :  { %8477 = vmatpush.bf16.msrb.mxu0 %v13356_v8  ;;  %v10023_v8 = vld [vmem:[#allocation5 + $0x400] sm:$0xf] }
 0x31d   :  { %8491 = vmatpush.bf16.msrb.mxu1 %v13548_v13  ;;  %v10024_v13 = vor.u32 %v14264_v50, %v10023_v8  ;;  %v14204_v8 = vld [vmem:[#allocation5 + $0x234] sm:$0xf0]  ;;  %v9975_v50 = vld [vmem:[#allocation5 + $0x3a0] sm:$0xf] }
 0x31e   :  { %8505 = vmatpush.bf16.msrb.mxu2 %v13740_v18  ;;  %v9615_v18 = vld [vmem:[#allocation5 + $0xd0] sm:$0xf] }
 0x31f   :  { %8519 = vmatpush.bf16.msrb.mxu3 %v13932_v0  ;;  %8478 = vmatmul.bf16.vlgmr.msrb.gmra.mxu0 %v15627_v26  ;;  %v10216_v0 = vor.u32 %v14312_v12, %v10215_v14  ;;  %v9616_v20 = vor.u32 %v14162_v28, %v9615_v18  ;;  %v14252_v14 = vld [vmem:[#allocation5 + $0x3b4] sm:$0xf0]  ;;  %v10167_v12 = vld [vmem:[#allocation5 + $0x520] sm:$0xf]  ;;  %v14150_v18 = vld [vmem:[#allocation5 + $0x84] sm:$0xf0] }
 0x320   :  { %8526 = vmatpush.bf16.msra.mxu0 %v9688_v15  ;;  %8492 = vmatmul.bf16.vlgmr.msrb.gmra.mxu1 %v15631_v34  ;;  %v15925_v15 = vpop.f32.mrf.mxu3  ;;  %v9759_v28 = vld [vmem:[#allocation5 + $0x1f0] sm:$0xf] }
 0x321   :  { %8540 = vmatpush.bf16.msra.mxu1 %v9880_v30  ;;  %8506 = vmatmul.bf16.vlgmr.msrb.gmra.mxu2 %v15629_v33  ;;  %16356 = vst [vmem:[#allocation95_spill] sm:$0xff] %v15925_v15  ;;  %v14210_v30 = vld [vmem:[#allocation5 + $0x264] sm:$0xf0]  ;;  %v14300_v15 = vld [vmem:[#allocation5 + $0x534] sm:$0xf0] }
 0x322   :  { %8554 = vmatpush.bf16.msra.mxu2 %v10072_v29  ;;  %8520 = vmatmul.bf16.vlgmr.msrb.gmra.mxu3 %v15635_v48  ;;  %v9999_v29 = vld [vmem:[#allocation5 + $0x3d0] sm:$0xf] }
 0x323   :  { %8568 = vmatpush.bf16.msra.mxu3 %v10264_v19  ;;  %v8255_v19 = vpop.f32.mrf.mxu0 }
 0x324   :  { %8527 = vmatpush.bf16.msra.mxu0 %v9664_v52  ;;  %v8256_v7 = vadd.f32 %v8255_v19, %v15913_v63  ;;  %v9808_v52 = vor.u32 %v14210_v30, %v9807_v23  ;;  %v9784_v63 = vor.u32 %v14204_v8, %v9783_v24  ;;  %v10168_v23 = vor.u32 %v14300_v15, %v10167_v12  ;;  %v8283_v30 = vpop.f32.mrf.mxu2  ;;  %v9735_v24 = vld [vmem:[#allocation5 + $0x1c0] sm:$0xf] }
 0x325   :  { %8541 = vmatpush.bf16.msra.mxu1 %v9856_v27  ;;  %v10000_v27 = vor.u32 %v14258_v54, %v9999_v29  ;;  %v9951_v29 = vld [vmem:[#allocation5 + $0x370] sm:$0xf]  ;;  %v14246_v54 = vld [vmem:[#allocation5 + $0x384] sm:$0xf0]  ;;  %v9927_v8 = vld [vmem:[#allocation5 + $0x340] sm:$0xf] }
 0x326   :  { %8555 = vmatpush.bf16.msra.mxu2 %v10048_v25  ;;  %v8269_v25 = vpop.f32.mrf.mxu1 }
 0x327   :  { %8569 = vmatpush.bf16.msra.mxu3 %v10240_v22  ;;  %v10192_v22 = vor.u32 %v14306_v3, %v10191_v5  ;;  %v8270_v62 = vadd.f32 %v8269_v25, %v8256_v7  ;;  %v10143_v5 = vld [vmem:[#allocation5 + $0x4f0] sm:$0xf]  ;;  %v14294_v3 = vld [vmem:[#allocation5 + $0x504] sm:$0xf0]  ;;  %v9952_v25 = vor.u32 %v14246_v54, %v9951_v29 }
 0x328   :  { %8528 = vmatpush.bf16.msra.mxu0 %v9640_v45  ;;  %v9592_v45 = vor.u32 %v14156_v11, %v9591_v42  ;;  %v8297_v7 = vpop.f32.mrf.mxu3  ;;  %v9543_v42 = vld [vmem:[#allocation5 + $0x40] sm:$0xf]  ;;  %v14144_v11 = vld [vmem:[#allocation5 + $0x54] sm:$0xf0]  ;;  %v10144_v15 = vor.u32 %v14294_v3, %v10143_v5  ;;  %v10095_v29 = vld [vmem:[#allocation5 + $0x490] sm:$0xf] }
 0x329   :  { %8542 = vmatpush.bf16.msra.mxu1 %v9832_v9  ;;  %v9976_v9 = vor.u32 %v14252_v14, %v9975_v50  ;;  %v8284_v19 = vadd.f32 %v8283_v30, %v8270_v62  ;;  %v14240_v50 = vld [vmem:[#allocation5 + $0x354] sm:$0xf0]  ;;  %v10119_v62 = vld [vmem:[#allocation5 + $0x4c0] sm:$0xf]  ;;  %v9544_v12 = vor.u32 %v14144_v11, %v9543_v42  ;;  %v9903_v30 = vld [vmem:[#allocation5 + $0x310] sm:$0xf] }
 0x32a   :  { %8556 = vmatpush.bf16.msra.mxu2 %v10024_v13  ;;  %v9567_v13 = vld [vmem:[#allocation5 + $0x70] sm:$0xf]  ;;  %v14288_v14 = vld [vmem:[#allocation5 + $0x4d4] sm:$0xf0]  ;;  %v14282_v54 = vld [vmem:[#allocation5 + $0x4a4] sm:$0xf0] }
 0x32b   :  { %8570 = vmatpush.bf16.msra.mxu3 %v10216_v0  ;;  %v14198_v0 = vld [vmem:[#allocation5 + $0x204] sm:$0xf0]  ;;  %v14372_v5 = vld [vmem:[#allocation5 + $0x774] sm:$0xf0]  ;;  %v10647_v3 = vld [vmem:[#allocation5 + $0x8e0] sm:$0xf]  ;;  %v15930_v61 = vpop.f32.mrf.mxu0 }
 0x32c   :  { %8529 = vmatpush.bf16.msra.mxu0 %v9616_v20  ;;  %v9568_v20 = vor.u32 %v14150_v18, %v9567_v13  ;;  %v14138_v13 = vld [vmem:[#allocation5 + $0x24] sm:$0xf0]  ;;  %v9711_v18 = vld [vmem:[#allocation5 + $0x190] sm:$0xf]  ;;  %v10839_v42 = vld [vmem:[#allocation5 + $0xa60] sm:$0xf] }
 0x32d   :  { %8543 = vmatpush.bf16.msra.mxu1 %v9808_v52  ;;  %v15928_v52 = vadd.f32 %v8297_v7, %v8284_v19  ;;  %v10455_v19 = vld [vmem:[#allocation5 + $0x760] sm:$0xf]  ;;  %v14468_v11 = vld [vmem:[#allocation5 + $0xa74] sm:$0xf0]  ;;  %16357 = vst [vmem:[#allocation96_spill] sm:$0xff] %v15930_v61 }
 0x32e   :  { %8557 = vmatpush.bf16.msra.mxu2 %v10000_v27  ;;  %v9760_v27 = vor.u32 %v14198_v0, %v9759_v28  ;;  %v14186_v28 = vld [vmem:[#allocation5 + $0x1a4] sm:$0xf0]  ;;  %v10120_v0 = vor.u32 %v14288_v14, %v10119_v62  ;;  %v10840_v62 = vor.u32 %v14468_v11, %v10839_v42  ;;  %v10431_v14 = vld [vmem:[#allocation5 + $0x730] sm:$0xf]  ;;  %v14504_v42 = vld [vmem:[#allocation5 + $0xb94] sm:$0xf0] }
 0x32f   :  { %8571 = vmatpush.bf16.msra.mxu3 %v10192_v22  ;;  %v14192_v22 = vld [vmem:[#allocation5 + $0x1d4] sm:$0xf0]  ;;  %v10383_v11 = vld [vmem:[#allocation5 + $0x6d0] sm:$0xf] }
 0x330   :  { %8530 = vmatpush.bf16.msra.mxu0 %v9592_v45  ;;  %v9519_v45 = vld [vmem:[#allocation5 + $0x10] sm:$0xf] }
 0x331   :  { %8544 = vmatpush.bf16.msra.mxu1 %v9784_v63  ;;  %v9736_v63 = vor.u32 %v14192_v22, %v9735_v24  ;;  %v9520_v7 = vor.u32 %v14138_v13, %v9519_v45  ;;  %v11031_v24 = vld [vmem:[#allocation5 + $0xbe0] sm:$0xf]  ;;  %v14516_v22 = vld [vmem:[#allocation5 + $0xbf4] sm:$0xf0]  ;;  %v14414_v45 = vld [vmem:[#allocation5 + $0x8c4] sm:$0xf0] }
 0x332   :  { %8558 = vmatpush.bf16.msra.mxu2 %v9976_v9  ;;  %v9928_v9 = vor.u32 %v14240_v50, %v9927_v8  ;;  %v10456_v8 = vor.u32 %v14372_v5, %v10455_v19  ;;  %v10815_v13 = vld [vmem:[#allocation5 + $0xa30] sm:$0xf]  ;;  %v14408_v5 = vld [vmem:[#allocation5 + $0x894] sm:$0xf0] }
 0x333   :  { %8572 = vmatpush.bf16.msra.mxu3 %v10168_v23  ;;  %v14234_v23 = vld [vmem:[#allocation5 + $0x324] sm:$0xf0] }
 0x334   :  { %8531 = vmatpush.bf16.msra.mxu0 %v9568_v20  ;;  %v14420_v20 = vld [vmem:[#allocation5 + $0x8f4] sm:$0xf0] }
 0x335   :  { %8545 = vmatpush.bf16.msra.mxu1 %v9760_v27  ;;  %v9712_v27 = vor.u32 %v14186_v28, %v9711_v18  ;;  %v10648_v50 = vor.u32 %v14420_v20, %v10647_v3  ;;  %v15932_v18 = vpop.f32.mrf.mxu1  ;;  %v10432_v28 = vor.u32 %v14366_v37, %v10431_v14  ;;  %v10791_v3 = vld [vmem:[#allocation5 + $0xa00] sm:$0xf] }
 0x336   :  { %8559 = vmatpush.bf16.msra.mxu2 %v9952_v25  ;;  %v9904_v25 = vor.u32 %v14234_v23, %v9903_v30  ;;  %16358 = vst [vmem:[#allocation97_spill] sm:$0xff] %v15932_v18  ;;  %v10624_v30 = vor.u32 %v14414_v45, %v10623_v53  ;;  %v10407_v23 = vld [vmem:[#allocation5 + $0x700] sm:$0xf]  ;;  %v14498_v45 = vld [vmem:[#allocation5 + $0xb64] sm:$0xf0] }
 0x337   :  { %8573 = vmatpush.bf16.msra.mxu3 %v10144_v15  ;;  %v10096_v15 = vor.u32 %v14282_v54, %v10095_v29  ;;  %v14360_v29 = vld [vmem:[#allocation5 + $0x714] sm:$0xf0]  ;;  %v10599_v54 = vld [vmem:[#allocation5 + $0x880] sm:$0xf]  ;;  %v14654_v18 = vld [vmem:[#allocation5 + $0x1044] sm:$0xf0] }
 0x338   :  { %8532 = vmatpush.bf16.msra.mxu0 %v9544_v12  ;;  %v11032_v12 = vor.u32 %v14516_v22, %v11031_v24  ;;  %v10983_v20 = vld [vmem:[#allocation5 + $0xb80] sm:$0xf]  ;;  %v10408_v37 = vor.u32 %v14360_v29, %v10407_v23  ;;  %v15938_v24 = vpop.f32.mrf.mxu2  ;;  %v14348_v23 = vld [vmem:[#allocation5 + $0x6b4] sm:$0xf0] }
 0x339   :  { %8546 = vmatpush.bf16.msra.mxu1 %v9736_v63  ;;  %v11007_v63 = vld [vmem:[#allocation5 + $0xbb0] sm:$0xf]  ;;  %16359 = vst [vmem:[#allocation98_spill] sm:$0xff] %v15938_v24  ;;  %v10984_v22 = vor.u32 %v14504_v42, %v10983_v20  ;;  %v10551_v29 = vld [vmem:[#allocation5 + $0x820] sm:$0xf] }
 0x33a   :  { %8560 = vmatpush.bf16.msra.mxu2 %v9928_v9  ;;  %v14510_v9 = vld [vmem:[#allocation5 + $0xbc4] sm:$0xf0]  ;;  %v10935_v20 = vld [vmem:[#allocation5 + $0xb20] sm:$0xf]  ;;  %v14492_v42 = vld [vmem:[#allocation5 + $0xb34] sm:$0xf0] }
 0x33b   :  { %8574 = vmatpush.bf16.msra.mxu3 %v10120_v0  ;;  %v10816_v0 = vor.u32 %v14462_v57, %v10815_v13  ;;  %v11008_v19 = vor.u32 %v14510_v9, %v11007_v63  ;;  %v10600_v57 = vor.u32 %v14408_v5, %v10599_v54  ;;  %v14396_v5 = vld [vmem:[#allocation5 + $0x834] sm:$0xf0]  ;;  %v11391_v24 = vld [vmem:[#allocation5 + $0xeb0] sm:$0xf] }
 0x33c   :  { %8533 = vmatpush.bf16.msra.mxu0 %v9520_v7  ;;  %v14456_v7 = vld [vmem:[#allocation5 + $0xa14] sm:$0xf0]  ;;  %v8311_v14 = vpop.f32.mrf.mxu0 }
 0x33d   :  { %8547 = vmatpush.bf16.msra.mxu1 %v9712_v27  ;;  %v10792_v53 = vor.u32 %v14456_v7, %v10791_v3  ;;  %v14354_v27 = vld [vmem:[#allocation5 + $0x6e4] sm:$0xf0]  ;;  %v8312_v13 = vadd.f32 %v8311_v14, %v15928_v52  ;;  %v8325_v9 = vpop.f32.mrf.mxu1  ;;  %v10743_v3 = vld [vmem:[#allocation5 + $0x9a0] sm:$0xf]  ;;  %v14444_v7 = vld [vmem:[#allocation5 + $0x9b4] sm:$0xf0]  ;;  %v10552_v52 = vor.u32 %v14396_v5, %v10551_v29 }
 0x33e   :  { %8561 = vmatpush.bf16.msra.mxu2 %v9904_v25  ;;  %v10575_v25 = vld [vmem:[#allocation5 + $0x850] sm:$0xf]  ;;  %v10384_v63 = vor.u32 %v14354_v27, %v10383_v11  ;;  %v14342_v11 = vld [vmem:[#allocation5 + $0x684] sm:$0xf0]  ;;  %v10503_v29 = vld [vmem:[#allocation5 + $0x7c0] sm:$0xf] }
 0x33f   :  { %8575 = vmatpush.bf16.msra.mxu3 %v10096_v15  ;;  %8534 = vmatmul.bf16.vlgmr.msra.gmra.mxu0 %v15558_v58  ;;  %v14402_v15 = vld [vmem:[#allocation5 + $0x864] sm:$0xf0]  ;;  %v10527_v27 = vld [vmem:[#allocation5 + $0x7f0] sm:$0xf]  ;;  %v14384_v5 = vld [vmem:[#allocation5 + $0x7d4] sm:$0xf0] }
 0x340   :  { %8582 = vmatpush.bf16.msrb.mxu0 %v10456_v8  ;;  %8548 = vmatmul.bf16.vlgmr.msra.gmra.mxu1 %v15564_v10  ;;  %v10767_v8 = vld [vmem:[#allocation5 + $0x9d0] sm:$0xf] }
 0x341   :  { %8596 = vmatpush.bf16.msrb.mxu1 %v10648_v50  ;;  %8562 = vmatmul.bf16.vlgmr.msra.gmra.mxu2 %v15560_v1  ;;  %v14450_v50 = vld [vmem:[#allocation5 + $0x9e4] sm:$0xf0] }
 0x342   :  { %8610 = vmatpush.bf16.msrb.mxu2 %v10840_v62  ;;  %8576 = vmatmul.bf16.vlgmr.msra.gmra.mxu3 %v15566_v17  ;;  %v15940_v62 = vpop.f32.mrf.mxu3 }
 0x343   :  { %8624 = vmatpush.bf16.msrb.mxu3 %v11032_v12  ;;  %16360 = vst [vmem:[#allocation99_spill] sm:$0xff] %v15940_v62  ;;  %v10959_v12 = vld [vmem:[#allocation5 + $0xb50] sm:$0xf]  ;;  %v14558_v62 = vld [vmem:[#allocation5 + $0xd44] sm:$0xf0] }
 0x344   :  { %8583 = vmatpush.bf16.msrb.mxu0 %v10432_v28  ;;  %v10576_v28 = vor.u32 %v14402_v15, %v10575_v25  ;;  %v10960_v54 = vor.u32 %v14498_v45, %v10959_v12  ;;  %v10936_v25 = vor.u32 %v14492_v42, %v10935_v20  ;;  %v8339_v15 = vpop.f32.mrf.mxu2  ;;  %v10911_v45 = vld [vmem:[#allocation5 + $0xaf0] sm:$0xf]  ;;  %v14480_v20 = vld [vmem:[#allocation5 + $0xad4] sm:$0xf0]  ;;  %v15945_v61 = vpop.f32.mrf.mxu0 }
 0x345   :  { %8597 = vmatpush.bf16.msrb.mxu1 %v10624_v30  ;;  %v10768_v30 = vor.u32 %v14450_v50, %v10767_v8  ;;  %v10719_v8 = vld [vmem:[#allocation5 + $0x970] sm:$0xf]  ;;  %v14438_v50 = vld [vmem:[#allocation5 + $0x984] sm:$0xf0]  ;;  %16361 = vst [vmem:[#allocation100_spill] sm:$0xff] %v15945_v61 }
 0x346   :  { %8611 = vmatpush.bf16.msrb.mxu2 %v10816_v0  ;;  %v10359_v0 = vld [vmem:[#allocation5 + $0x6a0] sm:$0xf] }
 0x347   :  { %8625 = vmatpush.bf16.msrb.mxu3 %v11008_v19  ;;  %v8326_v19 = vadd.f32 %v8325_v9, %v8312_v13  ;;  %v14486_v13 = vld [vmem:[#allocation5 + $0xb04] sm:$0xf0] }
 0x348   :  { %8584 = vmatpush.bf16.msrb.mxu0 %v10408_v37  ;;  %v10360_v37 = vor.u32 %v14348_v23, %v10359_v0  ;;  %v10311_v0 = vld [vmem:[#allocation5 + $0x640] sm:$0xf]  ;;  %v14336_v23 = vld [vmem:[#allocation5 + $0x654] sm:$0xf0] }
 0x349   :  { %8598 = vmatpush.bf16.msrb.mxu1 %v10600_v57  ;;  %v10744_v57 = vor.u32 %v14444_v7, %v10743_v3  ;;  %v8340_v14 = vadd.f32 %v8339_v15, %v8326_v19  ;;  %v10695_v3 = vld [vmem:[#allocation5 + $0x940] sm:$0xf]  ;;  %v14432_v7 = vld [vmem:[#allocation5 + $0x954] sm:$0xf0]  ;;  %v10312_v42 = vor.u32 %v14336_v23, %v10311_v0  ;;  %v10671_v15 = vld [vmem:[#allocation5 + $0x910] sm:$0xf] }
 0x34a   :  { %8612 = vmatpush.bf16.msrb.mxu2 %v10792_v53  ;;  %v10335_v53 = vld [vmem:[#allocation5 + $0x670] sm:$0xf]  ;;  %v8353_v12 = vpop.f32.mrf.mxu3  ;;  %v10887_v19 = vld [vmem:[#allocation5 + $0xac0] sm:$0xf]  ;;  %v14660_v23 = vld [vmem:[#allocation5 + $0x1074] sm:$0xf0] }
 0x34b   :  { %8626 = vmatpush.bf16.msrb.mxu3 %v10984_v22  ;;  %v14390_v22 = vld [vmem:[#allocation5 + $0x804] sm:$0xf0]  ;;  %v15943_v9 = vadd.f32 %v8353_v12, %v8340_v14  ;;  %v11223_v14 = vld [vmem:[#allocation5 + $0xd60] sm:$0xf]  ;;  %v14564_v12 = vld [vmem:[#allocation5 + $0xd74] sm:$0xf0] }
 0x34c   :  { %8585 = vmatpush.bf16.msrb.mxu0 %v10384_v63  ;;  %v10336_v63 = vor.u32 %v14342_v11, %v10335_v53  ;;  %v14330_v53 = vld [vmem:[#allocation5 + $0x624] sm:$0xf0]  ;;  %v10479_v11 = vld [vmem:[#allocation5 + $0x790] sm:$0xf]  ;;  %v11607_v0 = vld [vmem:[#allocation5 + $0x1060] sm:$0xf] }
 0x34d   :  { %8599 = vmatpush.bf16.msrb.mxu1 %v10576_v28  ;;  %v10528_v28 = vor.u32 %v14390_v22, %v10527_v27  ;;  %v14378_v27 = vld [vmem:[#allocation5 + $0x7a4] sm:$0xf0]  ;;  %v10888_v22 = vor.u32 %v14480_v20, %v10887_v19  ;;  %v11608_v19 = vor.u32 %v14660_v23, %v11607_v0  ;;  %v11199_v20 = vld [vmem:[#allocation5 + $0xd30] sm:$0xf] }
 0x34e   :  { %8613 = vmatpush.bf16.msrb.mxu2 %v10768_v30  ;;  %v10720_v30 = vor.u32 %v14438_v50, %v10719_v8  ;;  %v10863_v8 = vld [vmem:[#allocation5 + $0xa90] sm:$0xf]  ;;  %v14474_v50 = vld [vmem:[#allocation5 + $0xaa4] sm:$0xf0] }
 0x34f   :  { %8627 = vmatpush.bf16.msrb.mxu3 %v10960_v54  ;;  %v10912_v54 = vor.u32 %v14486_v13, %v10911_v45  ;;  %v11415_v45 = vld [vmem:[#allocation5 + $0xee0] sm:$0xf]  ;;  %v11151_v23 = vld [vmem:[#allocation5 + $0xcd0] sm:$0xf] }
 0x350   :  { %8586 = vmatpush.bf16.msrb.mxu0 %v10360_v37  ;;  %v10287_v37 = vld [vmem:[#allocation5 + $0x610] sm:$0xf] }
 0x351   :  { %8600 = vmatpush.bf16.msrb.mxu1 %v10552_v52  ;;  %v10504_v52 = vor.u32 %v14384_v5, %v10503_v29  ;;  %v10288_v13 = vor.u32 %v14330_v53, %v10287_v37  ;;  %v11799_v29 = vld [vmem:[#allocation5 + $0x11e0] sm:$0xf]  ;;  %v14708_v5 = vld [vmem:[#allocation5 + $0x11f4] sm:$0xf0]  ;;  %v14606_v37 = vld [vmem:[#allocation5 + $0xec4] sm:$0xf0] }
 0x352   :  { %8614 = vmatpush.bf16.msrb.mxu2 %v10744_v57  ;;  %v10696_v57 = vor.u32 %v14432_v7, %v10695_v3  ;;  %v11224_v3 = vor.u32 %v14564_v12, %v11223_v14  ;;  %v11583_v53 = vld [vmem:[#allocation5 + $0x1030] sm:$0xf]  ;;  %v14600_v12 = vld [vmem:[#allocation5 + $0xe94] sm:$0xf0] }
 0x353   :  { %8628 = vmatpush.bf16.msrb.mxu3 %v10936_v25  ;;  %v14426_v25 = vld [vmem:[#allocation5 + $0x924] sm:$0xf0] }
 0x354   :  { %8587 = vmatpush.bf16.msrb.mxu0 %v10336_v63  ;;  %v14612_v63 = vld [vmem:[#allocation5 + $0xef4] sm:$0xf0] }
 0x355   :  { %8601 = vmatpush.bf16.msrb.mxu1 %v10528_v28  ;;  %v10480_v28 = vor.u32 %v14378_v27, %v10479_v11  ;;  %v11416_v7 = vor.u32 %v14612_v63, %v11415_v45  ;;  %v15947_v11 = vpop.f32.mrf.mxu1  ;;  %v11200_v27 = vor.u32 %v14558_v62, %v11199_v20  ;;  %v11559_v45 = vld [vmem:[#allocation5 + $0x1000] sm:$0xf]  ;;  %v14696_v62 = vld [vmem:[#allocation5 + $0x1194] sm:$0xf0] }
 0x356   :  { %8615 = vmatpush.bf16.msrb.mxu2 %v10720_v30  ;;  %v10672_v30 = vor.u32 %v14426_v25, %v10671_v15  ;;  %16362 = vst [vmem:[#allocation101_spill] sm:$0xff] %v15947_v11  ;;  %v11392_v15 = vor.u32 %v14606_v37, %v11391_v24  ;;  %v11175_v25 = vld [vmem:[#allocation5 + $0xd00] sm:$0xf]  ;;  %v14690_v37 = vld [vmem:[#allocation5 + $0x1164] sm:$0xf0] }
 0x357   :  { %8629 = vmatpush.bf16.msrb.mxu3 %v10912_v54  ;;  %v10864_v54 = vor.u32 %v14474_v50, %v10863_v8  ;;  %v14552_v8 = vld [vmem:[#allocation5 + $0xd14] sm:$0xf0]  ;;  %v11367_v50 = vld [vmem:[#allocation5 + $0xe80] sm:$0xf]  ;;  %v14846_v11 = vld [vmem:[#allocation5 + $0x1644] sm:$0xf0] }
 0x358   :  { %8588 = vmatpush.bf16.msrb.mxu0 %v10312_v42  ;;  %v11800_v42 = vor.u32 %v14708_v5, %v11799_v29  ;;  %v11751_v63 = vld [vmem:[#allocation5 + $0x1180] sm:$0xf]  ;;  %v11368_v24 = vor.u32 %v14600_v12, %v11367_v50  ;;  %v15953_v29 = vpop.f32.mrf.mxu2  ;;  %v14588_v12 = vld [vmem:[#allocation5 + $0xe34] sm:$0xf0] }
 0x359   :  { %8602 = vmatpush.bf16.msrb.mxu1 %v10504_v52  ;;  %v11775_v52 = vld [vmem:[#allocation5 + $0x11b0] sm:$0xf]  ;;  %16363 = vst [vmem:[#allocation102_spill] sm:$0xff] %v15953_v29  ;;  %v11752_v5 = vor.u32 %v14696_v62, %v11751_v63  ;;  %v11703_v63 = vld [vmem:[#allocation5 + $0x1120] sm:$0xf] }
 0x35a   :  { %8616 = vmatpush.bf16.msrb.mxu2 %v10696_v57  ;;  %v14702_v57 = vld [vmem:[#allocation5 + $0x11c4] sm:$0xf0]  ;;  %v14684_v62 = vld [vmem:[#allocation5 + $0x1134] sm:$0xf0]  ;;  %v12159_v29 = vld [vmem:[#allocation5 + $0x14b0] sm:$0xf] }
 0x35b   :  { %8630 = vmatpush.bf16.msrb.mxu3 %v10888_v22  ;;  %v11584_v22 = vor.u32 %v14654_v18, %v11583_v53  ;;  %v11776_v14 = vor.u32 %v14702_v57, %v11775_v52  ;;  %v11176_v18 = vor.u32 %v14552_v8, %v11175_v25  ;;  %v14540_v25 = vld [vmem:[#allocation5 + $0xcb4] sm:$0xf0]  ;;  %v11319_v8 = vld [vmem:[#allocation5 + $0xe20] sm:$0xf] }
 0x35c   :  { %8589 = vmatpush.bf16.msrb.mxu0 %v10288_v13  ;;  %v14648_v13 = vld [vmem:[#allocation5 + $0x1014] sm:$0xf0]  ;;  %v8367_v20 = vpop.f32.mrf.mxu0 }
 0x35d   :  { %8603 = vmatpush.bf16.msrb.mxu1 %v10480_v28  ;;  %v11560_v0 = vor.u32 %v14648_v13, %v11559_v45  ;;  %v14546_v28 = vld [vmem:[#allocation5 + $0xce4] sm:$0xf0]  ;;  %v8368_v53 = vadd.f32 %v8367_v20, %v15943_v9  ;;  %v8381_v57 = vpop.f32.mrf.mxu1  ;;  %v11511_v45 = vld [vmem:[#allocation5 + $0xfa0] sm:$0xf]  ;;  %v14636_v13 = vld [vmem:[#allocation5 + $0xfb4] sm:$0xf0]  ;;  %v11320_v9 = vor.u32 %v14588_v12, %v11319_v8 }
 0x35e   :  { %8617 = vmatpush.bf16.msrb.mxu2 %v10672_v30  ;;  %v11343_v30 = vld [vmem:[#allocation5 + $0xe50] sm:$0xf]  ;;  %v11152_v52 = vor.u32 %v14546_v28, %v11151_v23  ;;  %v14534_v23 = vld [vmem:[#allocation5 + $0xc84] sm:$0xf0]  ;;  %v11271_v8 = vld [vmem:[#allocation5 + $0xdc0] sm:$0xf] }
 0x35f   :  { %8631 = vmatpush.bf16.msrb.mxu3 %v10864_v54  ;;  %8590 = vmatmul.bf16.vlgmr.msrb.gmra.mxu0 %v15570_v39  ;;  %v14594_v54 = vld [vmem:[#allocation5 + $0xe64] sm:$0xf0]  ;;  %v11295_v28 = vld [vmem:[#allocation5 + $0xdf0] sm:$0xf]  ;;  %v14576_v12 = vld [vmem:[#allocation5 + $0xdd4] sm:$0xf0] }
 0x360   :  { %8638 = vmatpush.bf16.msra.mxu0 %v11224_v3  ;;  %8604 = vmatmul.bf16.vlgmr.msrb.gmra.mxu1 %v15574_v44  ;;  %v11535_v3 = vld [vmem:[#allocation5 + $0xfd0] sm:$0xf] }
 0x361   :  { %8652 = vmatpush.bf16.msra.mxu1 %v11416_v7  ;;  %8618 = vmatmul.bf16.vlgmr.msrb.gmra.mxu2 %v15572_v43  ;;  %v14642_v7 = vld [vmem:[#allocation5 + $0xfe4] sm:$0xf0] }
 0x362   :  { %8666 = vmatpush.bf16.msra.mxu2 %v11608_v19  ;;  %8632 = vmatmul.bf16.vlgmr.msrb.gmra.mxu3 %v15576_v47  ;;  %v15955_v19 = vpop.f32.mrf.mxu3 }
 0x363   :  { %8680 = vmatpush.bf16.msra.mxu3 %v11800_v42  ;;  %16364 = vst [vmem:[#allocation103_spill] sm:$0xff] %v15955_v19  ;;  %v11727_v42 = vld [vmem:[#allocation5 + $0x1150] sm:$0xf]  ;;  %v14750_v19 = vld [vmem:[#allocation5 + $0x1344] sm:$0xf0] }
 0x364   :  { %8639 = vmatpush.bf16.msra.mxu0 %v11200_v27  ;;  %v11344_v27 = vor.u32 %v14594_v54, %v11343_v30  ;;  %v11728_v50 = vor.u32 %v14690_v37, %v11727_v42  ;;  %v11704_v30 = vor.u32 %v14684_v62, %v11703_v63  ;;  %v8395_v54 = vpop.f32.mrf.mxu2  ;;  %v11679_v37 = vld [vmem:[#allocation5 + $0x10f0] sm:$0xf]  ;;  %v14672_v63 = vld [vmem:[#allocation5 + $0x10d4] sm:$0xf0]  ;;  %v15960_v61 = vpop.f32.mrf.mxu0 }
 0x365   :  { %8653 = vmatpush.bf16.msra.mxu1 %v11392_v15  ;;  %v11536_v15 = vor.u32 %v14642_v7, %v11535_v3  ;;  %v11487_v3 = vld [vmem:[#allocation5 + $0xf70] sm:$0xf]  ;;  %v14630_v7 = vld [vmem:[#allocation5 + $0xf84] sm:$0xf0]  ;;  %16365 = vst [vmem:[#allocation104_spill] sm:$0xff] %v15960_v61 }
 0x366   :  { %8667 = vmatpush.bf16.msra.mxu2 %v11584_v22  ;;  %v11127_v22 = vld [vmem:[#allocation5 + $0xca0] sm:$0xf] }
 0x367   :  { %8681 = vmatpush.bf16.msra.mxu3 %v11776_v14  ;;  %v8382_v14 = vadd.f32 %v8381_v57, %v8368_v53  ;;  %v14678_v53 = vld [vmem:[#allocation5 + $0x1104] sm:$0xf0] }
 0x368   :  { %8640 = vmatpush.bf16.msra.mxu0 %v11176_v18  ;;  %v11128_v18 = vor.u32 %v14540_v25, %v11127_v22  ;;  %v11079_v22 = vld [vmem:[#allocation5 + $0xc40] sm:$0xf]  ;;  %v14528_v25 = vld [vmem:[#allocation5 + $0xc54] sm:$0xf0] }
 0x369   :  { %8654 = vmatpush.bf16.msra.mxu1 %v11368_v24  ;;  %v11512_v24 = vor.u32 %v14636_v13, %v11511_v45  ;;  %v8396_v20 = vadd.f32 %v8395_v54, %v8382_v14  ;;  %v11463_v45 = vld [vmem:[#allocation5 + $0xf40] sm:$0xf]  ;;  %v14624_v13 = vld [vmem:[#allocation5 + $0xf54] sm:$0xf0]  ;;  %v11080_v62 = vor.u32 %v14528_v25, %v11079_v22  ;;  %v11439_v54 = vld [vmem:[#allocation5 + $0xf10] sm:$0xf] }
 0x36a   :  { %8668 = vmatpush.bf16.msra.mxu2 %v11560_v0  ;;  %v11103_v0 = vld [vmem:[#allocation5 + $0xc70] sm:$0xf]  ;;  %v8409_v42 = vpop.f32.mrf.mxu3  ;;  %v11655_v14 = vld [vmem:[#allocation5 + $0x10c0] sm:$0xf]  ;;  %v14852_v25 = vld [vmem:[#allocation5 + $0x1674] sm:$0xf0] }
 0x36b   :  { %8682 = vmatpush.bf16.msra.mxu3 %v11752_v5  ;;  %v14582_v5 = vld [vmem:[#allocation5 + $0xe04] sm:$0xf0]  ;;  %v15958_v57 = vadd.f32 %v8409_v42, %v8396_v20  ;;  %v11991_v20 = vld [vmem:[#allocation5 + $0x1360] sm:$0xf]  ;;  %v14756_v42 = vld [vmem:[#allocation5 + $0x1374] sm:$0xf0] }
 0x36c   :  { %8641 = vmatpush.bf16.msra.mxu0 %v11152_v52  ;;  %v11104_v52 = vor.u32 %v14534_v23, %v11103_v0  ;;  %v14522_v0 = vld [vmem:[#allocation5 + $0xc24] sm:$0xf0]  ;;  %v11247_v23 = vld [vmem:[#allocation5 + $0xd90] sm:$0xf]  ;;  %v12375_v22 = vld [vmem:[#allocation5 + $0x1660] sm:$0xf] }
 0x36d   :  { %8655 = vmatpush.bf16.msra.mxu1 %v11344_v27  ;;  %v11296_v27 = vor.u32 %v14582_v5, %v11295_v28  ;;  %v14570_v28 = vld [vmem:[#allocation5 + $0xda4] sm:$0xf0]  ;;  %v11656_v5 = vor.u32 %v14672_v63, %v11655_v14  ;;  %v12376_v14 = vor.u32 %v14852_v25, %v12375_v22  ;;  %v11967_v63 = vld [vmem:[#allocation5 + $0x1330] sm:$0xf] }
 0x36e   :  { %8669 = vmatpush.bf16.msra.mxu2 %v11536_v15  ;;  %v11488_v15 = vor.u32 %v14630_v7, %v11487_v3  ;;  %v11631_v3 = vld [vmem:[#allocation5 + $0x1090] sm:$0xf]  ;;  %v14666_v7 = vld [vmem:[#allocation5 + $0x10a4] sm:$0xf0] }
 0x36f   :  { %8683 = vmatpush.bf16.msra.mxu3 %v11728_v50  ;;  %v11680_v50 = vor.u32 %v14678_v53, %v11679_v37  ;;  %v12183_v37 = vld [vmem:[#allocation5 + $0x14e0] sm:$0xf]  ;;  %v11919_v25 = vld [vmem:[#allocation5 + $0x12d0] sm:$0xf] }
 0x370   :  { %8642 = vmatpush.bf16.msra.mxu0 %v11128_v18  ;;  %v11055_v18 = vld [vmem:[#allocation5 + $0xc10] sm:$0xf] }
 0x371   :  { %8656 = vmatpush.bf16.msra.mxu1 %v11320_v9  ;;  %v11272_v9 = vor.u32 %v14576_v12, %v11271_v8  ;;  %v11056_v53 = vor.u32 %v14522_v0, %v11055_v18  ;;  %v12567_v8 = vld [vmem:[#allocation5 + $0x17e0] sm:$0xf]  ;;  %v14900_v12 = vld [vmem:[#allocation5 + $0x17f4] sm:$0xf0]  ;;  %v14798_v18 = vld [vmem:[#allocation5 + $0x14c4] sm:$0xf0] }
 0x372   :  { %8670 = vmatpush.bf16.msra.mxu2 %v11512_v24  ;;  %v11464_v24 = vor.u32 %v14624_v13, %v11463_v45  ;;  %v11992_v45 = vor.u32 %v14756_v42, %v11991_v20  ;;  %v12351_v0 = vld [vmem:[#allocation5 + $0x1630] sm:$0xf]  ;;  %v14792_v42 = vld [vmem:[#allocation5 + $0x1494] sm:$0xf0] }
 0x373   :  { %8684 = vmatpush.bf16.msra.mxu3 %v11704_v30  ;;  %v14618_v30 = vld [vmem:[#allocation5 + $0xf24] sm:$0xf0] }
 0x374   :  { %8643 = vmatpush.bf16.msra.mxu0 %v11104_v52  ;;  %v14804_v52 = vld [vmem:[#allocation5 + $0x14f4] sm:$0xf0] }
 0x375   :  { %8657 = vmatpush.bf16.msra.mxu1 %v11296_v27  ;;  %v11248_v27 = vor.u32 %v14570_v28, %v11247_v23  ;;  %v12184_v13 = vor.u32 %v14804_v52, %v12183_v37  ;;  %v15962_v23 = vpop.f32.mrf.mxu1  ;;  %v11968_v28 = vor.u32 %v14750_v19, %v11967_v63  ;;  %v12327_v37 = vld [vmem:[#allocation5 + $0x1600] sm:$0xf]  ;;  %v14888_v19 = vld [vmem:[#allocation5 + $0x1794] sm:$0xf0] }
 0x376   :  { %8671 = vmatpush.bf16.msra.mxu2 %v11488_v15  ;;  %v11440_v15 = vor.u32 %v14618_v30, %v11439_v54  ;;  %16366 = vst [vmem:[#allocation105_spill] sm:$0xff] %v15962_v23  ;;  %v12160_v54 = vor.u32 %v14798_v18, %v12159_v29  ;;  %v11943_v30 = vld [vmem:[#allocation5 + $0x1300] sm:$0xf]  ;;  %v14882_v18 = vld [vmem:[#allocation5 + $0x1764] sm:$0xf0] }
 0x377   :  { %8685 = vmatpush.bf16.msra.mxu3 %v11680_v50  ;;  %v11632_v50 = vor.u32 %v14666_v7, %v11631_v3  ;;  %v14744_v3 = vld [vmem:[#allocation5 + $0x1314] sm:$0xf0]  ;;  %v12135_v7 = vld [vmem:[#allocation5 + $0x1480] sm:$0xf]  ;;  %v15038_v23 = vld [vmem:[#allocation5 + $0x1c44] sm:$0xf0] }
 0x378   :  { %8644 = vmatpush.bf16.msra.mxu0 %v11080_v62  ;;  %v12568_v62 = vor.u32 %v14900_v12, %v12567_v8  ;;  %v12519_v52 = vld [vmem:[#allocation5 + $0x1780] sm:$0xf]  ;;  %v12136_v29 = vor.u32 %v14792_v42, %v12135_v7  ;;  %v15968_v8 = vpop.f32.mrf.mxu2  ;;  %v14780_v42 = vld [vmem:[#allocation5 + $0x1434] sm:$0xf0] }
 0x379   :  { %8658 = vmatpush.bf16.msra.mxu1 %v11272_v9  ;;  %v12543_v9 = vld [vmem:[#allocation5 + $0x17b0] sm:$0xf]  ;;  %16367 = vst [vmem:[#allocation106_spill] sm:$0xff] %v15968_v8  ;;  %v12520_v12 = vor.u32 %v14888_v19, %v12519_v52  ;;  %v12471_v52 = vld [vmem:[#allocation5 + $0x1720] sm:$0xf] }
 0x37a   :  { %8672 = vmatpush.bf16.msra.mxu2 %v11464_v24  ;;  %v14894_v24 = vld [vmem:[#allocation5 + $0x17c4] sm:$0xf0]  ;;  %v14876_v19 = vld [vmem:[#allocation5 + $0x1734] sm:$0xf0]  ;;  %v12927_v8 = vld [vmem:[#allocation5 + $0x1ab0] sm:$0xf] }
 0x37b   :  { %8686 = vmatpush.bf16.msra.mxu3 %v11656_v5  ;;  %v12352_v5 = vor.u32 %v14846_v11, %v12351_v0  ;;  %v12544_v20 = vor.u32 %v14894_v24, %v12543_v9  ;;  %v11944_v11 = vor.u32 %v14744_v3, %v11943_v30  ;;  %v14732_v30 = vld [vmem:[#allocation5 + $0x12b4] sm:$0xf0]  ;;  %v12087_v3 = vld [vmem:[#allocation5 + $0x1420] sm:$0xf] }
 0x37c   :  { %8645 = vmatpush.bf16.msra.mxu0 %v11056_v53  ;;  %v14840_v53 = vld [vmem:[#allocation5 + $0x1614] sm:$0xf0]  ;;  %v8423_v63 = vpop.f32.mrf.mxu0 }
 0x37d   :  { %8659 = vmatpush.bf16.msra.mxu1 %v11248_v27  ;;  %v12328_v22 = vor.u32 %v14840_v53, %v12327_v37  ;;  %v14738_v27 = vld [vmem:[#allocation5 + $0x12e4] sm:$0xf0]  ;;  %v8424_v0 = vadd.f32 %v8423_v63, %v15958_v57  ;;  %v8437_v24 = vpop.f32.mrf.mxu1  ;;  %v12279_v37 = vld [vmem:[#allocation5 + $0x15a0] sm:$0xf]  ;;  %v14828_v53 = vld [vmem:[#allocation5 + $0x15b4] sm:$0xf0]  ;;  %v12088_v57 = vor.u32 %v14780_v42, %v12087_v3 }
 0x37e   :  { %8673 = vmatpush.bf16.msra.mxu2 %v11440_v15  ;;  %v12111_v15 = vld [vmem:[#allocation5 + $0x1450] sm:$0xf]  ;;  %v11920_v9 = vor.u32 %v14738_v27, %v11919_v25  ;;  %v14726_v25 = vld [vmem:[#allocation5 + $0x1284] sm:$0xf0]  ;;  %v12039_v3 = vld [vmem:[#allocation5 + $0x13c0] sm:$0xf] }
 0x37f   :  { %8687 = vmatpush.bf16.msra.mxu3 %v11632_v50  ;;  %8646 = vmatmul.bf16.vlgmr.msra.gmra.mxu0 %v15582_v31  ;;  %v14786_v50 = vld [vmem:[#allocation5 + $0x1464] sm:$0xf0]  ;;  %v12063_v27 = vld [vmem:[#allocation5 + $0x13f0] sm:$0xf]  ;;  %v14768_v42 = vld [vmem:[#allocation5 + $0x13d4] sm:$0xf0] }
 0x380   :  { %8694 = vmatpush.bf16.msrb.mxu0 %v11992_v45  ;;  %8660 = vmatmul.bf16.vlgmr.msra.gmra.mxu1 %v15586_v36  ;;  %v12303_v45 = vld [vmem:[#allocation5 + $0x15d0] sm:$0xf] }
 0x381   :  { %8708 = vmatpush.bf16.msrb.mxu1 %v12184_v13  ;;  %8674 = vmatmul.bf16.vlgmr.msra.gmra.mxu2 %v15584_v35  ;;  %v14834_v13 = vld [vmem:[#allocation5 + $0x15e4] sm:$0xf0] }
 0x382   :  { %8722 = vmatpush.bf16.msrb.mxu2 %v12376_v14  ;;  %8688 = vmatmul.bf16.vlgmr.msra.gmra.mxu3 %v15588_v40  ;;  %v15970_v14 = vpop.f32.mrf.mxu3 }
 0x383   :  { %8736 = vmatpush.bf16.msrb.mxu3 %v12568_v62  ;;  %16368 = vst [vmem:[#allocation107_spill] sm:$0xff] %v15970_v14  ;;  %v12495_v62 = vld [vmem:[#allocation5 + $0x1750] sm:$0xf]  ;;  %v14942_v14 = vld [vmem:[#allocation5 + $0x1944] sm:$0xf0] }
 0x384   :  { %8695 = vmatpush.bf16.msrb.mxu0 %v11968_v28  ;;  %v12112_v28 = vor.u32 %v14786_v50, %v12111_v15  ;;  %v12496_v7 = vor.u32 %v14882_v18, %v12495_v62  ;;  %v12472_v15 = vor.u32 %v14876_v19, %v12471_v52  ;;  %v8451_v50 = vpop.f32.mrf.mxu2  ;;  %v12447_v18 = vld [vmem:[#allocation5 + $0x16f0] sm:$0xf]  ;;  %v14864_v52 = vld [vmem:[#allocation5 + $0x16d4] sm:$0xf0]  ;;  %v15975_v61 = vpop.f32.mrf.mxu0 }
 0x385   :  { %8709 = vmatpush.bf16.msrb.mxu1 %v12160_v54  ;;  %v12304_v54 = vor.u32 %v14834_v13, %v12303_v45  ;;  %v12255_v45 = vld [vmem:[#allocation5 + $0x1570] sm:$0xf]  ;;  %v14822_v13 = vld [vmem:[#allocation5 + $0x1584] sm:$0xf0]  ;;  %16369 = vst [vmem:[#allocation108_spill] sm:$0xff] %v15975_v61 }
 0x386   :  { %8723 = vmatpush.bf16.msrb.mxu2 %v12352_v5  ;;  %v11895_v5 = vld [vmem:[#allocation5 + $0x12a0] sm:$0xf] }
 0x387   :  { %8737 = vmatpush.bf16.msrb.mxu3 %v12544_v20  ;;  %v8438_v20 = vadd.f32 %v8437_v24, %v8424_v0  ;;  %v14870_v0 = vld [vmem:[#allocation5 + $0x1704] sm:$0xf0] }
 0x388   :  { %8696 = vmatpush.bf16.msrb.mxu0 %v11944_v11  ;;  %v11896_v11 = vor.u32 %v14732_v30, %v11895_v5  ;;  %v11847_v5 = vld [vmem:[#allocation5 + $0x1240] sm:$0xf]  ;;  %v14720_v30 = vld [vmem:[#allocation5 + $0x1254] sm:$0xf0] }
 0x389   :  { %8710 = vmatpush.bf16.msrb.mxu1 %v12136_v29  ;;  %v12280_v29 = vor.u32 %v14828_v53, %v12279_v37  ;;  %v8452_v63 = vadd.f32 %v8451_v50, %v8438_v20  ;;  %v12231_v37 = vld [vmem:[#allocation5 + $0x1540] sm:$0xf]  ;;  %v14816_v53 = vld [vmem:[#allocation5 + $0x1554] sm:$0xf0]  ;;  %v11848_v19 = vor.u32 %v14720_v30, %v11847_v5  ;;  %v12207_v50 = vld [vmem:[#allocation5 + $0x1510] sm:$0xf] }
 0x38a   :  { %8724 = vmatpush.bf16.msrb.mxu2 %v12328_v22  ;;  %v11871_v22 = vld [vmem:[#allocation5 + $0x1270] sm:$0xf]  ;;  %v8465_v62 = vpop.f32.mrf.mxu3  ;;  %v12423_v20 = vld [vmem:[#allocation5 + $0x16c0] sm:$0xf]  ;;  %v15044_v30 = vld [vmem:[#allocation5 + $0x1c74] sm:$0xf0] }
 0x38b   :  { %8738 = vmatpush.bf16.msrb.mxu3 %v12520_v12  ;;  %v14774_v12 = vld [vmem:[#allocation5 + $0x1404] sm:$0xf0]  ;;  %v15973_v24 = vadd.f32 %v8465_v62, %v8452_v63  ;;  %v12759_v63 = vld [vmem:[#allocation5 + $0x1960] sm:$0xf]  ;;  %v14948_v62 = vld [vmem:[#allocation5 + $0x1974] sm:$0xf0] }
 0x38c   :  { %8697 = vmatpush.bf16.msrb.mxu0 %v11920_v9  ;;  %v11872_v9 = vor.u32 %v14726_v25, %v11871_v22  ;;  %v14714_v22 = vld [vmem:[#allocation5 + $0x1224] sm:$0xf0]  ;;  %v12015_v25 = vld [vmem:[#allocation5 + $0x1390] sm:$0xf]  ;;  %v13143_v5 = vld [vmem:[#allocation5 + $0x1c60] sm:$0xf] }
 0x38d   :  { %8711 = vmatpush.bf16.msrb.mxu1 %v12112_v28  ;;  %v12064_v28 = vor.u32 %v14774_v12, %v12063_v27  ;;  %v14762_v27 = vld [vmem:[#allocation5 + $0x13a4] sm:$0xf0]  ;;  %v12424_v12 = vor.u32 %v14864_v52, %v12423_v20  ;;  %v13144_v20 = vor.u32 %v15044_v30, %v13143_v5  ;;  %v12735_v52 = vld [vmem:[#allocation5 + $0x1930] sm:$0xf] }
 0x38e   :  { %8725 = vmatpush.bf16.msrb.mxu2 %v12304_v54  ;;  %v12256_v54 = vor.u32 %v14822_v13, %v12255_v45  ;;  %v12399_v45 = vld [vmem:[#allocation5 + $0x1690] sm:$0xf]  ;;  %v14858_v13 = vld [vmem:[#allocation5 + $0x16a4] sm:$0xf0] }
 0x38f   :  { %8739 = vmatpush.bf16.msrb.mxu3 %v12496_v7  ;;  %v12448_v7 = vor.u32 %v14870_v0, %v12447_v18  ;;  %v12951_v18 = vld [vmem:[#allocation5 + $0x1ae0] sm:$0xf]  ;;  %v12687_v30 = vld [vmem:[#allocation5 + $0x18d0] sm:$0xf] }
 0x390   :  { %8698 = vmatpush.bf16.msrb.mxu0 %v11896_v11  ;;  %v11823_v11 = vld [vmem:[#allocation5 + $0x1210] sm:$0xf] }
 0x391   :  { %8712 = vmatpush.bf16.msrb.mxu1 %v12088_v57  ;;  %v12040_v57 = vor.u32 %v14768_v42, %v12039_v3  ;;  %v11824_v0 = vor.u32 %v14714_v22, %v11823_v11  ;;  %v13335_v3 = vld [vmem:[#allocation5 + $0x1de0] sm:$0xf]  ;;  %v15092_v42 = vld [vmem:[#allocation5 + $0x1df4] sm:$0xf0]  ;;  %v14990_v11 = vld [vmem:[#allocation5 + $0x1ac4] sm:$0xf0] }
 0x392   :  { %8726 = vmatpush.bf16.msrb.mxu2 %v12280_v29  ;;  %v12232_v29 = vor.u32 %v14816_v53, %v12231_v37  ;;  %v12760_v37 = vor.u32 %v14948_v62, %v12759_v63  ;;  %v13119_v22 = vld [vmem:[#allocation5 + $0x1c30] sm:$0xf]  ;;  %v14984_v62 = vld [vmem:[#allocation5 + $0x1a94] sm:$0xf0] }
 0x393   :  { %8740 = vmatpush.bf16.msrb.mxu3 %v12472_v15  ;;  %v14810_v15 = vld [vmem:[#allocation5 + $0x1524] sm:$0xf0] }
 0x394   :  { %8699 = vmatpush.bf16.msrb.mxu0 %v11872_v9  ;;  %v14996_v9 = vld [vmem:[#allocation5 + $0x1af4] sm:$0xf0] }
 0x395   :  { %8713 = vmatpush.bf16.msrb.mxu1 %v12064_v28  ;;  %v12016_v28 = vor.u32 %v14762_v27, %v12015_v25  ;;  %v12952_v53 = vor.u32 %v14996_v9, %v12951_v18  ;;  %v15977_v25 = vpop.f32.mrf.mxu1  ;;  %v12736_v27 = vor.u32 %v14942_v14, %v12735_v52  ;;  %v13095_v18 = vld [vmem:[#allocation5 + $0x1c00] sm:$0xf]  ;;  %v15080_v14 = vld [vmem:[#allocation5 + $0x1d94] sm:$0xf0] }
 0x396   :  { %8727 = vmatpush.bf16.msrb.mxu2 %v12256_v54  ;;  %v12208_v54 = vor.u32 %v14810_v15, %v12207_v50  ;;  %16370 = vst [vmem:[#allocation109_spill] sm:$0xff] %v15977_v25  ;;  %v12928_v50 = vor.u32 %v14990_v11, %v12927_v8  ;;  %v12711_v15 = vld [vmem:[#allocation5 + $0x1900] sm:$0xf]  ;;  %v15074_v11 = vld [vmem:[#allocation5 + $0x1d64] sm:$0xf0] }
 0x397   :  { %8741 = vmatpush.bf16.msrb.mxu3 %v12448_v7  ;;  %v12400_v7 = vor.u32 %v14858_v13, %v12399_v45  ;;  %v14936_v45 = vld [vmem:[#allocation5 + $0x1914] sm:$0xf0]  ;;  %v12903_v13 = vld [vmem:[#allocation5 + $0x1a80] sm:$0xf] }
 0x398   :  { %8700 = vmatpush.bf16.msrb.mxu0 %v11848_v19  ;;  %v13336_v19 = vor.u32 %v15092_v42, %v13335_v3  ;;  %v13287_v9 = vld [vmem:[#allocation5 + $0x1d80] sm:$0xf]  ;;  %v12904_v8 = vor.u32 %v14984_v62, %v12903_v13  ;;  %v15983_v3 = vpop.f32.mrf.mxu2  ;;  %v14972_v62 = vld [vmem:[#allocation5 + $0x1a34] sm:$0xf0] }
 0x399   :  { %8714 = vmatpush.bf16.msrb.mxu1 %v12040_v57  ;;  %v13311_v57 = vld [vmem:[#allocation5 + $0x1db0] sm:$0xf]  ;;  %16371 = vst [vmem:[#allocation110_spill] sm:$0xff] %v15983_v3  ;;  %v13288_v42 = vor.u32 %v15080_v14, %v13287_v9  ;;  %v13239_v9 = vld [vmem:[#allocation5 + $0x1d20] sm:$0xf] }
 0x39a   :  { %8728 = vmatpush.bf16.msrb.mxu2 %v12232_v29  ;;  %v15086_v29 = vld [vmem:[#allocation5 + $0x1dc4] sm:$0xf0]  ;;  %v15068_v14 = vld [vmem:[#allocation5 + $0x1d34] sm:$0xf0] }
 0x39b   :  { %8742 = vmatpush.bf16.msrb.mxu3 %v12424_v12  ;;  %v13120_v12 = vor.u32 %v15038_v23, %v13119_v22  ;;  %v13312_v63 = vor.u32 %v15086_v29, %v13311_v57  ;;  %v12712_v23 = vor.u32 %v14936_v45, %v12711_v15  ;;  %v14924_v15 = vld [vmem:[#allocation5 + $0x18b4] sm:$0xf0]  ;;  %v12855_v45 = vld [vmem:[#allocation5 + $0x1a20] sm:$0xf]  ;;  %v15230_v3 = vld [vmem:[#allocation5 + $0x2244] sm:$0xf0] }
 0x39c   :  { %8701 = vmatpush.bf16.msrb.mxu0 %v11824_v0  ;;  %v15032_v0 = vld [vmem:[#allocation5 + $0x1c14] sm:$0xf0]  ;;  %v8479_v52 = vpop.f32.mrf.mxu0 }
 0x39d   :  { %8715 = vmatpush.bf16.msrb.mxu1 %v12016_v28  ;;  %v13096_v5 = vor.u32 %v15032_v0, %v13095_v18  ;;  %v14930_v28 = vld [vmem:[#allocation5 + $0x18e4] sm:$0xf0]  ;;  %v8480_v22 = vadd.f32 %v8479_v52, %v15973_v24  ;;  %v8493_v29 = vpop.f32.mrf.mxu1  ;;  %v13047_v18 = vld [vmem:[#allocation5 + $0x1ba0] sm:$0xf]  ;;  %v15020_v0 = vld [vmem:[#allocation5 + $0x1bb4] sm:$0xf0]  ;;  %v12856_v24 = vor.u32 %v14972_v62, %v12855_v45 }
 0x39e   :  { %8729 = vmatpush.bf16.msrb.mxu2 %v12208_v54  ;;  %v12879_v54 = vld [vmem:[#allocation5 + $0x1a50] sm:$0xf]  ;;  %v12688_v57 = vor.u32 %v14930_v28, %v12687_v30  ;;  %v14918_v30 = vld [vmem:[#allocation5 + $0x1884] sm:$0xf0]  ;;  %v12807_v45 = vld [vmem:[#allocation5 + $0x19c0] sm:$0xf] }
 0x39f   :  { %8743 = vmatpush.bf16.msrb.mxu3 %v12400_v7  ;;  %8702 = vmatmul.bf16.vlgmr.msrb.gmra.mxu0 %v15594_v32  ;;  %v14978_v7 = vld [vmem:[#allocation5 + $0x1a64] sm:$0xf0]  ;;  %v12831_v28 = vld [vmem:[#allocation5 + $0x19f0] sm:$0xf]  ;;  %v14960_v62 = vld [vmem:[#allocation5 + $0x19d4] sm:$0xf0] }
 0x3a0   :  { %8750 = vmatpush.bf16.msra.mxu0 %v12760_v37  ;;  %8716 = vmatmul.bf16.vlgmr.msrb.gmra.mxu1 %v15598_v41  ;;  %v13071_v37 = vld [vmem:[#allocation5 + $0x1bd0] sm:$0xf] }
 0x3a1   :  { %8764 = vmatpush.bf16.msra.mxu1 %v12952_v53  ;;  %8730 = vmatmul.bf16.vlgmr.msrb.gmra.mxu2 %v15596_v38  ;;  %v15026_v53 = vld [vmem:[#allocation5 + $0x1be4] sm:$0xf0] }
 0x3a2   :  { %8778 = vmatpush.bf16.msra.mxu2 %v13144_v20  ;;  %8744 = vmatmul.bf16.vlgmr.msrb.gmra.mxu3 %v15600_v46  ;;  %v15985_v20 = vpop.f32.mrf.mxu3 }
 0x3a3   :  { %8792 = vmatpush.bf16.msra.mxu3 %v13336_v19  ;;  %16372 = vst [vmem:[#allocation111_spill] sm:$0xff] %v15985_v20  ;;  %v13263_v19 = vld [vmem:[#allocation5 + $0x1d50] sm:$0xf] }
 0x3a4   :  { %8751 = vmatpush.bf16.msra.mxu0 %v12736_v27  ;;  %v12880_v27 = vor.u32 %v14978_v7, %v12879_v54  ;;  %v13264_v13 = vor.u32 %v15074_v11, %v13263_v19  ;;  %v13240_v54 = vor.u32 %v15068_v14, %v13239_v9  ;;  %v8507_v7 = vpop.f32.mrf.mxu2  ;;  %v13215_v11 = vld [vmem:[#allocation5 + $0x1cf0] sm:$0xf]  ;;  %v15056_v9 = vld [vmem:[#allocation5 + $0x1cd4] sm:$0xf0]  ;;  %v15990_v25 = vpop.f32.mrf.mxu0 }
 0x3a5   :  { %8765 = vmatpush.bf16.msra.mxu1 %v12928_v50  ;;  %v13072_v50 = vor.u32 %v15026_v53, %v13071_v37  ;;  %v13023_v37 = vld [vmem:[#allocation5 + $0x1b70] sm:$0xf]  ;;  %v15014_v53 = vld [vmem:[#allocation5 + $0x1b84] sm:$0xf0]  ;;  %16374 = vst [vmem:[#allocation113_spill] sm:$0xff] %v15990_v25 }
 0x3a6   :  { %8779 = vmatpush.bf16.msra.mxu2 %v13120_v12  ;;  %v12663_v12 = vld [vmem:[#allocation5 + $0x18a0] sm:$0xf]  ;;  %v13695_v20 = vld [vmem:[#allocation5 + $0x20b0] sm:$0xf] }
 0x3a7   :  { %8793 = vmatpush.bf16.msra.mxu3 %v13312_v63  ;;  %v8494_v63 = vadd.f32 %v8493_v29, %v8480_v22  ;;  %v15062_v22 = vld [vmem:[#allocation5 + $0x1d04] sm:$0xf0] }
 0x3a8   :  { %8752 = vmatpush.bf16.msra.mxu0 %v12712_v23  ;;  %v12664_v23 = vor.u32 %v14924_v15, %v12663_v12  ;;  %v12615_v12 = vld [vmem:[#allocation5 + $0x1840] sm:$0xf]  ;;  %v14912_v15 = vld [vmem:[#allocation5 + $0x1854] sm:$0xf0] }
 0x3a9   :  { %8766 = vmatpush.bf16.msra.mxu1 %v12904_v8  ;;  %v13048_v8 = vor.u32 %v15020_v0, %v13047_v18  ;;  %v8508_v52 = vadd.f32 %v8507_v7, %v8494_v63  ;;  %v12999_v18 = vld [vmem:[#allocation5 + $0x1b40] sm:$0xf]  ;;  %v15008_v0 = vld [vmem:[#allocation5 + $0x1b54] sm:$0xf0]  ;;  %v12616_v14 = vor.u32 %v14912_v15, %v12615_v12  ;;  %v12975_v7 = vld [vmem:[#allocation5 + $0x1b10] sm:$0xf] }
 0x3aa   :  { %8780 = vmatpush.bf16.msra.mxu2 %v13096_v5  ;;  %v12639_v5 = vld [vmem:[#allocation5 + $0x1870] sm:$0xf]  ;;  %v8521_v19 = vpop.f32.mrf.mxu3  ;;  %v13191_v63 = vld [vmem:[#allocation5 + $0x1cc0] sm:$0xf]  ;;  %v15236_v15 = vld [vmem:[#allocation5 + $0x2274] sm:$0xf0] }
 0x3ab   :  { %8794 = vmatpush.bf16.msra.mxu3 %v13288_v42  ;;  %v14966_v42 = vld [vmem:[#allocation5 + $0x1a04] sm:$0xf0]  ;;  %v15988_v29 = vadd.f32 %v8521_v19, %v8508_v52  ;;  %v13527_v52 = vld [vmem:[#allocation5 + $0x1f60] sm:$0xf]  ;;  %v15140_v19 = vld [vmem:[#allocation5 + $0x1f74] sm:$0xf0] }
 0x3ac   :  { %8753 = vmatpush.bf16.msra.mxu0 %v12688_v57  ;;  %v12640_v57 = vor.u32 %v14918_v30, %v12639_v5  ;;  %v14906_v5 = vld [vmem:[#allocation5 + $0x1824] sm:$0xf0]  ;;  %v12783_v30 = vld [vmem:[#allocation5 + $0x1990] sm:$0xf]  ;;  %v13911_v12 = vld [vmem:[#allocation5 + $0x2260] sm:$0xf] }
 0x3ad   :  { %8767 = vmatpush.bf16.msra.mxu1 %v12880_v27  ;;  %16373 = vst [vmem:[#allocation112_spill] sm:$0xff] %v15988_v29  ;;  %v12832_v27 = vor.u32 %v14966_v42, %v12831_v28  ;;  %v14954_v28 = vld [vmem:[#allocation5 + $0x19a4] sm:$0xf0]  ;;  %v13192_v42 = vor.u32 %v15056_v9, %v13191_v63  ;;  %v13912_v63 = vor.u32 %v15236_v15, %v13911_v12  ;;  %v13503_v9 = vld [vmem:[#allocation5 + $0x1f30] sm:$0xf] }
 0x3ae   :  { %8781 = vmatpush.bf16.msra.mxu2 %v13072_v50  ;;  %v13024_v50 = vor.u32 %v15014_v53, %v13023_v37  ;;  %v13167_v37 = vld [vmem:[#allocation5 + $0x1c90] sm:$0xf]  ;;  %v15050_v53 = vld [vmem:[#allocation5 + $0x1ca4] sm:$0xf0] }
 0x3af   :  { %8795 = vmatpush.bf16.msra.mxu3 %v13264_v13  ;;  %v13216_v13 = vor.u32 %v15062_v22, %v13215_v11  ;;  %v13719_v11 = vld [vmem:[#allocation5 + $0x20e0] sm:$0xf]  ;;  %v15134_v29 = vld [vmem:[#allocation5 + $0x1f44] sm:$0xf0] }
 0x3b0   :  { %8754 = vmatpush.bf16.msra.mxu0 %v12664_v23  ;;  %v12591_v23 = vld [vmem:[#allocation5 + $0x1810] sm:$0xf] }
 0x3b1   :  { %8768 = vmatpush.bf16.msra.mxu1 %v12856_v24  ;;  %v12808_v24 = vor.u32 %v14960_v62, %v12807_v45  ;;  %v12592_v22 = vor.u32 %v14906_v5, %v12591_v23  ;;  %v14103_v45 = vld [vmem:[#allocation5 + $0x23e0] sm:$0xf]  ;;  %v15284_v62 = vld [vmem:[#allocation5 + $0x23f4] sm:$0xf0]  ;;  %v15182_v23 = vld [vmem:[#allocation5 + $0x20c4] sm:$0xf0] }
 0x3b2   :  { %8782 = vmatpush.bf16.msra.mxu2 %v13048_v8  ;;  %v13000_v8 = vor.u32 %v15008_v0, %v12999_v18  ;;  %v13528_v18 = vor.u32 %v15140_v19, %v13527_v52  ;;  %v13887_v5 = vld [vmem:[#allocation5 + $0x2230] sm:$0xf]  ;;  %v15176_v19 = vld [vmem:[#allocation5 + $0x2094] sm:$0xf0] }
 0x3b3   :  { %8796 = vmatpush.bf16.msra.mxu3 %v13240_v54  ;;  %v15002_v54 = vld [vmem:[#allocation5 + $0x1b24] sm:$0xf0] }
 0x3b4   :  { %8755 = vmatpush.bf16.msra.mxu0 %v12640_v57  ;;  %v15188_v57 = vld [vmem:[#allocation5 + $0x20f4] sm:$0xf0] }
 0x3b5   :  { %8769 = vmatpush.bf16.msra.mxu1 %v12832_v27  ;;  %v12784_v27 = vor.u32 %v14954_v28, %v12783_v30  ;;  %v13720_v0 = vor.u32 %v15188_v57, %v13719_v11  ;;  %v15992_v30 = vpop.f32.mrf.mxu1  ;;  %v13504_v28 = vor.u32 %v15134_v29, %v13503_v9  ;;  %v13863_v11 = vld [vmem:[#allocation5 + $0x2200] sm:$0xf]  ;;  %v15272_v29 = vld [vmem:[#allocation5 + $0x2394] sm:$0xf0]  ;;  %v15218_v9 = vld [vmem:[#allocation5 + $0x21e4] sm:$0xf0] }
 0x3b6   :  { %8783 = vmatpush.bf16.msra.mxu2 %v13024_v50  ;;  %v12976_v50 = vor.u32 %v15002_v54, %v12975_v7  ;;  %16375 = vst [vmem:[#allocation114_spill] sm:$0xff] %v15992_v30  ;;  %v13696_v7 = vor.u32 %v15182_v23, %v13695_v20  ;;  %v13479_v54 = vld [vmem:[#allocation5 + $0x1f00] sm:$0xf]  ;;  %v14031_v23 = vld [vmem:[#allocation5 + $0x2350] sm:$0xf] }
 0x3b7   :  { %8797 = vmatpush.bf16.msra.mxu3 %v13216_v13  ;;  %v13168_v13 = vor.u32 %v15050_v53, %v13167_v37  ;;  %v15128_v37 = vld [vmem:[#allocation5 + $0x1f14] sm:$0xf0]  ;;  %v13671_v53 = vld [vmem:[#allocation5 + $0x2080] sm:$0xf] }
 0x3b8   :  { %8756 = vmatpush.bf16.msra.mxu0 %v12616_v14  ;;  %v14104_v14 = vor.u32 %v15284_v62, %v14103_v45  ;;  %v14055_v57 = vld [vmem:[#allocation5 + $0x2380] sm:$0xf]  ;;  %v13672_v15 = vor.u32 %v15176_v19, %v13671_v53  ;;  %v15122_v45 = vld [vmem:[#allocation5 + $0x1ee4] sm:$0xf0]  ;;  %v13647_v62 = vld [vmem:[#allocation5 + $0x2050] sm:$0xf] }
 0x3b9   :  { %8770 = vmatpush.bf16.msra.mxu1 %v12808_v24  ;;  %v14079_v24 = vld [vmem:[#allocation5 + $0x23b0] sm:$0xf]  ;;  %v15308_v20 = vld [vmem:[#allocation7] sm:$0x3f]  ;;  %v15116_v53 = vld [vmem:[#allocation5 + $0x1eb4] sm:$0xf0] }
 0x3ba   :  { %8784 = vmatpush.bf16.msra.mxu2 %v13000_v8  ;;  %v15278_v8 = vld [vmem:[#allocation5 + $0x23c4] sm:$0xf0]  ;;  %v1294_v12 = vperm.slane %v15308_v20, 4  ;;  %v14007_v20 = vld [vmem:[#allocation5 + $0x2320] sm:$0xf] }
 0x3bb   :  { %8798 = vmatpush.bf16.msra.mxu3 %v13192_v42  ;;  %v13888_v42 = vor.u32 %v15230_v3, %v13887_v5  ;;  %v14080_v52 = vor.u32 %v15278_v8, %v14079_v24  ;;  %v13480_v3 = vor.u32 %v15128_v37, %v13479_v54  ;;  %v15266_v5 = vld [vmem:[#allocation5 + $0x2364] sm:$0xf0]  ;;  %v13431_v37 = vld [vmem:[#allocation5 + $0x1ea0] sm:$0xf] }
 0x3bc   :  { %8757 = vmatpush.bf16.msra.mxu0 %v12592_v22  ;;  %v15224_v22 = vld [vmem:[#allocation5 + $0x2214] sm:$0xf0]  ;;  %v8535_v24 = vpop.f32.mrf.mxu0  ;;  %v14032_v19 = vor.u32 %v15266_v5, %v14031_v23  ;;  %v13983_v5 = vld [vmem:[#allocation5 + $0x22f0] sm:$0xf]  ;;  %v13959_v30 = vld [vmem:[#allocation5 + $0x22c0] sm:$0xf] }
 0x3bd   :  { %8771 = vmatpush.bf16.msra.mxu1 %v12784_v27  ;;  %v13864_v27 = vor.u32 %v15224_v22, %v13863_v11  ;;  %v15164_v11 = vld [vmem:[#allocation5 + $0x2034] sm:$0xf0]  ;;  %v13815_v22 = vld [vmem:[#allocation5 + $0x21a0] sm:$0xf] }
 0x3be   :  { %8785 = vmatpush.bf16.msra.mxu2 %v12976_v50  ;;  %v13455_v50 = vld [vmem:[#allocation5 + $0x1ed0] sm:$0xf] }
 0x3bf   :  { %8799 = vmatpush.bf16.msra.mxu3 %v13168_v13  ;;  %8758 = vmatmul.bf16.vlgmr.msra.gmra.mxu0 %v15606_v51  ;;  %v15998_v13 = vpop.f32.mrf.mxu2  ;;  %v13456_v8 = vor.u32 %v15122_v45, %v13455_v50  ;;  %v15110_v45 = vld [vmem:[#allocation5 + $0x1e84] sm:$0xf0] }
 0x3c0   :  { %8806 = vmatpush.bf16.msrb.mxu0 %v13528_v18  ;;  %8772 = vmatmul.bf16.vlgmr.msra.gmra.mxu1 %v15610_v56  ;;  %16376 = vst [vmem:[#allocation115_spill] sm:$0xff] %v15998_v13  ;;  %v14056_v18 = vor.u32 %v15272_v29, %v14055_v57  ;;  %v15212_v57 = vld [vmem:[#allocation5 + $0x21b4] sm:$0xf0] }
 0x3c1   :  { %8820 = vmatpush.bf16.msrb.mxu1 %v13720_v0  ;;  %8786 = vmatmul.bf16.vlgmr.msra.gmra.mxu2 %v15608_v55  ;;  %v15170_v0 = vld [vmem:[#allocation5 + $0x2064] sm:$0xf0] }
 0x3c2   :  { %8834 = vmatpush.bf16.msrb.mxu2 %v13912_v63  ;;  %8800 = vmatmul.bf16.vlgmr.msra.gmra.mxu3 %v15612_v60  ;;  %v13839_v63 = vld [vmem:[#allocation5 + $0x21d0] sm:$0xf] }
 0x3c3   :  { %8848 = vmatpush.bf16.msrb.mxu3 %v14104_v14  ;;  %v16000_v14 = vpop.f32.mrf.mxu3  ;;  %v13840_v54 = vor.u32 %v15218_v9, %v13839_v63  ;;  %v15158_v63 = vld [vmem:[#allocation5 + $0x2004] sm:$0xf0] }
 0x3c4   :  { %8807 = vmatpush.bf16.msrb.mxu0 %v13504_v28  ;;  %16377 = vst [vmem:[#allocation116_spill] sm:$0xff] %v16000_v14  ;;  %v8536_v28 = vadd.f32 %v8535_v24, %v1294_v12  ;;  %v15260_v14 = vld [vmem:[#allocation5 + $0x2334] sm:$0xf0]  ;;  %v15206_v9 = vld [vmem:[#allocation5 + $0x2184] sm:$0xf0] }
 0x3c5   :  { %8821 = vmatpush.bf16.msrb.mxu1 %v13696_v7  ;;  %v8549_v7 = vpop.f32.mrf.mxu1  ;;  %v15254_v24 = vld [vmem:[#allocation5 + $0x2304] sm:$0xf0] }
 0x3c6   :  { %8835 = vmatpush.bf16.msrb.mxu2 %v13888_v42  ;;  %v13648_v42 = vor.u32 %v15170_v0, %v13647_v62  ;;  %v8550_v29 = vadd.f32 %v8549_v7, %v8536_v28  ;;  %v13599_v62 = vld [vmem:[#allocation5 + $0x1ff0] sm:$0xf]  ;;  %v14008_v0 = vor.u32 %v15260_v14, %v14007_v20  ;;  %v8537_v7 = vpop.f32.mrf.mxu0  ;;  %v13767_v20 = vld [vmem:[#allocation5 + $0x2140] sm:$0xf] }
 0x3c7   :  { %8849 = vmatpush.bf16.msrb.mxu3 %v14080_v52  ;;  %v13623_v52 = vld [vmem:[#allocation5 + $0x2020] sm:$0xf]  ;;  %v8563_v23 = vpop.f32.mrf.mxu2 }
 0x3c8   :  { %8808 = vmatpush.bf16.msrb.mxu0 %v13480_v3  ;;  %v13432_v3 = vor.u32 %v15116_v53, %v13431_v37  ;;  %v13624_v50 = vor.u32 %v15164_v11, %v13623_v52  ;;  %v8564_v28 = vadd.f32 %v8563_v23, %v8550_v29  ;;  %v13383_v53 = vld [vmem:[#allocation5 + $0x1e40] sm:$0xf]  ;;  %v15104_v52 = vld [vmem:[#allocation5 + $0x1e54] sm:$0xf0] }
 0x3c9   :  { %8822 = vmatpush.bf16.msrb.mxu1 %v13672_v15  ;;  %v13816_v15 = vor.u32 %v15212_v57, %v13815_v22  ;;  %v13984_v22 = vor.u32 %v15254_v24, %v13983_v5  ;;  %v15152_v57 = vld [vmem:[#allocation5 + $0x1fd4] sm:$0xf0]  ;;  %v15242_v5 = vld [vmem:[#allocation5 + $0x22a4] sm:$0xf0] }
 0x3ca   :  { %8836 = vmatpush.bf16.msrb.mxu2 %v13864_v27  ;;  %v13407_v27 = vld [vmem:[#allocation5 + $0x1e70] sm:$0xf]  ;;  %v15200_v29 = vld [vmem:[#allocation5 + $0x2154] sm:$0xf0] }
 0x3cb   :  { %8850 = vmatpush.bf16.msrb.mxu3 %v14056_v18  ;;  %v13791_v18 = vld [vmem:[#allocation5 + $0x2170] sm:$0xf]  ;;  %v8577_v13 = vpop.f32.mrf.mxu3 }
 0x3cc   :  { %8809 = vmatpush.bf16.msrb.mxu0 %v13456_v8  ;;  %v13408_v8 = vor.u32 %v15110_v45, %v13407_v27  ;;  %v13792_v37 = vor.u32 %v15206_v9, %v13791_v18  ;;  %v16002_v14 = vadd.f32 %v8577_v13, %v8564_v28  ;;  %v13768_v45 = vor.u32 %v15200_v29, %v13767_v20  ;;  %v15146_v13 = vld [vmem:[#allocation5 + $0x1fa4] sm:$0xf0]  ;;  %v13935_v9 = vld [vmem:[#allocation5 + $0x2290] sm:$0xf]  ;;  %v14177_v28 = vld [vmem:[#allocation5 + $0x164] sm:$0xf] }
 0x3cd   :  { %8823 = vmatpush.bf16.msrb.mxu1 %v13648_v42  ;;  %v8538_v42 = vadd.f32 %v8537_v7, %v1294_v12  ;;  %v8551_v11 = vpop.f32.mrf.mxu1  ;;  %v13384_v12 = vor.u32 %v15104_v52, %v13383_v53  ;;  %v15194_v18 = vld [vmem:[#allocation5 + $0x2124] sm:$0xf0]  ;;  %v9689_v7 = vld [vmem:[#allocation5 + $0x178] sm:$0xf0]  ;;  %v13936_v29 = vor.u32 %v15242_v5, %v13935_v9  ;;  %v14213_v5 = vld [vmem:[#allocation5 + $0x284] sm:$0xf] }
 0x3ce   :  { %8837 = vmatpush.bf16.msrb.mxu2 %v13840_v54  ;;  %v13600_v54 = vor.u32 %v15158_v63, %v13599_v62  ;;  %v13551_v62 = vld [vmem:[#allocation5 + $0x1f90] sm:$0xf]  ;;  %v9881_v52 = vld [vmem:[#allocation5 + $0x2f8] sm:$0xf0] }
 0x3cf   :  { %8851 = vmatpush.bf16.msrb.mxu3 %v14032_v19  ;;  %v13575_v19 = vld [vmem:[#allocation5 + $0x1fc0] sm:$0xf]  ;;  %v8552_v23 = vadd.f32 %v8551_v11, %v8538_v42  ;;  %v13743_v63 = vld [vmem:[#allocation5 + $0x2110] sm:$0xf]  ;;  %v8565_v24 = vpop.f32.mrf.mxu2  ;;  %v14225_v42 = vld [vmem:[#allocation5 + $0x2e4] sm:$0xf]  ;;  %v13552_v11 = vor.u32 %v15146_v13, %v13551_v62 }
 0x3d0   :  { %8810 = vmatpush.bf16.msrb.mxu0 %v13432_v3  ;;  %v15248_v3 = vld [vmem:[#allocation5 + $0x22d4] sm:$0xf0]  ;;  %v13576_v27 = vor.u32 %v15152_v57, %v13575_v19  ;;  %v13744_v57 = vor.u32 %v15194_v18, %v13743_v63  ;;  %v9884_v25 = vor.u32 %v14225_v42, %v9881_v52  ;;  %v10241_v62 = vld [vmem:[#allocation5 + $0x5c8] sm:$0xf0]  ;;  %v14165_v18 = vld [vmem:[#allocation5 + $0x104] sm:$0xf] }
 0x3d1   :  { %8824 = vmatpush.bf16.msrb.mxu1 %v13624_v50  ;;  %v13359_v50 = vld [vmem:[#allocation5 + $0x1e10] sm:$0xf]  ;;  %v9641_v9 = vld [vmem:[#allocation5 + $0x118] sm:$0xf0]  ;;  %v14261_v42 = vld [vmem:[#allocation5 + $0x404] sm:$0xf] }
 0x3d2   :  { %8838 = vmatpush.bf16.msrb.mxu2 %v13816_v15  ;;  %v15098_v15 = vld [vmem:[#allocation5 + $0x1e24] sm:$0xf0]  ;;  %v10217_v52 = vld [vmem:[#allocation5 + $0x598] sm:$0xf0] }
 0x3d3   :  { %8852 = vmatpush.bf16.msrb.mxu3 %v14008_v0  ;;  %v13960_v0 = vor.u32 %v15248_v3, %v13959_v30  ;;  %v13360_v53 = vor.u32 %v15098_v15, %v13359_v50  ;;  %v8579_v19 = vpop.f32.mrf.mxu3  ;;  %v10265_v30 = vld [vmem:[#allocation5 + $0x5f8] sm:$0xf0]  ;;  %v9692_v3 = vor.u32 %v14177_v28, %v9689_v7  ;;  %v14219_v50 = vld [vmem:[#allocation5 + $0x2b4] sm:$0xf] }
 0x3d4   :  { %8811 = vmatpush.bf16.msrb.mxu0 %v13408_v8  ;;  %v8566_v8 = vadd.f32 %v8565_v24, %v8552_v23  ;;  %v14171_v23 = vld [vmem:[#allocation5 + $0x134] sm:$0xf]  ;;  %v9857_v24 = vld [vmem:[#allocation5 + $0x2c8] sm:$0xf0]  ;;  %v9833_v7 = vld [vmem:[#allocation5 + $0x298] sm:$0xf0] }
 0x3d5   :  { %8825 = vmatpush.bf16.msrb.mxu1 %v13600_v54  ;;  %v14273_v54 = vld [vmem:[#allocation5 + $0x464] sm:$0xf]  ;;  %v9860_v63 = vor.u32 %v14219_v50, %v9857_v24 }
 0x3d6   :  { %8839 = vmatpush.bf16.msrb.mxu2 %v13792_v37  ;;  %v10073_v37 = vld [vmem:[#allocation5 + $0x478] sm:$0xf0]  ;;  %v16004_v20 = vadd.f32 %v8579_v19, %v8566_v8  ;;  %v14207_v19 = vld [vmem:[#allocation5 + $0x254] sm:$0xf] }
 0x3d7   :  { %8853 = vmatpush.bf16.msrb.mxu3 %v13984_v22  ;;  %v14321_v22 = vld [vmem:[#allocation5 + $0x5e4] sm:$0xf]  ;;  %v10076_v61 = vor.u32 %v14273_v54, %v10073_v37  ;;  %v10025_v8 = vld [vmem:[#allocation5 + $0x418] sm:$0xf0]  ;;  %v14159_v54 = vld [vmem:[#allocation5 + $0xd4] sm:$0xf] }
 0x3d8   :  { %8812 = vmatpush.bf16.msrb.mxu0 %v13384_v12  ;;  %v9665_v12 = vld [vmem:[#allocation5 + $0x148] sm:$0xf0]  ;;  %v10268_v15 = vor.u32 %v14321_v22, %v10265_v30  ;;  %v14255_v22 = vld [vmem:[#allocation5 + $0x3d4] sm:$0xf] }
 0x3d9   :  { %8826 = vmatpush.bf16.msrb.mxu1 %v13576_v27  ;;  %v10049_v27 = vld [vmem:[#allocation5 + $0x448] sm:$0xf0]  ;;  %v9668_v13 = vor.u32 %v14171_v23, %v9665_v12 }
 0x3da   :  { %8840 = vmatpush.bf16.msrb.mxu2 %v13768_v45  ;;  %v14315_v45 = vld [vmem:[#allocation5 + $0x5b4] sm:$0xf]  ;;  %v9617_v37 = vld [vmem:[#allocation5 + $0xe8] sm:$0xf0] }
 0x3db   :  { %8854 = vmatpush.bf16.msrb.mxu3 %v13960_v0  ;;  %v10052_v0 = vor.u32 %v14267_v59, %v10049_v27  ;;  %v10244_v28 = vor.u32 %v14315_v45, %v10241_v62  ;;  %v9644_v59 = vor.u32 %v14165_v18, %v9641_v9  ;;  %v10001_v30 = vld [vmem:[#allocation5 + $0x3e8] sm:$0xf0]  ;;  %v9620_v50 = vor.u32 %v14159_v54, %v9617_v37  ;;  %v14153_v45 = vld [vmem:[#allocation5 + $0xa4] sm:$0xf]  ;;  %v9593_v62 = vld [vmem:[#allocation5 + $0xb8] sm:$0xf0] }
 0x3dc   :  { %8813 = vmatpush.bf16.msrb.mxu0 %v13360_v53  ;;  %v14309_v53 = vld [vmem:[#allocation5 + $0x584] sm:$0xf]  ;;  %v10193_v23 = vld [vmem:[#allocation5 + $0x568] sm:$0xf0]  ;;  %v10004_v27 = vor.u32 %v14255_v22, %v10001_v30  ;;  %v9785_v18 = vld [vmem:[#allocation5 + $0x238] sm:$0xf0] }
 0x3dd   :  { %8827 = vmatpush.bf16.msrb.mxu1 %v13552_v11  ;;  %v10220_v11 = vor.u32 %v14309_v53, %v10217_v52  ;;  %v14249_v9 = vld [vmem:[#allocation5 + $0x3a4] sm:$0xf]  ;;  %v14147_v53 = vld [vmem:[#allocation5 + $0x74] sm:$0xf]  ;;  %v9569_v52 = vld [vmem:[#allocation5 + $0x88] sm:$0xf0] }
 0x3de   :  { %8841 = vmatpush.bf16.msrb.mxu2 %v13744_v57  ;;  %v9809_v57 = vld [vmem:[#allocation5 + $0x268] sm:$0xf0]  ;;  %v14243_v37 = vld [vmem:[#allocation5 + $0x374] sm:$0xf] }
 0x3df   :  { %8855 = vmatpush.bf16.msrb.mxu3 %v13936_v29  ;;  %8814 = vmatmul.bf16.vlgmr.msrb.gmra.mxu0 %v15627_v26  ;;  %v8591_v29 = vpop.f32.mrf.mxu0  ;;  %v9812_v24 = vor.u32 %v14207_v19, %v9809_v57  ;;  %v9761_v54 = vld [vmem:[#allocation5 + $0x208] sm:$0xf0]  ;;  %v14291_v30 = vld [vmem:[#allocation5 + $0x4f4] sm:$0xf] }
 0x3e0   :  { %8862 = vmatpush.bf16.msra.mxu0 %v9692_v3  ;;  %8828 = vmatmul.bf16.vlgmr.msrb.gmra.mxu1 %v15631_v34  ;;  %v14303_v3 = vld [vmem:[#allocation5 + $0x554] sm:$0xf]  ;;  %v8592_v12 = vadd.f32 %v8591_v29, %v16002_v14  ;;  %v9953_v19 = vld [vmem:[#allocation5 + $0x388] sm:$0xf0] }
 0x3e1   :  { %8876 = vmatpush.bf16.msra.mxu1 %v9884_v25  ;;  %8842 = vmatmul.bf16.vlgmr.msrb.gmra.mxu2 %v15629_v33  ;;  %v10028_v25 = vor.u32 %v14261_v42, %v10025_v8  ;;  %v9596_v42 = vor.u32 %v14153_v45, %v9593_v62  ;;  %v10145_v29 = vld [vmem:[#allocation5 + $0x508] sm:$0xf0]  ;;  %v9545_v45 = vld [vmem:[#allocation5 + $0x58] sm:$0xf0]  ;;  %v14189_v62 = vld [vmem:[#allocation5 + $0x1c4] sm:$0xf] }
 0x3e2   :  { %8890 = vmatpush.bf16.msra.mxu2 %v10076_v61  ;;  %8856 = vmatmul.bf16.vlgmr.msrb.gmra.mxu3 %v15635_v48  ;;  %v9836_v61 = vor.u32 %v14213_v5, %v9833_v7  ;;  %v9977_v5 = vld [vmem:[#allocation5 + $0x3b8] sm:$0xf0] }
 0x3e3   :  { %8904 = vmatpush.bf16.msra.mxu3 %v10268_v15  ;;  %v8605_v15 = vpop.f32.mrf.mxu1  ;;  %v10169_v7 = vld [vmem:[#allocation5 + $0x538] sm:$0xf0]  ;;  %v9980_v8 = vor.u32 %v14249_v9, %v9977_v5  ;;  %v14285_v5 = vld [vmem:[#allocation5 + $0x4c4] sm:$0xf] }
 0x3e4   :  { %8863 = vmatpush.bf16.msra.mxu0 %v9668_v13  ;;  %v14201_v13 = vld [vmem:[#allocation5 + $0x224] sm:$0xf]  ;;  %v9929_v9 = vld [vmem:[#allocation5 + $0x358] sm:$0xf0] }
 0x3e5   :  { %8877 = vmatpush.bf16.msra.mxu1 %v9860_v63  ;;  %v10196_v63 = vor.u32 %v14303_v3, %v10193_v23  ;;  %v9788_v14 = vor.u32 %v14201_v13, %v9785_v18  ;;  %v8633_v22 = vpop.f32.mrf.mxu3  ;;  %v9572_v23 = vor.u32 %v14147_v53, %v9569_v52  ;;  %v10148_v13 = vor.u32 %v14291_v30, %v10145_v29  ;;  %v14237_v18 = vld [vmem:[#allocation5 + $0x344] sm:$0xf]  ;;  %v14183_v53 = vld [vmem:[#allocation5 + $0x194] sm:$0xf]  ;;  %v9713_v52 = vld [vmem:[#allocation5 + $0x1a8] sm:$0xf0] }
 0x3e6   :  { %8891 = vmatpush.bf16.msra.mxu2 %v10052_v0  ;;  %v8606_v0 = vadd.f32 %v8605_v15, %v8592_v12  ;;  %v10457_v30 = vld [vmem:[#allocation5 + $0x778] sm:$0xf0]  ;;  %v14417_v29 = vld [vmem:[#allocation5 + $0x8e4] sm:$0xf] }
 0x3e7   :  { %8905 = vmatpush.bf16.msra.mxu3 %v10244_v28  ;;  %v14297_v28 = vld [vmem:[#allocation5 + $0x524] sm:$0xf]  ;;  %v8593_v57 = vpop.f32.mrf.mxu0 }
 0x3e8   :  { %8864 = vmatpush.bf16.msra.mxu0 %v9644_v59  ;;  %v14195_v59 = vld [vmem:[#allocation5 + $0x1f4] sm:$0xf]  ;;  %v8594_v3 = vadd.f32 %v8593_v57, %v16004_v20 }
 0x3e9   :  { %8878 = vmatpush.bf16.msra.mxu1 %v9836_v61  ;;  %v10172_v61 = vor.u32 %v14297_v28, %v10169_v7  ;;  %v9764_v15 = vor.u32 %v14195_v59, %v9761_v54  ;;  %v10121_v28 = vld [vmem:[#allocation5 + $0x4d8] sm:$0xf0]  ;;  %v14135_v7 = vld [vmem:[#allocation5 + $0x14] sm:$0xf]  ;;  %v9905_v54 = vld [vmem:[#allocation5 + $0x328] sm:$0xf0] }
 0x3ea   :  { %8892 = vmatpush.bf16.msra.mxu2 %v10028_v25  ;;  %v8619_v25 = vpop.f32.mrf.mxu2  ;;  %v14231_v59 = vld [vmem:[#allocation5 + $0x314] sm:$0xf] }
 0x3eb   :  { %8906 = vmatpush.bf16.msra.mxu3 %v10220_v11  ;;  %v8620_v11 = vadd.f32 %v8619_v25, %v8606_v0  ;;  %v8607_v12 = vpop.f32.mrf.mxu1  ;;  %v9737_v0 = vld [vmem:[#allocation5 + $0x1d8] sm:$0xf0] }
 0x3ec   :  { %8865 = vmatpush.bf16.msra.mxu0 %v9620_v50 }
 0x3ed   :  { %8879 = vmatpush.bf16.msra.mxu1 %v9812_v24  ;;  %v16012_v50 = vadd.f32 %v8633_v22, %v8620_v11  ;;  %v9956_v24 = vor.u32 %v14243_v37, %v9953_v19  ;;  %v14279_v37 = vld [vmem:[#allocation5 + $0x494] sm:$0xf]  ;;  %v10097_v19 = vld [vmem:[#allocation5 + $0x4a8] sm:$0xf0]  ;;  %v8635_v57 = vpop.f32.mrf.mxu3  ;;  %v14369_v22 = vld [vmem:[#allocation5 + $0x764] sm:$0xf] }
 0x3ee   :  { %8893 = vmatpush.bf16.msra.mxu2 %v10004_v27  ;;  %v14141_v27 = vld [vmem:[#allocation5 + $0x44] sm:$0xf] }
 0x3ef   :  { %8907 = vmatpush.bf16.msra.mxu3 %v10196_v63  ;;  %v8608_v63 = vadd.f32 %v8607_v12, %v8594_v3  ;;  %v9548_v20 = vor.u32 %v14141_v27, %v9545_v45  ;;  %v14465_v12 = vld [vmem:[#allocation5 + $0xa64] sm:$0xf]  ;;  %v9716_v27 = vor.u32 %v14183_v53, %v9713_v52  ;;  %v9908_v45 = vor.u32 %v14231_v59, %v9905_v54  ;;  %v11009_v53 = vld [vmem:[#allocation5 + $0xbc8] sm:$0xf0] }
 0x3f0   :  { %8866 = vmatpush.bf16.msra.mxu0 %v9596_v42  ;;  %v9521_v42 = vld [vmem:[#allocation5 + $0x28] sm:$0xf0]  ;;  %v14357_v54 = vld [vmem:[#allocation5 + $0x704] sm:$0xf] }
 0x3f1   :  { %8880 = vmatpush.bf16.msra.mxu1 %v9788_v14  ;;  %v9740_v14 = vor.u32 %v14189_v62, %v9737_v0  ;;  %v9524_v3 = vor.u32 %v14135_v7, %v9521_v42  ;;  %v14513_v62 = vld [vmem:[#allocation5 + $0xbe4] sm:$0xf]  ;;  %v10100_v0 = vor.u32 %v14279_v37, %v10097_v19  ;;  %v10625_v42 = vld [vmem:[#allocation5 + $0x8c8] sm:$0xf0]  ;;  %v10409_v37 = vld [vmem:[#allocation5 + $0x718] sm:$0xf0] }
 0x3f2   :  { %8894 = vmatpush.bf16.msra.mxu2 %v9980_v8  ;;  %v9932_v8 = vor.u32 %v14237_v18, %v9929_v9  ;;  %v8621_v25 = vpop.f32.mrf.mxu2  ;;  %v14405_v19 = vld [vmem:[#allocation5 + $0x884] sm:$0xf] }
 0x3f3   :  { %8908 = vmatpush.bf16.msra.mxu3 %v10172_v61  ;;  %v10124_v61 = vor.u32 %v14285_v5, %v10121_v28  ;;  %v8622_v11 = vadd.f32 %v8621_v25, %v8608_v63  ;;  %v10460_v63 = vor.u32 %v14369_v22, %v10457_v30  ;;  %v14363_v5 = vld [vmem:[#allocation5 + $0x734] sm:$0xf]  ;;  %v10433_v28 = vld [vmem:[#allocation5 + $0x748] sm:$0xf0]  ;;  %v14453_v22 = vld [vmem:[#allocation5 + $0xa04] sm:$0xf] }
 0x3f4   :  { %8867 = vmatpush.bf16.msra.mxu0 %v9572_v23  ;;  %v10649_v23 = vld [vmem:[#allocation5 + $0x8f8] sm:$0xf0]  ;;  %v14459_v25 = vld [vmem:[#allocation5 + $0xa34] sm:$0xf]  ;;  %v10436_v52 = vor.u32 %v14363_v5, %v10433_v28 }
 0x3f5   :  { %8881 = vmatpush.bf16.msra.mxu1 %v9764_v15  ;;  %v10841_v15 = vld [vmem:[#allocation5 + $0xa78] sm:$0xf0]  ;;  %v10652_v18 = vor.u32 %v14417_v29, %v10649_v23  ;;  %v14501_v29 = vld [vmem:[#allocation5 + $0xb84] sm:$0xf]  ;;  %v10412_v23 = vor.u32 %v14357_v54, %v10409_v37 }
 0x3f6   :  { %8895 = vmatpush.bf16.msra.mxu2 %v9956_v24  ;;  %v16014_v24 = vadd.f32 %v8635_v57, %v8622_v11  ;;  %v10844_v9 = vor.u32 %v14465_v12, %v10841_v15  ;;  %v10601_v57 = vld [vmem:[#allocation5 + $0x898] sm:$0xf0] }
 0x3f7   :  { %8909 = vmatpush.bf16.msra.mxu3 %v10148_v13  ;;  %v11033_v13 = vld [vmem:[#allocation5 + $0xbf8] sm:$0xf0]  ;;  %v10604_v12 = vor.u32 %v14405_v19, %v10601_v57  ;;  %v10337_v57 = vld [vmem:[#allocation5 + $0x688] sm:$0xf0] }
 0x3f8   :  { %8868 = vmatpush.bf16.msra.mxu0 %v9548_v20  ;;  %v14411_v20 = vld [vmem:[#allocation5 + $0x8b4] sm:$0xf]  ;;  %v11036_v7 = vor.u32 %v14513_v62, %v11033_v13  ;;  %v10793_v30 = vld [vmem:[#allocation5 + $0xa18] sm:$0xf0] }
 0x3f9   :  { %8882 = vmatpush.bf16.msra.mxu1 %v9740_v14  ;;  %v10817_v14 = vld [vmem:[#allocation5 + $0xa48] sm:$0xf0]  ;;  %v10628_v59 = vor.u32 %v14411_v20, %v10625_v42  ;;  %v10796_v15 = vor.u32 %v14453_v22, %v10793_v30  ;;  %v14399_v62 = vld [vmem:[#allocation5 + $0x854] sm:$0xf]  ;;  %v10361_v42 = vld [vmem:[#allocation5 + $0x6b8] sm:$0xf0] }
 0x3fa   :  { %8896 = vmatpush.bf16.msra.mxu2 %v9932_v8  ;;  %v14507_v8 = vld [vmem:[#allocation5 + $0xbb4] sm:$0xf]  ;;  %v10937_v54 = vld [vmem:[#allocation5 + $0xb38] sm:$0xf0] }
 0x3fb   :  { %8910 = vmatpush.bf16.msra.mxu3 %v10124_v61  ;;  %v10820_v61 = vor.u32 %v14459_v25, %v10817_v14  ;;  %v11012_v11 = vor.u32 %v14507_v8, %v11009_v53  ;;  %v14393_v25 = vld [vmem:[#allocation5 + $0x824] sm:$0xf]  ;;  %v10553_v53 = vld [vmem:[#allocation5 + $0x838] sm:$0xf0]  ;;  %v14387_v22 = vld [vmem:[#allocation5 + $0x7f4] sm:$0xf] }
 0x3fc   :  { %8869 = vmatpush.bf16.msra.mxu0 %v9524_v3  ;;  %v10985_v3 = vld [vmem:[#allocation5 + $0xb98] sm:$0xf0] }
 0x3fd   :  { %8883 = vmatpush.bf16.msra.mxu1 %v9716_v27  ;;  %v14351_v27 = vld [vmem:[#allocation5 + $0x6d4] sm:$0xf]  ;;  %v10988_v13 = vor.u32 %v14501_v29, %v10985_v3  ;;  %v10529_v3 = vld [vmem:[#allocation5 + $0x808] sm:$0xf0] }
 0x3fe   :  { %8897 = vmatpush.bf16.msra.mxu2 %v9908_v45  ;;  %v10385_v45 = vld [vmem:[#allocation5 + $0x6e8] sm:$0xf0] }
 0x3ff   :  { %8911 = vmatpush.bf16.msra.mxu3 %v10100_v0  ;;  %8870 = vmatmul.bf16.vlgmr.msra.gmra.mxu0 %v15558_v58  ;;  %v10577_v58 = vld [vmem:[#allocation5 + $0x868] sm:$0xf0]  ;;  %v14447_v0 = vld [vmem:[#allocation5 + $0x9d4] sm:$0xf]  ;;  %v10388_v5 = vor.u32 %v14351_v27, %v10385_v45 }
 0x400   :  { %8918 = vmatpush.bf16.msrb.mxu0 %v10460_v63  ;;  %8884 = vmatmul.bf16.vlgmr.msra.gmra.mxu1 %v15564_v10  ;;  %v10769_v63 = vld [vmem:[#allocation5 + $0x9e8] sm:$0xf0]  ;;  %v10580_v28 = vor.u32 %v14399_v62, %v10577_v58  ;;  %v14483_v62 = vld [vmem:[#allocation5 + $0xaf4] sm:$0xf] }
 0x401   :  { %8932 = vmatpush.bf16.msrb.mxu1 %v10652_v18  ;;  %8898 = vmatmul.bf16.vlgmr.msra.gmra.mxu2 %v15560_v1  ;;  %v8647_v18 = vpop.f32.mrf.mxu0  ;;  %v14495_v1 = vld [vmem:[#allocation5 + $0xb54] sm:$0xf]  ;;  %v10772_v20 = vor.u32 %v14447_v0, %v10769_v63 }
 0x402   :  { %8946 = vmatpush.bf16.msrb.mxu2 %v10844_v9  ;;  %8912 = vmatmul.bf16.vlgmr.msra.gmra.mxu3 %v15566_v17  ;;  %v10961_v9 = vld [vmem:[#allocation5 + $0xb68] sm:$0xf0]  ;;  %v8648_v10 = vadd.f32 %v8647_v18, %v16012_v50  ;;  %v8661_v17 = vpop.f32.mrf.mxu1  ;;  %v10556_v50 = vor.u32 %v14393_v25, %v10553_v53  ;;  %v10697_v25 = vld [vmem:[#allocation5 + $0x958] sm:$0xf0]  ;;  %v14327_v53 = vld [vmem:[#allocation5 + $0x614] sm:$0xf] }
 0x403   :  { %8960 = vmatpush.bf16.msrb.mxu3 %v11036_v7  ;;  %v14345_v7 = vld [vmem:[#allocation5 + $0x6a4] sm:$0xf]  ;;  %v10964_v14 = vor.u32 %v14495_v1, %v10961_v9  ;;  %v10532_v1 = vor.u32 %v14387_v22, %v10529_v3  ;;  %v14471_v22 = vld [vmem:[#allocation5 + $0xa94] sm:$0xf] }
 0x404   :  { %8919 = vmatpush.bf16.msrb.mxu0 %v10436_v52  ;;  %v8662_v8 = vadd.f32 %v8661_v17, %v8648_v10  ;;  %v14441_v52 = vld [vmem:[#allocation5 + $0x9a4] sm:$0xf]  ;;  %v10364_v37 = vor.u32 %v14345_v7, %v10361_v42  ;;  %v8675_v29 = vpop.f32.mrf.mxu2  ;;  %v10505_v7 = vld [vmem:[#allocation5 + $0x7d8] sm:$0xf0] }
 0x405   :  { %8933 = vmatpush.bf16.msrb.mxu1 %v10628_v59  ;;  %v10745_v59 = vld [vmem:[#allocation5 + $0x9b8] sm:$0xf0]  ;;  %v8689_v45 = vpop.f32.mrf.mxu3  ;;  %v14333_v10 = vld [vmem:[#allocation5 + $0x644] sm:$0xf] }
 0x406   :  { %8947 = vmatpush.bf16.msrb.mxu2 %v10820_v61  ;;  %v14489_v61 = vld [vmem:[#allocation5 + $0xb24] sm:$0xf]  ;;  %v10748_v19 = vor.u32 %v14441_v52, %v10745_v59  ;;  %v10289_v52 = vld [vmem:[#allocation5 + $0x628] sm:$0xf0] }
 0x407   :  { %8961 = vmatpush.bf16.msrb.mxu3 %v11012_v11  ;;  %v14339_v11 = vld [vmem:[#allocation5 + $0x674] sm:$0xf]  ;;  %v10940_v30 = vor.u32 %v14489_v61, %v10937_v54  ;;  %v14381_v17 = vld [vmem:[#allocation5 + $0x7c4] sm:$0xf] }
 0x408   :  { %8920 = vmatpush.bf16.msrb.mxu0 %v10412_v23  ;;  %v14435_v23 = vld [vmem:[#allocation5 + $0x974] sm:$0xf]  ;;  %v10340_v0 = vor.u32 %v14339_v11, %v10337_v57  ;;  %v14429_v42 = vld [vmem:[#allocation5 + $0x944] sm:$0xf]  ;;  %v10508_v59 = vor.u32 %v14381_v17, %v10505_v7  ;;  %v10673_v57 = vld [vmem:[#allocation5 + $0x928] sm:$0xf0] }
 0x409   :  { %8934 = vmatpush.bf16.msrb.mxu1 %v10604_v12  ;;  %v10721_v12 = vld [vmem:[#allocation5 + $0x988] sm:$0xf0]  ;;  %v8649_v27 = vpop.f32.mrf.mxu0  ;;  %v10700_v61 = vor.u32 %v14429_v42, %v10697_v25  ;;  %v14375_v54 = vld [vmem:[#allocation5 + $0x794] sm:$0xf] }
 0x40a   :  { %8948 = vmatpush.bf16.msrb.mxu2 %v10796_v15  ;;  %v8676_v15 = vadd.f32 %v8675_v29, %v8662_v8  ;;  %v8650_v58 = vadd.f32 %v8649_v27, %v16014_v24  ;;  %v8663_v63 = vpop.f32.mrf.mxu1  ;;  %v10724_v9 = vor.u32 %v14435_v23, %v10721_v12  ;;  %v10889_v8 = vld [vmem:[#allocation5 + $0xad8] sm:$0xf0]  ;;  %v14561_v23 = vld [vmem:[#allocation5 + $0xd64] sm:$0xf]  ;;  %v10292_v27 = vor.u32 %v14327_v53, %v10289_v52  ;;  %v11201_v7 = vld [vmem:[#allocation5 + $0xd48] sm:$0xf0] }
 0x40b   :  { %8962 = vmatpush.bf16.msrb.mxu3 %v10988_v13  ;;  %v10913_v13 = vld [vmem:[#allocation5 + $0xb08] sm:$0xf0]  ;;  %v11225_v12 = vld [vmem:[#allocation5 + $0xd78] sm:$0xf0]  ;;  %v14603_v42 = vld [vmem:[#allocation5 + $0xeb4] sm:$0xf] }
 0x40c   :  { %8921 = vmatpush.bf16.msrb.mxu0 %v10388_v5  ;;  %v16022_v18 = vadd.f32 %v8689_v45, %v8676_v15  ;;  %v10313_v5 = vld [vmem:[#allocation5 + $0x658] sm:$0xf0]  ;;  %v8677_v11 = vpop.f32.mrf.mxu2  ;;  %v14609_v15 = vld [vmem:[#allocation5 + $0xee4] sm:$0xf]  ;;  %v14699_v53 = vld [vmem:[#allocation5 + $0x11b4] sm:$0xf] }
 0x40d   :  { %8935 = vmatpush.bf16.msrb.mxu1 %v10580_v28  ;;  %v10916_v28 = vor.u32 %v14483_v62, %v10913_v13  ;;  %v10316_v24 = vor.u32 %v14333_v10, %v10313_v5  ;;  %v8691_v3 = vpop.f32.mrf.mxu3  ;;  %v11417_v45 = vld [vmem:[#allocation5 + $0xef8] sm:$0xf0]  ;;  %v14657_v62 = vld [vmem:[#allocation5 + $0x1064] sm:$0xf]  ;;  %v11228_v5 = vor.u32 %v14561_v23, %v11225_v12  ;;  %v11777_v52 = vld [vmem:[#allocation5 + $0x11c8] sm:$0xf0] }
 0x40e   :  { %8949 = vmatpush.bf16.msrb.mxu2 %v10772_v20  ;;  %v8664_v20 = vadd.f32 %v8663_v63, %v8650_v58  ;;  %v11609_v13 = vld [vmem:[#allocation5 + $0x1078] sm:$0xf0]  ;;  %v11420_v17 = vor.u32 %v14609_v15, %v11417_v45  ;;  %v14591_v45 = vld [vmem:[#allocation5 + $0xe54] sm:$0xf] }
 0x40f   :  { %8963 = vmatpush.bf16.msrb.mxu3 %v10964_v14  ;;  %v14477_v14 = vld [vmem:[#allocation5 + $0xac4] sm:$0xf] }
 0x410   :  { %8922 = vmatpush.bf16.msrb.mxu0 %v10364_v37  ;;  %v10481_v37 = vld [vmem:[#allocation5 + $0x7a8] sm:$0xf0]  ;;  %v8678_v29 = vadd.f32 %v8677_v11, %v8664_v20  ;;  %v14555_v20 = vld [vmem:[#allocation5 + $0xd34] sm:$0xf]  ;;  %v11780_v11 = vor.u32 %v14699_v53, %v11777_v52  ;;  %v14681_v53 = vld [vmem:[#allocation5 + $0x1124] sm:$0xf] }
 0x411   :  { %8936 = vmatpush.bf16.msrb.mxu1 %v10556_v50  ;;  %v14423_v50 = vld [vmem:[#allocation5 + $0x914] sm:$0xf]  ;;  %v11705_v52 = vld [vmem:[#allocation5 + $0x1138] sm:$0xf0] }
 0x412   :  { %8950 = vmatpush.bf16.msrb.mxu2 %v10748_v19  ;;  %v10892_v19 = vor.u32 %v14477_v14, %v10889_v8  ;;  %v16024_v58 = vadd.f32 %v8691_v3, %v8678_v29  ;;  %v10676_v63 = vor.u32 %v14423_v50, %v10673_v57  ;;  %v11393_v14 = vld [vmem:[#allocation5 + $0xec8] sm:$0xf0]  ;;  %v14651_v8 = vld [vmem:[#allocation5 + $0x1034] sm:$0xf]  ;;  %v11177_v50 = vld [vmem:[#allocation5 + $0xd18] sm:$0xf0] }
 0x413   :  { %8964 = vmatpush.bf16.msrb.mxu3 %v10940_v30  ;;  %v10865_v30 = vld [vmem:[#allocation5 + $0xaa8] sm:$0xf0]  ;;  %v11369_v57 = vld [vmem:[#allocation5 + $0xe98] sm:$0xf0]  ;;  %v14693_v29 = vld [vmem:[#allocation5 + $0x1184] sm:$0xf] }
 0x414   :  { %8923 = vmatpush.bf16.msrb.mxu0 %v10340_v0  ;;  %v10484_v0 = vor.u32 %v14375_v54, %v10481_v37  ;;  %v10868_v10 = vor.u32 %v14471_v22, %v10865_v30  ;;  %v14549_v37 = vld [vmem:[#allocation5 + $0xd04] sm:$0xf]  ;;  %v11561_v30 = vld [vmem:[#allocation5 + $0x1018] sm:$0xf0] }
 0x415   :  { %8937 = vmatpush.bf16.msrb.mxu1 %v10532_v1  ;;  %v14705_v1 = vld [vmem:[#allocation5 + $0x11e4] sm:$0xf]  ;;  %v11753_v3 = vld [vmem:[#allocation5 + $0x1198] sm:$0xf0]  ;;  %v11180_v23 = vor.u32 %v14549_v37, %v11177_v50  ;;  %v11105_v37 = vld [vmem:[#allocation5 + $0xc88] sm:$0xf0] }
 0x416   :  { %8951 = vmatpush.bf16.msrb.mxu2 %v10724_v9  ;;  %v11801_v9 = vld [vmem:[#allocation5 + $0x11f8] sm:$0xf0]  ;;  %v14645_v22 = vld [vmem:[#allocation5 + $0x1004] sm:$0xf]  ;;  %v14579_v50 = vld [vmem:[#allocation5 + $0xdf4] sm:$0xf] }
 0x417   :  { %8965 = vmatpush.bf16.msrb.mxu3 %v10916_v28  ;;  %v11612_v28 = vor.u32 %v14657_v62, %v11609_v13  ;;  %v11804_v25 = vor.u32 %v14705_v1, %v11801_v9  ;;  %v11564_v15 = vor.u32 %v14645_v22, %v11561_v30  ;;  %v11756_v62 = vor.u32 %v14693_v29, %v11753_v3  ;;  %v11345_v13 = vld [vmem:[#allocation5 + $0xe68] sm:$0xf0]  ;;  %v14627_v22 = vld [vmem:[#allocation5 + $0xf74] sm:$0xf] }
 0x418   :  { %8924 = vmatpush.bf16.msrb.mxu0 %v10316_v24  ;;  %v11585_v24 = vld [vmem:[#allocation5 + $0x1048] sm:$0xf0] }
 0x419   :  { %8938 = vmatpush.bf16.msrb.mxu1 %v10508_v59  ;;  %v11204_v59 = vor.u32 %v14555_v20, %v11201_v7  ;;  %v11588_v54 = vor.u32 %v14651_v8, %v11585_v24  ;;  %v11729_v1 = vld [vmem:[#allocation5 + $0x1168] sm:$0xf0]  ;;  %v11129_v20 = vld [vmem:[#allocation5 + $0xcb8] sm:$0xf0]  ;;  %v14585_v7 = vld [vmem:[#allocation5 + $0xe24] sm:$0xf] }
 0x41a   :  { %8952 = vmatpush.bf16.msrb.mxu2 %v10700_v61  ;;  %v11396_v61 = vor.u32 %v14603_v42, %v11393_v14  ;;  %v11321_v14 = vld [vmem:[#allocation5 + $0xe38] sm:$0xf0]  ;;  %v14633_v8 = vld [vmem:[#allocation5 + $0xfa4] sm:$0xf]  ;;  %v11489_v30 = vld [vmem:[#allocation5 + $0xf88] sm:$0xf0] }
 0x41b   :  { %8966 = vmatpush.bf16.msrb.mxu3 %v10892_v19  ;;  %v14597_v19 = vld [vmem:[#allocation5 + $0xe84] sm:$0xf]  ;;  %v11513_v24 = vld [vmem:[#allocation5 + $0xfb8] sm:$0xf0] }
 0x41c   :  { %8925 = vmatpush.bf16.msrb.mxu0 %v10292_v27  ;;  %v11372_v12 = vor.u32 %v14597_v19, %v11369_v57  ;;  %v14543_v27 = vld [vmem:[#allocation5 + $0xcd4] sm:$0xf]  ;;  %v11708_v19 = vor.u32 %v14681_v53, %v11705_v52  ;;  %v11297_v57 = vld [vmem:[#allocation5 + $0xe08] sm:$0xf0] }
 0x41d   :  { %8939 = vmatpush.bf16.msrb.mxu1 %v10484_v0  ;;  %v14639_v0 = vld [vmem:[#allocation5 + $0xfd4] sm:$0xf] }
 0x41e   :  { %8953 = vmatpush.bf16.msrb.mxu2 %v10676_v63  ;;  %v8703_v63 = vpop.f32.mrf.mxu0 }
 0x41f   :  { %8967 = vmatpush.bf16.msrb.mxu3 %v10868_v10  ;;  %8926 = vmatmul.bf16.vlgmr.msrb.gmra.mxu0 %v15570_v39  ;;  %v11153_v39 = vld [vmem:[#allocation5 + $0xce8] sm:$0xf0]  ;;  %v8717_v10 = vpop.f32.mrf.mxu1 }
 0x420   :  { %8974 = vmatpush.bf16.msra.mxu0 %v11228_v5  ;;  %8940 = vmatmul.bf16.vlgmr.msrb.gmra.mxu1 %v15574_v44  ;;  %v14687_v44 = vld [vmem:[#allocation5 + $0x1154] sm:$0xf]  ;;  %v11156_v9 = vor.u32 %v14543_v27, %v11153_v39  ;;  %v11348_v5 = vor.u32 %v14591_v45, %v11345_v13  ;;  %v11300_v13 = vor.u32 %v14579_v50, %v11297_v57  ;;  %v14753_v50 = vld [vmem:[#allocation5 + $0x1364] sm:$0xf] }
 0x421   :  { %8988 = vmatpush.bf16.msra.mxu1 %v11420_v17  ;;  %8954 = vmatmul.bf16.vlgmr.msrb.gmra.mxu2 %v15572_v43  ;;  %v11537_v43 = vld [vmem:[#allocation5 + $0xfe8] sm:$0xf0]  ;;  %v11732_v42 = vor.u32 %v14687_v44, %v11729_v1  ;;  %v14573_v44 = vld [vmem:[#allocation5 + $0xdc4] sm:$0xf] }
 0x422   :  { %9002 = vmatpush.bf16.msra.mxu2 %v11612_v28  ;;  %8968 = vmatmul.bf16.vlgmr.msrb.gmra.mxu3 %v15576_v47  ;;  %v8704_v47 = vadd.f32 %v8703_v63, %v16022_v18  ;;  %v11540_v17 = vor.u32 %v14639_v0, %v11537_v43  ;;  %v14537_v28 = vld [vmem:[#allocation5 + $0xca4] sm:$0xf]  ;;  %v11324_v18 = vor.u32 %v14585_v7, %v11321_v14  ;;  %v11081_v63 = vld [vmem:[#allocation5 + $0xc58] sm:$0xf0]  ;;  %v11057_v7 = vld [vmem:[#allocation5 + $0xc28] sm:$0xf0] }
 0x423   :  { %9016 = vmatpush.bf16.msra.mxu3 %v11804_v25  ;;  %v11492_v0 = vor.u32 %v14627_v22, %v11489_v30  ;;  %v14525_v43 = vld [vmem:[#allocation5 + $0xc44] sm:$0xf]  ;;  %v14567_v14 = vld [vmem:[#allocation5 + $0xd94] sm:$0xf]  ;;  %v12185_v22 = vld [vmem:[#allocation5 + $0x14f8] sm:$0xf0] }
 0x424   :  { %8975 = vmatpush.bf16.msra.mxu0 %v11204_v59  ;;  %v8718_v25 = vadd.f32 %v8717_v10, %v8704_v47  ;;  %v11132_v59 = vor.u32 %v14537_v28, %v11129_v20  ;;  %v14621_v10 = vld [vmem:[#allocation5 + $0xf44] sm:$0xf]  ;;  %v11657_v28 = vld [vmem:[#allocation5 + $0x10d8] sm:$0xf0]  ;;  %v14519_v20 = vld [vmem:[#allocation5 + $0xc14] sm:$0xf] }
 0x425   :  { %8989 = vmatpush.bf16.msra.mxu1 %v11396_v61  ;;  %v11516_v61 = vor.u32 %v14633_v8, %v11513_v24  ;;  %v11249_v8 = vld [vmem:[#allocation5 + $0xda8] sm:$0xf0]  ;;  %v14615_v24 = vld [vmem:[#allocation5 + $0xf14] sm:$0xf]  ;;  %v11060_v57 = vor.u32 %v14519_v20, %v11057_v7  ;;  %v14849_v30 = vld [vmem:[#allocation5 + $0x1664] sm:$0xf] }
 0x426   :  { %9003 = vmatpush.bf16.msra.mxu2 %v11588_v54  ;;  %v14531_v54 = vld [vmem:[#allocation5 + $0xc74] sm:$0xf]  ;;  %v8705_v3 = vpop.f32.mrf.mxu0  ;;  %v14741_v7 = vld [vmem:[#allocation5 + $0x1304] sm:$0xf] }
 0x427   :  { %9017 = vmatpush.bf16.msra.mxu3 %v11780_v11  ;;  %v8731_v11 = vpop.f32.mrf.mxu2  ;;  %v8706_v27 = vadd.f32 %v8705_v3, %v16024_v58  ;;  %v11108_v39 = vor.u32 %v14531_v54, %v11105_v37  ;;  %v8719_v45 = vpop.f32.mrf.mxu1  ;;  %v11084_v58 = vor.u32 %v14525_v43, %v11081_v63  ;;  %v14747_v43 = vld [vmem:[#allocation5 + $0x1334] sm:$0xf]  ;;  %v11969_v63 = vld [vmem:[#allocation5 + $0x1348] sm:$0xf0] }
 0x428   :  { %8976 = vmatpush.bf16.msra.mxu0 %v11180_v23  ;;  %v8732_v29 = vadd.f32 %v8731_v11, %v8718_v25  ;;  %v8745_v23 = vpop.f32.mrf.mxu3  ;;  %v14801_v11 = vld [vmem:[#allocation5 + $0x14e4] sm:$0xf] }
 0x429   :  { %8990 = vmatpush.bf16.msra.mxu1 %v11372_v12  ;;  %v14675_v12 = vld [vmem:[#allocation5 + $0x10f4] sm:$0xf]  ;;  %v8720_v47 = vadd.f32 %v8719_v45, %v8706_v27  ;;  %v12569_v27 = vld [vmem:[#allocation5 + $0x17f8] sm:$0xf0] }
 0x42a   :  { %9004 = vmatpush.bf16.msra.mxu2 %v11564_v15  ;;  %v11681_v15 = vld [vmem:[#allocation5 + $0x1108] sm:$0xf0] }
 0x42b   :  { %9018 = vmatpush.bf16.msra.mxu3 %v11756_v62  ;;  %v16032_v62 = vadd.f32 %v8745_v23, %v8732_v29  ;;  %v11684_v1 = vor.u32 %v14675_v12, %v11681_v15  ;;  %v12377_v29 = vld [vmem:[#allocation5 + $0x1678] sm:$0xf0]  ;;  %v11252_v23 = vor.u32 %v14567_v14, %v11249_v8  ;;  %v14897_v15 = vld [vmem:[#allocation5 + $0x17e4] sm:$0xf] }
 0x42c   :  { %8977 = vmatpush.bf16.msra.mxu0 %v11156_v9  ;;  %v11273_v9 = vld [vmem:[#allocation5 + $0xdd8] sm:$0xf0] }
 0x42d   :  { %8991 = vmatpush.bf16.msra.mxu1 %v11348_v5  ;;  %v11465_v5 = vld [vmem:[#allocation5 + $0xf58] sm:$0xf0] }
 0x42e   :  { %9005 = vmatpush.bf16.msra.mxu2 %v11540_v17  ;;  %v14669_v17 = vld [vmem:[#allocation5 + $0x10c4] sm:$0xf]  ;;  %v11468_v25 = vor.u32 %v14621_v10, %v11465_v5  ;;  %v12353_v10 = vld [vmem:[#allocation5 + $0x1648] sm:$0xf0]  ;;  %v14891_v5 = vld [vmem:[#allocation5 + $0x17b4] sm:$0xf] }
 0x42f   :  { %9019 = vmatpush.bf16.msra.mxu3 %v11732_v42  ;;  %v11276_v42 = vor.u32 %v14573_v44, %v11273_v9  ;;  %v11660_v53 = vor.u32 %v14669_v17, %v11657_v28  ;;  %v8733_v52 = vpop.f32.mrf.mxu2  ;;  %v14795_v44 = vld [vmem:[#allocation5 + $0x14b4] sm:$0xf]  ;;  %v12545_v17 = vld [vmem:[#allocation5 + $0x17c8] sm:$0xf0]  ;;  %v11972_v28 = vor.u32 %v14747_v43, %v11969_v63  ;;  %v12137_v8 = vld [vmem:[#allocation5 + $0x1498] sm:$0xf0] }
 0x430   :  { %8978 = vmatpush.bf16.msra.mxu0 %v11132_v59  ;;  %v11441_v59 = vld [vmem:[#allocation5 + $0xf28] sm:$0xf0]  ;;  %v8734_v54 = vadd.f32 %v8733_v52, %v8720_v47  ;;  %v8747_v37 = vpop.f32.mrf.mxu3  ;;  %v14843_v9 = vld [vmem:[#allocation5 + $0x1634] sm:$0xf]  ;;  %v12548_v14 = vor.u32 %v14891_v5, %v12545_v17  ;;  %v14885_v52 = vld [vmem:[#allocation5 + $0x1784] sm:$0xf] }
 0x431   :  { %8992 = vmatpush.bf16.msra.mxu1 %v11324_v18  ;;  %v14663_v18 = vld [vmem:[#allocation5 + $0x1094] sm:$0xf]  ;;  %v11444_v12 = vor.u32 %v14615_v24, %v11441_v59  ;;  %v12161_v47 = vld [vmem:[#allocation5 + $0x14c8] sm:$0xf0]  ;;  %v12356_v20 = vor.u32 %v14843_v9, %v12353_v10  ;;  %v14837_v24 = vld [vmem:[#allocation5 + $0x1604] sm:$0xf] }
 0x432   :  { %9006 = vmatpush.bf16.msra.mxu2 %v11516_v61  ;;  %v11633_v61 = vld [vmem:[#allocation5 + $0x10a8] sm:$0xf0]  ;;  %v16034_v3 = vadd.f32 %v8747_v37, %v8734_v54  ;;  %v12521_v59 = vld [vmem:[#allocation5 + $0x1798] sm:$0xf0]  ;;  %v14735_v37 = vld [vmem:[#allocation5 + $0x12d4] sm:$0xf] }
 0x433   :  { %9020 = vmatpush.bf16.msra.mxu3 %v11708_v19  ;;  %v11993_v19 = vld [vmem:[#allocation5 + $0x1378] sm:$0xf0]  ;;  %v14825_v63 = vld [vmem:[#allocation5 + $0x15a4] sm:$0xf]  ;;  %v14723_v5 = vld [vmem:[#allocation5 + $0x1274] sm:$0xf] }
 0x434   :  { %8979 = vmatpush.bf16.msra.mxu0 %v11108_v39  ;;  %v11636_v39 = vor.u32 %v14663_v18, %v11633_v61  ;;  %v11996_v45 = vor.u32 %v14753_v50, %v11993_v19  ;;  %v14783_v50 = vld [vmem:[#allocation5 + $0x1454] sm:$0xf]  ;;  %v12524_v19 = vor.u32 %v14885_v52, %v12521_v59  ;;  %v12089_v43 = vld [vmem:[#allocation5 + $0x1438] sm:$0xf0]  ;;  %v11873_v17 = vld [vmem:[#allocation5 + $0x1288] sm:$0xf0] }
 0x435   :  { %8993 = vmatpush.bf16.msra.mxu1 %v11300_v13  ;;  %v12188_v13 = vor.u32 %v14801_v11, %v12185_v22  ;;  %v12113_v11 = vld [vmem:[#allocation5 + $0x1468] sm:$0xf0] }
 0x436   :  { %9007 = vmatpush.bf16.msra.mxu2 %v11492_v0  ;;  %v12380_v0 = vor.u32 %v14849_v30, %v12377_v29  ;;  %v12497_v30 = vld [vmem:[#allocation5 + $0x1768] sm:$0xf0] }
 0x437   :  { %9021 = vmatpush.bf16.msra.mxu3 %v11684_v1  ;;  %v12572_v1 = vor.u32 %v14897_v15, %v12569_v27  ;;  %v14729_v27 = vld [vmem:[#allocation5 + $0x12a4] sm:$0xf]  ;;  %v12449_v52 = vld [vmem:[#allocation5 + $0x1708] sm:$0xf0] }
 0x438   :  { %8980 = vmatpush.bf16.msra.mxu0 %v11084_v58  ;;  %v12164_v58 = vor.u32 %v14795_v44, %v12161_v47  ;;  %v12281_v44 = vld [vmem:[#allocation5 + $0x15b8] sm:$0xf0] }
 0x439   :  { %8994 = vmatpush.bf16.msra.mxu1 %v11276_v42  ;;  %v11945_v42 = vld [vmem:[#allocation5 + $0x1318] sm:$0xf0]  ;;  %v12284_v10 = vor.u32 %v14825_v63, %v12281_v44  ;;  %v12209_v63 = vld [vmem:[#allocation5 + $0x1528] sm:$0xf0]  ;;  %v14855_v44 = vld [vmem:[#allocation5 + $0x1694] sm:$0xf] }
 0x43a   :  { %9008 = vmatpush.bf16.msra.mxu2 %v11468_v25  ;;  %v14789_v25 = vld [vmem:[#allocation5 + $0x1484] sm:$0xf]  ;;  %v11948_v18 = vor.u32 %v14741_v7, %v11945_v42  ;;  %v12473_v47 = vld [vmem:[#allocation5 + $0x1738] sm:$0xf0]  ;;  %v12065_v7 = vld [vmem:[#allocation5 + $0x1408] sm:$0xf0] }
 0x43b   :  { %9022 = vmatpush.bf16.msra.mxu3 %v11660_v53  ;;  %v12329_v53 = vld [vmem:[#allocation5 + $0x1618] sm:$0xf0]  ;;  %v12140_v61 = vor.u32 %v14789_v25, %v12137_v8  ;;  %v14819_v42 = vld [vmem:[#allocation5 + $0x1574] sm:$0xf]  ;;  %v12257_v25 = vld [vmem:[#allocation5 + $0x1588] sm:$0xf0] }
 0x43c   :  { %8981 = vmatpush.bf16.msra.mxu0 %v11060_v57  ;;  %v12332_v54 = vor.u32 %v14837_v24, %v12329_v53  ;;  %v14831_v57 = vld [vmem:[#allocation5 + $0x15d4] sm:$0xf]  ;;  %v8759_v22 = vpop.f32.mrf.mxu0 }
 0x43d   :  { %8995 = vmatpush.bf16.msra.mxu1 %v11252_v23  ;;  %v8773_v23 = vpop.f32.mrf.mxu1  ;;  %v14867_v53 = vld [vmem:[#allocation5 + $0x16f4] sm:$0xf] }
 0x43e   :  { %9009 = vmatpush.bf16.msra.mxu2 %v11444_v12  ;;  %v12116_v12 = vor.u32 %v14783_v50, %v12113_v11  ;;  %v14717_v50 = vld [vmem:[#allocation5 + $0x1244] sm:$0xf] }
 0x43f   :  { %9023 = vmatpush.bf16.msra.mxu3 %v11636_v39  ;;  %8982 = vmatmul.bf16.vlgmr.msra.gmra.mxu0 %v15582_v31  ;;  %v11921_v31 = vld [vmem:[#allocation5 + $0x12e8] sm:$0xf0]  ;;  %v11897_v39 = vld [vmem:[#allocation5 + $0x12b8] sm:$0xf0]  ;;  %v14765_v11 = vld [vmem:[#allocation5 + $0x13c4] sm:$0xf] }
 0x440   :  { %9030 = vmatpush.bf16.msrb.mxu0 %v11996_v45  ;;  %8996 = vmatmul.bf16.vlgmr.msra.gmra.mxu1 %v15586_v36  ;;  %v14879_v36 = vld [vmem:[#allocation5 + $0x1754] sm:$0xf]  ;;  %v11924_v29 = vor.u32 %v14735_v37, %v11921_v31  ;;  %v14777_v45 = vld [vmem:[#allocation5 + $0x1424] sm:$0xf]  ;;  %v11900_v9 = vor.u32 %v14729_v27, %v11897_v39  ;;  %v12260_v31 = vor.u32 %v14819_v42, %v12257_v25 }
 0x441   :  { %9044 = vmatpush.bf16.msrb.mxu1 %v12188_v13  ;;  %9010 = vmatmul.bf16.vlgmr.msra.gmra.mxu2 %v15584_v35  ;;  %v12305_v35 = vld [vmem:[#allocation5 + $0x15e8] sm:$0xf0]  ;;  %v12500_v13 = vor.u32 %v14879_v36, %v12497_v30  ;;  %v14813_v36 = vld [vmem:[#allocation5 + $0x1544] sm:$0xf]  ;;  %v12233_v30 = vld [vmem:[#allocation5 + $0x1558] sm:$0xf0] }
 0x442   :  { %9058 = vmatpush.bf16.msrb.mxu2 %v12380_v0  ;;  %9024 = vmatmul.bf16.vlgmr.msra.gmra.mxu3 %v15588_v40  ;;  %v8760_v40 = vadd.f32 %v8759_v22, %v16032_v62  ;;  %v12308_v15 = vor.u32 %v14831_v57, %v12305_v35  ;;  %v12092_v62 = vor.u32 %v14777_v45, %v12089_v43  ;;  %v12041_v22 = vld [vmem:[#allocation5 + $0x13d8] sm:$0xf0]  ;;  %v14759_v39 = vld [vmem:[#allocation5 + $0x1394] sm:$0xf]  ;;  %v12017_v45 = vld [vmem:[#allocation5 + $0x13a8] sm:$0xf0] }
 0x443   :  { %9072 = vmatpush.bf16.msrb.mxu3 %v12572_v1  ;;  %v14873_v1 = vld [vmem:[#allocation5 + $0x1724] sm:$0xf]  ;;  %v12452_v57 = vor.u32 %v14867_v53, %v12449_v52  ;;  %v12236_v27 = vor.u32 %v14813_v36, %v12233_v30  ;;  %v12020_v42 = vor.u32 %v14759_v39, %v12017_v45  ;;  %v13289_v45 = vld [vmem:[#allocation5 + $0x1d98] sm:$0xf0] }
 0x444   :  { %9031 = vmatpush.bf16.msrb.mxu0 %v11972_v28  ;;  %v8774_v0 = vadd.f32 %v8773_v23, %v8760_v40  ;;  %v14771_v28 = vld [vmem:[#allocation5 + $0x13f4] sm:$0xf]  ;;  %v8761_v8 = vpop.f32.mrf.mxu0  ;;  %v14861_v40 = vld [vmem:[#allocation5 + $0x16c4] sm:$0xf] }
 0x445   :  { %9045 = vmatpush.bf16.msrb.mxu1 %v12164_v58  ;;  %v12476_v58 = vor.u32 %v14873_v1, %v12473_v47  ;;  %v8801_v24 = vpop.f32.mrf.mxu3  ;;  %v8762_v59 = vadd.f32 %v8761_v8, %v16034_v3  ;;  %v12068_v37 = vor.u32 %v14771_v28, %v12065_v7  ;;  %v14711_v23 = vld [vmem:[#allocation5 + $0x1214] sm:$0xf]  ;;  %v12401_v1 = vld [vmem:[#allocation5 + $0x16a8] sm:$0xf0]  ;;  %v12953_v28 = vld [vmem:[#allocation5 + $0x1af8] sm:$0xf0] }
 0x446   :  { %9059 = vmatpush.bf16.msrb.mxu2 %v12356_v20  ;;  %v8787_v20 = vpop.f32.mrf.mxu2  ;;  %v13337_v8 = vld [vmem:[#allocation5 + $0x1df8] sm:$0xf0]  ;;  %v15077_v39 = vld [vmem:[#allocation5 + $0x1d84] sm:$0xf] }
 0x447   :  { %9073 = vmatpush.bf16.msrb.mxu3 %v12548_v14  ;;  %v8788_v14 = vadd.f32 %v8787_v20, %v8774_v0  ;;  %v13145_v20 = vld [vmem:[#allocation5 + $0x1c78] sm:$0xf0] }
 0x448   :  { %9032 = vmatpush.bf16.msrb.mxu0 %v11948_v18  ;;  %v11876_v18 = vor.u32 %v14723_v5, %v11873_v17  ;;  %v14993_v5 = vld [vmem:[#allocation5 + $0x1ae4] sm:$0xf] }
 0x449   :  { %9046 = vmatpush.bf16.msrb.mxu1 %v12140_v61  ;;  %v8775_v61 = vpop.f32.mrf.mxu1  ;;  %v12956_v52 = vor.u32 %v14993_v5, %v12953_v28 }
 0x44a   :  { %9060 = vmatpush.bf16.msrb.mxu2 %v12332_v54  ;;  %v16042_v54 = vadd.f32 %v8801_v24, %v8788_v14  ;;  %v8776_v35 = vadd.f32 %v8775_v61, %v8762_v59  ;;  %v15089_v14 = vld [vmem:[#allocation5 + $0x1de4] sm:$0xf]  ;;  %v12404_v24 = vor.u32 %v14855_v44, %v12401_v1  ;;  %v12737_v61 = vld [vmem:[#allocation5 + $0x1948] sm:$0xf0]  ;;  %v14975_v44 = vld [vmem:[#allocation5 + $0x1a54] sm:$0xf]  ;;  %v13292_v1 = vor.u32 %v15077_v39, %v13289_v45 }
 0x44b   :  { %9074 = vmatpush.bf16.msrb.mxu3 %v12524_v19  ;;  %v11849_v19 = vld [vmem:[#allocation5 + $0x1258] sm:$0xf0] }
 0x44c   :  { %9033 = vmatpush.bf16.msrb.mxu0 %v11924_v29  ;;  %v12425_v29 = vld [vmem:[#allocation5 + $0x16d8] sm:$0xf0]  ;;  %v11852_v3 = vor.u32 %v14717_v50, %v11849_v19  ;;  %v12929_v50 = vld [vmem:[#allocation5 + $0x1ac8] sm:$0xf0]  ;;  %v15035_v19 = vld [vmem:[#allocation5 + $0x1c34] sm:$0xf] }
 0x44d   :  { %9047 = vmatpush.bf16.msrb.mxu1 %v12116_v12  ;;  %v11825_v12 = vld [vmem:[#allocation5 + $0x1228] sm:$0xf0]  ;;  %v12428_v0 = vor.u32 %v14861_v40, %v12425_v29  ;;  %v14933_v40 = vld [vmem:[#allocation5 + $0x1904] sm:$0xf]  ;;  %v12713_v29 = vld [vmem:[#allocation5 + $0x1918] sm:$0xf0] }
 0x44e   :  { %9061 = vmatpush.bf16.msrb.mxu2 %v12308_v15  ;;  %v12044_v15 = vor.u32 %v14765_v11, %v12041_v22  ;;  %v8789_v43 = vpop.f32.mrf.mxu2  ;;  %v11828_v17 = vor.u32 %v14711_v23, %v11825_v12  ;;  %v13121_v11 = vld [vmem:[#allocation5 + $0x1c48] sm:$0xf0]  ;;  %v12905_v12 = vld [vmem:[#allocation5 + $0x1a98] sm:$0xf0] }
 0x44f   :  { %9075 = vmatpush.bf16.msrb.mxu3 %v12500_v13  ;;  %v14807_v13 = vld [vmem:[#allocation5 + $0x1514] sm:$0xf]  ;;  %v8790_v47 = vadd.f32 %v8789_v43, %v8776_v35  ;;  %v13313_v35 = vld [vmem:[#allocation5 + $0x1dc8] sm:$0xf0]  ;;  %v13124_v30 = vor.u32 %v15035_v19, %v13121_v11 }
 0x450   :  { %9034 = vmatpush.bf16.msrb.mxu0 %v11900_v9  ;;  %v8803_v9 = vpop.f32.mrf.mxu3  ;;  %v12212_v25 = vor.u32 %v14807_v13, %v12209_v63  ;;  %v12716_v13 = vor.u32 %v14933_v40, %v12713_v29  ;;  %v14927_v63 = vld [vmem:[#allocation5 + $0x18d4] sm:$0xf] }
 0x451   :  { %9048 = vmatpush.bf16.msrb.mxu1 %v12092_v62  ;;  %v14945_v62 = vld [vmem:[#allocation5 + $0x1964] sm:$0xf]  ;;  %v16044_v7 = vadd.f32 %v8803_v9, %v8790_v47  ;;  %v12881_v47 = vld [vmem:[#allocation5 + $0x1a68] sm:$0xf0]  ;;  %v15023_v9 = vld [vmem:[#allocation5 + $0x1bd4] sm:$0xf] }
 0x452   :  { %9062 = vmatpush.bf16.msrb.mxu2 %v12284_v10  ;;  %v12761_v10 = vld [vmem:[#allocation5 + $0x1978] sm:$0xf0]  ;;  %v12884_v28 = vor.u32 %v14975_v44, %v12881_v47  ;;  %v14963_v19 = vld [vmem:[#allocation5 + $0x19f4] sm:$0xf]  ;;  %v15005_v47 = vld [vmem:[#allocation5 + $0x1b44] sm:$0xf] }
 0x453   :  { %9076 = vmatpush.bf16.msrb.mxu3 %v12476_v58  ;;  %v15041_v58 = vld [vmem:[#allocation5 + $0x1c64] sm:$0xf]  ;;  %v12764_v53 = vor.u32 %v14945_v62, %v12761_v10  ;;  %v13265_v10 = vld [vmem:[#allocation5 + $0x1d68] sm:$0xf0] }
 0x454   :  { %9035 = vmatpush.bf16.msrb.mxu0 %v11876_v18  ;;  %v13148_v59 = vor.u32 %v15041_v58, %v13145_v20  ;;  %v14939_v18 = vld [vmem:[#allocation5 + $0x1934] sm:$0xf]  ;;  %v14921_v20 = vld [vmem:[#allocation5 + $0x18a4] sm:$0xf] }
 0x455   :  { %9049 = vmatpush.bf16.msrb.mxu1 %v12068_v37  ;;  %v14987_v37 = vld [vmem:[#allocation5 + $0x1ab4] sm:$0xf]  ;;  %v12740_v22 = vor.u32 %v14939_v18, %v12737_v61  ;;  %v13241_v18 = vld [vmem:[#allocation5 + $0x1d38] sm:$0xf0] }
 0x456   :  { %9063 = vmatpush.bf16.msrb.mxu2 %v12260_v31  ;;  %v13340_v31 = vor.u32 %v15089_v14, %v13337_v8  ;;  %v12932_v36 = vor.u32 %v14987_v37, %v12929_v50  ;;  %v12641_v50 = vld [vmem:[#allocation5 + $0x1888] sm:$0xf0] }
 0x457   :  { %9077 = vmatpush.bf16.msrb.mxu3 %v12452_v57  ;;  %v15083_v57 = vld [vmem:[#allocation5 + $0x1db4] sm:$0xf] }
 0x458   :  { %9036 = vmatpush.bf16.msrb.mxu0 %v11852_v3  ;;  %v14981_v3 = vld [vmem:[#allocation5 + $0x1a84] sm:$0xf]  ;;  %v13316_v23 = vor.u32 %v15083_v57, %v13313_v35  ;;  %v12833_v35 = vld [vmem:[#allocation5 + $0x1a08] sm:$0xf0] }
 0x459   :  { %9050 = vmatpush.bf16.msrb.mxu1 %v12044_v15  ;;  %v15029_v15 = vld [vmem:[#allocation5 + $0x1c04] sm:$0xf]  ;;  %v12836_v45 = vor.u32 %v14963_v19, %v12833_v35  ;;  %v14105_v35 = vld [vmem:[#allocation5 + $0x23f8] sm:$0xf0] }
 0x45a   :  { %9064 = vmatpush.bf16.msrb.mxu2 %v12236_v27  ;;  %v13097_v27 = vld [vmem:[#allocation5 + $0x1c18] sm:$0xf0] }
 0x45b   :  { %9078 = vmatpush.bf16.msrb.mxu3 %v12428_v0  ;;  %v12908_v0 = vor.u32 %v14981_v3, %v12905_v12  ;;  %v13100_v43 = vor.u32 %v15029_v15, %v13097_v27  ;;  %v15059_v3 = vld [vmem:[#allocation5 + $0x1cf4] sm:$0xf] }
 0x45c   :  { %9037 = vmatpush.bf16.msrb.mxu0 %v11828_v17  ;;  %v8815_v62 = vpop.f32.mrf.mxu0 }
 0x45d   :  { %9051 = vmatpush.bf16.msrb.mxu1 %v12020_v42  ;;  %v8829_v17 = vpop.f32.mrf.mxu1  ;;  %v12665_v42 = vld [vmem:[#allocation5 + $0x18b8] sm:$0xf0] }
 0x45e   :  { %9065 = vmatpush.bf16.msrb.mxu2 %v12212_v25  ;;  %v14969_v25 = vld [vmem:[#allocation5 + $0x1a24] sm:$0xf]  ;;  %v12668_v61 = vor.u32 %v14921_v20, %v12665_v42 }
 0x45f   :  { %9079 = vmatpush.bf16.msrb.mxu3 %v12404_v24  ;;  %9038 = vmatmul.bf16.vlgmr.msrb.gmra.mxu0 %v15594_v32  ;;  %v12689_v32 = vld [vmem:[#allocation5 + $0x18e8] sm:$0xf0]  ;;  %v12857_v24 = vld [vmem:[#allocation5 + $0x1a38] sm:$0xf0] }
 0x460   :  { %9086 = vmatpush.bf16.msra.mxu0 %v12764_v53  ;;  %9052 = vmatmul.bf16.vlgmr.msrb.gmra.mxu1 %v15598_v41  ;;  %v15071_v41 = vld [vmem:[#allocation5 + $0x1d54] sm:$0xf]  ;;  %v12692_v5 = vor.u32 %v14927_v63, %v12689_v32  ;;  %v15017_v53 = vld [vmem:[#allocation5 + $0x1ba4] sm:$0xf] }
 0x461   :  { %9100 = vmatpush.bf16.msra.mxu1 %v12956_v52  ;;  %9066 = vmatmul.bf16.vlgmr.msrb.gmra.mxu2 %v15596_v38  ;;  %v13073_v38 = vld [vmem:[#allocation5 + $0x1be8] sm:$0xf0]  ;;  %v13268_v14 = vor.u32 %v15071_v41, %v13265_v10  ;;  %v13049_v52 = vld [vmem:[#allocation5 + $0x1bb8] sm:$0xf0]  ;;  %v14957_v63 = vld [vmem:[#allocation5 + $0x19c4] sm:$0xf] }
 0x462   :  { %9114 = vmatpush.bf16.msra.mxu2 %v13148_v59  ;;  %9080 = vmatmul.bf16.vlgmr.msrb.gmra.mxu3 %v15600_v46  ;;  %v8816_v46 = vadd.f32 %v8815_v62, %v16042_v54  ;;  %v13076_v58 = vor.u32 %v15023_v9, %v13073_v38  ;;  %v15065_v59 = vld [vmem:[#allocation5 + $0x1d24] sm:$0xf]  ;;  %v12860_v54 = vor.u32 %v14969_v25, %v12857_v24  ;;  %v13001_v9 = vld [vmem:[#allocation5 + $0x1b58] sm:$0xf0]  ;;  %v14903_v41 = vld [vmem:[#allocation5 + $0x1814] sm:$0xf] }
 0x463   :  { %9128 = vmatpush.bf16.msra.mxu3 %v13340_v31  ;;  %v13052_v37 = vor.u32 %v15017_v53, %v13049_v52  ;;  %v14915_v31 = vld [vmem:[#allocation5 + $0x1874] sm:$0xf]  ;;  %v13244_v11 = vor.u32 %v15065_v59, %v13241_v18  ;;  %v15053_v38 = vld [vmem:[#allocation5 + $0x1cc4] sm:$0xf]  ;;  %v13193_v62 = vld [vmem:[#allocation5 + $0x1cd8] sm:$0xf0] }
 0x464   :  { %9087 = vmatpush.bf16.msra.mxu0 %v12740_v22  ;;  %v8830_v8 = vadd.f32 %v8829_v17, %v8816_v46  ;;  %v8843_v57 = vpop.f32.mrf.mxu2  ;;  %v15011_v22 = vld [vmem:[#allocation5 + $0x1b74] sm:$0xf]  ;;  %v8817_v40 = vpop.f32.mrf.mxu0  ;;  %v12644_v15 = vor.u32 %v14915_v31, %v12641_v50  ;;  %v12593_v10 = vld [vmem:[#allocation5 + $0x1828] sm:$0xf0]  ;;  %v13196_v20 = vor.u32 %v15053_v38, %v13193_v62  ;;  %v15137_v52 = vld [vmem:[#allocation5 + $0x1f64] sm:$0xf] }
 0x465   :  { %9101 = vmatpush.bf16.msra.mxu1 %v12932_v36  ;;  %v13025_v36 = vld [vmem:[#allocation5 + $0x1b88] sm:$0xf0]  ;;  %v8857_v29 = vpop.f32.mrf.mxu3  ;;  %v8818_v12 = vadd.f32 %v8817_v40, %v16044_v7  ;;  %v8831_v27 = vpop.f32.mrf.mxu1  ;;  %v14951_v17 = vld [vmem:[#allocation5 + $0x1994] sm:$0xf]  ;;  %v13529_v59 = vld [vmem:[#allocation5 + $0x1f78] sm:$0xf0] }
 0x466   :  { %9115 = vmatpush.bf16.msra.mxu2 %v13124_v30  ;;  %v8844_v30 = vadd.f32 %v8843_v57, %v8830_v8  ;;  %v12977_v25 = vld [vmem:[#allocation5 + $0x1b28] sm:$0xf0]  ;;  %v15185_v18 = vld [vmem:[#allocation5 + $0x20e4] sm:$0xf]  ;;  %v13913_v31 = vld [vmem:[#allocation5 + $0x2278] sm:$0xf0] }
 0x467   :  { %9129 = vmatpush.bf16.msra.mxu3 %v13316_v23  ;;  %v13217_v23 = vld [vmem:[#allocation5 + $0x1d08] sm:$0xf0]  ;;  %v8832_v44 = vadd.f32 %v8831_v27, %v8818_v12  ;;  %v15281_v57 = vld [vmem:[#allocation5 + $0x23e4] sm:$0xf]  ;;  %v15227_v27 = vld [vmem:[#allocation5 + $0x2234] sm:$0xf] }
 0x468   :  { %9088 = vmatpush.bf16.msra.mxu0 %v12716_v13  ;;  %v16052_v39 = vadd.f32 %v8857_v29, %v8844_v30  ;;  %v13028_v13 = vor.u32 %v15011_v22, %v13025_v36  ;;  %v13220_v32 = vor.u32 %v15059_v3, %v13217_v23  ;;  %v13169_v8 = vld [vmem:[#allocation5 + $0x1ca8] sm:$0xf0]  ;;  %v13532_v36 = vor.u32 %v15137_v52, %v13529_v59  ;;  %v15131_v29 = vld [vmem:[#allocation5 + $0x1f34] sm:$0xf]  ;;  %v13673_v38 = vld [vmem:[#allocation5 + $0x2098] sm:$0xf0] }
 0x469   :  { %9102 = vmatpush.bf16.msra.mxu1 %v12908_v0  ;;  %v14909_v0 = vld [vmem:[#allocation5 + $0x1844] sm:$0xf]  ;;  %v13505_v3 = vld [vmem:[#allocation5 + $0x1f48] sm:$0xf0]  ;;  %v15179_v23 = vld [vmem:[#allocation5 + $0x20b4] sm:$0xf]  ;;  %v14108_v12 = vor.u32 %v15281_v57, %v14105_v35 }
 0x46a   :  { %9116 = vmatpush.bf16.msra.mxu2 %v13100_v43  ;;  %v12617_v43 = vld [vmem:[#allocation5 + $0x1858] sm:$0xf0]  ;;  %v15221_v62 = vld [vmem:[#allocation5 + $0x2204] sm:$0xf] }
 0x46b   :  { %9130 = vmatpush.bf16.msra.mxu3 %v13292_v1  ;;  %v12809_v1 = vld [vmem:[#allocation5 + $0x19d8] sm:$0xf0]  ;;  %v12620_v7 = vor.u32 %v14909_v0, %v12617_v43  ;;  %v14081_v0 = vld [vmem:[#allocation5 + $0x23c8] sm:$0xf0]  ;;  %v13508_v43 = vor.u32 %v15131_v29, %v13505_v3  ;;  %v15161_v59 = vld [vmem:[#allocation5 + $0x2024] sm:$0xf] }
 0x46c   :  { %9089 = vmatpush.bf16.msra.mxu0 %v12692_v5  ;;  %v12812_v46 = vor.u32 %v14957_v63, %v12809_v1  ;;  %v13004_v5 = vor.u32 %v15005_v47, %v13001_v9  ;;  %v8845_v42 = vpop.f32.mrf.mxu2  ;;  %v13481_v1 = vld [vmem:[#allocation5 + $0x1f18] sm:$0xf0]  ;;  %v15173_v47 = vld [vmem:[#allocation5 + $0x2084] sm:$0xf]  ;;  %v13601_v29 = vld [vmem:[#allocation5 + $0x2008] sm:$0xf0] }
 0x46d   :  { %9103 = vmatpush.bf16.msra.mxu1 %v12884_v28  ;;  %v12785_v28 = vld [vmem:[#allocation5 + $0x19a8] sm:$0xf0]  ;;  %v8846_v24 = vadd.f32 %v8845_v42, %v8832_v44  ;;  %v8859_v53 = vpop.f32.mrf.mxu3  ;;  %v15125_v44 = vld [vmem:[#allocation5 + $0x1f04] sm:$0xf]  ;;  %v13433_v52 = vld [vmem:[#allocation5 + $0x1eb8] sm:$0xf0] }
 0x46e   :  { %9117 = vmatpush.bf16.msra.mxu2 %v13076_v58  ;;  %v14999_v58 = vld [vmem:[#allocation5 + $0x1b14] sm:$0xf]  ;;  %v12788_v19 = vor.u32 %v14951_v17, %v12785_v28  ;;  %v13649_v42 = vld [vmem:[#allocation5 + $0x2068] sm:$0xf0] }
 0x46f   :  { %9131 = vmatpush.bf16.msra.mxu3 %v13268_v14  ;;  %v15047_v14 = vld [vmem:[#allocation5 + $0x1c94] sm:$0xf]  ;;  %v16054_v50 = vadd.f32 %v8859_v53, %v8846_v24  ;;  %v15113_v53 = vld [vmem:[#allocation5 + $0x1ea4] sm:$0xf] }
 0x470   :  { %9090 = vmatpush.bf16.msra.mxu0 %v12668_v61  ;;  %v12596_v61 = vor.u32 %v14903_v41, %v12593_v10  ;;  %v13172_v22 = vor.u32 %v15047_v14, %v13169_v8  ;;  %v15269_v41 = vld [vmem:[#allocation5 + $0x2384] sm:$0xf]  ;;  %v14057_v10 = vld [vmem:[#allocation5 + $0x2398] sm:$0xf0]  ;;  %v15119_v28 = vld [vmem:[#allocation5 + $0x1ed4] sm:$0xf] }
 0x471   :  { %9104 = vmatpush.bf16.msra.mxu1 %v12860_v54  ;;  %v13721_v54 = vld [vmem:[#allocation5 + $0x20f8] sm:$0xf0]  ;;  %v15263_v14 = vld [vmem:[#allocation5 + $0x2354] sm:$0xf] }
 0x472   :  { %9118 = vmatpush.bf16.msra.mxu2 %v13052_v37  ;;  %v15233_v37 = vld [vmem:[#allocation5 + $0x2264] sm:$0xf]  ;;  %v13724_v30 = vor.u32 %v15185_v18, %v13721_v54  ;;  %v15203_v3 = vld [vmem:[#allocation5 + $0x2174] sm:$0xf] }
 0x473   :  { %9132 = vmatpush.bf16.msra.mxu3 %v13244_v11  ;;  %v12980_v11 = vor.u32 %v14999_v58, %v12977_v25  ;;  %v13916_v40 = vor.u32 %v15233_v37, %v13913_v31  ;;  %v15167_v58 = vld [vmem:[#allocation5 + $0x2054] sm:$0xf]  ;;  %v15209_v54 = vld [vmem:[#allocation5 + $0x21a4] sm:$0xf]  ;;  %v13817_v37 = vld [vmem:[#allocation5 + $0x21b8] sm:$0xf0] }
 0x474   :  { %9091 = vmatpush.bf16.msra.mxu0 %v12644_v15  ;;  %v13697_v15 = vld [vmem:[#allocation5 + $0x20c8] sm:$0xf0]  ;;  %v15215_v25 = vld [vmem:[#allocation5 + $0x21d4] sm:$0xf]  ;;  %v15257_v31 = vld [vmem:[#allocation5 + $0x2324] sm:$0xf]  ;;  %v13820_v35 = vor.u32 %v15209_v54, %v13817_v37 }
 0x475   :  { %9105 = vmatpush.bf16.msra.mxu1 %v12836_v45  ;;  %v13889_v45 = vld [vmem:[#allocation5 + $0x2248] sm:$0xf0]  ;;  %v13700_v63 = vor.u32 %v15179_v23, %v13697_v15  ;;  %v16378_v37 = vperm.slane %v15716_v6, 1 }
 0x476   :  { %9119 = vmatpush.bf16.msra.mxu2 %v13028_v13  ;;  %v15275_v13 = vld [vmem:[#allocation5 + $0x23b4] sm:$0xf]  ;;  %v13793_v23 = vld [vmem:[#allocation5 + $0x2188] sm:$0xf0] }
 0x477   :  { %9133 = vmatpush.bf16.msra.mxu3 %v13220_v32  ;;  %v13892_v32 = vor.u32 %v15227_v27, %v13889_v45  ;;  %v14084_v9 = vor.u32 %v15275_v13, %v14081_v0  ;;  %v13985_v15 = vld [vmem:[#allocation5 + $0x2308] sm:$0xf0]  ;;  %v13796_v13 = vor.u32 %v15203_v3, %v13793_v23  ;;  %v15101_v0 = vld [vmem:[#allocation5 + $0x1e44] sm:$0xf]  ;;  %v16385_v23 = vld [vmem:[#allocation19_spill] sm:$0xff] }
 0x478   :  { %9092 = vmatpush.bf16.msra.mxu0 %v12620_v7  ;;  %v13865_v7 = vld [vmem:[#allocation5 + $0x2218] sm:$0xf0] }
 0x479   :  { %9106 = vmatpush.bf16.msra.mxu1 %v12812_v46  ;;  %v13484_v46 = vor.u32 %v15125_v44, %v13481_v1  ;;  %v13868_v17 = vor.u32 %v15221_v62, %v13865_v7  ;;  %v13577_v44 = vld [vmem:[#allocation5 + $0x1fd8] sm:$0xf0]  ;;  %v15197_v1 = vld [vmem:[#allocation5 + $0x2144] sm:$0xf] }
 0x47a   :  { %9120 = vmatpush.bf16.msra.mxu2 %v13004_v5  ;;  %v13676_v5 = vor.u32 %v15173_v47, %v13673_v38  ;;  %v13769_v47 = vld [vmem:[#allocation5 + $0x2158] sm:$0xf0] }
 0x47b   :  { %9134 = vmatpush.bf16.msra.mxu3 %v13196_v20  ;;  %v14060_v20 = vor.u32 %v15269_v41, %v14057_v10  ;;  %v13961_v38 = vld [vmem:[#allocation5 + $0x22d8] sm:$0xf0]  ;;  %v13772_v41 = vor.u32 %v15197_v1, %v13769_v47  ;;  %v15095_v10 = vld [vmem:[#allocation5 + $0x1e14] sm:$0xf]  ;;  %v16391_v1 = vld [vmem:[#allocation45_spill] sm:$0xff] }
 0x47c   :  { %9093 = vmatpush.bf16.msra.mxu0 %v12596_v61  ;;  %v13625_v61 = vld [vmem:[#allocation5 + $0x2038] sm:$0xf0] }
 0x47d   :  { %9107 = vmatpush.bf16.msra.mxu1 %v12788_v19  ;;  %v14009_v19 = vld [vmem:[#allocation5 + $0x2338] sm:$0xf0]  ;;  %v13628_v57 = vor.u32 %v15161_v59, %v13625_v61 }
 0x47e   :  { %9121 = vmatpush.bf16.msra.mxu2 %v12980_v11  ;;  %v13436_v11 = vor.u32 %v15113_v53, %v13433_v52 }
 0x47f   :  { %9135 = vmatpush.bf16.msra.mxu3 %v13172_v22  ;;  %9094 = vmatmul.bf16.vlgmr.msra.gmra.mxu0 %v15606_v51  ;;  %v13457_v51 = vld [vmem:[#allocation5 + $0x1ee8] sm:$0xf0]  ;;  %v15107_v22 = vld [vmem:[#allocation5 + $0x1e74] sm:$0xf] }
 0x480   :  { %9142 = vmatpush.bf16.msrb.mxu0 %v13532_v36  ;;  %9108 = vmatmul.bf16.vlgmr.msra.gmra.mxu1 %v15610_v56  ;;  %v14033_v56 = vld [vmem:[#allocation5 + $0x2368] sm:$0xf0]  ;;  %v13460_v8 = vor.u32 %v15119_v28, %v13457_v51  ;;  %v15191_v51 = vld [vmem:[#allocation5 + $0x2114] sm:$0xf] }
 0x481   :  { %9156 = vmatpush.bf16.msrb.mxu1 %v13724_v30  ;;  %9122 = vmatmul.bf16.vlgmr.msra.gmra.mxu2 %v15608_v55  ;;  %v13841_v55 = vld [vmem:[#allocation5 + $0x21e8] sm:$0xf0]  ;;  %v14036_v18 = vor.u32 %v15263_v14, %v14033_v56  ;;  %v15155_v30 = vld [vmem:[#allocation5 + $0x1ff4] sm:$0xf] }
 0x482   :  { %9170 = vmatpush.bf16.msrb.mxu2 %v13916_v40  ;;  %9136 = vmatmul.bf16.vlgmr.msra.gmra.mxu3 %v15612_v60  ;;  %v13652_v60 = vor.u32 %v15167_v58, %v13649_v42  ;;  %v13844_v24 = vor.u32 %v15215_v25, %v13841_v55  ;;  %v13409_v36 = vld [vmem:[#allocation5 + $0x1e88] sm:$0xf0]  ;;  %v14012_v40 = vor.u32 %v15257_v31, %v14009_v19  ;;  %v15309_v19 = vld [vmem:[#allocation7] sm:$0x3f] }
 0x483   :  { %9184 = vmatpush.bf16.msrb.mxu3 %v14108_v12  ;;  %v15251_v12 = vld [vmem:[#allocation5 + $0x22f4] sm:$0xf]  ;;  %v13412_v27 = vor.u32 %v15107_v22, %v13409_v36  ;;  %v13604_v45 = vor.u32 %v15155_v30, %v13601_v29  ;;  %v13553_v28 = vld [vmem:[#allocation5 + $0x1fa8] sm:$0xf0]  ;;  %v7530_v31 = vadd.f32 %v15727_v2, %v16378_v37  ;;  %v16382_v30 = vld [vmem:[#allocation89_spill] sm:$0xff] }
 0x484   :  { %9143 = vmatpush.bf16.msrb.mxu0 %v13508_v43  ;;  %v13385_v43 = vld [vmem:[#allocation5 + $0x1e58] sm:$0xf0]  ;;  %v13745_v58 = vld [vmem:[#allocation5 + $0x2128] sm:$0xf0] }
 0x485   :  { %9157 = vmatpush.bf16.msrb.mxu1 %v13700_v63  ;;  %v15149_v63 = vld [vmem:[#allocation5 + $0x1fc4] sm:$0xf]  ;;  %v13388_v62 = vor.u32 %v15101_v0, %v13385_v43  ;;  %v13937_v42 = vld [vmem:[#allocation5 + $0x22a8] sm:$0xf0]  ;;  %v13748_v14 = vor.u32 %v15191_v51, %v13745_v58  ;;  %v8913_v53 = vpop.f32.mrf.mxu3  ;;  %v16384_v29 = vld [vmem:[#allocation92_spill] sm:$0xff] }
 0x486   :  { %9171 = vmatpush.bf16.msrb.mxu2 %v13892_v32  ;;  %v13988_v32 = vor.u32 %v15251_v12, %v13985_v15  ;;  %v13580_v7 = vor.u32 %v15149_v63, %v13577_v44  ;;  %v16386_v15 = vld [vmem:[#allocation67_spill] sm:$0xff]  ;;  %v16395_v58 = vld [vmem:[#allocation46_spill] sm:$0xff] }
 0x487   :  { %9185 = vmatpush.bf16.msrb.mxu3 %v14084_v9  ;;  %v15245_v9 = vld [vmem:[#allocation5 + $0x22c4] sm:$0xf] }
 0x488   :  { %9144 = vmatpush.bf16.msrb.mxu0 %v13484_v46  ;;  %v13361_v46 = vld [vmem:[#allocation5 + $0x1e28] sm:$0xf0] }
 0x489   :  { %9158 = vmatpush.bf16.msrb.mxu1 %v13676_v5  ;;  %v15143_v5 = vld [vmem:[#allocation5 + $0x1f94] sm:$0xf]  ;;  %v13364_v25 = vor.u32 %v15095_v10, %v13361_v46  ;;  %v16394_v46 = vld [vmem:[#allocation69_spill] sm:$0xff] }
 0x48a   :  { %9172 = vmatpush.bf16.msrb.mxu2 %v13868_v17  ;;  %v13964_v17 = vor.u32 %v15245_v9, %v13961_v38  ;;  %v13556_v55 = vor.u32 %v15143_v5, %v13553_v28  ;;  %v16392_v9 = vld [vmem:[#allocation94_spill] sm:$0xff] }
 0x48b   :  { %9186 = vmatpush.bf16.msrb.mxu3 %v14060_v20  ;;  %v15239_v20 = vld [vmem:[#allocation5 + $0x2294] sm:$0xf] }
 0x48c   :  { %9145 = vmatpush.bf16.msrb.mxu0 %v13460_v8  ;;  %v13940_v56 = vor.u32 %v15239_v20, %v13937_v42  ;;  %v8871_v8 = vpop.f32.mrf.mxu0  ;;  %v16396_v42 = vld [vmem:[#allocation95_spill] sm:$0xff] }
 0x48d   :  { %9159 = vmatpush.bf16.msrb.mxu1 %v13652_v60  ;;  %v8885_v60 = vpop.f32.mrf.mxu1  ;;  %v8915_v61 = vpop.f32.mrf.mxu3 }
 0x48e   :  { %9173 = vmatpush.bf16.msrb.mxu2 %v13844_v24  ;;  %v8899_v24 = vpop.f32.mrf.mxu2 }
 0x48f   :  { %9187 = vmatpush.bf16.msrb.mxu3 %v14036_v18 }
 0x490   :  { %9146 = vmatpush.bf16.msrb.mxu0 %v13436_v11  ;;  %v16380_v11 = vperm.slane %v15810_v49, 2 }
 0x491   :  { %9160 = vmatpush.bf16.msrb.mxu1 %v13628_v57 }
 0x492   :  { %9174 = vmatpush.bf16.msrb.mxu2 %v13820_v35  ;;  %v7866_v57 = vadd.f32 %v15821_v16, %v16380_v11  ;;  %v16381_v35 = vld [vmem:[#allocation43_spill] sm:$0xff]  ;;  %v16389_v16 = vld [vmem:[#allocation20_spill] sm:$0xff] }
 0x493   :  { %9188 = vmatpush.bf16.msrb.mxu3 %v14012_v40  ;;  %v7544_v22 = vadd.f32 %v16381_v35, %v7530_v31  ;;  %v16383_v40 = vperm.slane %v16382_v30, 3  ;;  %v16403_v30 = vld [vmem:[#allocation71_spill] sm:$0xff] }
 0x494   :  { %9147 = vmatpush.bf16.msrb.mxu0 %v13412_v27  ;;  %v8873_v52 = vpop.f32.mrf.mxu0  ;;  %v7880_v27 = vadd.f32 %v16386_v15, %v7866_v57  ;;  %v16401_v57 = vld [vmem:[#allocation23_spill] sm:$0xff]  ;;  %v16406_v15 = vld [vmem:[#allocation97_spill] sm:$0xff] }
 0x495   :  { %9161 = vmatpush.bf16.msrb.mxu1 %v13604_v45  ;;  %v8887_v59 = vpop.f32.mrf.mxu1  ;;  %v8202_v6 = vadd.f32 %v16384_v29, %v16383_v40  ;;  %v16387_v45 = vld [vmem:[#allocation44_spill] sm:$0xff] }
 0x496   :  { %9175 = vmatpush.bf16.msrb.mxu2 %v13796_v13  ;;  %v8901_v18 = vpop.f32.mrf.mxu2  ;;  %v16388_v13 = vld [vmem:[#allocation93_spill] sm:$0xff] }
 0x497   :  { %9189 = vmatpush.bf16.msrb.mxu3 %v13988_v32  ;;  %v8216_v49 = vadd.f32 %v16388_v13, %v8202_v6  ;;  %v16390_v32 = vld [vmem:[#allocation68_spill] sm:$0xff] }
 0x498   :  { %9148 = vmatpush.bf16.msrb.mxu0 %v13388_v62  ;;  %v7894_v44 = vadd.f32 %v16390_v32, %v7880_v27  ;;  %v16404_v6 = vld [vmem:[#allocation24_spill] sm:$0xff]  ;;  %v16410_v32 = vld [vmem:[#allocation50_spill] sm:$0xff] }
 0x499   :  { %9162 = vmatpush.bf16.msrb.mxu1 %v13580_v7  ;;  %v8230_v38 = vadd.f32 %v16392_v9, %v8216_v49  ;;  %v16393_v7 = vld [vmem:[#allocation21_spill] sm:$0xff] }
 0x49a   :  { %9176 = vmatpush.bf16.msrb.mxu2 %v13772_v41  ;;  %v7908_v5 = vadd.f32 %v16394_v46, %v7894_v44  ;;  %v16414_v46 = vld [vmem:[#allocation99_spill] sm:$0xff] }
 0x49b   :  { %9190 = vmatpush.bf16.msrb.mxu3 %v13964_v17 }
 0x49c   :  { %9149 = vmatpush.bf16.msrb.mxu0 %v13364_v25  ;;  %v8927_v54 = vpop.f32.mrf.mxu0  ;;  %v8244_v25 = vadd.f32 %v16396_v42, %v8230_v38  ;;  %v16412_v38 = vld [vmem:[#allocation26_spill] sm:$0xff]  ;;  %v16416_v42 = vld [vmem:[#allocation100_spill] sm:$0xff] }
 0x49d   :  { %9163 = vmatpush.bf16.msrb.mxu1 %v13556_v55 }
 0x49e   :  { %9177 = vmatpush.bf16.msrb.mxu2 %v13748_v14  ;;  %v16397_v14 = vld [vmem:[#allocation22_spill] sm:$0xff] }
 0x49f   :  { %9191 = vmatpush.bf16.msrb.mxu3 %v13940_v56  ;;  %9150 = vmatmul.bf16.vlgmr.msrb.gmra.mxu0 %v15627_v26  ;;  %v8941_v26 = vpop.f32.mrf.mxu1 }
 0x4a0   :  { %9164 = vmatmul.bf16.vlgmr.msrb.gmra.mxu1 %v15631_v34  ;;  %v1295_v34 = vperm.slane %v15309_v19, 5 }
 0x4a1   :  { %9178 = vmatmul.bf16.vlgmr.msrb.gmra.mxu2 %v15629_v33  ;;  %v16379_v33 = vperm.slane %v15614_v4, 0 }
 0x4a2   :  { %9192 = vmatmul.bf16.vlgmr.msrb.gmra.mxu3 %v15635_v48  ;;  %v8872_v3 = vadd.f32 %v8871_v8, %v1295_v34  ;;  %v8874_v17 = vadd.f32 %v8873_v52, %v1295_v34  ;;  %v16402_v34 = vld [vmem:[#allocation48_spill] sm:$0xff] }
 0x4a3   :  { %v7194_v48 = vadd.f32 %v15625_v21, %v16379_v33  ;;  %v7558_v21 = vadd.f32 %v16387_v45, %v7544_v22  ;;  %v16400_v33 = vld [vmem:[#allocation96_spill] sm:$0xff] }
 0x4a4   :  { %v8955_v36 = vpop.f32.mrf.mxu2  ;;  %v8929_v4 = vpop.f32.mrf.mxu0  ;;  %v8886_v0 = vadd.f32 %v8885_v60, %v8872_v3  ;;  %v16398_v60 = vld [vmem:[#allocation70_spill] sm:$0xff]  ;;  %v8888_v31 = vadd.f32 %v8887_v59, %v8874_v17  ;;  %v16415_v17 = vld [vmem:[#allocation51_spill] sm:$0xff] }
 0x4a5   :  { %v8969_v2 = vpop.f32.mrf.mxu3  ;;  %v7208_v12 = vadd.f32 %v16385_v23, %v7194_v48  ;;  %v7572_v47 = vadd.f32 %v16391_v1, %v7558_v21  ;;  %v7922_v37 = vadd.f32 %v16398_v60, %v7908_v5  ;;  %v8258_v48 = vadd.f32 %v16400_v33, %v8244_v25  ;;  %v16405_v23 = vld [vmem:[#allocation72_spill] sm:$0xff]  ;;  %v16407_v21 = vld [vmem:[#allocation49_spill] sm:$0xff] }
 0x4a6   :  { %v8900_v62 = vadd.f32 %v8899_v24, %v8886_v0  ;;  %v16399_v24 = vld [vmem:[#allocation47_spill] sm:$0xff]  ;;  %v8902_v29 = vadd.f32 %v8901_v18, %v8888_v31  ;;  %v16411_v18 = vld [vmem:[#allocation73_spill] sm:$0xff] }
 0x4a7   :  { %v7222_v43 = vadd.f32 %v16389_v16, %v7208_v12  ;;  %v8943_v63 = vpop.f32.mrf.mxu1  ;;  %v7586_v20 = vadd.f32 %v16395_v58, %v7572_v47  ;;  %v7936_v40 = vadd.f32 %v16403_v30, %v7922_v37  ;;  %v8272_v59 = vadd.f32 %v16406_v15, %v8258_v48  ;;  %v16409_v16 = vld [vmem:[#allocation25_spill] sm:$0xff]  ;;  %v16418_v37 = vld [vmem:[#allocation52_spill] sm:$0xff]  ;;  %v16426_v15 = vld [vmem:[#allocation54_spill] sm:$0xff] }
 0x4a8   :  { %v8914_v55 = vadd.f32 %v8913_v53, %v8900_v62  ;;  %v8916_v0 = vadd.f32 %v8915_v61, %v8902_v29  ;;  %v16420_v48 = vld [vmem:[#allocation28_spill] sm:$0xff]  ;;  %v16424_v29 = vld [vmem:[#allocation102_spill] sm:$0xff] }
 0x4a9   :  { %v7236_v41 = vadd.f32 %v16393_v7, %v7222_v43  ;;  %v7600_v19 = vadd.f32 %v16399_v24, %v7586_v20  ;;  %v7950_v12 = vadd.f32 %v16405_v23, %v7936_v40  ;;  %v16413_v7 = vld [vmem:[#allocation74_spill] sm:$0xff]  ;;  %v16423_v40 = vld [vmem:[#allocation53_spill] sm:$0xff] }
 0x4aa   :  { %v8928_v11 = vadd.f32 %v8927_v54, %v8914_v55  ;;  %v16408_v54 = vld [vmem:[#allocation98_spill] sm:$0xff]  ;;  %v8930_v5 = vadd.f32 %v8929_v4, %v8916_v0  ;;  %v16421_v4 = vld [vmem:[#allocation76_spill] sm:$0xff]  ;;  %v16425_v23 = vld [vmem:[#allocation29_spill] sm:$0xff] }
 0x4ab   :  { %v7250_v56 = vadd.f32 %v16397_v14, %v7236_v41  ;;  %v7614_v35 = vadd.f32 %v16402_v34, %v7600_v19  ;;  %v8286_v49 = vadd.f32 %v16408_v54, %v8272_v59  ;;  %v7964_v47 = vadd.f32 %v16411_v18, %v7950_v12  ;;  %v16422_v34 = vld [vmem:[#allocation101_spill] sm:$0xff] }
 0x4ac   :  { %v8957_v10 = vpop.f32.mrf.mxu2  ;;  %v8942_v27 = vadd.f32 %v8941_v26, %v8928_v11  ;;  %v8944_v19 = vadd.f32 %v8943_v63, %v8930_v5  ;;  %v16427_v63 = vld [vmem:[#allocation77_spill] sm:$0xff] }
 0x4ad   :  { %v8971_v28 = vpop.f32.mrf.mxu3  ;;  %v7264_v52 = vadd.f32 %v16401_v57, %v7250_v56  ;;  %v7628_v13 = vadd.f32 %v16407_v21, %v7614_v35  ;;  %v7978_v41 = vadd.f32 %v16413_v7, %v7964_v47  ;;  %v8300_v26 = vadd.f32 %v16414_v46, %v8286_v49  ;;  %v16417_v56 = vld [vmem:[#allocation27_spill] sm:$0xff]  ;;  %v16428_v49 = vld [vmem:[#allocation30_spill] sm:$0xff]  ;;  %v16434_v46 = vld [vmem:[#allocation56_spill] sm:$0xff] }
 0x4ae   :  { %v8956_v9 = vadd.f32 %v8955_v36, %v8942_v27  ;;  %v16419_v36 = vld [vmem:[#allocation75_spill] sm:$0xff]  ;;  %v8958_v30 = vadd.f32 %v8957_v10, %v8944_v19 }
 0x4af   :  { %v7278_v3 = vadd.f32 %v16404_v6, %v7264_v52  ;;  %v7642_v44 = vadd.f32 %v16410_v32, %v7628_v13  ;;  %v8314_v61 = vadd.f32 %v16416_v42, %v8300_v26  ;;  %v7992_v24 = vadd.f32 %v16419_v36, %v7978_v41  ;;  %v16430_v10 = vld [vmem:[#allocation103_spill] sm:$0xff]  ;;  %v16436_v42 = vld [vmem:[#allocation32_spill] sm:$0xff] }
 0x4b0   :  { %v8970_v25 = vadd.f32 %v8969_v2, %v8956_v9  ;;  %v8972_v21 = vadd.f32 %v8971_v28, %v8958_v30  ;;  %v16431_v47 = vld [vmem:[#allocation55_spill] sm:$0xff]  ;;  %v16432_v9 = vld [vmem:[#allocation104_spill] sm:$0xff] }
 0x4b1   :  { %v7292_v43 = vadd.f32 %v16409_v16, %v7278_v3  ;;  %v7656_v58 = vadd.f32 %v16415_v17, %v7642_v44  ;;  %v8006_v52 = vadd.f32 %v16421_v4, %v7992_v24  ;;  %v8328_v35 = vadd.f32 %v16422_v34, %v8314_v61  ;;  %v16429_v16 = vld [vmem:[#allocation78_spill] sm:$0xff]  ;;  %v16433_v7 = vld [vmem:[#allocation31_spill] sm:$0xff]  ;;  %v16441_v4 = vld [vmem:[#allocation33_spill] sm:$0xff] }
 0x4b2   :  { %v16442_v34 = vld [vmem:[#allocation58_spill] sm:$0xff] }
 0x4b3   :  { %v7306_v62 = vadd.f32 %v16412_v38, %v7292_v43  ;;  %v7670_v31 = vadd.f32 %v16418_v37, %v7656_v58  ;;  %v8342_v6 = vadd.f32 %v16424_v29, %v8328_v35 }
 0x4b5   :  { %v7320_v60 = vadd.f32 %v16417_v56, %v7306_v62  ;;  %v7684_v2 = vadd.f32 %v16423_v40, %v7670_v31  ;;  %v8356_v32 = vadd.f32 %v16430_v10, %v8342_v6  ;;  %v16439_v31 = vld [vmem:[#allocation57_spill] sm:$0xff] }
 0x4b7   :  { %v7334_v11 = vadd.f32 %v16420_v48, %v7320_v60  ;;  %v7698_v59 = vadd.f32 %v16426_v15, %v7684_v2  ;;  %v8370_v38 = vadd.f32 %v16432_v9, %v8356_v32  ;;  %v16444_v2 = vld [vmem:[#allocation34_spill] sm:$0xff]  ;;  %v16453_v9 = vld [vmem:[#allocation84_spill] sm:$0xff] }
 0x4b9   :  { %v7348_v12 = vadd.f32 %v16425_v23, %v7334_v11  ;;  %v16446_v23 = vld [vmem:[#allocation107_spill] sm:$0xff] }
 0x4bb   :  { %v7362_v0 = vadd.f32 %v16428_v49, %v7348_v12 }
 0x4bc   :  { %v8983_v51 = vpop.f32.mrf.mxu0 }
 0x4bd   :  { %v8997_v8 = vpop.f32.mrf.mxu1  ;;  %v8984_v33 = vadd.f32 %v8983_v51, %v8970_v25  ;;  %v8020_v51 = vadd.f32 %v16427_v63, %v8006_v52  ;;  %v7376_v41 = vadd.f32 %v16433_v7, %v7362_v0  ;;  %v16437_v25 = vld [vmem:[#allocation80_spill] sm:$0xff] }
 0x4be   :  { %v16448_v63 = vld [vmem:[#allocation108_spill] sm:$0xff] }
 0x4bf   :  { %v8998_v3 = vadd.f32 %v8997_v8, %v8984_v33  ;;  %v8034_v43 = vadd.f32 %v16429_v16, %v8020_v51  ;;  %v7712_v8 = vadd.f32 %v16431_v47, %v7698_v59  ;;  %v7390_v61 = vadd.f32 %v16436_v42, %v7376_v41  ;;  %v16447_v59 = vld [vmem:[#allocation59_spill] sm:$0xff]  ;;  %v16450_v0 = vld [vmem:[#allocation60_spill] sm:$0xff] }
 0x4c0   :  { %v16452_v47 = vld [vmem:[#allocation36_spill] sm:$0xff]  ;;  %v16458_v42 = vld [vmem:[#allocation63_spill] sm:$0xff] }
 0x4c1   :  { %v7726_v26 = vadd.f32 %v16434_v46, %v7712_v8  ;;  %v7404_v52 = vadd.f32 %v16441_v4, %v7390_v61  ;;  %v16455_v46 = vld [vmem:[#allocation61_spill] sm:$0xff]  ;;  %v16463_v4 = vld [vmem:[#allocation64_spill] sm:$0xff] }
 0x4c3   :  { %v7740_v36 = vadd.f32 %v16439_v31, %v7726_v26  ;;  %v7418_v29 = vadd.f32 %v16444_v2, %v7404_v52  ;;  %v16456_v26 = vld [vmem:[#allocation110_spill] sm:$0xff] }
 0x4c4   :  { %v9011_v22 = vpop.f32.mrf.mxu2  ;;  %v8985_v45 = vpop.f32.mrf.mxu0 }
 0x4c5   :  { %v9025_v53 = vpop.f32.mrf.mxu3  ;;  %v8999_v1 = vpop.f32.mrf.mxu1  ;;  %v9012_v13 = vadd.f32 %v9011_v22, %v8998_v3  ;;  %v8986_v44 = vadd.f32 %v8985_v45, %v8972_v21  ;;  %v16435_v22 = vld [vmem:[#allocation79_spill] sm:$0xff]  ;;  %v16438_v45 = vld [vmem:[#allocation105_spill] sm:$0xff] }
 0x4c6   :  { %v8048_v5 = vadd.f32 %v16435_v22, %v8034_v43  ;;  %v8384_v60 = vadd.f32 %v16438_v45, %v8370_v38 }
 0x4c7   :  { %v9026_v62 = vadd.f32 %v9025_v53, %v9012_v13  ;;  %v9000_v17 = vadd.f32 %v8999_v1, %v8986_v44  ;;  %v16440_v53 = vld [vmem:[#allocation106_spill] sm:$0xff]  ;;  %v7754_v1 = vadd.f32 %v16442_v34, %v7740_v36  ;;  %v16449_v13 = vld [vmem:[#allocation35_spill] sm:$0xff] }
 0x4c8   :  { %v8062_v56 = vadd.f32 %v16437_v25, %v8048_v5  ;;  %v8398_v19 = vadd.f32 %v16440_v53, %v8384_v60  ;;  %v7432_v49 = vadd.f32 %v16449_v13, %v7418_v29  ;;  %v16459_v25 = vld [vmem:[#allocation85_spill] sm:$0xff]  ;;  %v9199_v36 = vld [vmem:[#allocation8 + $0x8] sm:$0xff] }
 0x4c9   :  { %v16461_v53 = vld [vmem:[#allocation87_spill] sm:$0xff]  ;;  %v16470_v13 = vld [vmem:[#allocation41_spill] sm:$0xff] }
 0x4ca   :  { %v8412_v12 = vadd.f32 %v16446_v23, %v8398_v19  ;;  %v7446_v8 = vadd.f32 %v16452_v47, %v7432_v49  ;;  %v16462_v19 = vld [vmem:[#allocation111_spill] sm:$0xff]  ;;  %v16467_v23 = vld [vmem:[#allocation65_spill] sm:$0xff] }
 0x4cc   :  { %v9013_v20 = vpop.f32.mrf.mxu2  ;;  %v8426_v51 = vadd.f32 %v16448_v63, %v8412_v12 }
 0x4cd   :  { %v9027_v55 = vpop.f32.mrf.mxu3  ;;  %v9014_v37 = vadd.f32 %v9013_v20, %v9000_v17  ;;  %v16445_v20 = vld [vmem:[#allocation82_spill] sm:$0xff]  ;;  %v16457_v17 = vld [vmem:[#allocation37_spill] sm:$0xff] }
 0x4cf   :  { %v9028_v30 = vadd.f32 %v9027_v55, %v9014_v37  ;;  %v16451_v55 = vld [vmem:[#allocation83_spill] sm:$0xff] }
 0x4d0   :  { %v16460_v37 = vld [vmem:[#allocation39_spill] sm:$0xff] }
 0x4dc   :  { %v9039_v14 = vpop.f32.mrf.mxu0 }
 0x4dd   :  { %v9053_v57 = vpop.f32.mrf.mxu1  ;;  %v9040_v58 = vadd.f32 %v9039_v14, %v9026_v62  ;;  %v16443_v14 = vld [vmem:[#allocation81_spill] sm:$0xff] }
 0x4de   :  { %v8076_v35 = vadd.f32 %v16443_v14, %v8062_v56  ;;  %v9200_v14 = vld [vmem:[#allocation8 + $0x10] sm:$0xff] }
 0x4df   :  { %v9054_v33 = vadd.f32 %v9053_v57, %v9040_v58  ;;  %v7768_v57 = vadd.f32 %v16447_v59, %v7754_v1  ;;  %v7460_v58 = vadd.f32 %v16457_v17, %v7446_v8  ;;  %v9198_v1 = vld [vmem:[#allocation8] sm:$0xff] }
 0x4e0   :  { %v8090_v3 = vadd.f32 %v16445_v20, %v8076_v35  ;;  %v16464_v35 = vld [vmem:[#allocation113_spill] sm:$0xff]  ;;  %v16466_v20 = vld [vmem:[#allocation62_spill] sm:$0xff] }
 0x4e1   :  { %v7782_v16 = vadd.f32 %v16450_v0, %v7768_v57  ;;  %v7474_v31 = vadd.f32 %v16460_v37, %v7460_v58  ;;  %v16471_v0 = vld [vmem:[#allocation86_spill] sm:$0xff]  ;;  %v9204_v37 = vld [vmem:[#allocation8 + $0x30] sm:$0xff] }
 0x4e4   :  { %v9067_v27 = vpop.f32.mrf.mxu2  ;;  %v9041_v18 = vpop.f32.mrf.mxu0 }
 0x4e5   :  { %v9081_v54 = vpop.f32.mrf.mxu3  ;;  %v9055_v28 = vpop.f32.mrf.mxu1  ;;  %v9068_v40 = vadd.f32 %v9067_v27, %v9054_v33  ;;  %v9042_v15 = vadd.f32 %v9041_v18, %v9028_v30  ;;  %v8104_v27 = vadd.f32 %v16451_v55, %v8090_v3  ;;  %v16454_v18 = vld [vmem:[#allocation109_spill] sm:$0xff]  ;;  %v16159_v3 = vadd.f32 %v9199_v36, %v16466_v20 }
 0x4e6   :  { %v8440_v62 = vadd.f32 %v16454_v18, %v8426_v51  ;;  %v16469_v51 = vld [vmem:[#allocation38_spill] sm:$0xff] }
 0x4e7   :  { %v9082_v21 = vadd.f32 %v9081_v54, %v9068_v40  ;;  %v9056_v10 = vadd.f32 %v9055_v28, %v9042_v15  ;;  %v8118_v38 = vadd.f32 %v16453_v9, %v8104_v27  ;;  %v7796_v54 = vadd.f32 %v16455_v46, %v7782_v16  ;;  %v16468_v15 = vld [vmem:[#allocation88_spill] sm:$0xff]  ;;  %v16472_v27 = vld [vmem:[#allocation90_spill] sm:$0xff]  ;;  %v16476_v46 = vld [vmem:[#allocation115_spill] sm:$0xff] }
 0x4e8   :  { %v8454_v22 = vadd.f32 %v16456_v26, %v8440_v62  ;;  %v16168_v16 = vadd.f32 %v9200_v14, %v16471_v0  ;;  %v16474_v9 = vld [vmem:[#allocation66_spill] sm:$0xff]  ;;  %v9205_v62 = vld [vmem:[#allocation8 + $0x38] sm:$0xff]  ;;  %v15500_v0 = vmov 768.0  }
 0x4e9   :  { %v7810_v61 = vadd.f32 %v16458_v42, %v7796_v54  ;;  %v8132_v56 = vadd.f32 %v16459_v25, %v8118_v38  ;;  %v9202_v18 = vld [vmem:[#allocation8 + $0x20] sm:$0xff]  ;;  %v16478_v42 = vld [vmem:[#allocation91_spill] sm:$0xff]  ;;  %15299 = vrcp.f32 %v15500_v0 }
 0x4ea   :  { %v8468_v33 = vadd.f32 %v16462_v19, %v8454_v22  ;;  %v16477_v22 = vld [vmem:[#allocation42_spill] sm:$0xff] }
 0x4eb   :  { %v7824_v52 = vadd.f32 %v16463_v4, %v7810_v61  ;;  %v9206_v36 = vld [vmem:[#allocation8 + $0x40] sm:$0xff] }
 0x4ec   :  { %v9069_v24 = vpop.f32.mrf.mxu2  ;;  %v8482_v30 = vadd.f32 %v16464_v35, %v8468_v33 }
 0x4ed   :  { %v9083_v48 = vpop.f32.mrf.mxu3  ;;  %v9070_v7 = vadd.f32 %v9069_v24, %v9056_v10  ;;  %v8146_v24 = vadd.f32 %v16461_v53, %v8132_v56  ;;  %v7838_v12 = vadd.f32 %v16467_v23, %v7824_v52  ;;  %v9203_v53 = vld [vmem:[#allocation8 + $0x28] sm:$0xff] }
 0x4ee   :  { %v9207_v52 = vld [vmem:[#allocation8 + $0x48] sm:$0xff] }
 0x4ef   :  { %v9084_v45 = vadd.f32 %v9083_v48, %v9070_v7  ;;  %v16465_v48 = vld [vmem:[#allocation40_spill] sm:$0xff]  ;;  %v8160_v59 = vadd.f32 %v16468_v15, %v8146_v24  ;;  %v7852_v38 = vadd.f32 %v16474_v9, %v7838_v12 }
 0x4f0   :  { %v16475_v7 = vld [vmem:[#allocation112_spill] sm:$0xff] }
 0x4f1   :  { %v8174_v10 = vadd.f32 %v16472_v27, %v8160_v59  ;;  %v16479_v24 = vld [vmem:[#allocation116_spill] sm:$0xff] }
 0x4f2   :  { %v9209_v59 = vld [vmem:[#allocation8 + $0x58] sm:$0xff] }
 0x4f3   :  { %v8188_v61 = vadd.f32 %v16478_v42, %v8174_v10 }
 0x4fc   :  { %v9095_v11 = vpop.f32.mrf.mxu0 }
 0x4fd   :  { %v9109_v6 = vpop.f32.mrf.mxu1  ;;  %v9096_v32 = vadd.f32 %v9095_v11, %v9082_v21  ;;  %v16164_v21 = vadd.f32 %v9198_v1, %v16469_v51  ;;  %v9218_v1 = vadd.f32 %v9206_v36, %v8188_v61 }
 0x4ff   :  { %v9110_v5 = vadd.f32 %v9109_v6, %v9096_v32  ;;  %v7488_v6 = vadd.f32 %v16465_v48, %v7474_v31  ;;  %v16473_v32 = vld [vmem:[#allocation114_spill] sm:$0xff]  ;;  %v9222_v8 = vadd.f32 %v16159_v3, %v16164_v21  ;;  %v9217_v31 = vadd.f32 %v9205_v62, %v7852_v38 }
 0x501   :  { %v7502_v49 = vadd.f32 %v16470_v13, %v7488_v6  ;;  %v9223_v17 = vadd.f32 %v9222_v8, %v16168_v16 }
 0x504   :  { %v9123_v43 = vpop.f32.mrf.mxu2  ;;  %v9097_v41 = vpop.f32.mrf.mxu0 }
 0x505   :  { %v9137_v44 = vpop.f32.mrf.mxu3  ;;  %v9111_v28 = vpop.f32.mrf.mxu1  ;;  %v9124_v60 = vadd.f32 %v9123_v43, %v9110_v5  ;;  %v9098_v11 = vadd.f32 %v9097_v41, %v9084_v45  ;;  %v9201_v43 = vld [vmem:[#allocation8 + $0x18] sm:$0xff]  ;;  %v7516_v5 = vadd.f32 %v16477_v22, %v7502_v49 }
 0x506   :  { %v9213_v41 = vadd.f32 %v9201_v43, %v16475_v7  ;;  %v15300_v43 = vpop.eup %15299 }
 0x507   :  { %v9138_v40 = vadd.f32 %v9137_v44, %v9124_v60  ;;  %v9112_v57 = vadd.f32 %v9111_v28, %v9098_v11  ;;  %v8496_v44 = vadd.f32 %v16473_v32, %v8482_v30  ;;  %v9214_v28 = vadd.f32 %v9202_v18, %v16052_v39  ;;  %v9208_v30 = vld [vmem:[#allocation8 + $0x50] sm:$0xff] }
 0x508   :  { %v9224_v4 = vadd.f32 %v9223_v17, %v9213_v41  ;;  %v9220_v23 = vadd.f32 %v9208_v30, %v16054_v50  ;;  %vm9241_vm0 = vweird.f32 %v15300_v43 }
 0x509   :  { %v8510_v54 = vadd.f32 %v16476_v46, %v8496_v44 }
 0x50a   :  { %v9225_v35 = vadd.f32 %v9224_v4, %v9214_v28 }
 0x50b   :  { %v8524_v19 = vadd.f32 %v16479_v24, %v8510_v54 }
 0x50c   :  { %v9125_v34 = vpop.f32.mrf.mxu2 }
 0x50d   :  { %v9139_v2 = vpop.f32.mrf.mxu3  ;;  %v9126_v47 = vadd.f32 %v9125_v34, %v9112_v57  ;;  %v9216_v34 = vadd.f32 %v9204_v37, %v7516_v5 }
 0x50f   :  { %v9140_v25 = vadd.f32 %v9139_v2, %v9126_v47  ;;  %v9219_v2 = vadd.f32 %v9207_v52, %v8524_v19 }
 0x51c   :  { %v9151_v29 = vpop.f32.mrf.mxu0 }
 0x51d   :  { %v9152_v63 = vadd.f32 %v9151_v29, %v9138_v40  ;;  %v9165_v55 = vpop.f32.mrf.mxu1  ;;  %v9229_v40 = vadd.f32 %v9217_v31, %v9216_v34 }
 0x51f   :  { %v9166_v26 = vadd.f32 %v9165_v55, %v9152_v63  ;;  %v9230_v20 = vadd.f32 %v9229_v40, %v9218_v1  ;;  %v9237_v55 = vmul.f32 768.0, %v15300_v43 }
 0x521   :  { %v9231_v63 = vadd.f32 %v9230_v20, %v9219_v2  ;;  %v9238_v27 = vsub.f32 1.0, %v9237_v55  ;;  %v16234_v20 = vld [vmem:[#allocation10] sm:$0x3f] }
 0x522   :  { %v9326_v55 = vperm.slane %v16234_v20, 5 }
 0x523   :  { %v9232_v13 = vadd.f32 %v9231_v63, %v9220_v23  ;;  %v9239_v10 = vmul.f32 %v15300_v43, %v9238_v27  ;;  %v9322_v63 = vperm.slane %v16234_v20, 1 }
 0x524   :  { %v9179_v58 = vpop.f32.mrf.mxu2  ;;  %v9153_v60 = vpop.f32.mrf.mxu0 }
 0x525   :  { %v9180_v56 = vadd.f32 %v9179_v58, %v9166_v26  ;;  %v9193_v45 = vpop.f32.mrf.mxu3  ;;  %v9154_v11 = vadd.f32 %v9153_v60, %v9140_v25  ;;  %v9167_v39 = vpop.f32.mrf.mxu1  ;;  %v9240_v32 = vadd.f32 %v15300_v43, %v9239_v10 }
 0x527   :  { %v9194_v33 = vadd.f32 %v9193_v45, %v9180_v56  ;;  %v9168_v29 = vadd.f32 %v9167_v39, %v9154_v11  ;;  %v9242_v44 = vsel %vm9241_vm0, %v15300_v43, %v9240_v32 }
 0x529   :  { %v9215_v14 = vadd.f32 %v9203_v53, %v9194_v33 }
 0x52b   :  { %v9226_v48 = vadd.f32 %v9225_v35, %v9215_v14 }
 0x52c   :  { %v9181_v6 = vpop.f32.mrf.mxu2 }
 0x52d   :  { %v9182_v12 = vadd.f32 %v9181_v6, %v9168_v29  ;;  %9227 = vadd.xlane.f32.xlu0 %v9226_v48  ;;  %v9195_v15 = vpop.f32.mrf.mxu3 }
 0x52f   :  { %v9196_v57 = vadd.f32 %v9195_v15, %v9182_v12  ;;  %v16236_v12 = vld [vmem:[#allocation11] sm:$0x3f] }
 0x530   :  { %v9347_v27 = vperm.slane %v16236_v12, 0  ;;  %v9348_v10 = vperm.slane %v16236_v12, 1  ;;  %v9349_v32 = vperm.slane %v16236_v12, 2 }
 0x531   :  { %v9221_v51 = vadd.f32 %v9209_v59, %v9196_v57  ;;  %v9321_v57 = vperm.slane %v16234_v20, 0 }
 0x533   :  { %v9233_v49 = vadd.f32 %v9232_v13, %v9221_v51  ;;  %v9324_v13 = vperm.slane %v16234_v20, 3 }
 0x535   :  { %9234 = vadd.xlane.f32.xlu0 %v9233_v49  ;;  %v9325_v49 = vperm.slane %v16234_v20, 4 }
 0x5a0   :  { %v9228_v50 = vpop.xlane.xlu0 %9227 }
 0x5a1   :  { %v9243_v47 = vmul.f32 %v9242_v44, %v9228_v50  ;;  %v9351_v50 = vperm.slane %v16236_v12, 4 }
 0x5a3   :  { %v16184_v8 = vsub.f32 %v16164_v21, %v9243_v47  ;;  %v16187_v9 = vsub.f32 %v16159_v3, %v9243_v47  ;;  %v16190_v38 = vsub.f32 %v16168_v16, %v9243_v47  ;;  %v16192_v18 = vsub.f32 %v9213_v41, %v9243_v47 }
 0x5a4   :  { %v16198_v46 = vsub.f32 %v9214_v28, %v9243_v47  ;;  %v16202_v3 = vsub.f32 %v9215_v14, %v9243_v47 }
 0x5a5   :  { %v9257_v62 = vmul.f32 %v16184_v8, %v16184_v8  ;;  %v9258_v7 = vmul.f32 %v16187_v9, %v16187_v9  ;;  %v9259_v21 = vmul.f32 %v16190_v38, %v16190_v38  ;;  %v9260_v16 = vmul.f32 %v16192_v18, %v16192_v18 }
 0x5a6   :  { %v9261_v5 = vmul.f32 %v16198_v46, %v16198_v46  ;;  %v9262_v28 = vmul.f32 %v16202_v3, %v16202_v3 }
 0x5a7   :  { %v9269_v54 = vadd.f32 %v9258_v7, %v9257_v62 }
 0x5a8   :  { %v9235_v26 = vpop.xlane.xlu0 %9234 }
 0x5a9   :  { %v9244_v22 = vmul.f32 %v9242_v44, %v9235_v26  ;;  %v9270_v41 = vadd.f32 %v9269_v54, %v9259_v21 }
 0x5ab   :  { %v9271_v17 = vadd.f32 %v9270_v41, %v9260_v16  ;;  %v16208_v58 = vsub.f32 %v9216_v34, %v9244_v22  ;;  %v16210_v42 = vsub.f32 %v9217_v31, %v9244_v22  ;;  %v16212_v61 = vsub.f32 %v9218_v1, %v9244_v22 }
 0x5ac   :  { %v16216_v56 = vsub.f32 %v9219_v2, %v9244_v22  ;;  %v16222_v36 = vsub.f32 %v9220_v23, %v9244_v22  ;;  %v16226_v24 = vsub.f32 %v9221_v51, %v9244_v22  ;;  %v9323_v51 = vperm.slane %v16234_v20, 2 }
 0x5ad   :  { %v9272_v25 = vadd.f32 %v9271_v17, %v9261_v5  ;;  %v9263_v45 = vmul.f32 %v16208_v58, %v16208_v58  ;;  %v9264_v60 = vmul.f32 %v16210_v42, %v16210_v42  ;;  %v9265_v31 = vmul.f32 %v16212_v61, %v16212_v61 }
 0x5ae   :  { %v9266_v19 = vmul.f32 %v16216_v56, %v16216_v56  ;;  %v9267_v11 = vmul.f32 %v16222_v36, %v16222_v36  ;;  %v9268_v52 = vmul.f32 %v16226_v24, %v16226_v24  ;;  %v9352_v22 = vperm.slane %v16236_v12, 5 }
 0x5af   :  { %v9273_v37 = vadd.f32 %v9272_v25, %v9262_v28  ;;  %v9276_v53 = vadd.f32 %v9264_v60, %v9263_v45 }
 0x5b1   :  { %9274 = vadd.xlane.f32.xlu1 %v9273_v37  ;;  %v9277_v33 = vadd.f32 %v9276_v53, %v9265_v31 }
 0x5b3   :  { %v9278_v4 = vadd.f32 %v9277_v33, %v9266_v19 }
 0x5b5   :  { %v9279_v34 = vadd.f32 %v9278_v4, %v9267_v11 }
 0x5b7   :  { %v9280_v1 = vadd.f32 %v9279_v34, %v9268_v52 }
 0x5b9   :  { %9281 = vadd.xlane.f32.xlu1 %v9280_v1 }
 0x624   :  { %v9275_v14 = vpop.xlane.xlu1 %9274 }
 0x625   :  { %v9283_v35 = vmul.f32 %v9275_v14, %v9242_v44 }
 0x627   :  { %v9285_v30 = vadd.f32 1e-12, %v9283_v35 }
 0x629   :  { %15301 = vrsqrt.f32 %v9285_v30  ;;  %vm9293_vm2 = vweird.f32 %v9285_v30 }
 0x62c   :  { %v9282_v39 = vpop.xlane.xlu1 %9281 }
 0x62d   :  { %v9284_v40 = vmul.f32 %v9282_v39, %v9242_v44  ;;  %v9350_v44 = vperm.slane %v16236_v12, 3 }
 0x62f   :  { %v15302_v2 = vpop.eup %15301  ;;  %v9286_v29 = vadd.f32 1e-12, %v9284_v40 }
 0x630   :  { %v9288_v48 = vmul.f32 %v15302_v2, %v9285_v30  ;;  %vm9294_vm1 = vweird.f32 %v15302_v2 }
 0x631   :  { %15303 = vrsqrt.f32 %v9286_v29  ;;  %vm9295_vm3 = vmor %vm9293_vm2, %vm9294_vm1  ;;  %vm9303_vm5 = vweird.f32 %v9286_v29 }
 0x632   :  { %v9289_v6 = vmul.f32 %v15302_v2, %v9288_v48 }
 0x634   :  { %v9290_v23 = vmul.f32 0.5, %v9289_v6 }
 0x636   :  { %v9291_v15 = vsub.f32 1.5, %v9290_v23 }
 0x637   :  { %v15304_v59 = vpop.eup %15303 }
 0x638   :  { %v9292_v0 = vmul.f32 %v15302_v2, %v9291_v15  ;;  %v9298_v43 = vmul.f32 %v15304_v59, %v9286_v29  ;;  %vm9304_vm4 = vweird.f32 %v15304_v59 }
 0x639   :  { %vm9305_vm6 = vmor %vm9303_vm5, %vm9304_vm4 }
 0x63a   :  { %v9296_v47 = vsel %vm9295_vm3, %v15302_v2, %v9292_v0  ;;  %v9299_v62 = vmul.f32 %v15304_v59, %v9298_v43 }
 0x63b   :  { %v9307_v7 = vmul.f32 %v9296_v47, %v16184_v8  ;;  %v9308_v21 = vmul.f32 %v9296_v47, %v16187_v9  ;;  %v9309_v54 = vmul.f32 %v9296_v47, %v16190_v38  ;;  %v9310_v26 = vmul.f32 %v9296_v47, %v16192_v18 }
 0x63c   :  { %v9311_v16 = vmul.f32 %v9296_v47, %v16198_v46  ;;  %v9312_v41 = vmul.f32 %v9296_v47, %v16202_v3  ;;  %v9300_v5 = vmul.f32 0.5, %v9299_v62 }
 0x63d   :  { %v9333_v17 = vmul.f32 %v9321_v57, %v9307_v7  ;;  %v9334_v28 = vmul.f32 %v9322_v63, %v9308_v21  ;;  %v9335_v25 = vmul.f32 %v9323_v51, %v9309_v54  ;;  %v9336_v45 = vmul.f32 %v9324_v13, %v9310_v26 }
 0x63e   :  { %v9337_v60 = vmul.f32 %v9325_v49, %v9311_v16  ;;  %v9338_v37 = vmul.f32 %v9326_v55, %v9312_v41  ;;  %v9301_v8 = vsub.f32 1.5, %v9300_v5 }
 0x63f   :  { %v9359_v9 = vadd.f32 %v9347_v27, %v9333_v17  ;;  %v9360_v31 = vadd.f32 %v9348_v10, %v9334_v28  ;;  %v9361_v38 = vadd.f32 %v9349_v32, %v9335_v25  ;;  %v9362_v53 = vadd.f32 %v9350_v44, %v9336_v45 }
 0x640   :  { %v9302_v18 = vmul.f32 %v15304_v59, %v9301_v8  ;;  %v9363_v19 = vadd.f32 %v9351_v50, %v9337_v60  ;;  %v9364_v46 = vadd.f32 %v9352_v22, %v9338_v37 }
 0x641   :  { %9371 = vst [vmem:[#allocation13] sm:$0xff] %v9359_v9 }
 0x642   :  { %9372 = vst [vmem:[#allocation13 + $0x8] sm:$0xff] %v9360_v31  ;;  %v9306_v3 = vsel %vm9305_vm6, %v15304_v59, %v9302_v18 }
 0x643   :  { %9373 = vst [vmem:[#allocation13 + $0x10] sm:$0xff] %v9361_v38  ;;  %v9313_v33 = vmul.f32 %v9306_v3, %v16208_v58  ;;  %v9314_v11 = vmul.f32 %v9306_v3, %v16210_v42  ;;  %v9315_v4 = vmul.f32 %v9306_v3, %v16212_v61  ;;  %v9316_v52 = vmul.f32 %v9306_v3, %v16216_v56 }
 0x644   :  { %9374 = vst [vmem:[#allocation13 + $0x18] sm:$0xff] %v9362_v53  ;;  %v9317_v34 = vmul.f32 %v9306_v3, %v16222_v36  ;;  %v9318_v1 = vmul.f32 %v9306_v3, %v16226_v24 }
 0x645   :  { %9375 = vst [vmem:[#allocation13 + $0x20] sm:$0xff] %v9363_v19  ;;  %v9339_v14 = vmul.f32 %v9321_v57, %v9313_v33  ;;  %v9340_v35 = vmul.f32 %v9322_v63, %v9314_v11  ;;  %v9341_v30 = vmul.f32 %v9323_v51, %v9315_v4  ;;  %v9342_v39 = vmul.f32 %v9324_v13, %v9316_v52 }
 0x646   :  { %9376 = vst [vmem:[#allocation13 + $0x28] sm:$0xff] %v9364_v46  ;;  %v9343_v40 = vmul.f32 %v9325_v49, %v9317_v34  ;;  %v9344_v2 = vmul.f32 %v9326_v55, %v9318_v1 }
 0x647   :  { %v9365_v58 = vadd.f32 %v9347_v27, %v9339_v14  ;;  %v9366_v29 = vadd.f32 %v9348_v10, %v9340_v35  ;;  %v9367_v42 = vadd.f32 %v9349_v32, %v9341_v30  ;;  %v9368_v48 = vadd.f32 %v9350_v44, %v9342_v39 }
 0x648   :  { %v9369_v61 = vadd.f32 %v9351_v50, %v9343_v40  ;;  %v9370_v56 = vadd.f32 %v9352_v22, %v9344_v2 }
 0x649   :  { %9377 = vst [vmem:[#allocation13 + $0x30] sm:$0xff] %v9365_v58 }
 0x64a   :  { %9378 = vst [vmem:[#allocation13 + $0x38] sm:$0xff] %v9366_v29 }
 0x64b   :  { %9379 = vst [vmem:[#allocation13 + $0x40] sm:$0xff] %v9367_v42 }
 0x64c   :  { %9380 = vst [vmem:[#allocation13 + $0x48] sm:$0xff] %v9368_v48 }
 0x64d   :  { %9381 = vst [vmem:[#allocation13 + $0x50] sm:$0xff] %v9369_v61 }
 0x64e   :  { %9382 = vst [vmem:[#allocation13 + $0x58] sm:$0xff] %v9370_v56 }
 0x64f   :  { %9395 = dma.vmem_to_hbm [thread:$0]  %s9388_s5, 1536, %s9390_s7, [#allocation4], %s15492_s9, %s15492_s9, %s15493_s10  }
 0x650   :  { %15486 = dma.done.wait [#allocation4], 1536  }
 0x651   :  { %15487 = vsyncadd [#allocation4], 4294965760 }
 0x652   :  { %9400 = vsyncpa [#allocation3], 1 }
 0x653   :  { %9401 = vsyncpa [#allocation6], 1 }
 0x654   :  { %9402 = vsyncpa [#allocation9], 1 }
 0x655   :  { %9403 = vsyncpa [#allocation12], 1 }
 0x656   :  { %9404 = vsyncpa [#allocation4], 1 }

</bundles_post_ra>
